<compile_context>
chip_gen: v6e
topology: v6e:2x2x1
jax: 0.10.0
libtpu: 0.0.40
codegen_flags: <defaults>
</compile_context>

<pallas_src>
import functools

import jax
import jax.numpy as jnp
from jax.experimental import pallas as pl
from jax.experimental.pallas import tpu as pltpu


# ----------------------------------------------------------------------------
# Host-side helpers (parameter / mask preparation only)
# ----------------------------------------------------------------------------
def _relative_embedding(rel_params, window_size):
    """rel_params: (n_heads, 2*ws-1, 2*ws-1) -> (n_heads, ws*ws, ws*ws)."""
    ws = window_size
    coords = jnp.stack(
        jnp.meshgrid(jnp.arange(ws), jnp.arange(ws), indexing="ij"), axis=-1
    ).reshape(ws * ws, 2)
    relation = coords[:, None, :] - coords[None, :, :] + (ws - 1)
    return rel_params[:, relation[..., 0], relation[..., 1]]


def _generate_mask(h_windows, w_windows, p, shift):
    """Boolean SW-MSA mask, True = forbidden. Returns (nw, p*p, p*p)."""
    s = p - shift
    m = jnp.zeros((h_windows, w_windows, p, p, p, p), dtype=bool)
    m = m.at[-1, :, :s, :, s:, :].set(True)
    m = m.at[-1, :, s:, :, :s, :].set(True)
    m = m.at[:, -1, :, :s, :, s:].set(True)
    m = m.at[:, -1, :, s:, :, :s].set(True)
    return m.reshape(h_windows * w_windows, p * p, p * p)


# ----------------------------------------------------------------------------
# Pallas kernel: one tile of windows, fully fused
# ----------------------------------------------------------------------------
def _wmsa_kernel(x_ref, wqkv_ref, bqkv_ref, rel_ref, wo_ref, bo_ref, *rest,
                 n_heads, wt, p2, has_mask):
    # x_ref:    (wt*P2, C)       tile of wt windows, P2 tokens each (2-D slab)
    # wqkv_ref: (C, 3C)          fused projection (q-scale folded in)
    # bqkv_ref: (1, 3C)
    # rel_ref:  (nh, P2, P2)     relative-position bias (f32)
    # wo_ref:   (C, out_dim)     output projection
    # bo_ref:   (1, out_dim)
    # mask_ref: (wt, P2, P2)     additive mask (only present for SW)
    # o_ref:    (wt*P2, out_dim)
    if has_mask:
        mask_ref, o_ref = rest
    else:
        (o_ref,) = rest

    R, C = x_ref.shape
    hd = C // n_heads

    # (1) one wide QKV projection: fills the MXU N dimension.
    qkv = jnp.dot(x_ref[...], wqkv_ref[...], preferred_element_type=jnp.float32)
    qkv = qkv + bqkv_ref[...].astype(jnp.float32)      # columns: [q | k | v] heads

    if has_mask:
        mask = mask_ref[...].astype(jnp.float32)       # (wt, P2, P2), 0 / -1e30

    # (2) per-head attention (inherently head_dim-sized contractions).
    ctx_parts = []
    for h in range(n_heads):                           # static unroll (small nh)
        q = qkv[:, h * hd:(h + 1) * hd].reshape(wt, p2, hd)       # scale in W
        k = qkv[:, C + h * hd:C + (h + 1) * hd].reshape(wt, p2, hd)
        v = qkv[:, 2 * C + h * hd:2 * C + (h + 1) * hd].reshape(wt, p2, hd)

        sim = jnp.einsum("wpd,wqd->wpq", q, k,
                         preferred_element_type=jnp.float32)
        sim = sim + rel_ref[h][None, :, :]
        if has_mask:
            sim = sim + mask

        sim = sim - jnp.max(sim, axis=-1, keepdims=True)
        p = jnp.exp(sim)
        denom = jnp.sum(p, axis=-1, keepdims=True)                 # (wt, P2, 1)

        ctx = jnp.einsum("wpq,wqd->wpd", p, v,
                         preferred_element_type=jnp.float32)
        # Normalize the small PV result (P2/hd fewer elements than p) on the EUP.
        ctx = ctx * pl.reciprocal(denom, approx=True)
        ctx_parts.append(ctx.reshape(R, hd))

    # (3) concat heads and do ONE K=C output projection.
    ctx = jnp.concatenate(ctx_parts, axis=-1)                       # (R, C)
    out = jnp.dot(ctx, wo_ref[...], preferred_element_type=jnp.float32)
    out = out + bo_ref[...].astype(jnp.float32)
    o_ref[...] = out.astype(o_ref.dtype)


# ----------------------------------------------------------------------------
# Wrapper: full WMSA forward (matches the PyTorch module semantics)
# ----------------------------------------------------------------------------
def wmsa_forward(x, wqkv, bqkv, rel_params, wlin, blin, *,
                 head_dim, window_size, attn_type="W",
                 max_rows_per_tile=2048, compute_dtype=None):
    """x: (B, H, W, C). wqkv: (3C, C). rel_params: (nh, 2ws-1, 2ws-1).
    wlin: (out_dim, C). Returns (B, H, W, out_dim)."""
    B, H, W, C = x.shape
    ws = window_size
    assert H % ws == 0 and W % ws == 0
    n_heads = C // head_dim
    out_dim = wlin.shape[0]
    P2 = ws * ws
    scale = head_dim ** (-0.5)
    shift = ws // 2 if attn_type != "W" else 0
    out_dtype = x.dtype

    if shift:
        x = jnp.roll(x, (-shift, -shift), axis=(1, 2))

    hw, ww = H // ws, W // ws
    nw = hw * ww
    NW = B * nw

    # window partition to a flat 2-D slab: b (w1 p1) (w2 p2) c -> (b w1 w2 p1 p2, c)
    xw = (x.reshape(B, hw, ws, ww, ws, C)
            .transpose(0, 1, 3, 2, 4, 5)
            .reshape(NW * P2, C))

    # ---- one-time parameter prep (host side) ----
    # qkv output channels are ordered [q heads | k heads | v heads].
    w_qkv_t = wqkv.T.astype(jnp.float32)                         # (C, 3C)
    b_qkv = bqkv.reshape(1, 3 * C).astype(jnp.float32)
    scale_vec = jnp.concatenate(
        [jnp.full((C,), scale, jnp.float32), jnp.ones((2 * C,), jnp.float32)])
    w_qkv_t = w_qkv_t * scale_vec[None, :]                       # fold q-scale
    b_qkv = b_qkv * scale_vec[None, :]

    wo_t = wlin.T.astype(jnp.float32)                            # (C, out_dim)
    bo = blin.reshape(1, out_dim).astype(jnp.float32)
    rel = _relative_embedding(rel_params, ws).astype(jnp.float32)

    mm_dtype = compute_dtype if compute_dtype is not None else xw.dtype
    xw = xw.astype(mm_dtype)
    w_qkv_t = w_qkv_t.astype(mm_dtype)
    wo_t = wo_t.astype(mm_dtype)

    # ---- window-tile size: largest divisor of nw within the row budget,
    #      preferring >= 2 grid steps (pipelining / multi-TC sharding) ----
    divs = [d for d in range(1, nw + 1)
            if nw % d == 0 and d * P2 <= max_rows_per_tile] or [1]
    good = [d for d in divs if NW // d >= 2]
    wt = max(good) if good else max(divs)
    grid = NW // wt

    in_specs = [
        pl.BlockSpec((wt * P2, C), lambda i: (i, 0)),
        pl.BlockSpec((C, 3 * C), lambda i: (0, 0)),
        pl.BlockSpec((1, 3 * C), lambda i: (0, 0)),
        pl.BlockSpec((n_heads, P2, P2), lambda i: (0, 0, 0)),
        pl.BlockSpec((C, out_dim), lambda i: (0, 0)),
        pl.BlockSpec((1, out_dim), lambda i: (0, 0)),
    ]
    args = [xw, w_qkv_t, b_qkv, rel, wo_t, bo]

    if shift:
        mask_bool = _generate_mask(hw, ww, ws, shift)            # (nw, P2, P2)
        mask_bias = jnp.where(mask_bool, jnp.float32(-1e30), jnp.float32(0.0))
        mask_blocks = nw // wt                                   # wt | nw
        in_specs.append(
            pl.BlockSpec((wt, P2, P2), lambda i: (i % mask_blocks, 0, 0)))
        args.append(mask_bias)

    kernel = functools.partial(_wmsa_kernel, n_heads=n_heads, wt=wt, p2=P2,
                               has_mask=bool(shift))

    out = pl.pallas_call(
        kernel,
        out_shape=jax.ShapeDtypeStruct((NW * P2, out_dim), out_dtype),
        grid_spec=pltpu.PrefetchScalarGridSpec(
            num_scalar_prefetch=0,
            grid=(grid,),
            in_specs=in_specs,
            out_specs=pl.BlockSpec((wt * P2, out_dim), lambda i: (i, 0)),
        ),
        compiler_params=pltpu.CompilerParams(
            dimension_semantics=("parallel",)),
    )(*args)

    # window merge: (b w1 w2 p1 p2, c) -> b (w1 p1) (w2 p2) c
    out = (out.reshape(B, hw, ww, ws, ws, out_dim)
              .transpose(0, 1, 3, 2, 4, 5)
              .reshape(B, H, W, out_dim))
    if shift:
        out = jnp.roll(out, (shift, shift), axis=(1, 2))
    return out


# ----------------------------------------------------------------------------
# Pure-JAX reference (mirrors the PyTorch forward)
# ----------------------------------------------------------------------------
def _reference(x, wqkv, bqkv, rel_params, wlin, blin, *,
               head_dim, window_size, attn_type):
    B, H, W, C = x.shape
    ws = window_size
    n_heads = C // head_dim
    scale = head_dim ** (-0.5)
    shift = ws // 2 if attn_type != "W" else 0
    if shift:
        x = jnp.roll(x, (-shift, -shift), axis=(1, 2))
    hw, ww = H // ws, W // ws
    nw, P2 = hw * ww, ws * ws
    xw = (x.reshape(B, hw, ws, ww, ws, C)
            .transpose(0, 1, 3, 2, 4, 5)
            .reshape(B, nw, P2, C))
    qkv = jnp.einsum("bwpc,oc->bwpo", xw, wqkv) + bqkv
    qkv = jnp.moveaxis(qkv.reshape(B, nw, P2, 3 * n_heads, head_dim), 3, 0)
    q, k, v = qkv[:n_heads], qkv[n_heads:2 * n_heads], qkv[2 * n_heads:]
    sim = jnp.einsum("hbwpc,hbwqc->hbwpq", q, k) * scale
    rel = _relative_embedding(rel_params, ws)
    sim = sim + rel[:, None, None]
    if attn_type != "W":
        m = _generate_mask(hw, ww, ws, shift)
        sim = jnp.where(m[None, None], -jnp.inf, sim)
    probs = jax.nn.softmax(sim, axis=-1)
    out = jnp.einsum("hbwpq,hbwqc->hbwpc", probs, v)
    out = jnp.moveaxis(out, 0, 3).reshape(B, nw, P2, n_heads * head_dim)
    out = jnp.einsum("bwpc,oc->bwpo", out, wlin) + blin
    out = (out.reshape(B, hw, ww, ws, ws, -1)
              .transpose(0, 1, 3, 2, 4, 5)
              .reshape(B, H, W, -1))
    if shift:
        out = jnp.roll(out, (shift, shift), axis=(1, 2))
    return out


if __name__ == "__main__":
    B, H, W = 2, 16, 16
    input_dim, output_dim, head_dim, ws = 32, 32, 8, 4
    n_heads = input_dim // head_dim

    key = jax.random.PRNGKey(0)
    k1, k2, k3, k4, k5, k6 = jax.random.split(key, 6)
    x = jax.random.normal(k1, (B, H, W, input_dim), dtype=jnp.float32)
    wqkv = 0.05 * jax.random.normal(k2, (3 * input_dim, input_dim), dtype=jnp.float32)
    bqkv = 0.02 * jax.random.normal(k3, (3 * input_dim,), dtype=jnp.float32)
    rel_params = 0.02 * jax.random.normal(
        k4, (n_heads, 2 * ws - 1, 2 * ws - 1), dtype=jnp.float32)
    wlin = 0.05 * jax.random.normal(k5, (output_dim, input_dim), dtype=jnp.float32)
    blin = 0.02 * jax.random.normal(k6, (output_dim,), dtype=jnp.float32)

    for attn_type in ("W", "SW"):          # regular and shifted windows
        out = wmsa_forward(x, wqkv, bqkv, rel_params, wlin, blin,
                           head_dim=head_dim, window_size=ws,
                           attn_type=attn_type)
        out = jax.block_until_ready(out)
        ref = _reference(x, wqkv, bqkv, rel_params, wlin, blin,
                         head_dim=head_dim, window_size=ws,
                         attn_type=attn_type)
        assert out.shape == (B, H, W, output_dim), out.shape
        assert jnp.allclose(out, ref, atol=5e-3, rtol=5e-3), \
            f"mismatch vs reference for type {attn_type}"

    print("KERNEL_OK")
</pallas_src>

<mosaic_0001>
module attributes {stable_mosaic.version = 11 : i64} {
  func.func @_wmsa_kernel(%arg0: i32, %arg1: memref<256x32xf32, #tpu.memory_space<vmem>>, %arg2: memref<32x96xf32, #tpu.memory_space<vmem>>, %arg3: memref<1x96xf32, #tpu.memory_space<vmem>>, %arg4: memref<4x16x16xf32, #tpu.memory_space<vmem>>, %arg5: memref<32x32xf32, #tpu.memory_space<vmem>>, %arg6: memref<1x32xf32, #tpu.memory_space<vmem>>, %arg7: memref<256x32xf32, #tpu.memory_space<vmem>>) attributes {dimension_semantics = [#tpu.dimension_semantics<parallel>], iteration_bounds = array<i64: 2>, scalar_prefetch = 0 : i64, scratch_operands = 0 : i64, tpu.core_type = #tpu.core_type<tc>, window_params = [{transform_indices = @transform_0, window_bounds = array<i64: 256, 32>}, {pipeline_mode = #tpu.pipeline_mode<synchronous>, transform_indices = @transform_1, window_bounds = array<i64: 32, 96>}, {pipeline_mode = #tpu.pipeline_mode<synchronous>, transform_indices = @transform_2, window_bounds = array<i64: 1, 96>}, {pipeline_mode = #tpu.pipeline_mode<synchronous>, transform_indices = @transform_3, window_bounds = array<i64: 4, 16, 16>}, {pipeline_mode = #tpu.pipeline_mode<synchronous>, transform_indices = @transform_4, window_bounds = array<i64: 32, 32>}, {pipeline_mode = #tpu.pipeline_mode<synchronous>, transform_indices = @transform_5, window_bounds = array<i64: 1, 32>}, {transform_indices = @transform_6, window_bounds = array<i64: 256, 32>}]} {
    %c0 = arith.constant 0 : index
    %c0_0 = arith.constant 0 : index
    %0 = vector.load %arg1[%c0, %c0_0] : memref<256x32xf32, #tpu.memory_space<vmem>>, vector<256x32xf32>
    %c0_1 = arith.constant 0 : index
    %c0_2 = arith.constant 0 : index
    %1 = vector.load %arg2[%c0_1, %c0_2] : memref<32x96xf32, #tpu.memory_space<vmem>>, vector<32x96xf32>
    %cst = arith.constant dense<0.000000e+00> : vector<256x96xf32>
    %2 = tpu.matmul %0, %1, %cst {dimension_numbers = #tpu.dot_dimension_numbers<[1], [0], [0], [1], [0, 0, 1, 1], [], []>} : vector<256x32xf32>, vector<32x96xf32>, vector<256x96xf32> -> vector<256x96xf32>
    %c0_3 = arith.constant 0 : index
    %c0_4 = arith.constant 0 : index
    %3 = vector.load %arg3[%c0_3, %c0_4] : memref<1x96xf32, #tpu.memory_space<vmem>>, vector<1x96xf32>
    %4 = vector.broadcast %3 : vector<1x96xf32> to vector<256x96xf32>
    %5 = arith.addf %2, %4 : vector<256x96xf32>
    %6 = vector.extract_strided_slice %5 {offsets = [0, 0], sizes = [256, 8], strides = [1, 1]} : vector<256x96xf32> to vector<256x8xf32>
    %7 = vector.shape_cast %6 : vector<256x8xf32> to vector<16x16x8xf32>
    %8 = vector.extract_strided_slice %5 {offsets = [0, 32], sizes = [256, 8], strides = [1, 1]} : vector<256x96xf32> to vector<256x8xf32>
    %9 = vector.shape_cast %8 : vector<256x8xf32> to vector<16x16x8xf32>
    %10 = vector.extract_strided_slice %5 {offsets = [0, 64], sizes = [256, 8], strides = [1, 1]} : vector<256x96xf32> to vector<256x8xf32>
    %11 = vector.shape_cast %10 : vector<256x8xf32> to vector<16x16x8xf32>
    "tpu.trace_start"() <{level = 10 : i32, message = "wpd,wqd->wpq"}> : () -> ()
    %cst_5 = arith.constant dense<0.000000e+00> : vector<16x16x16xf32>
    %12 = tpu.matmul %7, %9, %cst_5 {dimension_numbers = #tpu.dot_dimension_numbers<[2], [2], [1], [1], [0, 0, 0, 1, 1, 1], [0], [0]>} : vector<16x16x8xf32>, vector<16x16x8xf32>, vector<16x16x16xf32> -> vector<16x16x16xf32>
    "tpu.trace_stop"() : () -> ()
    %c0_6 = arith.constant 0 : index
    %c0_7 = arith.constant 0 : index
    %c0_8 = arith.constant 0 : index
    %13 = vector.load %arg4[%c0_6, %c0_7, %c0_8] : memref<4x16x16xf32, #tpu.memory_space<vmem>>, vector<1x16x16xf32>
    %14 = vector.shape_cast %13 : vector<1x16x16xf32> to vector<16x16xf32>
    %15 = vector.shape_cast %14 : vector<16x16xf32> to vector<1x16x16xf32>
    %16 = vector.broadcast %15 : vector<1x16x16xf32> to vector<16x16x16xf32>
    %17 = arith.addf %12, %16 : vector<16x16x16xf32>
    %cst_9 = arith.constant dense<0xFF800000> : vector<16x16xf32>
    %18 = vector.multi_reduction <maximumf>, %17, %cst_9 [2] : vector<16x16x16xf32> to vector<16x16xf32>
    %19 = vector.shape_cast %18 : vector<16x16xf32> to vector<16x16x1xf32>
    %20 = vector.broadcast %19 : vector<16x16x1xf32> to vector<16x16x16xf32>
    %21 = arith.subf %17, %20 : vector<16x16x16xf32>
    %22 = math.exp %21 : vector<16x16x16xf32>
    %cst_10 = arith.constant dense<0.000000e+00> : vector<16x16xf32>
    %23 = vector.multi_reduction <add>, %22, %cst_10 [2] : vector<16x16x16xf32> to vector<16x16xf32>
    %24 = vector.shape_cast %23 : vector<16x16xf32> to vector<16x16x1xf32>
    "tpu.trace_start"() <{level = 10 : i32, message = "wpq,wqd->wpd"}> : () -> ()
    %cst_11 = arith.constant dense<0.000000e+00> : vector<16x16x8xf32>
    %25 = tpu.matmul %22, %11, %cst_11 {dimension_numbers = #tpu.dot_dimension_numbers<[2], [1], [1], [2], [0, 0, 0, 1, 1, 2], [0], [0]>} : vector<16x16x16xf32>, vector<16x16x8xf32>, vector<16x16x8xf32> -> vector<16x16x8xf32>
    "tpu.trace_stop"() : () -> ()
    %26 = tpu.reciprocal %24 {approx = true} : vector<16x16x1xf32> -> vector<16x16x1xf32>
    %27 = vector.broadcast %26 : vector<16x16x1xf32> to vector<16x16x8xf32>
    %28 = arith.mulf %25, %27 : vector<16x16x8xf32>
    %29 = vector.shape_cast %28 : vector<16x16x8xf32> to vector<256x8xf32>
    %30 = vector.extract_strided_slice %5 {offsets = [0, 8], sizes = [256, 8], strides = [1, 1]} : vector<256x96xf32> to vector<256x8xf32>
    %31 = vector.shape_cast %30 : vector<256x8xf32> to vector<16x16x8xf32>
    %32 = vector.extract_strided_slice %5 {offsets = [0, 40], sizes = [256, 8], strides = [1, 1]} : vector<256x96xf32> to vector<256x8xf32>
    %33 = vector.shape_cast %32 : vector<256x8xf32> to vector<16x16x8xf32>
    %34 = vector.extract_strided_slice %5 {offsets = [0, 72], sizes = [256, 8], strides = [1, 1]} : vector<256x96xf32> to vector<256x8xf32>
    %35 = vector.shape_cast %34 : vector<256x8xf32> to vector<16x16x8xf32>
    "tpu.trace_start"() <{level = 10 : i32, message = "wpd,wqd->wpq"}> : () -> ()
    %cst_12 = arith.constant dense<0.000000e+00> : vector<16x16x16xf32>
    %36 = tpu.matmul %31, %33, %cst_12 {dimension_numbers = #tpu.dot_dimension_numbers<[2], [2], [1], [1], [0, 0, 0, 1, 1, 1], [0], [0]>} : vector<16x16x8xf32>, vector<16x16x8xf32>, vector<16x16x16xf32> -> vector<16x16x16xf32>
    "tpu.trace_stop"() : () -> ()
    %c1 = arith.constant 1 : index
    %c0_13 = arith.constant 0 : index
    %c0_14 = arith.constant 0 : index
    %37 = vector.load %arg4[%c1, %c0_13, %c0_14] : memref<4x16x16xf32, #tpu.memory_space<vmem>>, vector<1x16x16xf32>
    %38 = vector.shape_cast %37 : vector<1x16x16xf32> to vector<16x16xf32>
    %39 = vector.shape_cast %38 : vector<16x16xf32> to vector<1x16x16xf32>
    %40 = vector.broadcast %39 : vector<1x16x16xf32> to vector<16x16x16xf32>
    %41 = arith.addf %36, %40 : vector<16x16x16xf32>
    %cst_15 = arith.constant dense<0xFF800000> : vector<16x16xf32>
    %42 = vector.multi_reduction <maximumf>, %41, %cst_15 [2] : vector<16x16x16xf32> to vector<16x16xf32>
    %43 = vector.shape_cast %42 : vector<16x16xf32> to vector<16x16x1xf32>
    %44 = vector.broadcast %43 : vector<16x16x1xf32> to vector<16x16x16xf32>
    %45 = arith.subf %41, %44 : vector<16x16x16xf32>
    %46 = math.exp %45 : vector<16x16x16xf32>
    %cst_16 = arith.constant dense<0.000000e+00> : vector<16x16xf32>
    %47 = vector.multi_reduction <add>, %46, %cst_16 [2] : vector<16x16x16xf32> to vector<16x16xf32>
    %48 = vector.shape_cast %47 : vector<16x16xf32> to vector<16x16x1xf32>
    "tpu.trace_start"() <{level = 10 : i32, message = "wpq,wqd->wpd"}> : () -> ()
    %cst_17 = arith.constant dense<0.000000e+00> : vector<16x16x8xf32>
    %49 = tpu.matmul %46, %35, %cst_17 {dimension_numbers = #tpu.dot_dimension_numbers<[2], [1], [1], [2], [0, 0, 0, 1, 1, 2], [0], [0]>} : vector<16x16x16xf32>, vector<16x16x8xf32>, vector<16x16x8xf32> -> vector<16x16x8xf32>
    "tpu.trace_stop"() : () -> ()
    %50 = tpu.reciprocal %48 {approx = true} : vector<16x16x1xf32> -> vector<16x16x1xf32>
    %51 = vector.broadcast %50 : vector<16x16x1xf32> to vector<16x16x8xf32>
    %52 = arith.mulf %49, %51 : vector<16x16x8xf32>
    %53 = vector.shape_cast %52 : vector<16x16x8xf32> to vector<256x8xf32>
    %54 = vector.extract_strided_slice %5 {offsets = [0, 16], sizes = [256, 8], strides = [1, 1]} : vector<256x96xf32> to vector<256x8xf32>
    %55 = vector.shape_cast %54 : vector<256x8xf32> to vector<16x16x8xf32>
    %56 = vector.extract_strided_slice %5 {offsets = [0, 48], sizes = [256, 8], strides = [1, 1]} : vector<256x96xf32> to vector<256x8xf32>
    %57 = vector.shape_cast %56 : vector<256x8xf32> to vector<16x16x8xf32>
    %58 = vector.extract_strided_slice %5 {offsets = [0, 80], sizes = [256, 8], strides = [1, 1]} : vector<256x96xf32> to vector<256x8xf32>
    %59 = vector.shape_cast %58 : vector<256x8xf32> to vector<16x16x8xf32>
    "tpu.trace_start"() <{level = 10 : i32, message = "wpd,wqd->wpq"}> : () -> ()
    %cst_18 = arith.constant dense<0.000000e+00> : vector<16x16x16xf32>
    %60 = tpu.matmul %55, %57, %cst_18 {dimension_numbers = #tpu.dot_dimension_numbers<[2], [2], [1], [1], [0, 0, 0, 1, 1, 1], [0], [0]>} : vector<16x16x8xf32>, vector<16x16x8xf32>, vector<16x16x16xf32> -> vector<16x16x16xf32>
    "tpu.trace_stop"() : () -> ()
    %c2 = arith.constant 2 : index
    %c0_19 = arith.constant 0 : index
    %c0_20 = arith.constant 0 : index
    %61 = vector.load %arg4[%c2, %c0_19, %c0_20] : memref<4x16x16xf32, #tpu.memory_space<vmem>>, vector<1x16x16xf32>
    %62 = vector.shape_cast %61 : vector<1x16x16xf32> to vector<16x16xf32>
    %63 = vector.shape_cast %62 : vector<16x16xf32> to vector<1x16x16xf32>
    %64 = vector.broadcast %63 : vector<1x16x16xf32> to vector<16x16x16xf32>
    %65 = arith.addf %60, %64 : vector<16x16x16xf32>
    %cst_21 = arith.constant dense<0xFF800000> : vector<16x16xf32>
    %66 = vector.multi_reduction <maximumf>, %65, %cst_21 [2] : vector<16x16x16xf32> to vector<16x16xf32>
    %67 = vector.shape_cast %66 : vector<16x16xf32> to vector<16x16x1xf32>
    %68 = vector.broadcast %67 : vector<16x16x1xf32> to vector<16x16x16xf32>
    %69 = arith.subf %65, %68 : vector<16x16x16xf32>
    %70 = math.exp %69 : vector<16x16x16xf32>
    %cst_22 = arith.constant dense<0.000000e+00> : vector<16x16xf32>
    %71 = vector.multi_reduction <add>, %70, %cst_22 [2] : vector<16x16x16xf32> to vector<16x16xf32>
    %72 = vector.shape_cast %71 : vector<16x16xf32> to vector<16x16x1xf32>
    "tpu.trace_start"() <{level = 10 : i32, message = "wpq,wqd->wpd"}> : () -> ()
    %cst_23 = arith.constant dense<0.000000e+00> : vector<16x16x8xf32>
    %73 = tpu.matmul %70, %59, %cst_23 {dimension_numbers = #tpu.dot_dimension_numbers<[2], [1], [1], [2], [0, 0, 0, 1, 1, 2], [0], [0]>} : vector<16x16x16xf32>, vector<16x16x8xf32>, vector<16x16x8xf32> -> vector<16x16x8xf32>
    "tpu.trace_stop"() : () -> ()
    %74 = tpu.reciprocal %72 {approx = true} : vector<16x16x1xf32> -> vector<16x16x1xf32>
    %75 = vector.broadcast %74 : vector<16x16x1xf32> to vector<16x16x8xf32>
    %76 = arith.mulf %73, %75 : vector<16x16x8xf32>
    %77 = vector.shape_cast %76 : vector<16x16x8xf32> to vector<256x8xf32>
    %78 = vector.extract_strided_slice %5 {offsets = [0, 24], sizes = [256, 8], strides = [1, 1]} : vector<256x96xf32> to vector<256x8xf32>
    %79 = vector.shape_cast %78 : vector<256x8xf32> to vector<16x16x8xf32>
    %80 = vector.extract_strided_slice %5 {offsets = [0, 56], sizes = [256, 8], strides = [1, 1]} : vector<256x96xf32> to vector<256x8xf32>
    %81 = vector.shape_cast %80 : vector<256x8xf32> to vector<16x16x8xf32>
    %82 = vector.extract_strided_slice %5 {offsets = [0, 88], sizes = [256, 8], strides = [1, 1]} : vector<256x96xf32> to vector<256x8xf32>
    %83 = vector.shape_cast %82 : vector<256x8xf32> to vector<16x16x8xf32>
    "tpu.trace_start"() <{level = 10 : i32, message = "wpd,wqd->wpq"}> : () -> ()
    %cst_24 = arith.constant dense<0.000000e+00> : vector<16x16x16xf32>
    %84 = tpu.matmul %79, %81, %cst_24 {dimension_numbers = #tpu.dot_dimension_numbers<[2], [2], [1], [1], [0, 0, 0, 1, 1, 1], [0], [0]>} : vector<16x16x8xf32>, vector<16x16x8xf32>, vector<16x16x16xf32> -> vector<16x16x16xf32>
    "tpu.trace_stop"() : () -> ()
    %c3 = arith.constant 3 : index
    %c0_25 = arith.constant 0 : index
    %c0_26 = arith.constant 0 : index
    %85 = vector.load %arg4[%c3, %c0_25, %c0_26] : memref<4x16x16xf32, #tpu.memory_space<vmem>>, vector<1x16x16xf32>
    %86 = vector.shape_cast %85 : vector<1x16x16xf32> to vector<16x16xf32>
    %87 = vector.shape_cast %86 : vector<16x16xf32> to vector<1x16x16xf32>
    %88 = vector.broadcast %87 : vector<1x16x16xf32> to vector<16x16x16xf32>
    %89 = arith.addf %84, %88 : vector<16x16x16xf32>
    %cst_27 = arith.constant dense<0xFF800000> : vector<16x16xf32>
    %90 = vector.multi_reduction <maximumf>, %89, %cst_27 [2] : vector<16x16x16xf32> to vector<16x16xf32>
    %91 = vector.shape_cast %90 : vector<16x16xf32> to vector<16x16x1xf32>
    %92 = vector.broadcast %91 : vector<16x16x1xf32> to vector<16x16x16xf32>
    %93 = arith.subf %89, %92 : vector<16x16x16xf32>
    %94 = math.exp %93 : vector<16x16x16xf32>
    %cst_28 = arith.constant dense<0.000000e+00> : vector<16x16xf32>
    %95 = vector.multi_reduction <add>, %94, %cst_28 [2] : vector<16x16x16xf32> to vector<16x16xf32>
    %96 = vector.shape_cast %95 : vector<16x16xf32> to vector<16x16x1xf32>
    "tpu.trace_start"() <{level = 10 : i32, message = "wpq,wqd->wpd"}> : () -> ()
    %cst_29 = arith.constant dense<0.000000e+00> : vector<16x16x8xf32>
    %97 = tpu.matmul %94, %83, %cst_29 {dimension_numbers = #tpu.dot_dimension_numbers<[2], [1], [1], [2], [0, 0, 0, 1, 1, 2], [0], [0]>} : vector<16x16x16xf32>, vector<16x16x8xf32>, vector<16x16x8xf32> -> vector<16x16x8xf32>
    "tpu.trace_stop"() : () -> ()
    %98 = tpu.reciprocal %96 {approx = true} : vector<16x16x1xf32> -> vector<16x16x1xf32>
    %99 = vector.broadcast %98 : vector<16x16x1xf32> to vector<16x16x8xf32>
    %100 = arith.mulf %97, %99 : vector<16x16x8xf32>
    %101 = vector.shape_cast %100 : vector<16x16x8xf32> to vector<256x8xf32>
    %102 = tpu.concatenate %29, %53, %77, %101 in 1 : vector<256x8xf32>, vector<256x8xf32>, vector<256x8xf32>, vector<256x8xf32> -> vector<256x32xf32>
    %c0_30 = arith.constant 0 : index
    %c0_31 = arith.constant 0 : index
    %103 = vector.load %arg5[%c0_30, %c0_31] : memref<32x32xf32, #tpu.memory_space<vmem>>, vector<32x32xf32>
    %cst_32 = arith.constant dense<0.000000e+00> : vector<256x32xf32>
    %104 = tpu.matmul %102, %103, %cst_32 {dimension_numbers = #tpu.dot_dimension_numbers<[1], [0], [0], [1], [0, 0, 1, 1], [], []>} : vector<256x32xf32>, vector<32x32xf32>, vector<256x32xf32> -> vector<256x32xf32>
    %c0_33 = arith.constant 0 : index
    %c0_34 = arith.constant 0 : index
    %105 = vector.load %arg6[%c0_33, %c0_34] : memref<1x32xf32, #tpu.memory_space<vmem>>, vector<1x32xf32>
    %106 = vector.broadcast %105 : vector<1x32xf32> to vector<256x32xf32>
    %107 = arith.addf %104, %106 : vector<256x32xf32>
    %c0_35 = arith.constant 0 : index
    %c0_36 = arith.constant 0 : index
    %108 = vector.load %arg7[%c0_35, %c0_36] : memref<256x32xf32, #tpu.memory_space<vmem>>, vector<256x32xf32>
    tpu.vector_store %arg7[%c0_35, %c0_36], %107 {strides = array<i32>} : memref<256x32xf32, #tpu.memory_space<vmem>>, vector<256x32xf32>,
    return
  }
  func.func @transform_0(%arg0: i32) -> (i32, i32) {
    %c0_i32 = arith.constant 0 : i32
    %c0_i32_0 = arith.constant 0 : i32
    return %arg0, %c0_i32 : i32, i32
  }
  func.func @transform_1(%arg0: i32) -> (i32, i32) {
    %c0_i32 = arith.constant 0 : i32
    %c0_i32_0 = arith.constant 0 : i32
    %c0_i32_1 = arith.constant 0 : i32
    return %c0_i32, %c0_i32_0 : i32, i32
  }
  func.func @transform_2(%arg0: i32) -> (i32, i32) {
    %c0_i32 = arith.constant 0 : i32
    %c0_i32_0 = arith.constant 0 : i32
    %c0_i32_1 = arith.constant 0 : i32
    return %c0_i32, %c0_i32_0 : i32, i32
  }
  func.func @transform_3(%arg0: i32) -> (i32, i32, i32) {
    %c0_i32 = arith.constant 0 : i32
    %c0_i32_0 = arith.constant 0 : i32
    %c0_i32_1 = arith.constant 0 : i32
    %c0_i32_2 = arith.constant 0 : i32
    return %c0_i32, %c0_i32_0, %c0_i32_1 : i32, i32, i32
  }
  func.func @transform_4(%arg0: i32) -> (i32, i32) {
    %c0_i32 = arith.constant 0 : i32
    %c0_i32_0 = arith.constant 0 : i32
    %c0_i32_1 = arith.constant 0 : i32
    return %c0_i32, %c0_i32_0 : i32, i32
  }
  func.func @transform_5(%arg0: i32) -> (i32, i32) {
    %c0_i32 = arith.constant 0 : i32
    %c0_i32_0 = arith.constant 0 : i32
    %c0_i32_1 = arith.constant 0 : i32
    return %c0_i32, %c0_i32_0 : i32, i32
  }
  func.func @transform_6(%arg0: i32) -> (i32, i32) {
    %c0_i32 = arith.constant 0 : i32
    %c0_i32_0 = arith.constant 0 : i32
    return %arg0, %c0_i32 : i32, i32
  }
}

</mosaic_0001>

<bundles_post_ra>
// kernel: tpu_custom_call.1
= control target key start
LH: loop header
LB: loop body
LE: loop exit
PB: predicated region body
PF: predicated region fallthrough
CT: control target
= control target key end

     0   :  { %s16961_s21 = smov 0   ;;  %s21928_s0 = inlined_call_operand.vmem [shape: f32[512,32], index: 0, kind: input, shape index: {}]   ;;  %s21929_s1 = inlined_call_operand.vmem [shape: f32[32,96], index: 1, kind: input, shape index: {}]   ;;  %s21930_s2 = inlined_call_operand.vmem [shape: f32[1,96], index: 2, kind: input, shape index: {}]   ;;  %s21931_s3 = inlined_call_operand.vmem [shape: f32[4,16,16], index: 3, kind: input, shape index: {}]   ;;  %s21932_s4 = inlined_call_operand.vmem [shape: f32[32,32], index: 4, kind: input, shape index: {}]   ;;  %s21933_s5 = inlined_call_operand.vmem [shape: f32[1,32], index: 5, kind: input, shape index: {}]   ;;  %s21934_s6 = inlined_call_operand.vmem [shape: f32[512,32], index: 6, kind: output, shape index: {}]  }
   0x1 LB: > { %s14302_s22 = sadd.s32 4294967295, %s16910_s21   ;;  %p14306_p0 = scmp.ge.s32.totalorder %s16910_s21, 1  ;;  %s16910_s21 = sphi %s16961_s21, %s16_s21  }
   0x2   : > { %p213_p1 = scmp.lt.s32.totalorder %s16910_s21, 3 }
   0x4   : > { %p214_p2 = pnand %p14306_p0, %p213_p1 }
   0x6   : > { %217 = sbr.rel (%p214_p2) target bundleno = 3228 (0xc9c), region = 44 }
   0xb   : > { %v290_v0 = vld [vmem:[%s21929_s1 + $0x18] sm:$0xff]  ;;  %v289_v1 = vld [vmem:[%s21929_s1 + $0x10] sm:$0xff]  ;;  %s14307_s27 = sshll.u32 %s14302_s22, 5  ;;  %v288_v2 = vld [vmem:[%s21929_s1 + $0x8] sm:$0xff]  ;;  %vm298_vm0 = vcmask 261120   ;;  %vm628_vm1 = vcmask 64512  }
   0xc   : > { %15353 = vmatprep.subr.mxu0 %v290_v0  ;;  %16361 = vmatprep.subr.mxu1 %v290_v0  ;;  %p244_p3 = scmp.lt.s32.totalorder %s14307_s27, 63  ;;  %v287_v3 = vld [vmem:[%s21929_s1] sm:$0xff]  ;;  %s16912_s14 = smov 64   ;;  %vm2047_vm2 = vcmask 130048   ;;  %vm13849_vm3 = vcmask 195584  }
   0xd   : > { %15354 = vmatpush3.msra.mxu0 %v290_v0  ;;  %16365 = vmatpush3.msra.mxu1 %v290_v0  ;;  %v17058_v36 = vld [vmem:[%s21930_s2] ss:$0 sm:$0xff]  ;;  %s16913_s15 = smov 96   ;;  %s16914_s16 = smov 88  }
   0xe   : > { %15355 = vmatprep.subr.mxu0 %v289_v1  ;;  %16362 = vmatprep.subr.mxu1 %v289_v1  ;;  %s23303_s27 = smov (!%p244_p3, %s14307_s27), 63  ;;  %s16915_s17 = smov 120  }
   0xf   : > { %15356 = vmatpush3.msra.mxu0 %v289_v1  ;;  %16366 = vmatpush3.msra.mxu1 %v289_v1  ;;  %s14308_s8 = sshll.u32 %s23303_s27, 3  ;;  %s16916_s18 = smov 56  }
  0x10   : > { %15357 = vmatprep.subr.mxu0 %v288_v2  ;;  %16363 = vmatprep.subr.mxu1 %v288_v2  ;;  %s16989_s11 = scalar_lea.vmem %s21928_s0, %s14308_s8  ;;  %s16917_s19 = smov 80  }
  0x11   : > { %15358 = vmatpush3.msra.mxu0 %v288_v2  ;;  %16367 = vmatpush3.msra.mxu1 %v288_v2  ;;  %v255_v4 = vld [vmem:[%s16989_s11] sm:$0xff]  ;;  %v256_v5 = vld [vmem:[%s16989_s11 + $0x8] sm:$0xff]  ;;  %v273_v8 = vld [vmem:[%s16989_s11 + $0x90] sm:$0xff]  ;;  %s16918_s20 = smov 112   ;;  %s16919_s26 = smov 48  }
  0x12   : > { %15359 = vmatprep.subr.mxu0 %v287_v3  ;;  %16364 = vmatprep.subr.mxu1 %v287_v3  ;;  %v271_v6 = vld [vmem:[%s16989_s11 + $0x80] sm:$0xff]  ;;  %v272_v7 = vld [vmem:[%s16989_s11 + $0x88] sm:$0xff]  ;;  %v257_v9 = vld [vmem:[%s16989_s11 + $0x10] sm:$0xff]  ;;  %s16920_s28 = smov 72   ;;  %s16921_s29 = smov 104  }
  0x13   : > { %15360 = vmatpush3.msra.mxu0 %v287_v3  ;;  %15361 = vmatprep.mubr.msk.f32.mxu0 %vm298_vm0, %v255_v4  ;;  %v258_v10 = vld [vmem:[%s16989_s11 + $0x18] sm:$0xff]  ;;  %v259_v11 = vld [vmem:[%s16989_s11 + $0x20] sm:$0xff]  ;;  %v260_v14 = vld [vmem:[%s16989_s11 + $0x28] sm:$0xff]  ;;  %s16924_s22 = smov 16   ;;  %s16925_s23 = smov 24  }
  0x14   : > { %15362 = vmatmul.mubr.msk.f32.vlgmr.msra.gmra.mxu0 %vm298_vm0, %v256_v5  ;;  %16368 = vmatpush3.msra.mxu1 %v287_v3  ;;  %v274_v12 = vld [vmem:[%s16989_s11 + $0x98] sm:$0xff]  ;;  %v275_v13 = vld [vmem:[%s16989_s11 + $0xa0] sm:$0xff]  ;;  %v261_v15 = vld [vmem:[%s16989_s11 + $0x30] sm:$0xff] }
  0x15   : > { %15385 = vmatprep.mubr.msk.f32.mxu1 %vm298_vm0, %v271_v6  ;;  %15364 = vmatprep.mubr.msk.f32.mxu0 %vm298_vm0, %v257_v9  ;;  %v276_v16 = vld [vmem:[%s16989_s11 + $0xa8] sm:$0xff]  ;;  %v277_v17 = vld [vmem:[%s16989_s11 + $0xb0] sm:$0xff]  ;;  %v262_v18 = vld [vmem:[%s16989_s11 + $0x38] sm:$0xff] }
  0x16   : > { %15386 = vmatmul.mubr.msk.f32.vlgmr.msra.gmra.mxu1 %vm298_vm0, %v272_v7  ;;  %v263_v19 = vld [vmem:[%s16989_s11 + $0x40] sm:$0xff]  ;;  %v278_v20 = vld [vmem:[%s16989_s11 + $0xb8] sm:$0xff]  ;;  %v264_v22 = vld [vmem:[%s16989_s11 + $0x48] sm:$0xff] }
  0x17   : > { %15388 = vmatprep.mubr.msk.f32.mxu1 %vm298_vm0, %v273_v8  ;;  %v279_v21 = vld [vmem:[%s16989_s11 + $0xc0] sm:$0xff]  ;;  %v265_v23 = vld [vmem:[%s16989_s11 + $0x50] sm:$0xff]  ;;  %v280_v24 = vld [vmem:[%s16989_s11 + $0xc8] sm:$0xff] }
  0x18   : > { %15365 = vmatmul.mubr.msk.f32.gmra.mxu0 %vm298_vm0, %v258_v10  ;;  %v281_v25 = vld [vmem:[%s16989_s11 + $0xd0] sm:$0xff]  ;;  %v266_v26 = vld [vmem:[%s16989_s11 + $0x58] sm:$0xff]  ;;  %v267_v27 = vld [vmem:[%s16989_s11 + $0x60] sm:$0xff] }
  0x19   : > { %15367 = vmatprep.mubr.msk.f32.mxu0 %vm298_vm0, %v259_v11  ;;  %v282_v28 = vld [vmem:[%s16989_s11 + $0xd8] sm:$0xff]  ;;  %v283_v29 = vld [vmem:[%s16989_s11 + $0xe0] sm:$0xff]  ;;  %v268_v30 = vld [vmem:[%s16989_s11 + $0x68] sm:$0xff] }
  0x1a   : > { %15389 = vmatmul.mubr.msk.f32.gmra.mxu1 %vm298_vm0, %v274_v12  ;;  %v269_v31 = vld [vmem:[%s16989_s11 + $0x70] sm:$0xff]  ;;  %v284_v32 = vld [vmem:[%s16989_s11 + $0xe8] sm:$0xff]  ;;  %v270_v34 = vld [vmem:[%s16989_s11 + $0x78] sm:$0xff] }
  0x1b   : > { %15391 = vmatprep.mubr.msk.f32.mxu1 %vm298_vm0, %v275_v13  ;;  %v285_v33 = vld [vmem:[%s16989_s11 + $0xf0] sm:$0xff]  ;;  %v286_v35 = vld [vmem:[%s16989_s11 + $0xf8] sm:$0xff]  ;;  %s16922_s11 = smov 40  }
  0x1c   : > { %15368 = vmatmul.mubr.msk.f32.gmra.mxu0 %vm298_vm0, %v260_v14 }
  0x1d   : > { %15370 = vmatprep.mubr.msk.f32.mxu0 %vm298_vm0, %v261_v15 }
  0x1e   : > { %15392 = vmatmul.mubr.msk.f32.gmra.mxu1 %vm298_vm0, %v276_v16 }
  0x1f   : > { %15394 = vmatprep.mubr.msk.f32.mxu1 %vm298_vm0, %v277_v17 }
  0x20   : > { %15371 = vmatmul.mubr.msk.f32.gmra.mxu0 %vm298_vm0, %v262_v18 }
  0x21   : > { %15373 = vmatprep.mubr.msk.f32.mxu0 %vm298_vm0, %v263_v19 }
  0x22   : > { %15395 = vmatmul.mubr.msk.f32.gmra.mxu1 %vm298_vm0, %v278_v20 }
  0x23   : > { %15397 = vmatprep.mubr.msk.f32.mxu1 %vm298_vm0, %v279_v21 }
  0x24   : > { %15374 = vmatmul.mubr.msk.f32.gmra.mxu0 %vm298_vm0, %v264_v22 }
  0x25   : > { %15376 = vmatprep.mubr.msk.f32.mxu0 %vm298_vm0, %v265_v23 }
  0x26   : > { %15398 = vmatmul.mubr.msk.f32.gmra.mxu1 %vm298_vm0, %v280_v24 }
  0x27   : > { %15400 = vmatprep.mubr.msk.f32.mxu1 %vm298_vm0, %v281_v25 }
  0x28   : > { %15377 = vmatmul.mubr.msk.f32.gmra.mxu0 %vm298_vm0, %v266_v26 }
  0x29   : > { %15379 = vmatprep.mubr.msk.f32.mxu0 %vm298_vm0, %v267_v27 }
  0x2a   : > { %15401 = vmatmul.mubr.msk.f32.gmra.mxu1 %vm298_vm0, %v282_v28 }
  0x2b   : > { %15403 = vmatprep.mubr.msk.f32.mxu1 %vm298_vm0, %v283_v29 }
  0x2c   : > { %15380 = vmatmul.mubr.msk.f32.gmra.mxu0 %vm298_vm0, %v268_v30 }
  0x2d   : > { %15382 = vmatprep.mubr.msk.f32.mxu0 %vm298_vm0, %v269_v31 }
  0x2e   : > { %15404 = vmatmul.mubr.msk.f32.gmra.mxu1 %vm298_vm0, %v284_v32 }
  0x2f   : > { %15406 = vmatprep.mubr.msk.f32.mxu1 %vm298_vm0, %v285_v33 }
  0x30   : > { %15383 = vmatmul.mubr.msk.f32.gmra.mxu0 %vm298_vm0, %v270_v34 }
  0x32   : > { %15407 = vmatmul.mubr.msk.f32.gmra.mxu1 %vm298_vm0, %v286_v35 }
  0xd4   : > { %v15363_v37 = vpop.f32.mrf.mxu0 }
  0xd5   : > { %v17061_v38 = vadd.f32 %v15363_v37, %v17058_v36 }
  0xd6   : > { %v461_v39 = vpop.f32.mrf.mxu0  ;;  %v15387_v40 = vpop.f32.mrf.mxu1 }
  0xd7   : > { %v17064_v41 = vadd.f32 %v17058_v36, %v461_v39  ;;  %v17067_v42 = vadd.f32 %v15387_v40, %v17058_v36  ;;  %2338 = vrot.lane.b32.xlu1 %v17061_v38, %s16912_s14  ;;  %626 = vrot.lane.b32.xlu0 %v17061_v38, %s16913_s15 }
  0xd8   : > { %v541_v43 = vpop.f32.mrf.mxu1  ;;  %v15366_v47 = vpop.f32.mrf.mxu0 }
  0xd9   : > { %22224 = vst [vmem:[#allocation2_spill] sm:$0xff] %v17064_v41  ;;  %v17074_v44 = vadd.f32 %v17058_v36, %v541_v43  ;;  %15413 = vmatprep.mubr.msk.f32.mxu1 %vm628_vm1, %v17064_v41  ;;  %v17108_v48 = vadd.f32 %v15366_v47, %v17058_v36 }
  0xda   : > { %v15390_v45 = vpop.f32.mrf.mxu1  ;;  %v471_v49 = vpop.f32.mrf.mxu0 }
  0xdb   : > { %22225 = vst [vmem:[#allocation3_spill] sm:$0xff] %v17074_v44  ;;  %15469 = vmatprep.mubr.msk.f32.mxu0 %vm628_vm1, %v17074_v44  ;;  %3034 = vrot.lane.b32.xlu1 %v17067_v42, %s16912_s14  ;;  %v17097_v46 = vadd.f32 %v15390_v45, %v17058_v36  ;;  %22226 = vst [vmem:[#allocation4_spill] sm:$0xff] %v17108_v48  ;;  %v17119_v51 = vadd.f32 %v17058_v36, %v471_v49 }
  0xdc   : > { %1339 = vrot.lane.b32.xlu0 %v17067_v42, %s16913_s15  ;;  %v551_v50 = vpop.f32.mrf.mxu1  ;;  %v15369_v53 = vpop.f32.mrf.mxu0 }
  0xdd   : > { %22227 = vst [vmem:[#allocation5_spill] sm:$0xff] %v17119_v51  ;;  %v17126_v52 = vadd.f32 %v17058_v36, %v551_v50  ;;  %v17137_v54 = vadd.f32 %v15369_v53, %v17058_v36 }
  0xde   : > { %v15393_v55 = vpop.f32.mrf.mxu1  ;;  %v481_v57 = vpop.f32.mrf.mxu0 }
  0xdf   : > { %3801 = vrot.lane.b32.xlu1 %v17061_v38, %s16914_s16  ;;  %22228 = vst [vmem:[#allocation6_spill] sm:$0xff] %v17137_v54  ;;  %v17140_v56 = vadd.f32 %v15393_v55, %v17058_v36  ;;  %v17155_v58 = vadd.f32 %v17058_v36, %v481_v57 }
  0xe0   : > { %3797 = vrot.lane.b32.xlu0 %v17061_v38, %s16915_s17  ;;  %v561_v59 = vpop.f32.mrf.mxu1  ;;  %v15372_v61 = vpop.f32.mrf.mxu0 }
  0xe1   : > { %22229 = vst [vmem:[#allocation7_spill] sm:$0xff] %v17155_v58  ;;  %v17162_v60 = vadd.f32 %v17058_v36, %v561_v59  ;;  %v17173_v62 = vadd.f32 %v15372_v61, %v17058_v36 }
  0xe2   : > { %v15396_v63 = vpop.f32.mrf.mxu1  ;;  %v491_v1 = vpop.f32.mrf.mxu0 }
  0xe3   : > { %4529 = vrot.lane.b32.xlu1 %v17067_v42, %s16914_s16  ;;  %22230 = vst [vmem:[#allocation8_spill] sm:$0xff] %v17173_v62  ;;  %v17180_v0 = vadd.f32 %v15396_v63, %v17058_v36  ;;  %v17191_v2 = vadd.f32 %v17058_v36, %v491_v1 }
  0xe4   : > { %624 = vrot.lane.b32.xlu0 %v17064_v41, %s16913_s15  ;;  %v571_v3 = vpop.f32.mrf.mxu1  ;;  %v15375_v5 = vpop.f32.mrf.mxu0 }
  0xe5   : > { %22231 = vst [vmem:[#allocation9_spill] sm:$0xff] %v17191_v2  ;;  %v17198_v4 = vadd.f32 %v17058_v36, %v571_v3  ;;  %v17205_v6 = vadd.f32 %v15375_v5, %v17058_v36 }
  0xe6   : > { %v15399_v7 = vpop.f32.mrf.mxu1  ;;  %v501_v9 = vpop.f32.mrf.mxu0 }
  0xe7   : > { %1337 = vrot.lane.b32.xlu1 %v17074_v44, %s16913_s15  ;;  %v17212_v8 = vadd.f32 %v15399_v7, %v17058_v36  ;;  %v17227_v10 = vadd.f32 %v17058_v36, %v501_v9 }
  0xe8   : > { %2336 = vrot.lane.b32.xlu0 %v17064_v41, %s16912_s14  ;;  %v581_v11 = vpop.f32.mrf.mxu1  ;;  %v15378_v13 = vpop.f32.mrf.mxu0 }
  0xe9   : > { %22232 = vst [vmem:[#allocation10_spill] sm:$0xff] %v17227_v10  ;;  %v17234_v12 = vadd.f32 %v17058_v36, %v581_v11  ;;  %v17241_v14 = vadd.f32 %v15378_v13, %v17058_v36 }
  0xea   : > { %v15402_v15 = vpop.f32.mrf.mxu1  ;;  %v511_v29 = vpop.f32.mrf.mxu0 }
  0xeb   : > { %3032 = vrot.lane.b32.xlu1 %v17074_v44, %s16912_s14  ;;  %v17252_v18 = vadd.f32 %v15402_v15, %v17058_v36  ;;  %v17296_v32 = vadd.f32 %v17058_v36, %v511_v29 }
  0xec   : > { %1428 = vrot.lane.b32.xlu0 %v17097_v46, %s16913_s15  ;;  %v591_v24 = vpop.f32.mrf.mxu1  ;;  %v15381_v31 = vpop.f32.mrf.mxu0 }
  0xed   : > { %v17279_v26 = vadd.f32 %v17058_v36, %v591_v24  ;;  %22238 = vst [vmem:[#allocation16_spill] sm:$0xff] %v17296_v32  ;;  %v17309_v34 = vadd.f32 %v15381_v31, %v17058_v36 }
  0xee   : > { %v15405_v37 = vpop.f32.mrf.mxu1  ;;  %v521_v49 = vpop.f32.mrf.mxu0 }
  0xef   : > { %3799 = vrot.lane.b32.xlu1 %v17064_v41, %s16914_s16  ;;  %v17320_v40 = vadd.f32 %v15405_v37, %v17058_v36  ;;  %v17339_v53 = vadd.f32 %v17058_v36, %v521_v49 }
  0xf0   : > { %3121 = vrot.lane.b32.xlu0 %v17097_v46, %s16912_s14  ;;  %v15384_v57 = vpop.f32.mrf.mxu0  ;;  %v601_v61 = vpop.f32.mrf.mxu1 }
  0xf1   : > { %v17350_v63 = vadd.f32 %v15384_v57, %v17058_v36  ;;  %v17386_v24 = vadd.f32 %v17058_v36, %v601_v61 }
  0xf2   : > { %v15408_v3 = vpop.f32.mrf.mxu1 }
  0xf3   : > { %3795 = vrot.lane.b32.xlu1 %v17064_v41, %s16915_s17  ;;  %v17361_v7 = vadd.f32 %v15408_v3, %v17058_v36 }
  0xf4   : > { %3892 = vrot.lane.b32.xlu0 %v17108_v48, %s16914_s16  ;;  %v611_v31 = vpop.f32.mrf.mxu1 }
  0xf7   : > { %716 = vrot.lane.b32.xlu1 %v17108_v48, %s16913_s15 }
  0xf8   : > { %3888 = vrot.lane.b32.xlu0 %v17108_v48, %s16915_s17 }
  0xfb   : > { %2425 = vrot.lane.b32.xlu1 %v17108_v48, %s16912_s14 }
  0xfc   : > { %2423 = vrot.lane.b32.xlu0 %v17119_v51, %s16912_s14 }
  0xff   : > { %714 = vrot.lane.b32.xlu1 %v17119_v51, %s16913_s15 }
 0x100   : > { %3119 = vrot.lane.b32.xlu0 %v17126_v52, %s16912_s14 }
 0x103   : > { %1426 = vrot.lane.b32.xlu1 %v17126_v52, %s16913_s15 }
 0x104   : > { %3890 = vrot.lane.b32.xlu0 %v17119_v51, %s16914_s16 }
 0x107   : > { %3886 = vrot.lane.b32.xlu1 %v17119_v51, %s16915_s17 }
 0x108   : > { %805 = vrot.lane.b32.xlu0 %v17137_v54, %s16913_s15 }
 0x10b   : > { %3208 = vrot.lane.b32.xlu1 %v17140_v56, %s16912_s14 }
 0x10c   : > { %1517 = vrot.lane.b32.xlu0 %v17140_v56, %s16913_s15 }
 0x10f   : > { %3983 = vrot.lane.b32.xlu1 %v17137_v54, %s16914_s16 }
 0x110   : > { %2512 = vrot.lane.b32.xlu0 %v17137_v54, %s16912_s14 }
 0x113   : > { %803 = vrot.lane.b32.xlu1 %v17155_v58, %s16913_s15 }
 0x114   : > { %3979 = vrot.lane.b32.xlu0 %v17137_v54, %s16915_s17 }
 0x117   : > { %1515 = vrot.lane.b32.xlu1 %v17162_v60, %s16913_s15 }
 0x118   : > { %2510 = vrot.lane.b32.xlu0 %v17155_v58, %s16912_s14 }
 0x11b   : > { %3206 = vrot.lane.b32.xlu1 %v17162_v60, %s16912_s14 }
 0x11c   : > { %3981 = vrot.lane.b32.xlu0 %v17155_v58, %s16914_s16 }
 0x11f   : > { %3977 = vrot.lane.b32.xlu1 %v17155_v58, %s16915_s17 }
 0x120   : > { %894 = vrot.lane.b32.xlu0 %v17173_v62, %s16913_s15 }
 0x123   : > { %2599 = vrot.lane.b32.xlu1 %v17173_v62, %s16912_s14 }
 0x124   : > { %1606 = vrot.lane.b32.xlu0 %v17180_v0, %s16913_s15 }
 0x127   : > { %4074 = vrot.lane.b32.xlu1 %v17173_v62, %s16914_s16 }
 0x128   : > { %3295 = vrot.lane.b32.xlu0 %v17180_v0, %s16912_s14 }
 0x12b   : > { %892 = vrot.lane.b32.xlu1 %v17191_v2, %s16913_s15 }
 0x12c   : > { %4070 = vrot.lane.b32.xlu0 %v17173_v62, %s16915_s17 }
 0x12f   : > { %1604 = vrot.lane.b32.xlu1 %v17198_v4, %s16913_s15 }
 0x130   : > { %2597 = vrot.lane.b32.xlu0 %v17191_v2, %s16912_s14 }
 0x133   : > { %4068 = vrot.lane.b32.xlu1 %v17191_v2, %s16915_s17 }
 0x134   : > { %3293 = vrot.lane.b32.xlu0 %v17198_v4, %s16912_s14 }
 0x137   : > { %2686 = vrot.lane.b32.xlu1 %v17205_v6, %s16912_s14 }
 0x138   : > { %4072 = vrot.lane.b32.xlu0 %v17191_v2, %s16914_s16 }
 0x13b   : > { %3382 = vrot.lane.b32.xlu1 %v17212_v8, %s16912_s14 }
 0x13c   : > { %983 = vrot.lane.b32.xlu0 %v17205_v6, %s16913_s15 }
 0x13f   : > { %4165 = vrot.lane.b32.xlu1 %v17205_v6, %s16914_s16 }
 0x140   : > { %1695 = vrot.lane.b32.xlu0 %v17212_v8, %s16913_s15 }
 0x143   : > { %981 = vrot.lane.b32.xlu1 %v17227_v10, %s16913_s15 }
 0x144   : > { %4161 = vrot.lane.b32.xlu0 %v17205_v6, %s16915_s17 }
 0x147   : > { %1693 = vrot.lane.b32.xlu1 %v17234_v12, %s16913_s15 }
 0x148   : > { %4163 = vrot.lane.b32.xlu0 %v17227_v10, %s16914_s16 }
 0x149   : > { %v17243_v16 = vpop.permute.xlu1 %2338  ;;  %v627_v17 = vpop.permute.xlu0 %626 }
 0x14a   : > { %15409 = vmatprep.subr.msk.mxu1 %vm628_vm1, %v627_v17 }
 0x14b   : > { %15410 = vmatpush3.xpose.msk.msra.mxu1 %vm628_vm1, %v627_v17  ;;  %2684 = vrot.lane.b32.xlu1 %v17227_v10, %s16912_s14 }
 0x14c   : > { %1072 = vrot.lane.b32.xlu0 %v17241_v14, %s16913_s15 }
 0x14d   : > { %v17254_v19 = vpop.permute.xlu1 %3034 }
 0x14e   : > { %22233 = vst [vmem:[#allocation11_spill] sm:$0xff] %v17254_v19  ;;  %v1340_v20 = vpop.permute.xlu0 %1339 }
 0x14f   : > { %15465 = vmatprep.subr.msk.mxu0 %vm628_vm1, %v1340_v20  ;;  %3380 = vrot.lane.b32.xlu1 %v17234_v12, %s16912_s14 }
 0x150   : > { %15466 = vmatpush3.xpose.msk.msra.mxu0 %vm628_vm1, %v1340_v20  ;;  %1784 = vrot.lane.b32.xlu0 %v17252_v18, %s16913_s15  ;;  %v531_v20 = vpop.f32.mrf.mxu0 }
 0x151   : > { %v17262_v21 = vpop.permute.xlu1 %3801 }
 0x152   : > { %22234 = vst [vmem:[#allocation12_spill] sm:$0xff] %v17262_v21  ;;  %v17264_v22 = vpop.permute.xlu0 %3797 }
 0x153   : > { %22235 = vst [vmem:[#allocation13_spill] sm:$0xff] %v17264_v22  ;;  %4159 = vrot.lane.b32.xlu1 %v17227_v10, %s16915_s17 }
 0x154   : > { %3469 = vrot.lane.b32.xlu0 %v17252_v18, %s16912_s14 }
 0x155   : > { %v17270_v23 = vpop.permute.xlu1 %4529 }
 0x156   : > { %22236 = vst [vmem:[#allocation14_spill] sm:$0xff] %v17270_v23  ;;  %v625_v25 = vpop.permute.xlu0 %624 }
 0x157   : > { %15411 = vmatprep.subr.msk.mxu1 %vm628_vm1, %v625_v25  ;;  %2773 = vrot.lane.b32.xlu1 %v17241_v14, %s16912_s14 }
 0x158   : > { %4252 = vrot.lane.b32.xlu0 %v17241_v14, %s16915_s17  ;;  %15412 = vmatpush3.xpose.msk.msra.mxu1 %vm628_vm1, %v625_v25 }
 0x159   : > { %v1338_v27 = vpop.permute.xlu1 %1337 }
 0x15a   : > { %v17281_v28 = vpop.permute.xlu0 %2336  ;;  %15467 = vmatprep.subr.msk.mxu0 %vm628_vm1, %v1338_v27 }
 0x15b   : > { %15414 = vmatmul.mubr.msk.f32.vlgmr.msra.gmra.mxu1 %vm628_vm1, %v17061_v38  ;;  %15468 = vmatpush3.xpose.msk.msra.mxu0 %vm628_vm1, %v1338_v27  ;;  %v17394_v27 = vadd.f32 %v17058_v36, %v531_v20 }
 0x15c   : > { %4256 = vrot.lane.b32.xlu1 %v17241_v14, %s16914_s16  ;;  %3467 = vrot.lane.b32.xlu0 %v17279_v26, %s16912_s14 }
 0x15d   : > { %15420 = vmatprep.mubr.msk.f32.mxu1 %vm628_vm1, %v17119_v51  ;;  %v17293_v30 = vpop.permute.xlu1 %3032 }
 0x15e   : > { %22237 = vst [vmem:[#allocation15_spill] sm:$0xff] %v17293_v30  ;;  %v17298_v33 = vpop.permute.xlu0 %1428  ;;  %15470 = vmatmul.mubr.msk.f32.vlgmr.msra.gmra.mxu0 %vm628_vm1, %v17067_v42 }
 0x15f   : > { %15483 = vmatprep.mubr.msk.f32.mxu0 %vm628_vm1, %v17162_v60 }
 0x160   : > { %1070 = vrot.lane.b32.xlu1 %v17296_v32, %s16913_s15  ;;  %4254 = vrot.lane.b32.xlu0 %v17296_v32, %s16914_s16 }
 0x161   : > { %v17311_v35 = vpop.permute.xlu1 %3799 }
 0x162   : > { %22239 = vst [vmem:[#allocation17_spill] sm:$0xff] %v17311_v35  ;;  %v17313_v39 = vpop.permute.xlu0 %3121 }
 0x164   : > { %1782 = vrot.lane.b32.xlu1 %v17279_v26, %s16913_s15  ;;  %1161 = vrot.lane.b32.xlu0 %v17309_v34, %s16913_s15 }
 0x165   : > { %v17322_v43 = vpop.permute.xlu1 %3795 }
 0x166   : > { %22240 = vst [vmem:[#allocation18_spill] sm:$0xff] %v17322_v43  ;;  %v17324_v45 = vpop.permute.xlu0 %3892 }
 0x167   : > { %22241 = vst [vmem:[#allocation19_spill] sm:$0xff] %v17324_v45 }
 0x168   : > { %2771 = vrot.lane.b32.xlu1 %v17296_v32, %s16912_s14  ;;  %1873 = vrot.lane.b32.xlu0 %v17320_v40, %s16913_s15 }
 0x169   : > { %v717_v47 = vpop.permute.xlu1 %716 }
 0x16a   : > { %v17330_v50 = vpop.permute.xlu0 %3888  ;;  %15416 = vmatprep.subr.msk.mxu1 %vm628_vm1, %v717_v47 }
 0x16b   : > { %22242 = vst [vmem:[#allocation20_spill] sm:$0xff] %v17330_v50  ;;  %15417 = vmatpush3.xpose.msk.msra.mxu1 %vm628_vm1, %v717_v47  ;;  %v17406_v47 = vadd.f32 %v17058_v36, %v611_v31 }
 0x16c   : > { %4250 = vrot.lane.b32.xlu1 %v17296_v32, %s16915_s17  ;;  %4343 = vrot.lane.b32.xlu0 %v17309_v34, %s16915_s17 }
 0x16d   : > { %v17341_v55 = vpop.permute.xlu1 %2425 }
 0x16e   : > { %v17343_v59 = vpop.permute.xlu0 %2423 }
 0x170   : > { %2860 = vrot.lane.b32.xlu1 %v17309_v34, %s16912_s14  ;;  %4345 = vrot.lane.b32.xlu0 %v17339_v53, %s16914_s16 }
 0x171   : > { %v715_v1 = vpop.permute.xlu1 %714 }
 0x172   : > { %v17352_v5 = vpop.permute.xlu0 %3119  ;;  %15418 = vmatprep.subr.msk.mxu1 %vm628_vm1, %v715_v1 }
 0x173   : > { %22243 = vst [vmem:[#allocation21_spill] sm:$0xff] %v17352_v5  ;;  %15419 = vmatpush3.xpose.msk.msra.mxu1 %vm628_vm1, %v715_v1 }
 0x174   : > { %3556 = vrot.lane.b32.xlu1 %v17320_v40, %s16912_s14  ;;  %1250 = vrot.lane.b32.xlu0 %v17350_v63, %s16913_s15 }
 0x175   : > { %v17363_v9 = vpop.permute.xlu1 %1426 }
 0x176   : > { %v17365_v11 = vpop.permute.xlu0 %3890  ;;  %15421 = vmatmul.mubr.msk.f32.vlgmr.msra.gmra.mxu1 %vm628_vm1, %v17108_v48 }
 0x177   : > { %22244 = vst [vmem:[#allocation22_spill] sm:$0xff] %v17365_v11  ;;  %15427 = vmatprep.mubr.msk.f32.mxu1 %vm628_vm1, %v17155_v58 }
 0x178   : > { %4347 = vrot.lane.b32.xlu1 %v17309_v34, %s16914_s16  ;;  %1962 = vrot.lane.b32.xlu0 %v17361_v7, %s16913_s15 }
 0x179   : > { %v17375_v13 = vpop.permute.xlu1 %3886 }
 0x17a   : > { %22245 = vst [vmem:[#allocation23_spill] sm:$0xff] %v17375_v13  ;;  %v806_v15 = vpop.permute.xlu0 %805 }
 0x17b   : > { %15423 = vmatprep.subr.msk.mxu1 %vm628_vm1, %v806_v15 }
 0x17c   : > { %1159 = vrot.lane.b32.xlu1 %v17339_v53, %s16913_s15  ;;  %2947 = vrot.lane.b32.xlu0 %v17350_v63, %s16912_s14 }
 0x17d   : > { %v17382_v17 = vpop.permute.xlu1 %3208  ;;  %15424 = vmatpush3.xpose.msk.msra.mxu1 %vm628_vm1, %v806_v15 }
 0x17e   : > { %22246 = vst [vmem:[#allocation24_spill] sm:$0xff] %v17382_v17  ;;  %v1518_v25 = vpop.permute.xlu0 %1517 }
 0x17f   : > { %15479 = vmatprep.subr.msk.mxu0 %vm628_vm1, %v1518_v25 }
 0x180   : > { %1871 = vrot.lane.b32.xlu1 %v17386_v24, %s16913_s15  ;;  %3643 = vrot.lane.b32.xlu0 %v17361_v7, %s16912_s14 }
 0x181   : > { %15480 = vmatpush3.xpose.msk.msra.mxu0 %vm628_vm1, %v1518_v25  ;;  %v17397_v29 = vpop.permute.xlu1 %3983 }
 0x182   : > { %22247 = vst [vmem:[#allocation25_spill] sm:$0xff] %v17397_v29  ;;  %v17399_v37 = vpop.permute.xlu0 %2512 }
 0x184   : > { %2858 = vrot.lane.b32.xlu1 %v17339_v53, %s16912_s14  ;;  %2945 = vrot.lane.b32.xlu0 %v17394_v27, %s16912_s14 }
 0x185   : > { %v804_v49 = vpop.permute.xlu1 %803 }
 0x186   : > { %v17408_v57 = vpop.permute.xlu0 %3979  ;;  %15425 = vmatprep.subr.msk.mxu1 %vm628_vm1, %v804_v49 }
 0x187   : > { %22248 = vst [vmem:[#allocation26_spill] sm:$0xff] %v17408_v57  ;;  %15426 = vmatpush3.xpose.msk.msra.mxu1 %vm628_vm1, %v804_v49 }
 0x188   : > { %3554 = vrot.lane.b32.xlu1 %v17386_v24, %s16912_s14  ;;  %3641 = vrot.lane.b32.xlu0 %v17406_v47, %s16912_s14  ;;  %s21545_s14 = scalar_lea.vmem %s21934_s6, %s14308_s8 }
 0x189   : > { %v1516_v61 = vpop.permute.xlu1 %1515 }
 0x18a   : > { %v17416_v1 = vpop.permute.xlu0 %2510  ;;  %15428 = vmatmul.mubr.msk.f32.vlgmr.msra.gmra.mxu1 %vm628_vm1, %v17137_v54  ;;  %15481 = vmatprep.subr.msk.mxu0 %vm628_vm1, %v1516_v61 }
 0x18b   : > { %15434 = vmatprep.mubr.msk.f32.mxu1 %vm628_vm1, %v17191_v2  ;;  %15482 = vmatpush3.xpose.msk.msra.mxu0 %vm628_vm1, %v1516_v61 }
 0x18c   : > { %4341 = vrot.lane.b32.xlu1 %v17339_v53, %s16915_s17  ;;  %4436 = vrot.lane.b32.xlu0 %v17394_v27, %s16914_s16 }
 0x18d   : > { %v17428_v36 = vpop.permute.xlu1 %3206 }
 0x18e   : > { %22249 = vst [vmem:[#allocation27_spill] sm:$0xff] %v17428_v36  ;;  %v17430_v3 = vpop.permute.xlu0 %3981  ;;  %15484 = vmatmul.mubr.msk.f32.vlgmr.msra.gmra.mxu0 %vm628_vm1, %v17140_v56 }
 0x18f   : > { %22250 = vst [vmem:[#allocation28_spill] sm:$0xff] %v17430_v3  ;;  %15497 = vmatprep.mubr.msk.f32.mxu0 %vm628_vm1, %v17234_v12 }
 0x190   : > { %4438 = vrot.lane.b32.xlu1 %v17350_v63, %s16914_s16  ;;  %4527 = vrot.lane.b32.xlu0 %v17074_v44, %s16914_s16 }
 0x191   : > { %v17440_v15 = vpop.permute.xlu1 %3977 }
 0x192   : > { %22251 = vst [vmem:[#allocation29_spill] sm:$0xff] %v17440_v15  ;;  %v895_v20 = vpop.permute.xlu0 %894 }
 0x193   : > { %15430 = vmatprep.subr.msk.mxu1 %vm628_vm1, %v895_v20 }
 0x194   : > { %1248 = vrot.lane.b32.xlu1 %v17394_v27, %s16913_s15  ;;  %4434 = vrot.lane.b32.xlu0 %v17350_v63, %s16915_s17 }
 0x195   : > { %v17447_v25 = vpop.permute.xlu1 %2599  ;;  %15431 = vmatpush3.xpose.msk.msra.mxu1 %vm628_vm1, %v895_v20 }
 0x196   : > { %v17450_v31 = vpop.permute.xlu0 %1606 }
 0x198   : > { %1960 = vrot.lane.b32.xlu1 %v17406_v47, %s16913_s15  ;;  %4618 = vrot.lane.b32.xlu0 %v17126_v52, %s16914_s16 }
 0x199   : > { %v17456_v49 = vpop.permute.xlu1 %4074 }
 0x19a   : > { %22252 = vst [vmem:[#allocation30_spill] sm:$0xff] %v17456_v49  ;;  %v17458_v61 = vpop.permute.xlu0 %3295 }
 0x19b   : > { %22253 = vst [vmem:[#allocation31_spill] sm:$0xff] %v17458_v61 }
 0x19c   : > { %4432 = vrot.lane.b32.xlu1 %v17394_v27, %s16915_s17  ;;  %4525 = vrot.lane.b32.xlu0 %v17067_v42, %s16915_s17 }
 0x19d   : > { %v893_v50 = vpop.permute.xlu1 %892 }
 0x19e   : > { %v17464_v20 = vpop.permute.xlu0 %4070  ;;  %15432 = vmatprep.subr.msk.mxu1 %vm628_vm1, %v893_v50 }
 0x19f   : > { %22254 = vst [vmem:[#allocation32_spill] sm:$0xff] %v17464_v20  ;;  %15433 = vmatpush3.xpose.msk.msra.mxu1 %vm628_vm1, %v893_v50 }
 0x1a0   : > { %4620 = vrot.lane.b32.xlu1 %v17097_v46, %s16914_s16  ;;  %4709 = vrot.lane.b32.xlu0 %v17162_v60, %s16914_s16 }
 0x1a1   : > { %v17472_v49 = vpop.permute.xlu1 %1604 }
 0x1a2   : > { %v17474_v13 = vpop.permute.xlu0 %2597  ;;  %15435 = vmatmul.mubr.msk.f32.vlgmr.msra.gmra.mxu1 %vm628_vm1, %v17173_v62 }
 0x1a3   : > { %15441 = vmatprep.mubr.msk.f32.mxu1 %vm628_vm1, %v17227_v10 }
 0x1a4   : > { %4523 = vrot.lane.b32.xlu1 %v17074_v44, %s16915_s17  ;;  %4616 = vrot.lane.b32.xlu0 %v17097_v46, %s16915_s17 }
 0x1a5   : > { %v17484_v50 = vpop.permute.xlu1 %4068 }
 0x1a6   : > { %22255 = vst [vmem:[#allocation33_spill] sm:$0xff] %v17484_v50  ;;  %v17486_v20 = vpop.permute.xlu0 %3293 }
 0x1a7   : > { %22256 = vst [vmem:[#allocation34_spill] sm:$0xff] %v17486_v20 }
 0x1a8   : > { %4711 = vrot.lane.b32.xlu1 %v17140_v56, %s16914_s16  ;;  %4800 = vrot.lane.b32.xlu0 %v17198_v4, %s16914_s16 }
 0x1a9   : > { %v17492_v11 = vpop.permute.xlu1 %2686 }
 0x1aa   : > { %v17494_v45 = vpop.permute.xlu0 %4072 }
 0x1ab   : > { %22257 = vst [vmem:[#allocation35_spill] sm:$0xff] %v17494_v45 }
 0x1ac   : > { %4614 = vrot.lane.b32.xlu1 %v17126_v52, %s16915_s17  ;;  %4707 = vrot.lane.b32.xlu0 %v17140_v56, %s16915_s17 }
 0x1ad   : > { %v17500_v23 = vpop.permute.xlu1 %3382 }
 0x1ae   : > { %22258 = vst [vmem:[#allocation36_spill] sm:$0xff] %v17500_v23  ;;  %v984_v50 = vpop.permute.xlu0 %983 }
 0x1af   : > { %15437 = vmatprep.subr.msk.mxu1 %vm628_vm1, %v984_v50 }
 0x1b0   : > { %4802 = vrot.lane.b32.xlu1 %v17180_v0, %s16914_s16  ;;  %4891 = vrot.lane.b32.xlu0 %v17234_v12, %s16914_s16 }
 0x1b1   : > { %15438 = vmatpush3.xpose.msk.msra.mxu1 %vm628_vm1, %v984_v50  ;;  %v17508_v45 = vpop.permute.xlu1 %4165 }
 0x1b2   : > { %22259 = vst [vmem:[#allocation37_spill] sm:$0xff] %v17508_v45  ;;  %v1696_v57 = vpop.permute.xlu0 %1695 }
 0x1b3   : > { %15493 = vmatprep.subr.msk.mxu0 %vm628_vm1, %v1696_v57 }
 0x1b4   : > { %4705 = vrot.lane.b32.xlu1 %v17162_v60, %s16915_s17  ;;  %4798 = vrot.lane.b32.xlu0 %v17180_v0, %s16915_s17 }
 0x1b5   : > { %15494 = vmatpush3.xpose.msk.msra.mxu0 %vm628_vm1, %v1696_v57  ;;  %v982_v3 = vpop.permute.xlu1 %981 }
 0x1b6   : > { %v17516_v15 = vpop.permute.xlu0 %4161  ;;  %15439 = vmatprep.subr.msk.mxu1 %vm628_vm1, %v982_v3 }
 0x1b7   : > { %22260 = vst [vmem:[#allocation38_spill] sm:$0xff] %v17516_v15  ;;  %15440 = vmatpush3.xpose.msk.msra.mxu1 %vm628_vm1, %v982_v3 }
 0x1b8   : > { %4893 = vrot.lane.b32.xlu1 %v17212_v8, %s16914_s16  ;;  %4982 = vrot.lane.b32.xlu0 %v17279_v26, %s16914_s16 }
 0x1b9   : > { %v1694_v50 = vpop.permute.xlu1 %1693 }
 0x1ba   : > { %v17524_v45 = vpop.permute.xlu0 %4163  ;;  %15442 = vmatmul.mubr.msk.f32.vlgmr.msra.gmra.mxu1 %vm628_vm1, %v17205_v6  ;;  %15495 = vmatprep.subr.msk.mxu0 %vm628_vm1, %v1694_v50 }
 0x1bb   : > { %22261 = vst [vmem:[#allocation39_spill] sm:$0xff] %v17524_v45  ;;  %15448 = vmatprep.mubr.msk.f32.mxu1 %vm628_vm1, %v17296_v32  ;;  %15496 = vmatpush3.xpose.msk.msra.mxu0 %vm628_vm1, %v1694_v50 }
 0x1bc   : > { %4796 = vrot.lane.b32.xlu1 %v17198_v4, %s16915_s17  ;;  %4889 = vrot.lane.b32.xlu0 %v17212_v8, %s16915_s17 }
 0x1bd   : > { %v17536_v57 = vpop.permute.xlu1 %2684 }
 0x1be   : > { %v1073_v3 = vpop.permute.xlu0 %1072  ;;  %15498 = vmatmul.mubr.msk.f32.vlgmr.msra.gmra.mxu0 %vm628_vm1, %v17212_v8 }
 0x1bf   : > { %15511 = vmatprep.mubr.msk.f32.mxu0 %vm628_vm1, %v17386_v24  ;;  %15444 = vmatprep.subr.msk.mxu1 %vm628_vm1, %v1073_v3 }
 0x1c0   : > { %4984 = vrot.lane.b32.xlu1 %v17252_v18, %s16914_s16  ;;  %5073 = vrot.lane.b32.xlu0 %v17386_v24, %s16914_s16 }
 0x1c1   : > { %v17547_v50 = vpop.permute.xlu1 %3380  ;;  %15445 = vmatpush3.xpose.msk.msra.mxu1 %vm628_vm1, %v1073_v3 }
 0x1c2   : > { %22262 = vst [vmem:[#allocation40_spill] sm:$0xff] %v17547_v50  ;;  %v17550_v15 = vpop.permute.xlu0 %1784 }
 0x1c4   : > { %4887 = vrot.lane.b32.xlu1 %v17234_v12, %s16915_s17  ;;  %4980 = vrot.lane.b32.xlu0 %v17252_v18, %s16915_s17 }
 0x1c5   : > { %v17556_v45 = vpop.permute.xlu1 %4159 }
 0x1c6   : > { %22263 = vst [vmem:[#allocation41_spill] sm:$0xff] %v17556_v45  ;;  %v17558_v22 = vpop.permute.xlu0 %3469 }
 0x1c7   : > { %22264 = vst [vmem:[#allocation42_spill] sm:$0xff] %v17558_v22 }
 0x1c8   : > { %5075 = vrot.lane.b32.xlu1 %v17320_v40, %s16914_s16  ;;  %5071 = vrot.lane.b32.xlu0 %v17320_v40, %s16915_s17 }
 0x1c9   : > { %v17564_v29 = vpop.permute.xlu1 %2773 }
 0x1ca   : > { %v17566_v3 = vpop.permute.xlu0 %4252 }
 0x1cb   : > { %22265 = vst [vmem:[#allocation43_spill] sm:$0xff] %v17566_v3 }
 0x1cc   : > { %4978 = vrot.lane.b32.xlu1 %v17279_v26, %s16915_s17  ;;  %5160 = vrot.lane.b32.xlu0 %v17406_v47, %s16915_s17 }
 0x1ce   : > { %v17572_v35 = vpop.permute.xlu1 %4256  ;;  %v17574_v45 = vpop.permute.xlu0 %3467 }
 0x1cf   : > { %22266 = vst [vmem:[#allocation44_spill] sm:$0xff] %v17572_v35  ;;  %22267 = vst [vmem:[#allocation45_spill] sm:$0xff] %v17574_v45 }
 0x1d0   : > { %5166 = vrot.lane.b32.xlu1 %v17361_v7, %s16914_s16  ;;  %5539 = vrot.lane.b32.xlu0 %v17064_v41, %s16916_s18 }
 0x1d2   : > { %v1071_v43 = vpop.permute.xlu1 %1070  ;;  %v17580_v21 = vpop.permute.xlu0 %4254 }
 0x1d3   : > { %22268 = vst [vmem:[#allocation46_spill] sm:$0xff] %v17580_v21  ;;  %15446 = vmatprep.subr.msk.mxu1 %vm628_vm1, %v1071_v43 }
 0x1d4   : > { %5069 = vrot.lane.b32.xlu1 %v17386_v24, %s16915_s17  ;;  %5715 = vrot.lane.b32.xlu0 %v17137_v54, %s16916_s18 }
 0x1d5   : > { %15447 = vmatpush3.xpose.msk.msra.mxu1 %vm628_vm1, %v1071_v43 }
 0x1d6   : > { %v17588_v3 = vpop.permute.xlu1 %1782  ;;  %v1162_v35 = vpop.permute.xlu0 %1161 }
 0x1d7   : > { %15451 = vmatprep.subr.msk.mxu1 %vm628_vm1, %v1162_v35 }
 0x1d8   : > { %15449 = vmatmul.mubr.msk.f32.vlgmr.msra.gmra.mxu1 %vm628_vm1, %v17241_v14  ;;  %5164 = vrot.lane.b32.xlu1 %v17406_v47, %s16914_s16 }
 0x1d9   : > { %5626 = vrot.lane.b32.xlu0 %v17119_v51, %s16916_s18  ;;  %15455 = vmatprep.mubr.msk.f32.mxu1 %vm628_vm1, %v17339_v53 }
 0x1da   : > { %v17599_v21 = vpop.permute.xlu1 %2771  ;;  %v1874_v43 = vpop.permute.xlu0 %1873  ;;  %15452 = vmatpush3.xpose.msk.msra.mxu1 %vm628_vm1, %v1162_v35 }
 0x1db   : > { %15507 = vmatprep.subr.msk.mxu0 %vm628_vm1, %v1874_v43 }
 0x1dc   : > { %5162 = vrot.lane.b32.xlu1 %v17361_v7, %s16915_s17  ;;  %15508 = vmatpush3.xpose.msk.msra.mxu0 %vm628_vm1, %v1874_v43 }
 0x1dd   : > { %5713 = vrot.lane.b32.xlu0 %v17155_v58, %s16916_s18 }
 0x1de   : > { %v17608_v50 = vpop.permute.xlu1 %4250  ;;  %v17610_v23 = vpop.permute.xlu0 %4343 }
 0x1df   : > { %22269 = vst [vmem:[#allocation47_spill] sm:$0xff] %v17608_v50  ;;  %22270 = vst [vmem:[#allocation48_spill] sm:$0xff] %v17610_v23 }
 0x1e0   : > { %5541 = vrot.lane.b32.xlu1 %v17061_v38, %s16916_s18 }
 0x1e1   : > { %5800 = vrot.lane.b32.xlu0 %v17191_v2, %s16916_s18 }
 0x1e2   : > { %v17616_v35 = vpop.permute.xlu1 %2860  ;;  %v17618_v36 = vpop.permute.xlu0 %4345 }
 0x1e3   : > { %22271 = vst [vmem:[#allocation49_spill] sm:$0xff] %v17618_v36 }
 0x1e4   : > { %5628 = vrot.lane.b32.xlu1 %v17108_v48, %s16916_s18 }
 0x1e5   : > { %6150 = vrot.lane.b32.xlu0 %v17350_v63, %s16916_s18 }
 0x1e6   : > { %v17624_v43 = vpop.permute.xlu1 %3556  ;;  %v1251_v50 = vpop.permute.xlu0 %1250 }
 0x1e7   : > { %22272 = vst [vmem:[#allocation50_spill] sm:$0xff] %v17624_v43 }
 0x1e8   : > { %5802 = vrot.lane.b32.xlu1 %v17173_v62, %s16916_s18 }
 0x1e9   : > { %6148 = vrot.lane.b32.xlu0 %v17394_v27, %s16916_s18 }
 0x1ea   : > { %v17630_v23 = vpop.permute.xlu1 %4347  ;;  %v17632_v17 = vpop.permute.xlu0 %1962 }
 0x1eb   : > { %22273 = vst [vmem:[#allocation51_spill] sm:$0xff] %v17630_v23 }
 0x1ec   : > { %5889 = vrot.lane.b32.xlu1 %v17205_v6, %s16916_s18 }
 0x1ed   : > { %6324 = vrot.lane.b32.xlu0 %v17097_v46, %s16916_s18 }
 0x1ee   : > { %v1160_v36 = vpop.permute.xlu1 %1159  ;;  %v17638_v30 = vpop.permute.xlu0 %2947 }
 0x1ef   : > { %15453 = vmatprep.subr.msk.mxu1 %vm628_vm1, %v1160_v36 }
 0x1f0   : > { %5887 = vrot.lane.b32.xlu1 %v17227_v10, %s16916_s18  ;;  %15454 = vmatpush3.xpose.msk.msra.mxu1 %vm628_vm1, %v1160_v36 }
 0x1f1   : > { %6322 = vrot.lane.b32.xlu0 %v17126_v52, %s16916_s18  ;;  %15458 = vmatprep.subr.msk.mxu1 %vm628_vm1, %v1251_v50 }
 0x1f2   : > { %v1872_v23 = vpop.permute.xlu1 %1871  ;;  %v17647_v43 = vpop.permute.xlu0 %3643 }
 0x1f3   : > { %22274 = vst [vmem:[#allocation52_spill] sm:$0xff] %v17647_v43  ;;  %15456 = vmatmul.mubr.msk.f32.vlgmr.msra.gmra.mxu1 %vm628_vm1, %v17309_v34  ;;  %15509 = vmatprep.subr.msk.mxu0 %vm628_vm1, %v1872_v23 }
 0x1f4   : > { %5976 = vrot.lane.b32.xlu1 %v17241_v14, %s16916_s18  ;;  %15462 = vmatprep.mubr.msk.f32.mxu1 %vm628_vm1, %v17394_v27 }
 0x1f5   : > { %6498 = vrot.lane.b32.xlu0 %v17180_v0, %s16916_s18  ;;  %15510 = vmatpush3.xpose.msk.msra.mxu0 %vm628_vm1, %v1872_v23 }
 0x1f6   : > { %15521 = vmatprep.subr.mxu0 %v17243_v16  ;;  %v17660_v36 = vpop.permute.xlu1 %2858  ;;  %v17662_v43 = vpop.permute.xlu0 %2945  ;;  %15459 = vmatpush3.xpose.msk.msra.mxu1 %vm628_vm1, %v1251_v50 }
 0x1f8   : > { %15512 = vmatmul.mubr.msk.f32.vlgmr.msra.gmra.mxu0 %vm628_vm1, %v17320_v40  ;;  %6063 = vrot.lane.b32.xlu1 %v17309_v34, %s16916_s18 }
 0x1f9   : > { %6496 = vrot.lane.b32.xlu0 %v17198_v4, %s16916_s18  ;;  %15522 = vmatpush3.msra.mxu0 %v17243_v16 }
 0x1fa   : > { %15523 = vmatprep.subr.mxu0 %v17281_v28  ;;  %v17673_v23 = vpop.permute.xlu1 %3554  ;;  %v17675_v45 = vpop.permute.xlu0 %3641 }
 0x1fb   : > { %22275 = vst [vmem:[#allocation53_spill] sm:$0xff] %v17673_v23  ;;  %22276 = vst [vmem:[#allocation54_spill] sm:$0xff] %v17675_v45  ;;  %15524 = vmatpush3.msra.mxu0 %v17281_v28 }
 0x1fc   : > { %15535 = vmatprep.subr.mxu0 %v17399_v37  ;;  %5974 = vrot.lane.b32.xlu1 %v17296_v32, %s16916_s18 }
 0x1fd   : > { %6672 = vrot.lane.b32.xlu0 %v17252_v18, %s16916_s18 }
 0x1fe   : > { %v17683_v50 = vpop.permute.xlu1 %4341  ;;  %v17685_v22 = vpop.permute.xlu0 %4436 }
 0x1ff   : > { %22277 = vst [vmem:[#allocation55_spill] sm:$0xff] %v17683_v50  ;;  %22278 = vst [vmem:[#allocation56_spill] sm:$0xff] %v17685_v22 }
 0x200   : > { %6061 = vrot.lane.b32.xlu1 %v17339_v53, %s16916_s18 }
 0x201   : > { %6670 = vrot.lane.b32.xlu0 %v17279_v26, %s16916_s18 }
 0x202   : > { %v17691_v16 = vpop.permute.xlu1 %4438  ;;  %v17693_v28 = vpop.permute.xlu0 %4527 }
 0x203   : > { %22279 = vst [vmem:[#allocation57_spill] sm:$0xff] %v17691_v16  ;;  %22280 = vst [vmem:[#allocation58_spill] sm:$0xff] %v17693_v28 }
 0x204   : > { %6237 = vrot.lane.b32.xlu1 %v17067_v42, %s16916_s18 }
 0x205   : > { %6846 = vrot.lane.b32.xlu0 %v17361_v7, %s16916_s18 }
 0x206   : > { %v1249_v45 = vpop.permute.xlu1 %1248  ;;  %v17699_v50 = vpop.permute.xlu0 %4434 }
 0x207   : > { %22281 = vst [vmem:[#allocation59_spill] sm:$0xff] %v17699_v50  ;;  %15460 = vmatprep.subr.msk.mxu1 %vm628_vm1, %v1249_v45 }
 0x208   : > { %6235 = vrot.lane.b32.xlu1 %v17074_v44, %s16916_s18  ;;  %15461 = vmatpush3.xpose.msk.msra.mxu1 %vm628_vm1, %v1249_v45 }
 0x209   : > { %6844 = vrot.lane.b32.xlu0 %v17406_v47, %s16916_s18  ;;  %15472 = vmatprep.subr.msk.mxu1 %vm628_vm1, %v17298_v33 }
 0x20a   : > { %v1961_v22 = vpop.permute.xlu1 %1960  ;;  %v17709_v16 = vpop.permute.xlu0 %4618 }
 0x20b   : > { %22282 = vst [vmem:[#allocation60_spill] sm:$0xff] %v17709_v16  ;;  %15463 = vmatmul.mubr.msk.f32.vlgmr.msra.gmra.mxu1 %vm628_vm1, %v17350_v63 }
 0x20c   : > { %6411 = vrot.lane.b32.xlu1 %v17140_v56, %s16916_s18  ;;  %15473 = vmatpush3.xpose.msk.msra.mxu1 %vm628_vm1, %v17298_v33 }
 0x20d   : > { %7095 = vrot.lane.b32.xlu0 %v17108_v48, %s16917_s19  ;;  %15476 = vmatprep.mubr.msk.f32.mxu1 %vm628_vm1, %v17126_v52 }
 0x20e   : > { %15474 = vmatprep.subr.msk.mxu1 %vm628_vm1, %v17363_v9  ;;  %v17723_v45 = vpop.permute.xlu1 %4432  ;;  %v17725_v16 = vpop.permute.xlu0 %4525 }
 0x20f   : > { %22283 = vst [vmem:[#allocation61_spill] sm:$0xff] %v17723_v45  ;;  %22284 = vst [vmem:[#allocation62_spill] sm:$0xff] %v17725_v16 }
 0x210   : > { %6409 = vrot.lane.b32.xlu1 %v17162_v60, %s16916_s18  ;;  %15475 = vmatpush3.xpose.msk.msra.mxu1 %vm628_vm1, %v17363_v9 }
 0x211   : > { %7093 = vrot.lane.b32.xlu0 %v17119_v51, %s16917_s19  ;;  %15486 = vmatprep.subr.msk.mxu1 %vm628_vm1, %v17450_v31 }
 0x212   : > { %v17735_v33 = vpop.permute.xlu1 %4620  ;;  %v17737_v50 = vpop.permute.xlu0 %4709 }
 0x213   : > { %22285 = vst [vmem:[#allocation63_spill] sm:$0xff] %v17735_v33  ;;  %22286 = vst [vmem:[#allocation64_spill] sm:$0xff] %v17737_v50  ;;  %15477 = vmatmul.mubr.msk.f32.vlgmr.msra.gmra.mxu1 %vm628_vm1, %v17097_v46 }
 0x214   : > { %6585 = vrot.lane.b32.xlu1 %v17212_v8, %s16916_s18  ;;  %15487 = vmatpush3.xpose.msk.msra.mxu1 %vm628_vm1, %v17450_v31 }
 0x215   : > { %7000 = vrot.lane.b32.xlu0 %v17061_v38, %s16918_s20  ;;  %15490 = vmatprep.mubr.msk.f32.mxu1 %vm628_vm1, %v17198_v4 }
 0x216   : > { %15488 = vmatprep.subr.msk.mxu1 %vm628_vm1, %v17472_v49  ;;  %v17751_v9 = vpop.permute.xlu1 %4523  ;;  %v17753_v33 = vpop.permute.xlu0 %4616 }
 0x217   : > { %22287 = vst [vmem:[#allocation65_spill] sm:$0xff] %v17751_v9  ;;  %22288 = vst [vmem:[#allocation66_spill] sm:$0xff] %v17753_v33 }
 0x218   : > { %6583 = vrot.lane.b32.xlu1 %v17234_v12, %s16916_s18  ;;  %15489 = vmatpush3.xpose.msk.msra.mxu1 %vm628_vm1, %v17472_v49 }
 0x219   : > { %7184 = vrot.lane.b32.xlu0 %v17155_v58, %s16917_s19  ;;  %15500 = vmatprep.subr.msk.mxu1 %vm628_vm1, %v17550_v15 }
 0x21a   : > { %v17763_v31 = vpop.permute.xlu1 %4711  ;;  %v17765_v45 = vpop.permute.xlu0 %4800 }
 0x21b   : > { %22289 = vst [vmem:[#allocation67_spill] sm:$0xff] %v17763_v31  ;;  %22290 = vst [vmem:[#allocation68_spill] sm:$0xff] %v17765_v45  ;;  %15491 = vmatmul.mubr.msk.f32.vlgmr.msra.gmra.mxu1 %vm628_vm1, %v17180_v0 }
 0x21c   : > { %6759 = vrot.lane.b32.xlu1 %v17320_v40, %s16916_s18  ;;  %15501 = vmatpush3.xpose.msk.msra.mxu1 %vm628_vm1, %v17550_v15 }
 0x21d   : > { %7091 = vrot.lane.b32.xlu0 %v17108_v48, %s16918_s20  ;;  %15504 = vmatprep.mubr.msk.f32.mxu1 %vm628_vm1, %v17279_v26 }
 0x21e   : > { %15502 = vmatprep.subr.msk.mxu1 %vm628_vm1, %v17588_v3  ;;  %v17779_v49 = vpop.permute.xlu1 %4614  ;;  %v17781_v45 = vpop.permute.xlu0 %4707 }
 0x21f   : > { %22291 = vst [vmem:[#allocation69_spill] sm:$0xff] %v17779_v49  ;;  %22292 = vst [vmem:[#allocation70_spill] sm:$0xff] %v17781_v45 }
 0x220   : > { %6757 = vrot.lane.b32.xlu1 %v17386_v24, %s16916_s18  ;;  %15503 = vmatpush3.xpose.msk.msra.mxu1 %vm628_vm1, %v17588_v3 }
 0x221   : > { %7275 = vrot.lane.b32.xlu0 %v17191_v2, %s16917_s19  ;;  %15514 = vmatprep.subr.msk.mxu1 %vm628_vm1, %v17632_v17 }
 0x222   : > { %v17791_v15 = vpop.permute.xlu1 %4802  ;;  %v17793_v33 = vpop.permute.xlu0 %4891 }
 0x223   : > { %22293 = vst [vmem:[#allocation71_spill] sm:$0xff] %v17791_v15  ;;  %22294 = vst [vmem:[#allocation72_spill] sm:$0xff] %v17793_v33  ;;  %15505 = vmatmul.mubr.msk.f32.vlgmr.msra.gmra.mxu1 %vm628_vm1, %v17252_v18 }
 0x224   : > { %7004 = vrot.lane.b32.xlu1 %v17061_v38, %s16917_s19  ;;  %15515 = vmatpush3.xpose.msk.msra.mxu1 %vm628_vm1, %v17632_v17 }
 0x225   : > { %7182 = vrot.lane.b32.xlu0 %v17137_v54, %s16918_s20  ;;  %15518 = vmatprep.mubr.msk.f32.mxu1 %vm628_vm1, %v17406_v47 }
 0x226   : > { %v17805_v3 = vpop.permute.xlu1 %4705  ;;  %v17807_v15 = vpop.permute.xlu0 %4798  ;;  %15516 = vmatprep.subr.msk.mxu1 %vm628_vm1, %v1961_v22 }
 0x227   : > { %22295 = vst [vmem:[#allocation73_spill] sm:$0xff] %v17805_v3  ;;  %22296 = vst [vmem:[#allocation74_spill] sm:$0xff] %v17807_v15 }
 0x228   : > { %7002 = vrot.lane.b32.xlu1 %v17064_v41, %s16917_s19  ;;  %15517 = vmatpush3.xpose.msk.msra.mxu1 %vm628_vm1, %v1961_v22 }
 0x229   : > { %7366 = vrot.lane.b32.xlu0 %v17227_v10, %s16917_s19  ;;  %15528 = vmatprep.subr.mxu1 %v17341_v55 }
 0x22a   : > { %v17816_v17 = vpop.permute.xlu1 %4893  ;;  %v17818_v49 = vpop.permute.xlu0 %4982 }
 0x22b   : > { %22297 = vst [vmem:[#allocation75_spill] sm:$0xff] %v17816_v17  ;;  %22298 = vst [vmem:[#allocation76_spill] sm:$0xff] %v17818_v49  ;;  %15519 = vmatmul.mubr.msk.f32.vlgmr.msra.gmra.mxu1 %vm628_vm1, %v17361_v7 }
 0x22c   : > { %6998 = vrot.lane.b32.xlu1 %v17064_v41, %s16918_s20  ;;  %15529 = vmatpush3.msra.mxu1 %v17341_v55 }
 0x22d   : > { %15530 = vmatprep.subr.mxu1 %v17343_v59 }
 0x22e   : > { %v17826_v22 = vpop.permute.xlu1 %4796  ;;  %v17828_v15 = vpop.permute.xlu0 %4889  ;;  %15531 = vmatpush3.msra.mxu1 %v17343_v59 }
 0x22f   : > { %22299 = vst [vmem:[#allocation77_spill] sm:$0xff] %v17826_v22  ;;  %22300 = vst [vmem:[#allocation78_spill] sm:$0xff] %v17828_v15  ;;  %15542 = vmatprep.subr.mxu1 %v17447_v25  ;;  %v15471_v15 = vpop.f32.mrf.mxu0 }
 0x230   : > { %7186 = vrot.lane.b32.xlu1 %v17137_v54, %s16917_s19 }
 0x232   : > { %v17834_v49 = vpop.permute.xlu1 %4984  ;;  %v17836_v33 = vpop.permute.xlu0 %5073 }
 0x233   : > { %22301 = vst [vmem:[#allocation79_spill] sm:$0xff] %v17834_v49  ;;  %22302 = vst [vmem:[#allocation80_spill] sm:$0xff] %v17836_v33  ;;  %v15415_v33 = vpop.f32.mrf.mxu1 }
 0x234   : > { %7089 = vrot.lane.b32.xlu1 %v17119_v51, %s16918_s20 }
 0x235   : > { %v703_v17 = vpop.f32.mrf.mxu1 }
 0x236   : > { %v17840_v55 = vpop.permute.xlu1 %4887  ;;  %v17842_v45 = vpop.permute.xlu0 %4980 }
 0x237   : > { %22303 = vst [vmem:[#allocation81_spill] sm:$0xff] %v17840_v55  ;;  %22304 = vst [vmem:[#allocation82_spill] sm:$0xff] %v17842_v45  ;;  %v17859_v45 = vld [vmem:[%s21931_s3 + $0x8] sm:$0xff] }
 0x238   : > { %7277 = vrot.lane.b32.xlu1 %v17173_v62, %s16917_s19 }
 0x23a   : > { %v17846_v59 = vpop.permute.xlu1 %5075  ;;  %v17848_v22 = vpop.permute.xlu0 %5071 }
 0x23b   : > { %22305 = vst [vmem:[#allocation83_spill] sm:$0xff] %v17846_v59  ;;  %22306 = vst [vmem:[#allocation84_spill] sm:$0xff] %v17848_v22  ;;  %v17866_v22 = vadd.f32 %v15471_v15, %v17859_v45  ;;  %v1415_v15 = vpop.f32.mrf.mxu0 }
 0x23c   : > { %7180 = vrot.lane.b32.xlu1 %v17155_v58, %s16918_s20 }
 0x23d   : > { %22310 = vst [vmem:[#allocation88_spill] sm:$0xff] %v17866_v22 }
 0x23e   : > { %v17852_v49 = vpop.permute.xlu1 %4978  ;;  %v17861_v55 = vpop.permute.xlu0 %5160 }
 0x23f   : > { %22307 = vst [vmem:[#allocation85_spill] sm:$0xff] %v17852_v49  ;;  %22308 = vst [vmem:[#allocation86_spill] sm:$0xff] %v17861_v55  ;;  %v17871_v49 = vld [vmem:[%s21931_s3] sm:$0xff]  ;;  %v2099_v55 = vsel %vm2047_vm2, %v17866_v22, -inf }
 0x240   : > { %7368 = vrot.lane.b32.xlu1 %v17205_v6, %s16917_s19  ;;  %v17878_v3 = vadd.f32 %v703_v17, %v17871_v49  ;;  %v17889_v31 = vadd.f32 %v1415_v15, %v17871_v49  ;;  %v15422_v17 = vpop.f32.mrf.mxu1 }
 0x241   : > { %v17939_v41 = vadd.f32 %v15422_v17, %v17859_v45 }
 0x242   : > { %v17863_v59 = vpop.permute.xlu1 %5166  ;;  %22314 = vst [vmem:[#allocation92_spill] sm:$0xff] %v17889_v31 }
 0x243   : > { %22309 = vst [vmem:[#allocation87_spill] sm:$0xff] %v17863_v59  ;;  %v17882_v59 = vpop.permute.xlu0 %5539 }
 0x244   : > { %7271 = vrot.lane.b32.xlu1 %v17191_v2, %s16918_s20  ;;  %22312 = vst [vmem:[#allocation90_spill] sm:$0xff] %v17882_v59  ;;  %v2096_v59 = vsel %vm2047_vm2, %v17889_v31, -inf }
 0x246   : > { %v17875_v50 = vpop.permute.xlu1 %5069 }
 0x247   : > { %22311 = vst [vmem:[#allocation89_spill] sm:$0xff] %v17875_v50  ;;  %v2048_v50 = vsel %vm2047_vm2, %v17878_v3, -inf  ;;  %v17893_v28 = vpop.permute.xlu0 %5715 }
 0x248   : > { %2100 = vmax.xlane.f32.xlu0 %v2099_v55  ;;  %7459 = vrot.lane.b32.xlu1 %v17241_v14, %s16917_s19  ;;  %22315 = vst [vmem:[#allocation93_spill] sm:$0xff] %v17893_v28 }
 0x24a   : > { %v17886_v16 = vpop.permute.xlu1 %5164 }
 0x24b   : > { %22313 = vst [vmem:[#allocation91_spill] sm:$0xff] %v17886_v16  ;;  %v792_v16 = vpop.f32.mrf.mxu1 }
 0x24c   : > { %2049 = vmax.xlane.f32.xlu0 %v2048_v50  ;;  %v17905_v58 = vadd.f32 %v792_v16, %v17871_v49  ;;  %v17907_v50 = vpop.permute.xlu0 %5626 }
 0x24d   : > { %22318 = vst [vmem:[#allocation96_spill] sm:$0xff] %v17907_v50  ;;  %v15429_v51 = vpop.f32.mrf.mxu1 }
 0x24e   : > { %v15485_v9 = vpop.f32.mrf.mxu0  ;;  %v17895_v2 = vpop.permute.xlu1 %5162  ;;  %v17919_v54 = vadd.f32 %v15429_v51, %v17859_v45 }
 0x24f   : > { %22316 = vst [vmem:[#allocation94_spill] sm:$0xff] %v17895_v2  ;;  %v17898_v55 = vadd.f32 %v15485_v9, %v17859_v45  ;;  %v2054_v2 = vsel %vm2047_vm2, %v17905_v58, -inf }
 0x250   : > { %2097 = vmax.xlane.f32.xlu0 %v2096_v59  ;;  %v1593_v28 = vpop.f32.mrf.mxu0  ;;  %v17916_v59 = vpop.permute.xlu0 %5713 }
 0x251   : > { %22317 = vst [vmem:[#allocation95_spill] sm:$0xff] %v17898_v55  ;;  %v2111_v15 = vsel %vm2047_vm2, %v17898_v55, -inf  ;;  %v17912_v9 = vadd.f32 %v1593_v28, %v17871_v49  ;;  %22321 = vst [vmem:[#allocation99_spill] sm:$0xff] %v17916_v59  ;;  %v2063_v28 = vsel %vm2047_vm2, %v17919_v54, -inf  ;;  %v17934_v59 = vadd.f32 %v15415_v33, %v17859_v45 }
 0x252   : > { %v17909_v23 = vpop.permute.xlu1 %5541  ;;  %v2057_v33 = vsel %vm2047_vm2, %v17939_v41, -inf }
 0x253   : > { %22319 = vst [vmem:[#allocation97_spill] sm:$0xff] %v17909_v23  ;;  %22320 = vst [vmem:[#allocation98_spill] sm:$0xff] %v17912_v9 }
 0x254   : > { %2112 = vmax.xlane.f32.xlu0 %v2111_v15  ;;  %v2108_v15 = vsel %vm2047_vm2, %v17912_v9, -inf  ;;  %v17927_v50 = vpop.permute.xlu0 %5800 }
 0x255   : > { %22323 = vst [vmem:[#allocation101_spill] sm:$0xff] %v17927_v50 }
 0x256   : > { %v17921_v16 = vpop.permute.xlu1 %5628 }
 0x257   : > { %22322 = vst [vmem:[#allocation100_spill] sm:$0xff] %v17921_v16  ;;  %v881_v16 = vpop.f32.mrf.mxu1 }
 0x258   : > { %2055 = vmax.xlane.f32.xlu0 %v2054_v2  ;;  %v17931_v2 = vpop.permute.xlu0 %6150 }
 0x259   : > { %22325 = vst [vmem:[#allocation103_spill] sm:$0xff] %v17931_v2 }
 0x25a   : > { %v17929_v23 = vpop.permute.xlu1 %5802 }
 0x25b   : > { %22324 = vst [vmem:[#allocation102_spill] sm:$0xff] %v17929_v23 }
 0x25c   : > { %2109 = vmax.xlane.f32.xlu0 %v2108_v15  ;;  %v2051_v15 = vsel %vm2047_vm2, %v17934_v59, -inf  ;;  %v17943_v20 = vpop.permute.xlu0 %6148 }
 0x25d   : > { %22327 = vst [vmem:[#allocation105_spill] sm:$0xff] %v17943_v20 }
 0x25e   : > { %v17936_v51 = vpop.permute.xlu1 %5889 }
 0x25f   : > { %22326 = vst [vmem:[#allocation104_spill] sm:$0xff] %v17936_v51 }
 0x260   : > { %2064 = vmax.xlane.f32.xlu0 %v2063_v28  ;;  %v17952_v23 = vpop.permute.xlu0 %6324 }
 0x261   : > { %22329 = vst [vmem:[#allocation107_spill] sm:$0xff] %v17952_v23 }
 0x262   : > { %v15436_v50 = vpop.f32.mrf.mxu1  ;;  %v17945_v28 = vpop.permute.xlu1 %5887 }
 0x263   : > { %22328 = vst [vmem:[#allocation106_spill] sm:$0xff] %v17945_v28  ;;  %v17948_v2 = vadd.f32 %v15436_v50, %v17859_v45 }
 0x264   : > { %v970_v51 = vpop.f32.mrf.mxu1  ;;  %v17963_v20 = vpop.permute.xlu0 %6322 }
 0x265   : > { %v17955_v17 = vadd.f32 %v970_v51, %v17871_v49  ;;  %22331 = vst [vmem:[#allocation109_spill] sm:$0xff] %v17963_v20 }
 0x266   : > { %v17957_v55 = vpop.permute.xlu1 %5976 }
 0x267   : > { %22330 = vst [vmem:[#allocation108_spill] sm:$0xff] %v17957_v55  ;;  %v2066_v50 = vsel %vm2047_vm2, %v17955_v17, -inf  ;;  %v17975_v55 = vadd.f32 %v881_v16, %v17871_v49 }
 0x26a   : > { %v17965_v28 = vpop.permute.xlu1 %6063 }
 0x26b   : > { %22332 = vst [vmem:[#allocation110_spill] sm:$0xff] %v17965_v28 }
 0x26c   : > { %2052 = vmax.xlane.f32.xlu1 %v2051_v15  ;;  %v2069_v15 = vsel %vm2047_vm2, %v17948_v2, -inf }
 0x26e   : > { %v17969_v9 = vpop.permute.xlu1 %5974 }
 0x26f   : > { %22334 = vst [vmem:[#allocation112_spill] sm:$0xff] %v17969_v9  ;;  %v2060_v9 = vsel %vm2047_vm2, %v17975_v55, -inf }
 0x270   : > { %2058 = vmax.xlane.f32.xlu1 %v2057_v33  ;;  %v17967_v33 = vpop.permute.xlu0 %6498 }
 0x271   : > { %22333 = vst [vmem:[#allocation111_spill] sm:$0xff] %v17967_v33 }
 0x274   : > { %2070 = vmax.xlane.f32.xlu1 %v2069_v15  ;;  %v17979_v20 = vpop.permute.xlu0 %6496 }
 0x275   : > { %22336 = vst [vmem:[#allocation114_spill] sm:$0xff] %v17979_v20 }
 0x278   : > { %2067 = vmax.xlane.f32.xlu1 %v2066_v50  ;;  %v17981_v50 = vpop.permute.xlu1 %6061  ;;  %v17992_v16 = vpop.permute.xlu0 %6672 }
 0x279   : > { %22337 = vst [vmem:[#allocation115_spill] sm:$0xff] %v17981_v50  ;;  %22339 = vst [vmem:[#allocation117_spill] sm:$0xff] %v17992_v16 }
 0x27e   : > { %v15499_v23 = vpop.f32.mrf.mxu0 }
 0x27f   : > { %v17972_v51 = vadd.f32 %v15499_v23, %v17859_v45 }
 0x280   : > { %v1771_v22 = vpop.f32.mrf.mxu0 }
 0x281   : > { %22335 = vst [vmem:[#allocation113_spill] sm:$0xff] %v17972_v51  ;;  %v2123_v15 = vsel %vm2047_vm2, %v17972_v51, -inf  ;;  %v17984_v33 = vadd.f32 %v1771_v22, %v17871_v49  ;;  %v17998_v22 = vpop.permute.xlu0 %6670 }
 0x282   : > { %2124 = vmax.xlane.f32.xlu0 %v2123_v15  ;;  %v17994_v15 = vpop.permute.xlu1 %6237  ;;  %22341 = vst [vmem:[#allocation119_spill] sm:$0xff] %v17998_v22 }
 0x283   : > { %22338 = vst [vmem:[#allocation116_spill] sm:$0xff] %v17984_v33  ;;  %v2120_v23 = vsel %vm2047_vm2, %v17984_v33, -inf  ;;  %22340 = vst [vmem:[#allocation118_spill] sm:$0xff] %v17994_v15 }
 0x285   : > { %v18002_v50 = vpop.permute.xlu0 %6846 }
 0x286   : > { %2061 = vmax.xlane.f32.xlu0 %v2060_v9  ;;  %v18000_v20 = vpop.permute.xlu1 %6235  ;;  %22343 = vst [vmem:[#allocation121_spill] sm:$0xff] %v18002_v50 }
 0x287   : > { %22342 = vst [vmem:[#allocation120_spill] sm:$0xff] %v18000_v20 }
 0x289   : > { %7362 = vrot.lane.b32.xlu1 %v17227_v10, %s16918_s20  ;;  %v18006_v28 = vpop.permute.xlu0 %6844 }
 0x28a   : > { %2121 = vmax.xlane.f32.xlu0 %v2120_v23  ;;  %v18004_v9 = vpop.permute.xlu1 %6411  ;;  %22345 = vst [vmem:[#allocation123_spill] sm:$0xff] %v18006_v28  ;;  %v15443_v23 = vpop.f32.mrf.mxu1 }
 0x28b   : > { %22344 = vst [vmem:[#allocation122_spill] sm:$0xff] %v18004_v9 }
 0x28c   : > { %v1059_v15 = vpop.f32.mrf.mxu1 }
 0x28d   : > { %7550 = vrot.lane.b32.xlu1 %v17309_v34, %s16917_s19  ;;  %v18010_v33 = vpop.permute.xlu0 %7095 }
 0x28e   : > { %v18008_v51 = vpop.permute.xlu1 %6409  ;;  %22347 = vst [vmem:[#allocation125_spill] sm:$0xff] %v18010_v33 }
 0x28f   : > { %22346 = vst [vmem:[#allocation124_spill] sm:$0xff] %v18008_v51 }
 0x291   : > { %v18014_v61 = vpop.permute.xlu0 %7093 }
 0x292   : > { %v18012_v16 = vpop.permute.xlu1 %6585  ;;  %22349 = vst [vmem:[#allocation127_spill] sm:$0xff] %v18014_v61 }
 0x293   : > { %22348 = vst [vmem:[#allocation126_spill] sm:$0xff] %v18012_v16 }
 0x295   : > { %v18021_v9 = vpop.permute.xlu0 %7000 }
 0x296   : > { %v18016_v5 = vpop.permute.xlu1 %6583  ;;  %22351 = vst [vmem:[#allocation129_spill] sm:$0xff] %v18021_v9 }
 0x297   : > { %22350 = vst [vmem:[#allocation128_spill] sm:$0xff] %v18016_v5 }
 0x298   : > { %v15450_v22 = vpop.f32.mrf.mxu1 }
 0x299   : > { %v18019_v20 = vadd.f32 %v15450_v22, %v17859_v45  ;;  %v18032_v5 = vpop.permute.xlu0 %7184 }
 0x29a   : > { %v1148_v50 = vpop.f32.mrf.mxu1  ;;  %v18023_v28 = vpop.permute.xlu1 %6759  ;;  %22353 = vst [vmem:[#allocation131_spill] sm:$0xff] %v18032_v5  ;;  %v18049_v5 = vadd.f32 %v15443_v23, %v17859_v45 }
 0x29b   : > { %22352 = vst [vmem:[#allocation130_spill] sm:$0xff] %v18023_v28  ;;  %v18026_v51 = vadd.f32 %v1148_v50, %v17871_v49  ;;  %v2081_v33 = vsel %vm2047_vm2, %v18019_v20, -inf }
 0x29d   : > { %v2078_v61 = vsel %vm2047_vm2, %v18026_v51, -inf  ;;  %v18039_v31 = vpop.permute.xlu0 %7091 }
 0x29e   : > { %v18034_v16 = vpop.permute.xlu1 %6757  ;;  %22356 = vst [vmem:[#allocation134_spill] sm:$0xff] %v18039_v31  ;;  %v18058_v31 = vadd.f32 %v1059_v15, %v17871_v49 }
 0x29f   : > { %22354 = vst [vmem:[#allocation132_spill] sm:$0xff] %v18034_v16 }
 0x2a2   : > { %v18041_v50 = vpop.permute.xlu1 %7004 }
 0x2a3   : > { %22357 = vst [vmem:[#allocation135_spill] sm:$0xff] %v18041_v50 }
 0x2a6   : > { %v18055_v16 = vpop.permute.xlu1 %7002 }
 0x2a7   : > { %22360 = vst [vmem:[#allocation138_spill] sm:$0xff] %v18055_v16 }
 0x2b1   : > { %2082 = vmax.xlane.f32.xlu1 %v2081_v33 }
 0x2b5   : > { %2079 = vmax.xlane.f32.xlu1 %v2078_v61 }
 0x2b8   : > { %v15513_v22 = vpop.f32.mrf.mxu0 }
 0x2b9   : > { %v18037_v9 = vadd.f32 %v15513_v22, %v17859_v45  ;;  %v18053_v22 = vpop.permute.xlu0 %7275 }
 0x2ba   : > { %v1949_v28 = vpop.f32.mrf.mxu0  ;;  %22359 = vst [vmem:[#allocation137_spill] sm:$0xff] %v18053_v22 }
 0x2bb   : > { %22355 = vst [vmem:[#allocation133_spill] sm:$0xff] %v18037_v9  ;;  %v18044_v10 = vadd.f32 %v1949_v28, %v17871_v49  ;;  %v2135_v33 = vsel %vm2047_vm2, %v18037_v9, -inf  ;;  %v2075_v28 = vsel %vm2047_vm2, %v18049_v5, -inf }
 0x2bc   : > { %2136 = vmax.xlane.f32.xlu0 %v2135_v33  ;;  %v18066_v33 = vpop.permute.xlu1 %6998 }
 0x2bd   : > { %22358 = vst [vmem:[#allocation136_spill] sm:$0xff] %v18044_v10  ;;  %v2132_v61 = vsel %vm2047_vm2, %v18044_v10, -inf  ;;  %v18064_v23 = vpop.permute.xlu0 %7182  ;;  %22362 = vst [vmem:[#allocation140_spill] sm:$0xff] %v18066_v33  ;;  %v15457_v33 = vpop.f32.mrf.mxu1 }
 0x2be   : > { %22361 = vst [vmem:[#allocation139_spill] sm:$0xff] %v18064_v23 }
 0x2c0   : > { %2133 = vmax.xlane.f32.xlu0 %v2132_v61  ;;  %v2072_v61 = vsel %vm2047_vm2, %v18058_v31, -inf  ;;  %v18072_v16 = vpop.permute.xlu1 %7186 }
 0x2c1   : > { %v18070_v22 = vpop.permute.xlu0 %7366  ;;  %22364 = vst [vmem:[#allocation142_spill] sm:$0xff] %v18072_v16 }
 0x2c2   : > { %22363 = vst [vmem:[#allocation141_spill] sm:$0xff] %v18070_v22  ;;  %v1237_v22 = vpop.f32.mrf.mxu1 }
 0x2c4   : > { %2076 = vmax.xlane.f32.xlu0 %v2075_v28  ;;  %v18076_v50 = vpop.permute.xlu1 %7089 }
 0x2c5   : > { %22366 = vst [vmem:[#allocation144_spill] sm:$0xff] %v18076_v50 }
 0x2c6   : > { %7453 = vrot.lane.b32.xlu1 %v17296_v32, %s16918_s20 }
 0x2c8   : > { %2073 = vmax.xlane.f32.xlu0 %v2072_v61  ;;  %v18079_v48 = vpop.permute.xlu1 %7277 }
 0x2c9   : > { %22367 = vst [vmem:[#allocation145_spill] sm:$0xff] %v18079_v48 }
 0x2cb   : > { %v15464_v50 = vpop.f32.mrf.mxu1 }
 0x2cc   : > { %v18087_v61 = vpop.permute.xlu1 %7180 }
 0x2cd   : > { %22370 = vst [vmem:[#allocation148_spill] sm:$0xff] %v18087_v61 }
 0x2d1   : > { %v18074_v15 = vpop.xlane.xlu0 %2100 }
 0x2d2   : > { %22365 = vst [vmem:[#allocation143_spill] sm:$0xff] %v18074_v15 }
 0x2d5   : > { %v2050_v28 = vpop.xlane.xlu0 %2049 }
 0x2d6   : > { %v2144_v9 = vsub.f32 %v17878_v3, %v2050_v28  ;;  %v1326_v28 = vpop.f32.mrf.mxu1 }
 0x2d7   : > { %v18102_v61 = vadd.f32 %v1326_v28, %v17871_v49 }
 0x2d8   : > { %v2176_v10 = vmul.f32 1.442695, %v2144_v9  ;;  %v18092_v9 = vpop.permute.xlu1 %7368 }
 0x2d9   : > { %v18081_v23 = vpop.xlane.xlu0 %2097  ;;  %22371 = vst [vmem:[#allocation149_spill] sm:$0xff] %v18092_v9  ;;  %22374 = vst [vmem:[#allocation152_spill] sm:$0xff] %v18102_v61 }
 0x2da   : > { %22368 = vst [vmem:[#allocation146_spill] sm:$0xff] %v18081_v23  ;;  %16391 = vpow2.f32 %v2176_v10  ;;  %v18095_v10 = vadd.f32 %v15464_v50, %v17859_v45 }
 0x2dc   : > { %22372 = vst [vmem:[#allocation150_spill] sm:$0xff] %v18095_v10 }
 0x2dd   : > { %v18083_v19 = vpop.xlane.xlu0 %2112 }
 0x2de   : > { %22369 = vst [vmem:[#allocation147_spill] sm:$0xff] %v18083_v19  ;;  %7273 = vrot.lane.b32.xlu0 %v17173_v62, %s16918_s20  ;;  %v15478_v19 = vpop.f32.mrf.mxu1 }
 0x2df   : > { %v18109_v50 = vadd.f32 %v15478_v19, %v17859_v45 }
 0x2e1   : > { %v2056_v16 = vpop.xlane.xlu0 %2055  ;;  %22376 = vst [vmem:[#allocation154_spill] sm:$0xff] %v18109_v50 }
 0x2e2   : > { %v2146_v15 = vsub.f32 %v17905_v58, %v2056_v16  ;;  %7457 = vrot.lane.b32.xlu0 %v17296_v32, %s16917_s19  ;;  %v2093_v58 = vsel %vm2047_vm2, %v18095_v10, -inf  ;;  %v18106_v16 = vpop.permute.xlu1 %7271 }
 0x2e3   : > { %22375 = vst [vmem:[#allocation153_spill] sm:$0xff] %v18106_v16 }
 0x2e4   : > { %v2180_v3 = vmul.f32 1.442695, %v2146_v15  ;;  %v1504_v15 = vpop.f32.mrf.mxu1 }
 0x2e5   : > { %v18116_v28 = vadd.f32 %v1504_v15, %v17871_v49 }
 0x2e6   : > { %16393 = vpow2.f32 %v2180_v3  ;;  %v2090_v3 = vsel %vm2047_vm2, %v18102_v61, -inf  ;;  %v15492_v9 = vpop.f32.mrf.mxu1  ;;  %v18113_v23 = vpop.permute.xlu1 %7459 }
 0x2e7   : > { %v18097_v48 = vpop.eup %16391  ;;  %22377 = vst [vmem:[#allocation155_spill] sm:$0xff] %v18113_v23  ;;  %22378 = vst [vmem:[#allocation156_spill] sm:$0xff] %v18116_v28  ;;  %v18125_v19 = vadd.f32 %v15492_v9, %v17859_v45  ;;  %v2102_v23 = vsel %vm2047_vm2, %v18116_v28, -inf  ;;  %v18141_v28 = vadd.f32 %v15457_v33, %v17859_v45  ;;  %v18154_v33 = vpop.xlane.xlu0 %2109 }
 0x2e8   : > { %22373 = vst [vmem:[#allocation151_spill] sm:$0xff] %v18097_v48  ;;  %15525 = vmatprep.mubr.msk.f32.mxu0 %vm2047_vm2, %v18097_v48  ;;  %v2105_v48 = vsel %vm2047_vm2, %v18109_v50, -inf }
 0x2e9   : > { %22380 = vst [vmem:[#allocation158_spill] sm:$0xff] %v18125_v19 }
 0x2ea   : > { %2094 = vmax.xlane.f32.xlu1 %v2093_v58  ;;  %v1682_v58 = vpop.f32.mrf.mxu1 }
 0x2ec   : > { %v15506_v32 = vpop.f32.mrf.mxu1 }
 0x2ee   : > { %2091 = vmax.xlane.f32.xlu1 %v2090_v3  ;;  %v18130_v61 = vpop.f32.mrf.mxu1 }
 0x2f0   : > { %v18137_v62 = vpop.f32.mrf.mxu1 }
 0x2f2   : > { %2106 = vmax.xlane.f32.xlu1 %v2105_v48  ;;  %v18133_v48 = vadd.f32 %v1682_v58, %v17871_v49 }
 0x2f3   : > { %v18120_v16 = vpop.eup %16393 }
 0x2f4   : > { %22379 = vst [vmem:[#allocation157_spill] sm:$0xff] %v18120_v16  ;;  %15532 = vmatprep.mubr.msk.f32.mxu1 %vm2047_vm2, %v18120_v16  ;;  %v2117_v16 = vsel %vm2047_vm2, %v18125_v19, -inf  ;;  %v2114_v58 = vsel %vm2047_vm2, %v18133_v48, -inf }
 0x2f5   : > { %v2053_v3 = vpop.xlane.xlu1 %2052 }
 0x2f6   : > { %v2145_v15 = vsub.f32 %v17934_v59, %v2053_v3  ;;  %2103 = vmax.xlane.f32.xlu1 %v2102_v23  ;;  %v18144_v23 = vadd.f32 %v15506_v32, %v17859_v45 }
 0x2f8   : > { %v2178_v50 = vmul.f32 1.442695, %v2145_v15  ;;  %v2038_v15 = vpop.f32.mrf.mxu1 }
 0x2f9   : > { %v2059_v10 = vpop.xlane.xlu1 %2058  ;;  %v18157_v32 = vadd.f32 %v2038_v15, %v17871_v49  ;;  %v2065_v15 = vpop.xlane.xlu0 %2064 }
 0x2fa   : > { %16395 = vpow2.f32 %v2178_v50  ;;  %v2147_v9 = vsub.f32 %v17939_v41, %v2059_v10  ;;  %2118 = vmax.xlane.f32.xlu1 %v2117_v16  ;;  %v18150_v50 = vadd.f32 %v1237_v22, %v17871_v49  ;;  %v2087_v41 = vsel %vm2047_vm2, %v18141_v28, -inf }
 0x2fb   : > { %v2129_v16 = vsel %vm2047_vm2, %v18144_v23, -inf }
 0x2fc   : > { %v2182_v59 = vmul.f32 1.442695, %v2147_v9  ;;  %v2084_v22 = vsel %vm2047_vm2, %v18150_v50, -inf }
 0x2fd   : > { %v2071_v3 = vpop.xlane.xlu1 %2070 }
 0x2fe   : > { %16397 = vpow2.f32 %v2182_v59  ;;  %2115 = vmax.xlane.f32.xlu1 %v2114_v58  ;;  %v2151_v19 = vsub.f32 %v17948_v2, %v2071_v3  ;;  %v2138_v3 = vsel %vm2047_vm2, %v18157_v32, -inf }
 0x300   : > { %v2190_v2 = vmul.f32 1.442695, %v2151_v19 }
 0x301   : > { %2088 = vmax.xlane.f32.xlu0 %v2087_v41  ;;  %v2068_v10 = vpop.xlane.xlu1 %2067  ;;  %v2149_v41 = vsub.f32 %v17919_v54, %v2065_v15 }
 0x302   : > { %v2150_v9 = vsub.f32 %v17955_v17, %v2068_v10  ;;  %2130 = vmax.xlane.f32.xlu1 %v2129_v16 }
 0x303   : > { %v2186_v10 = vmul.f32 1.442695, %v2149_v41 }
 0x304   : > { %v2188_v59 = vmul.f32 1.442695, %v2150_v9 }
 0x305   : > { %2085 = vmax.xlane.f32.xlu0 %v2084_v22 }
 0x306   : > { %16399 = vpow2.f32 %v2188_v59  ;;  %2139 = vmax.xlane.f32.xlu1 %v2138_v3 }
 0x307   : > { %v18166_v58 = vpop.eup %16395  ;;  %16401 = vpow2.f32 %v2190_v2 }
 0x308   : > { %22381 = vst [vmem:[#allocation159_spill] sm:$0xff] %v18166_v58  ;;  %15526 = vmatmul.mubr.msk.f32.vlgmr.msra.gmra.mxu0 %vm2047_vm2, %v18166_v58  ;;  %v22524_v58 = vld [vmem:[#allocation90_spill] sm:$0xff] }
 0x309   : > { %15536 = vmatpush3.msra.mxu0 %v17399_v37 }
 0x30a   : > { %15537 = vmatprep.subr.mxu0 %v17416_v1 }
 0x30b   : > { %v18172_v17 = vpop.eup %16397  ;;  %15538 = vmatpush3.msra.mxu0 %v17416_v1  ;;  %v18175_v19 = vpop.xlane.xlu0 %2124 }
 0x30c   : > { %22382 = vst [vmem:[#allocation160_spill] sm:$0xff] %v18172_v17  ;;  %15549 = vmatprep.subr.mxu0 %v17492_v11  ;;  %15533 = vmatmul.mubr.msk.f32.vlgmr.msra.gmra.mxu1 %vm2047_vm2, %v18172_v17  ;;  %v22514_v17 = vld [vmem:[#allocation80_spill] sm:$0xff] }
 0x30d   : > { %15543 = vmatpush3.msra.mxu1 %v17447_v25  ;;  %v18240_v25 = vadd.f32 %v18137_v62, %v17859_v45 }
 0x30e   : > { %15544 = vmatprep.subr.mxu1 %v17474_v13 }
 0x30f   : > { %15545 = vmatpush3.msra.mxu1 %v17474_v13  ;;  %v2062_v37 = vpop.xlane.xlu0 %2061 }
 0x310   : > { %15556 = vmatprep.subr.mxu1 %v17564_v29  ;;  %v2148_v1 = vsub.f32 %v17975_v55, %v2062_v37 }
 0x312   : > { %v2184_v16 = vmul.f32 1.442695, %v2148_v1 }
 0x313   : > { %v18186_v9 = vpop.eup %16399  ;;  %v18252_v45 = vpop.xlane.xlu0 %2121 }
 0x314   : > { %22383 = vst [vmem:[#allocation161_spill] sm:$0xff] %v18186_v9  ;;  %v18188_v2 = vpop.eup %16401  ;;  %16403 = vpow2.f32 %v2184_v16  ;;  %15546 = vmatprep.mubr.msk.f32.mxu1 %vm2047_vm2, %v18186_v9  ;;  %v22503_v9 = vld [vmem:[#allocation72_spill] sm:$0xff] }
 0x315   : > { %22384 = vst [vmem:[#allocation162_spill] sm:$0xff] %v18188_v2  ;;  %16405 = vpow2.f32 %v2186_v10  ;;  %15547 = vmatmul.mubr.msk.f32.vlgmr.msra.gmra.mxu1 %vm2047_vm2, %v18188_v2  ;;  %v22513_v2 = vld [vmem:[#allocation47_spill] sm:$0xff] }
 0x316   : > { %15557 = vmatpush3.msra.mxu1 %v17564_v29 }
 0x317   : > { %15558 = vmatprep.subr.mxu1 %v17599_v21  ;;  %7641 = vrot.lane.b32.xlu1 %v17350_v63, %s16917_s19 }
 0x318   : > { %15559 = vmatpush3.msra.mxu1 %v17599_v21  ;;  %v18226_v21 = vpop.permute.xlu1 %7362 }
 0x319   : > { %15570 = vmatprep.subr.mxu1 %v17638_v30  ;;  %22387 = vst [vmem:[#allocation165_spill] sm:$0xff] %v18226_v21 }
 0x31b   : > { %7364 = vrot.lane.b32.xlu0 %v17205_v6, %s16918_s20  ;;  %7544 = vrot.lane.b32.xlu1 %v17339_v53, %s16918_s20 }
 0x31c   : > { %v18234_v29 = vpop.permute.xlu1 %7550 }
 0x31d   : > { %22388 = vst [vmem:[#allocation166_spill] sm:$0xff] %v18234_v29 }
 0x31f   : > { %7732 = vrot.lane.b32.xlu1 %v17067_v42, %s16917_s19 }
 0x321   : > { %v18206_v54 = vpop.eup %16403 }
 0x322   : > { %22385 = vst [vmem:[#allocation163_spill] sm:$0xff] %v18206_v54  ;;  %v18208_v13 = vpop.eup %16405  ;;  %15539 = vmatprep.mubr.msk.f32.mxu0 %vm2047_vm2, %v18206_v54  ;;  %v22512_v54 = vld [vmem:[#allocation89_spill] sm:$0xff] }
 0x323   : > { %22386 = vst [vmem:[#allocation164_spill] sm:$0xff] %v18208_v13  ;;  %7635 = vrot.lane.b32.xlu1 %v17394_v27, %s16918_s20  ;;  %15540 = vmatmul.mubr.msk.f32.vlgmr.msra.gmra.mxu0 %vm2047_vm2, %v18208_v13  ;;  %v22523_v13 = vld [vmem:[#allocation61_spill] sm:$0xff] }
 0x324   : > { %15550 = vmatpush3.msra.mxu0 %v17492_v11  ;;  %v18232_v11 = vadd.f32 %v18130_v61, %v17871_v49  ;;  %v2141_v61 = vsel %vm2047_vm2, %v18240_v25, -inf }
 0x325   : > { %15551 = vmatprep.subr.mxu0 %v17536_v57 }
 0x326   : > { %15552 = vmatpush3.msra.mxu0 %v17536_v57  ;;  %v2126_v57 = vsel %vm2047_vm2, %v18232_v11, -inf }
 0x327   : > { %7823 = vrot.lane.b32.xlu1 %v17097_v46, %s16917_s19  ;;  %15563 = vmatprep.subr.mxu0 %v17616_v35 }
 0x32b   : > { %7726 = vrot.lane.b32.xlu1 %v17074_v44, %s16918_s20 }
 0x32f   : > { %7914 = vrot.lane.b32.xlu1 %v17140_v56, %s16917_s19 }
 0x333   : > { %7817 = vrot.lane.b32.xlu1 %v17126_v52, %s16918_s20 }
 0x337   : > { %8005 = vrot.lane.b32.xlu1 %v17180_v0, %s16917_s19 }
 0x33a   : > { %2127 = vmax.xlane.f32.xlu0 %v2126_v57  ;;  %v2083_v55 = vpop.xlane.xlu1 %2082 }
 0x33b   : > { %7908 = vrot.lane.b32.xlu1 %v17162_v60, %s16918_s20  ;;  %v2155_v49 = vsub.f32 %v18019_v20, %v2083_v55  ;;  %v22394_v55 = vld [vmem:[#allocation4_spill] sm:$0xff] }
 0x33d   : > { %v2198_v62 = vmul.f32 1.442695, %v2155_v49  ;;  %v22396_v49 = vld [vmem:[#allocation8_spill] sm:$0xff] }
 0x33e   : > { %2142 = vmax.xlane.f32.xlu0 %v2141_v61  ;;  %v2080_v59 = vpop.xlane.xlu1 %2079  ;;  %v22397_v61 = vld [vmem:[#allocation150_spill] sm:$0xff] }
 0x33f   : > { %v2154_v22 = vsub.f32 %v18026_v51, %v2080_v59  ;;  %8096 = vrot.lane.b32.xlu1 %v17212_v8, %s16917_s19 }
 0x341   : > { %v2196_v3 = vmul.f32 1.442695, %v2154_v22  ;;  %v22398_v22 = vld [vmem:[#allocation10_spill] sm:$0xff] }
 0x343   : > { %16407 = vpow2.f32 %v2196_v3  ;;  %7999 = vrot.lane.b32.xlu1 %v17198_v4, %s16918_s20  ;;  %v22399_v3 = vld [vmem:[#allocation152_spill] sm:$0xff] }
 0x344   : > { %16409 = vpow2.f32 %v2198_v62 }
 0x345   : > { %v18256_v20 = vpop.xlane.xlu0 %2136 }
 0x347   : > { %8187 = vrot.lane.b32.xlu1 %v17252_v18, %s16917_s19 }
 0x349   : > { %v18260_v15 = vpop.xlane.xlu0 %2133 }
 0x34b   : > { %8090 = vrot.lane.b32.xlu1 %v17234_v12, %s16918_s20 }
 0x34d   : > { %v2077_v51 = vpop.xlane.xlu0 %2076 }
 0x34e   : > { %v2153_v41 = vsub.f32 %v18049_v5, %v2077_v51 }
 0x34f   : > { %8278 = vrot.lane.b32.xlu1 %v17320_v40, %s16917_s19 }
 0x350   : > { %v18267_v37 = vpop.eup %16407  ;;  %v2194_v57 = vmul.f32 1.442695, %v2153_v41 }
 0x351   : > { %22389 = vst [vmem:[#allocation167_spill] sm:$0xff] %v18267_v37  ;;  %v18269_v1 = vpop.eup %16409  ;;  %v2074_v10 = vpop.xlane.xlu0 %2073  ;;  %15560 = vmatprep.mubr.msk.f32.mxu1 %vm2047_vm2, %v18267_v37 }
 0x352   : > { %22390 = vst [vmem:[#allocation168_spill] sm:$0xff] %v18269_v1  ;;  %v2152_v16 = vsub.f32 %v18058_v31, %v2074_v10  ;;  %15561 = vmatmul.mubr.msk.f32.vlgmr.msra.gmra.mxu1 %vm2047_vm2, %v18269_v1  ;;  %v22393_v31 = vld [vmem:[#allocation11_spill] sm:$0xff] }
 0x353   : > { %15571 = vmatpush3.msra.mxu1 %v17638_v30  ;;  %8181 = vrot.lane.b32.xlu1 %v17279_v26, %s16918_s20 }
 0x354   : > { %v2192_v5 = vmul.f32 1.442695, %v2152_v16  ;;  %7548 = vrot.lane.b32.xlu0 %v17339_v53, %s16917_s19  ;;  %15572 = vmatprep.subr.mxu1 %v17662_v43 }
 0x355   : > { %15573 = vmatpush3.msra.mxu1 %v17662_v43 }
 0x356   : > { %16411 = vpow2.f32 %v2192_v5  ;;  %15584 = vmatprep.subr.mxu1 %v17313_v39 }
 0x357   : > { %16413 = vpow2.f32 %v2194_v57  ;;  %8369 = vrot.lane.b32.xlu1 %v17361_v7, %s16917_s19  ;;  %v22400_v57 = vld [vmem:[#allocation154_spill] sm:$0xff] }
 0x358   : > { %7455 = vrot.lane.b32.xlu0 %v17241_v14, %s16918_s20 }
 0x35b   : > { %8272 = vrot.lane.b32.xlu1 %v17386_v24, %s16918_s20 }
 0x35c   : > { %7639 = vrot.lane.b32.xlu0 %v17394_v27, %s16917_s19 }
 0x35f   : > { %8367 = vrot.lane.b32.xlu1 %v17406_v47, %s16917_s19 }
 0x360   : > { %7546 = vrot.lane.b32.xlu0 %v17309_v34, %s16918_s20 }
 0x363   : > { %v18296_v30 = vpop.eup %16411  ;;  %8365 = vrot.lane.b32.xlu1 %v17361_v7, %s16918_s20 }
 0x364   : > { %22391 = vst [vmem:[#allocation169_spill] sm:$0xff] %v18296_v30  ;;  %v18300_v43 = vpop.eup %16413  ;;  %7730 = vrot.lane.b32.xlu0 %v17074_v44, %s16917_s19  ;;  %15553 = vmatprep.mubr.msk.f32.mxu0 %vm2047_vm2, %v18296_v30 }
 0x365   : > { %22392 = vst [vmem:[#allocation170_spill] sm:$0xff] %v18300_v43  ;;  %15554 = vmatmul.mubr.msk.f32.vlgmr.msra.gmra.mxu0 %vm2047_vm2, %v18300_v43  ;;  %v22502_v43 = vld [vmem:[#allocation33_spill] sm:$0xff] }
 0x366   : > { %15564 = vmatpush3.msra.mxu0 %v17616_v35  ;;  %v18320_v35 = vpop.permute.xlu1 %7453 }
 0x367   : > { %15565 = vmatprep.subr.mxu0 %v17660_v36  ;;  %8744 = vrot.lane.b32.xlu1 %v17061_v38, %s16919_s26  ;;  %22395 = vst [vmem:[#allocation11_spill] sm:$0xff] %v18320_v35 }
 0x368   : > { %15566 = vmatpush3.msra.mxu0 %v17660_v36  ;;  %7637 = vrot.lane.b32.xlu0 %v17350_v63, %s16918_s20 }
 0x369   : > { %15577 = vmatprep.subr.mxu0 %v22393_v31 }
 0x36b   : > { %8831 = vrot.lane.b32.xlu1 %v22394_v55, %s16919_s26 }
 0x36c   : > { %7821 = vrot.lane.b32.xlu0 %v17126_v52, %s16917_s19 }
 0x36f   : > { %9005 = vrot.lane.b32.xlu1 %v22396_v49, %s16919_s26 }
 0x370   : > { %7728 = vrot.lane.b32.xlu0 %v17067_v42, %s16918_s20 }
 0x373   : > { %9092 = vrot.lane.b32.xlu1 %v17205_v6, %s16919_s26  ;;  %v2095_v36 = vpop.xlane.xlu1 %2094 }
 0x374   : > { %7912 = vrot.lane.b32.xlu0 %v17162_v60, %s16917_s19  ;;  %v2159_v59 = vsub.f32 %v22397_v61, %v2095_v36  ;;  %v18343_v61 = vpop.permute.xlu0 %7273 }
 0x375   : > { %22401 = vst [vmem:[#allocation4_spill] sm:$0xff] %v18343_v61 }
 0x376   : > { %v2206_v41 = vmul.f32 1.442695, %v2159_v59 }
 0x377   : > { %9090 = vrot.lane.b32.xlu1 %v22398_v22, %s16919_s26  ;;  %v2092_v62 = vpop.xlane.xlu1 %2091 }
 0x378   : > { %v2158_v51 = vsub.f32 %v22399_v3, %v2092_v62  ;;  %7819 = vrot.lane.b32.xlu0 %v17097_v46, %s16918_s20  ;;  %v22402_v62 = vld [vmem:[#allocation156_spill] sm:$0xff] }
 0x37a   : > { %v2204_v10 = vmul.f32 1.442695, %v2158_v51 }
 0x37b   : > { %9179 = vrot.lane.b32.xlu1 %v17241_v14, %s16919_s26  ;;  %v2107_v16 = vpop.xlane.xlu1 %2106 }
 0x37c   : > { %16415 = vpow2.f32 %v2204_v10  ;;  %8003 = vrot.lane.b32.xlu0 %v17198_v4, %s16917_s19  ;;  %v2163_v5 = vsub.f32 %v22400_v57, %v2107_v16  ;;  %v22403_v10 = vld [vmem:[#allocation16_spill] sm:$0xff]  ;;  %v18353_v57 = vpop.permute.xlu0 %7457 }
 0x37d   : > { %16417 = vpow2.f32 %v2206_v41  ;;  %v22404_v41 = vld [vmem:[#allocation158_spill] sm:$0xff]  ;;  %22405 = vst [vmem:[#allocation8_spill] sm:$0xff] %v18353_v57 }
 0x37e   : > { %v2214_v3 = vmul.f32 1.442695, %v2163_v5 }
 0x37f   : > { %9266 = vrot.lane.b32.xlu1 %v17309_v34, %s16919_s26  ;;  %v2104_v36 = vpop.xlane.xlu1 %2103 }
 0x380   : > { %v2162_v59 = vsub.f32 %v22402_v62, %v2104_v36  ;;  %7910 = vrot.lane.b32.xlu0 %v17140_v56, %s16918_s20 }
 0x382   : > { %v2212_v51 = vmul.f32 1.442695, %v2162_v59 }
 0x383   : > { %9177 = vrot.lane.b32.xlu1 %v22403_v10, %s16919_s26  ;;  %v2119_v37 = vpop.xlane.xlu1 %2118 }
 0x384   : > { %16419 = vpow2.f32 %v2212_v51  ;;  %8094 = vrot.lane.b32.xlu0 %v17234_v12, %s16917_s19  ;;  %v2167_v16 = vsub.f32 %v22404_v41, %v2119_v37  ;;  %v22408_v37 = vld [vmem:[#allocation146_spill] sm:$0xff]  ;;  %v22409_v41 = vld [vmem:[#allocation92_spill] sm:$0xff] }
 0x385   : > { %16421 = vpow2.f32 %v2214_v3 }
 0x386   : > { %v2222_v59 = vmul.f32 1.442695, %v2167_v16  ;;  %v2160_v16 = vsub.f32 %v22409_v41, %v22408_v37  ;;  %v22415_v41 = vld [vmem:[#allocation98_spill] sm:$0xff] }
 0x387   : > { %9264 = vrot.lane.b32.xlu1 %v17339_v53, %s16919_s26  ;;  %v2116_v36 = vpop.xlane.xlu1 %2115 }
 0x388   : > { %v2166_v5 = vsub.f32 %v18133_v48, %v2116_v36  ;;  %8001 = vrot.lane.b32.xlu0 %v17180_v0, %s16918_s20  ;;  %v22410_v36 = vld [vmem:[#allocation21_spill] sm:$0xff]  ;;  %v2208_v37 = vmul.f32 1.442695, %v2160_v16 }
 0x389   : > { %v18360_v62 = vpop.eup %16415 }
 0x38a   : > { %22406 = vst [vmem:[#allocation150_spill] sm:$0xff] %v18360_v62  ;;  %v18362_v51 = vpop.eup %16417  ;;  %v2220_v1 = vmul.f32 1.442695, %v2166_v5  ;;  %v2089_v3 = vpop.xlane.xlu0 %2088  ;;  %15574 = vmatprep.mubr.msk.f32.mxu1 %vm2047_vm2, %v18360_v62 }
 0x38b   : > { %22407 = vst [vmem:[#allocation10_spill] sm:$0xff] %v18362_v51  ;;  %9440 = vrot.lane.b32.xlu1 %v17067_v42, %s16919_s26  ;;  %15575 = vmatmul.mubr.msk.f32.vlgmr.msra.gmra.mxu1 %vm2047_vm2, %v18362_v51  ;;  %v2157_v48 = vsub.f32 %v18141_v28, %v2089_v3  ;;  %v22411_v51 = vld [vmem:[#allocation31_spill] sm:$0xff] }
 0x38c   : > { %16423 = vpow2.f32 %v2220_v1  ;;  %8185 = vrot.lane.b32.xlu0 %v17279_v26, %s16917_s19  ;;  %15585 = vmatpush3.msra.mxu1 %v17313_v39  ;;  %v22412_v28 = vld [vmem:[#allocation143_spill] sm:$0xff]  ;;  %v22413_v1 = vld [vmem:[#allocation88_spill] sm:$0xff] }
 0x38d   : > { %16425 = vpow2.f32 %v2222_v59  ;;  %15586 = vmatprep.subr.mxu1 %v22410_v36  ;;  %v2161_v3 = vsub.f32 %v22413_v1, %v22412_v28  ;;  %v2202_v39 = vmul.f32 1.442695, %v2157_v48  ;;  %v22418_v28 = vld [vmem:[#allocation95_spill] sm:$0xff]  ;;  %v22420_v1 = vld [vmem:[#allocation34_spill] sm:$0xff] }
 0x38e   : > { %15587 = vmatpush3.msra.mxu1 %v22410_v36  ;;  %v2086_v5 = vpop.xlane.xlu0 %2085  ;;  %v2164_v36 = vsub.f32 %v22415_v41, %v18154_v33  ;;  %v22421_v41 = vld [vmem:[#allocation42_spill] sm:$0xff] }
 0x38f   : > { %v2156_v62 = vsub.f32 %v18150_v50, %v2086_v5  ;;  %15598 = vmatprep.subr.mxu1 %v22411_v51  ;;  %9438 = vrot.lane.b32.xlu1 %v17074_v44, %s16919_s26  ;;  %v2210_v48 = vmul.f32 1.442695, %v2161_v3  ;;  %v22417_v5 = vld [vmem:[#allocation147_spill] sm:$0xff] }
 0x390   : > { %8092 = vrot.lane.b32.xlu0 %v17212_v8, %s16918_s20  ;;  %v2165_v16 = vsub.f32 %v22418_v28, %v22417_v5  ;;  %v2216_v33 = vmul.f32 1.442695, %v2164_v36 }
 0x391   : > { %v18386_v59 = vpop.eup %16419  ;;  %v2200_v30 = vmul.f32 1.442695, %v2156_v62 }
 0x392   : > { %22414 = vst [vmem:[#allocation152_spill] sm:$0xff] %v18386_v59  ;;  %v18390_v50 = vpop.eup %16421  ;;  %15588 = vmatprep.mubr.msk.f32.mxu1 %vm2047_vm2, %v18386_v59  ;;  %v2218_v3 = vmul.f32 1.442695, %v2165_v16  ;;  %v22464_v59 = vld [vmem:[#allocation41_spill] sm:$0xff] }
 0x393   : > { %22416 = vst [vmem:[#allocation154_spill] sm:$0xff] %v18390_v50  ;;  %16427 = vpow2.f32 %v2200_v30  ;;  %9614 = vrot.lane.b32.xlu1 %v17140_v56, %s16919_s26  ;;  %15589 = vmatmul.mubr.msk.f32.vlgmr.msra.gmra.mxu1 %vm2047_vm2, %v18390_v50  ;;  %v22419_v30 = vld [vmem:[#allocation116_spill] sm:$0xff]  ;;  %v18549_v50 = vpop.permute.xlu0 %7364 }
 0x394   : > { %16429 = vpow2.f32 %v2202_v39  ;;  %8276 = vrot.lane.b32.xlu0 %v17386_v24, %s16917_s19  ;;  %15599 = vmatpush3.msra.mxu1 %v22411_v51  ;;  %v2168_v62 = vsub.f32 %v22419_v30, %v18252_v45  ;;  %v22422_v39 = vld [vmem:[#allocation113_spill] sm:$0xff]  ;;  %v22428_v30 = vld [vmem:[#allocation52_spill] sm:$0xff] }
 0x395   : > { %16431 = vpow2.f32 %v2208_v37  ;;  %15600 = vmatprep.subr.mxu1 %v22420_v1  ;;  %v2169_v5 = vsub.f32 %v22422_v39, %v18175_v19  ;;  %v22424_v37 = vld [vmem:[#allocation136_spill] sm:$0xff]  ;;  %22461 = vst [vmem:[#allocation113_spill] sm:$0xff] %v18549_v50 }
 0x396   : > { %15601 = vmatpush3.msra.mxu1 %v22420_v1  ;;  %16433 = vpow2.f32 %v2210_v48  ;;  %v2224_v45 = vmul.f32 1.442695, %v2168_v62  ;;  %v2172_v36 = vsub.f32 %v22424_v37, %v18260_v15  ;;  %v22426_v48 = vld [vmem:[#allocation133_spill] sm:$0xff]  ;;  %v18461_v37 = vpop.xlane.xlu1 %2130 }
 0x397   : > { %15612 = vmatprep.subr.mxu1 %v22421_v41  ;;  %9612 = vrot.lane.b32.xlu1 %v17162_v60, %s16919_s26  ;;  %16435 = vpow2.f32 %v2216_v33  ;;  %v2226_v19 = vmul.f32 1.442695, %v2169_v5  ;;  %v2173_v16 = vsub.f32 %v22426_v48, %v18256_v20  ;;  %v22427_v33 = vld [vmem:[#allocation45_spill] sm:$0xff]  ;;  %v22434_v5 = vld [vmem:[#allocation2_spill] sm:$0xff] }
 0x398   : > { %8183 = vrot.lane.b32.xlu0 %v17252_v18, %s16918_s20  ;;  %16437 = vpow2.f32 %v2218_v3  ;;  %v2232_v15 = vmul.f32 1.442695, %v2172_v36  ;;  %v22432_v3 = vld [vmem:[#allocation15_spill] sm:$0xff]  ;;  %v22439_v48 = vld [vmem:[#allocation6_spill] sm:$0xff] }
 0x399   : > { %v18414_v51 = vpop.eup %16423  ;;  %16439 = vpow2.f32 %v2224_v45  ;;  %v2234_v20 = vmul.f32 1.442695, %v2173_v16  ;;  %v22437_v36 = vld [vmem:[#allocation27_spill] sm:$0xff] }
 0x39a   : > { %22423 = vst [vmem:[#allocation156_spill] sm:$0xff] %v18414_v51  ;;  %v18418_v28 = vpop.eup %16425  ;;  %15602 = vmatprep.mubr.msk.f32.mxu1 %vm2047_vm2, %v18414_v51  ;;  %16441 = vpow2.f32 %v2226_v19 }
 0x39b   : > { %22425 = vst [vmem:[#allocation16_spill] sm:$0xff] %v18418_v28  ;;  %9788 = vrot.lane.b32.xlu1 %v17212_v8, %s16919_s26  ;;  %15603 = vmatmul.mubr.msk.f32.vlgmr.msra.gmra.mxu1 %vm2047_vm2, %v18418_v28  ;;  %16443 = vpow2.f32 %v2232_v15  ;;  %v22441_v15 = vld [vmem:[#allocation36_spill] sm:$0xff] }
 0x39c   : > { %8274 = vrot.lane.b32.xlu0 %v17320_v40, %s16918_s20  ;;  %15613 = vmatpush3.msra.mxu1 %v22421_v41  ;;  %16445 = vpow2.f32 %v2234_v20  ;;  %v22442_v20 = vld [vmem:[#allocation40_spill] sm:$0xff] }
 0x39d   : > { %15614 = vmatprep.subr.mxu1 %v22427_v33 }
 0x39e   : > { %15615 = vmatpush3.msra.mxu1 %v22427_v33  ;;  %v2140_v33 = vpop.xlane.xlu1 %2139 }
 0x39f   : > { %15626 = vmatprep.subr.mxu1 %v22428_v30  ;;  %9786 = vrot.lane.b32.xlu1 %v17234_v12, %s16919_s26 }
 0x3a0   : > { %v18436_v62 = vpop.eup %16427  ;;  %8363 = vrot.lane.b32.xlu0 %v17406_v47, %s16918_s20  ;;  %s16923_s20 = smov 8  }
 0x3a1   : > { %22429 = vst [vmem:[#allocation158_spill] sm:$0xff] %v18436_v62  ;;  %v18440_v1 = vpop.eup %16429  ;;  %15567 = vmatprep.mubr.msk.f32.mxu0 %vm2047_vm2, %v18436_v62  ;;  %v22500_v62 = vld [vmem:[#allocation20_spill] sm:$0xff] }
 0x3a2   : > { %22430 = vst [vmem:[#allocation146_spill] sm:$0xff] %v18440_v1  ;;  %v18444_v41 = vpop.eup %16431  ;;  %15568 = vmatmul.mubr.msk.f32.vlgmr.msra.gmra.mxu0 %vm2047_vm2, %v18440_v1  ;;  %v18509_v51 = vpop.permute.xlu1 %7641  ;;  %v22466_v1 = vld [vmem:[#allocation39_spill] sm:$0xff] }
 0x3a3   : > { %22431 = vst [vmem:[#allocation92_spill] sm:$0xff] %v18444_v41  ;;  %15578 = vmatpush3.msra.mxu0 %v22393_v31  ;;  %15581 = vmatprep.mubr.msk.f32.mxu0 %vm2047_vm2, %v18444_v41  ;;  %v18454_v39 = vpop.eup %16433  ;;  %v22436_v31 = vld [vmem:[#allocation24_spill] sm:$0xff]  ;;  %22450 = vst [vmem:[#allocation116_spill] sm:$0xff] %v18509_v51 }
 0x3a4   : > { %15579 = vmatprep.subr.mxu0 %v22432_v3  ;;  %9962 = vrot.lane.b32.xlu1 %v17320_v40, %s16919_s26  ;;  %22433 = vst [vmem:[#allocation21_spill] sm:$0xff] %v18454_v39  ;;  %v18459_v45 = vpop.eup %16435 }
 0x3a5   : > { %8742 = vrot.lane.b32.xlu0 %v22434_v5, %s16919_s26  ;;  %15580 = vmatpush3.msra.mxu0 %v22432_v3  ;;  %22435 = vst [vmem:[#allocation31_spill] sm:$0xff] %v18459_v45  ;;  %v18472_v19 = vpop.eup %16437 }
 0x3a6   : > { %15591 = vmatprep.subr.mxu0 %v22436_v31  ;;  %15582 = vmatmul.mubr.msk.f32.vlgmr.msra.gmra.mxu0 %vm2047_vm2, %v18454_v39  ;;  %22438 = vst [vmem:[#allocation143_spill] sm:$0xff] %v18472_v19  ;;  %v18477_v16 = vpop.eup %16439  ;;  %v2174_v39 = vsub.f32 %v18157_v32, %v2140_v33  ;;  %v22467_v33 = vld [vmem:[#allocation51_spill] sm:$0xff] }
 0x3a7   : > { %15592 = vmatpush3.msra.mxu0 %v22436_v31  ;;  %15595 = vmatprep.mubr.msk.f32.mxu0 %vm2047_vm2, %v18459_v45  ;;  %22440 = vst [vmem:[#allocation88_spill] sm:$0xff] %v18477_v16  ;;  %v18488_v3 = vpop.eup %16441  ;;  %v22444_v31 = vld [vmem:[#allocation5_spill] sm:$0xff] }
 0x3a8   : > { %15593 = vmatprep.subr.mxu0 %v22437_v36  ;;  %9960 = vrot.lane.b32.xlu1 %v17386_v24, %s16919_s26  ;;  %22443 = vst [vmem:[#allocation98_spill] sm:$0xff] %v18488_v3  ;;  %v2236_v32 = vmul.f32 1.442695, %v2174_v39 }
 0x3a9   : > { %8918 = vrot.lane.b32.xlu0 %v22439_v48, %s16919_s26  ;;  %15594 = vmatpush3.msra.mxu0 %v22437_v36  ;;  %v18493_v36 = vpop.eup %16443 }
 0x3aa   : > { %15605 = vmatprep.subr.mxu0 %v22441_v15  ;;  %15596 = vmatmul.mubr.msk.f32.vlgmr.msra.gmra.mxu0 %vm2047_vm2, %v18472_v19  ;;  %22445 = vst [vmem:[#allocation147_spill] sm:$0xff] %v18493_v36  ;;  %v18504_v28 = vpop.eup %16445  ;;  %v22456_v19 = vld [vmem:[#allocation25_spill] sm:$0xff] }
 0x3ab   : > { %15606 = vmatpush3.msra.mxu0 %v22441_v15  ;;  %15609 = vmatprep.mubr.msk.f32.mxu0 %vm2047_vm2, %v18477_v16  ;;  %v22446_v15 = vld [vmem:[#allocation50_spill] sm:$0xff]  ;;  %v22447_v16 = vld [vmem:[#allocation53_spill] sm:$0xff]  ;;  %22448 = vst [vmem:[#allocation95_spill] sm:$0xff] %v18504_v28 }
 0x3ac   : > { %15607 = vmatprep.subr.mxu0 %v22442_v20  ;;  %10207 = vrot.lane.b32.xlu1 %v17061_v38, %s16920_s28 }
 0x3ad   : > { %8829 = vrot.lane.b32.xlu0 %v22444_v31, %s16919_s26  ;;  %15608 = vmatpush3.msra.mxu0 %v22442_v20  ;;  %v22449_v20 = vld [vmem:[#allocation7_spill] sm:$0xff] }
 0x3ae   : > { %15619 = vmatprep.subr.mxu0 %v22446_v15  ;;  %15610 = vmatmul.mubr.msk.f32.vlgmr.msra.gmra.mxu0 %vm2047_vm2, %v18488_v3  ;;  %v22451_v3 = vld [vmem:[#allocation12_spill] sm:$0xff] }
 0x3af   : > { %15620 = vmatpush3.msra.mxu0 %v22446_v15  ;;  %15623 = vmatprep.mubr.msk.f32.mxu0 %vm2047_vm2, %v18493_v36  ;;  %v22452_v15 = vld [vmem:[#allocation18_spill] sm:$0xff]  ;;  %v22453_v36 = vld [vmem:[#allocation17_spill] sm:$0xff] }
 0x3b0   : > { %15621 = vmatprep.subr.mxu0 %v22447_v16  ;;  %10205 = vrot.lane.b32.xlu1 %v22434_v5, %s16920_s28 }
 0x3b1   : > { %8916 = vrot.lane.b32.xlu0 %v22449_v20, %s16919_s26  ;;  %15622 = vmatpush3.msra.mxu0 %v22447_v16  ;;  %v22454_v16 = vld [vmem:[#allocation9_spill] sm:$0xff] }
 0x3b2   : > { %15633 = vmatprep.subr.msk.mxu0 %vm628_vm1, %v22451_v3  ;;  %15624 = vmatmul.mubr.msk.f32.vlgmr.msra.gmra.mxu0 %vm2047_vm2, %v18504_v28  ;;  %v18527_v28 = vpop.permute.xlu1 %7544 }
 0x3b3   : > { %15634 = vmatpush3.xpose.msk.msra.mxu0 %vm628_vm1, %v22451_v3  ;;  %15637 = vmatprep.mubr.msk.f32.mxu0 %vm628_vm1, %v22452_v15  ;;  %22455 = vst [vmem:[#allocation34_spill] sm:$0xff] %v18527_v28  ;;  %v22457_v3 = vld [vmem:[#allocation13_spill] sm:$0xff] }
 0x3b4   : > { %15635 = vmatprep.subr.msk.mxu0 %vm628_vm1, %v22453_v36  ;;  %10201 = vrot.lane.b32.xlu1 %v22434_v5, %s16921_s29  ;;  %v22458_v15 = vld [vmem:[#allocation29_spill] sm:$0xff] }
 0x3b5   : > { %9003 = vrot.lane.b32.xlu0 %v22454_v16, %s16919_s26 }
 0x3b6   : > { %v18547_v45 = vpop.permute.xlu1 %7732 }
 0x3b7   : > { %15636 = vmatpush3.xpose.msk.msra.mxu0 %vm628_vm1, %v22453_v36  ;;  %v22459_v36 = vld [vmem:[#allocation28_spill] sm:$0xff]  ;;  %22460 = vst [vmem:[#allocation42_spill] sm:$0xff] %v18547_v45 }
 0x3b8   : > { %15647 = vmatprep.subr.msk.mxu0 %vm628_vm1, %v22456_v19  ;;  %10296 = vrot.lane.b32.xlu1 %v22444_v31, %s16920_s28 }
 0x3b9   : > { %9353 = vrot.lane.b32.xlu0 %v17350_v63, %s16919_s26 }
 0x3ba   : > { %15638 = vmatmul.mubr.msk.f32.vlgmr.msra.gmra.mxu0 %vm628_vm1, %v22457_v3  ;;  %v2171_v3 = vsub.f32 %v18144_v23, %v18461_v37  ;;  %v18568_v41 = vpop.permute.xlu1 %7635 }
 0x3bb   : > { %15648 = vmatpush3.xpose.msk.msra.mxu0 %vm628_vm1, %v22456_v19  ;;  %15651 = vmatprep.mubr.msk.f32.mxu0 %vm628_vm1, %v22458_v15  ;;  %v22462_v19 = vld [vmem:[#allocation37_spill] sm:$0xff]  ;;  %v22463_v15 = vld [vmem:[#allocation26_spill] sm:$0xff]  ;;  %22465 = vst [vmem:[#allocation136_spill] sm:$0xff] %v18568_v41 }
 0x3bc   : > { %15649 = vmatprep.subr.msk.mxu0 %vm628_vm1, %v22459_v36  ;;  %10292 = vrot.lane.b32.xlu1 %v22444_v31, %s16921_s29  ;;  %v2230_v37 = vmul.f32 1.442695, %v2171_v3 }
 0x3bd   : > { %9351 = vrot.lane.b32.xlu0 %v17394_v27, %s16919_s26 }
 0x3bf   : > { %15650 = vmatpush3.xpose.msk.msra.mxu0 %vm628_vm1, %v22459_v36 }
 0x3c0   : > { %15661 = vmatprep.subr.msk.mxu0 %vm628_vm1, %v22462_v19  ;;  %10387 = vrot.lane.b32.xlu1 %v22449_v20, %s16920_s28 }
 0x3c1   : > { %9527 = vrot.lane.b32.xlu0 %v17097_v46, %s16919_s26 }
 0x3c2   : > { %15652 = vmatmul.mubr.msk.f32.vlgmr.msra.gmra.mxu0 %vm628_vm1, %v22463_v15 }
 0x3c3   : > { %15662 = vmatpush3.xpose.msk.msra.mxu0 %vm628_vm1, %v22462_v19  ;;  %15665 = vmatprep.mubr.msk.f32.mxu0 %vm628_vm1, %v22464_v59  ;;  %v2128_v36 = vpop.xlane.xlu0 %2127 }
 0x3c4   : > { %15663 = vmatprep.subr.msk.mxu0 %vm628_vm1, %v22466_v1  ;;  %v2170_v23 = vsub.f32 %v18232_v11, %v2128_v36  ;;  %10383 = vrot.lane.b32.xlu1 %v22449_v20, %s16921_s29  ;;  %v18586_v11 = vpop.permute.xlu1 %7823  ;;  %v22469_v36 = vld [vmem:[#allocation38_spill] sm:$0xff] }
 0x3c5   : > { %9525 = vrot.lane.b32.xlu0 %v17126_v52, %s16919_s26  ;;  %22468 = vst [vmem:[#allocation133_spill] sm:$0xff] %v18586_v11 }
 0x3c6   : > { %v2228_v19 = vmul.f32 1.442695, %v2170_v23 }
 0x3c7   : > { %15664 = vmatpush3.xpose.msk.msra.mxu0 %vm628_vm1, %v22466_v1  ;;  %v2143_v59 = vpop.xlane.xlu0 %2142  ;;  %v22470_v1 = vld [vmem:[#allocation55_spill] sm:$0xff] }
 0x3c8   : > { %16447 = vpow2.f32 %v2228_v19  ;;  %15675 = vmatprep.subr.msk.mxu0 %vm628_vm1, %v22467_v33  ;;  %v2175_v15 = vsub.f32 %v18240_v25, %v2143_v59  ;;  %10478 = vrot.lane.b32.xlu1 %v22454_v16, %s16920_s28  ;;  %v22471_v25 = vld [vmem:[#allocation49_spill] sm:$0xff]  ;;  %v18604_v23 = vpop.permute.xlu1 %7726  ;;  %v22475_v19 = vld [vmem:[#allocation48_spill] sm:$0xff] }
 0x3c9   : > { %16449 = vpow2.f32 %v2230_v37  ;;  %9701 = vrot.lane.b32.xlu0 %v17180_v0, %s16919_s26  ;;  %22473 = vst [vmem:[#allocation52_spill] sm:$0xff] %v18604_v23  ;;  %v22474_v37 = vld [vmem:[#allocation14_spill] sm:$0xff] }
 0x3ca   : > { %v2238_v3 = vmul.f32 1.442695, %v2175_v15  ;;  %15666 = vmatmul.mubr.msk.f32.vlgmr.msra.gmra.mxu0 %vm628_vm1, %v22469_v36  ;;  %16451 = vpow2.f32 %v2236_v32  ;;  %v22477_v32 = vld [vmem:[#allocation65_spill] sm:$0xff] }
 0x3cb   : > { %15676 = vmatpush3.xpose.msk.msra.mxu0 %vm628_vm1, %v22467_v33  ;;  %15679 = vmatprep.mubr.msk.f32.mxu0 %vm628_vm1, %v22470_v1  ;;  %v18598_v39 = vpop.permute.xlu0 %7548  ;;  %v22478_v33 = vld [vmem:[#allocation58_spill] sm:$0xff]  ;;  %v22482_v1 = vld [vmem:[#allocation67_spill] sm:$0xff] }
 0x3cc   : > { %15677 = vmatprep.subr.msk.mxu0 %vm628_vm1, %v22471_v25  ;;  %10474 = vrot.lane.b32.xlu1 %v22454_v16, %s16921_s29  ;;  %16453 = vpow2.f32 %v2238_v3  ;;  %22472 = vst [vmem:[#allocation45_spill] sm:$0xff] %v18598_v39  ;;  %v18630_v36 = vpop.permute.xlu1 %7914 }
 0x3cd   : > { %9699 = vrot.lane.b32.xlu0 %v17198_v4, %s16919_s26  ;;  %22481 = vst [vmem:[#allocation27_spill] sm:$0xff] %v18630_v36 }
 0x3cf   : > { %15678 = vmatpush3.xpose.msk.msra.mxu0 %vm628_vm1, %v22471_v25  ;;  %v18614_v59 = vpop.permute.xlu0 %7455 }
 0x3d0   : > { %15689 = vmatprep.subr.msk.mxu0 %vm628_vm1, %v22474_v37  ;;  %10569 = vrot.lane.b32.xlu1 %v22398_v22, %s16920_s28  ;;  %22476 = vst [vmem:[#allocation15_spill] sm:$0xff] %v18614_v59 }
 0x3d1   : > { %9875 = vrot.lane.b32.xlu0 %v17252_v18, %s16919_s26 }
 0x3d2   : > { %15680 = vmatmul.mubr.msk.f32.vlgmr.msra.gmra.mxu0 %vm628_vm1, %v22475_v19 }
 0x3d3   : > { %15690 = vmatpush3.xpose.msk.msra.mxu0 %vm628_vm1, %v22474_v37  ;;  %15693 = vmatprep.mubr.msk.f32.mxu0 %vm628_vm1, %v22477_v32  ;;  %v18643_v37 = vpop.permute.xlu0 %7639  ;;  %v22486_v32 = vld [vmem:[#allocation54_spill] sm:$0xff] }
 0x3d4   : > { %15691 = vmatprep.subr.msk.mxu0 %vm628_vm1, %v22478_v33  ;;  %10565 = vrot.lane.b32.xlu1 %v22398_v22, %s16921_s29  ;;  %22484 = vst [vmem:[#allocation36_spill] sm:$0xff] %v18643_v37 }
 0x3d5   : > { %v18624_v15 = vpop.eup %16447  ;;  %9873 = vrot.lane.b32.xlu0 %v17279_v26, %s16919_s26 }
 0x3d6   : > { %22479 = vst [vmem:[#allocation2_spill] sm:$0xff] %v18624_v15  ;;  %v18628_v3 = vpop.eup %16449  ;;  %15616 = vmatprep.mubr.msk.f32.mxu1 %vm2047_vm2, %v18624_v15  ;;  %v22490_v15 = vld [vmem:[#allocation73_spill] sm:$0xff] }
 0x3d7   : > { %22480 = vst [vmem:[#allocation24_spill] sm:$0xff] %v18628_v3  ;;  %15692 = vmatpush3.xpose.msk.msra.mxu0 %vm628_vm1, %v22478_v33  ;;  %15617 = vmatmul.mubr.msk.f32.vlgmr.msra.gmra.mxu1 %vm2047_vm2, %v18628_v3  ;;  %v18641_v25 = vpop.eup %16451  ;;  %v18657_v33 = vpop.permute.xlu1 %7817  ;;  %v22489_v3 = vld [vmem:[#allocation19_spill] sm:$0xff] }
 0x3d8   : > { %15627 = vmatpush3.msra.mxu1 %v22428_v30  ;;  %15703 = vmatprep.subr.msk.mxu0 %vm628_vm1, %v22482_v1  ;;  %22483 = vst [vmem:[#allocation6_spill] sm:$0xff] %v18641_v25  ;;  %v22487_v30 = vld [vmem:[#allocation62_spill] sm:$0xff]  ;;  %22488 = vst [vmem:[#allocation5_spill] sm:$0xff] %v18657_v33 }
 0x3d9   : > { %10660 = vrot.lane.b32.xlu1 %v22403_v10, %s16920_s28  ;;  %10049 = vrot.lane.b32.xlu0 %v17361_v7, %s16919_s26  ;;  %v18649_v19 = vpop.eup %16453 }
 0x3da   : > { %22485 = vst [vmem:[#allocation40_spill] sm:$0xff] %v18649_v19  ;;  %15628 = vmatprep.subr.mxu1 %v22486_v32  ;;  %15630 = vmatprep.mubr.msk.f32.mxu1 %vm2047_vm2, %v18641_v25  ;;  %v22497_v25 = vld [vmem:[#allocation30_spill] sm:$0xff] }
 0x3db   : > { %15629 = vmatpush3.msra.mxu1 %v22486_v32  ;;  %15694 = vmatmul.mubr.msk.f32.vlgmr.msra.gmra.mxu0 %vm628_vm1, %v22487_v30  ;;  %v22491_v32 = vld [vmem:[#allocation64_spill] sm:$0xff]  ;;  %v18671_v30 = vpop.permute.xlu0 %7546 }
 0x3dc   : > { %15640 = vmatprep.subr.msk.mxu1 %vm628_vm1, %v22489_v3  ;;  %15704 = vmatpush3.xpose.msk.msra.mxu0 %vm628_vm1, %v22482_v1  ;;  %22492 = vst [vmem:[#allocation50_spill] sm:$0xff] %v18671_v30  ;;  %v22493_v1 = vld [vmem:[#allocation22_spill] sm:$0xff] }
 0x3dd   : > { %15707 = vmatprep.mubr.msk.f32.mxu0 %vm628_vm1, %v22490_v15  ;;  %15631 = vmatmul.mubr.msk.f32.vlgmr.msra.gmra.mxu1 %vm2047_vm2, %v18649_v19  ;;  %v22494_v15 = vld [vmem:[#allocation23_spill] sm:$0xff] }
 0x3de   : > { %15641 = vmatpush3.xpose.msk.msra.mxu1 %vm628_vm1, %v22489_v3  ;;  %15705 = vmatprep.subr.msk.mxu0 %vm628_vm1, %v22491_v32  ;;  %v18683_v3 = vpop.permute.xlu1 %8005  ;;  %v22496_v19 = vld [vmem:[#allocation75_spill] sm:$0xff] }
 0x3df   : > { %10656 = vrot.lane.b32.xlu1 %v22403_v10, %s16921_s29  ;;  %10047 = vrot.lane.b32.xlu0 %v17406_v47, %s16919_s26  ;;  %22495 = vst [vmem:[#allocation53_spill] sm:$0xff] %v18683_v3 }
 0x3e0   : > { %15642 = vmatprep.subr.msk.mxu1 %vm628_vm1, %v22493_v1  ;;  %15644 = vmatprep.mubr.msk.f32.mxu1 %vm628_vm1, %v22494_v15  ;;  %v22498_v15 = vld [vmem:[#allocation70_spill] sm:$0xff] }
 0x3e1   : > { %15706 = vmatpush3.xpose.msk.msra.mxu0 %vm628_vm1, %v22491_v32  ;;  %v18697_v32 = vpop.permute.xlu0 %7730 }
 0x3e2   : > { %15643 = vmatpush3.xpose.msk.msra.mxu1 %vm628_vm1, %v22493_v1  ;;  %15717 = vmatprep.subr.msk.mxu0 %vm628_vm1, %v22496_v19  ;;  %22499 = vst [vmem:[#allocation7_spill] sm:$0xff] %v18697_v32  ;;  %v22501_v1 = vld [vmem:[#allocation81_spill] sm:$0xff] }
 0x3e3   : > { %10751 = vrot.lane.b32.xlu1 %v17339_v53, %s16920_s28  ;;  %10298 = vrot.lane.b32.xlu0 %v22394_v55, %s16920_s28 }
 0x3e4   : > { %15654 = vmatprep.subr.msk.mxu1 %vm628_vm1, %v22497_v25  ;;  %15708 = vmatmul.mubr.msk.f32.vlgmr.msra.gmra.mxu0 %vm628_vm1, %v22498_v15  ;;  %v18711_v15 = vpop.permute.xlu1 %7908 }
 0x3e5   : > { %15645 = vmatmul.mubr.msk.f32.vlgmr.msra.gmra.mxu1 %vm628_vm1, %v22500_v62  ;;  %15718 = vmatpush3.xpose.msk.msra.mxu0 %vm628_vm1, %v22496_v19  ;;  %22504 = vst [vmem:[#allocation12_spill] sm:$0xff] %v18711_v15  ;;  %v22505_v62 = vld [vmem:[#allocation35_spill] sm:$0xff]  ;;  %v22508_v19 = vld [vmem:[#allocation44_spill] sm:$0xff] }
 0x3e6   : > { %15721 = vmatprep.mubr.msk.f32.mxu0 %vm628_vm1, %v22501_v1  ;;  %15655 = vmatpush3.xpose.msk.msra.mxu1 %vm628_vm1, %v22497_v25  ;;  %v18725_v25 = vpop.permute.xlu0 %7637  ;;  %v22509_v1 = vld [vmem:[#allocation78_spill] sm:$0xff] }
 0x3e7   : > { %15658 = vmatprep.mubr.msk.f32.mxu1 %vm628_vm1, %v22502_v43  ;;  %15719 = vmatprep.subr.msk.mxu0 %vm628_vm1, %v22503_v9  ;;  %v22506_v43 = vld [vmem:[#allocation83_spill] sm:$0xff]  ;;  %22507 = vst [vmem:[#allocation18_spill] sm:$0xff] %v18725_v25 }
 0x3e8   : > { %10747 = vrot.lane.b32.xlu1 %v17339_v53, %s16921_s29  ;;  %10203 = vrot.lane.b32.xlu0 %v17061_v38, %s16921_s29 }
 0x3e9   : > { %15656 = vmatprep.subr.msk.mxu1 %vm628_vm1, %v22505_v62  ;;  %15720 = vmatpush3.xpose.msk.msra.mxu0 %vm628_vm1, %v22503_v9  ;;  %v22510_v9 = vld [vmem:[#allocation32_spill] sm:$0xff] }
 0x3ea   : > { %15657 = vmatpush3.xpose.msk.msra.mxu1 %vm628_vm1, %v22505_v62  ;;  %15731 = vmatprep.subr.msk.mxu0 %vm628_vm1, %v22506_v43  ;;  %v18737_v62 = vpop.permute.xlu1 %8096 }
 0x3eb   : > { %15668 = vmatprep.subr.msk.mxu1 %vm628_vm1, %v22508_v19  ;;  %22511 = vst [vmem:[#allocation17_spill] sm:$0xff] %v18737_v62 }
 0x3ec   : > { %10842 = vrot.lane.b32.xlu1 %v17394_v27, %s16920_s28  ;;  %10389 = vrot.lane.b32.xlu0 %v22439_v48, %s16920_s28 }
 0x3ed   : > { %15722 = vmatmul.mubr.msk.f32.vlgmr.msra.gmra.mxu0 %vm628_vm1, %v22509_v1  ;;  %15659 = vmatmul.mubr.msk.f32.vlgmr.msra.gmra.mxu1 %vm628_vm1, %v22510_v9  ;;  %v18751_v1 = vpop.permute.xlu0 %7821  ;;  %v22520_v9 = vld [vmem:[#allocation84_spill] sm:$0xff] }
 0x3ee   : > { %15732 = vmatpush3.xpose.msk.msra.mxu0 %vm628_vm1, %v22506_v43  ;;  %15735 = vmatprep.mubr.msk.f32.mxu0 %vm628_vm1, %v22512_v54  ;;  %22515 = vst [vmem:[#allocation9_spill] sm:$0xff] %v18751_v1  ;;  %v22516_v43 = vld [vmem:[#allocation46_spill] sm:$0xff]  ;;  %v18762_v54 = vpop.permute.xlu1 %7999  ;;  %v22538_v1 = vld [vmem:[#allocation77_spill] sm:$0xff] }
 0x3ef   : > { %15669 = vmatpush3.xpose.msk.msra.mxu1 %vm628_vm1, %v22508_v19  ;;  %15672 = vmatprep.mubr.msk.f32.mxu1 %vm628_vm1, %v22513_v2  ;;  %v22517_v2 = vld [vmem:[#allocation97_spill] sm:$0xff]  ;;  %22518 = vst [vmem:[#allocation25_spill] sm:$0xff] %v18762_v54  ;;  %v22530_v54 = vld [vmem:[#allocation59_spill] sm:$0xff] }
 0x3f0   : > { %15733 = vmatprep.subr.msk.mxu0 %vm628_vm1, %v22514_v17  ;;  %10838 = vrot.lane.b32.xlu1 %v17394_v27, %s16921_s29  ;;  %v22519_v19 = vld [vmem:[#allocation57_spill] sm:$0xff] }
 0x3f1   : > { %10294 = vrot.lane.b32.xlu0 %v22394_v55, %s16921_s29  ;;  %15670 = vmatprep.subr.msk.mxu1 %vm628_vm1, %v22516_v43 }
 0x3f2   : > { %15734 = vmatpush3.xpose.msk.msra.mxu0 %vm628_vm1, %v22514_v17  ;;  %v22521_v17 = vld [vmem:[#allocation43_spill] sm:$0xff] }
 0x3f3   : > { %15671 = vmatpush3.xpose.msk.msra.mxu1 %vm628_vm1, %v22516_v43  ;;  %15745 = vmatprep.subr.mxu0 %v22517_v2  ;;  %v18775_v43 = vpop.permute.xlu0 %7728 }
 0x3f4   : > { %10933 = vrot.lane.b32.xlu1 %v17074_v44, %s16920_s28  ;;  %15682 = vmatprep.subr.msk.mxu1 %vm628_vm1, %v22519_v19  ;;  %22522 = vst [vmem:[#allocation13_spill] sm:$0xff] %v18775_v43 }
 0x3f5   : > { %10480 = vrot.lane.b32.xlu0 %v22396_v49, %s16920_s28  ;;  %15736 = vmatmul.mubr.msk.f32.vlgmr.msra.gmra.mxu0 %vm628_vm1, %v22520_v9  ;;  %v22525_v9 = vld [vmem:[#allocation56_spill] sm:$0xff] }
 0x3f6   : > { %15673 = vmatmul.mubr.msk.f32.vlgmr.msra.gmra.mxu1 %vm628_vm1, %v22521_v17  ;;  %15746 = vmatpush3.msra.mxu0 %v22517_v2  ;;  %v18788_v2 = vpop.permute.xlu1 %8187  ;;  %v22527_v17 = vld [vmem:[#allocation93_spill] sm:$0xff] }
 0x3f7   : > { %15683 = vmatpush3.xpose.msk.msra.mxu1 %vm628_vm1, %v22519_v19  ;;  %15686 = vmatprep.mubr.msk.f32.mxu1 %vm628_vm1, %v22523_v13  ;;  %22526 = vst [vmem:[#allocation29_spill] sm:$0xff] %v18788_v2  ;;  %v22528_v13 = vld [vmem:[#allocation63_spill] sm:$0xff]  ;;  %v18798_v19 = vpop.permute.xlu0 %7912  ;;  %v22533_v2 = vld [vmem:[#allocation60_spill] sm:$0xff] }
 0x3f8   : > { %15747 = vmatprep.subr.mxu0 %v22524_v58  ;;  %10929 = vrot.lane.b32.xlu1 %v17074_v44, %s16921_s29  ;;  %22529 = vst [vmem:[#allocation28_spill] sm:$0xff] %v18798_v19 }
 0x3f9   : > { %10385 = vrot.lane.b32.xlu0 %v22439_v48, %s16921_s29  ;;  %15684 = vmatprep.subr.msk.mxu1 %vm628_vm1, %v22525_v9 }
 0x3fa   : > { %15748 = vmatpush3.msra.mxu0 %v22524_v58  ;;  %v22531_v58 = vld [vmem:[#allocation69_spill] sm:$0xff] }
 0x3fb   : > { %15759 = vmatprep.subr.mxu0 %v22527_v17  ;;  %15685 = vmatpush3.xpose.msk.msra.mxu1 %vm628_vm1, %v22525_v9  ;;  %v18808_v9 = vpop.permute.xlu1 %8090  ;;  %v18814_v3 = vpop.permute.xlu0 %7819 }
 0x3fc   : > { %11024 = vrot.lane.b32.xlu1 %v17126_v52, %s16920_s28  ;;  %15696 = vmatprep.subr.msk.mxu1 %vm628_vm1, %v22528_v13  ;;  %22532 = vst [vmem:[#allocation37_spill] sm:$0xff] %v18808_v9  ;;  %22534 = vst [vmem:[#allocation26_spill] sm:$0xff] %v18814_v3  ;;  %v22539_v3 = vld [vmem:[#allocation68_spill] sm:$0xff] }
 0x3fd   : > { %10571 = vrot.lane.b32.xlu0 %v17205_v6, %s16920_s28 }
 0x3fe   : > { %15687 = vmatmul.mubr.msk.f32.vlgmr.msra.gmra.mxu1 %vm628_vm1, %v22530_v54  ;;  %v22535_v54 = vld [vmem:[#allocation71_spill] sm:$0xff] }
 0x3ff   : > { %15697 = vmatpush3.xpose.msk.msra.mxu1 %vm628_vm1, %v22528_v13  ;;  %15700 = vmatprep.mubr.msk.f32.mxu1 %vm628_vm1, %v22531_v58  ;;  %v18822_v13 = vpop.permute.xlu1 %8278  ;;  %v22537_v58 = vld [vmem:[#allocation66_spill] sm:$0xff] }
 0x400   : > { %15698 = vmatprep.subr.msk.mxu1 %vm628_vm1, %v22533_v2  ;;  %22536 = vst [vmem:[#allocation41_spill] sm:$0xff] %v18822_v13 }
 0x401   : > { %10476 = vrot.lane.b32.xlu0 %v22396_v49, %s16921_s29 }
 0x403   : > { %15699 = vmatpush3.xpose.msk.msra.mxu1 %vm628_vm1, %v22533_v2  ;;  %v18832_v2 = vpop.permute.xlu0 %8003  ;;  %v18838_v13 = vpop.permute.xlu1 %8181 }
 0x404   : > { %15710 = vmatprep.subr.msk.mxu1 %vm628_vm1, %v22535_v54  ;;  %22540 = vst [vmem:[#allocation39_spill] sm:$0xff] %v18832_v2  ;;  %22541 = vst [vmem:[#allocation51_spill] sm:$0xff] %v18838_v13  ;;  %v22545_v2 = vld [vmem:[#allocation85_spill] sm:$0xff] }
 0x405   : > { %10662 = vrot.lane.b32.xlu0 %v17241_v14, %s16920_s28 }
 0x406   : > { %15701 = vmatmul.mubr.msk.f32.vlgmr.msra.gmra.mxu1 %vm628_vm1, %v22537_v58  ;;  %v22542_v58 = vld [vmem:[#allocation79_spill] sm:$0xff] }
 0x407   : > { %15711 = vmatpush3.xpose.msk.msra.mxu1 %vm628_vm1, %v22535_v54  ;;  %15714 = vmatprep.mubr.msk.f32.mxu1 %vm628_vm1, %v22538_v1  ;;  %v22543_v1 = vld [vmem:[#allocation74_spill] sm:$0xff]  ;;  %v18846_v54 = vpop.permute.xlu0 %7910  ;;  %v18856_v13 = vpop.permute.xlu1 %8369 }
 0x408   : > { %15712 = vmatprep.subr.msk.mxu1 %vm628_vm1, %v22539_v3  ;;  %22544 = vst [vmem:[#allocation38_spill] sm:$0xff] %v18846_v54  ;;  %22547 = vst [vmem:[#allocation55_spill] sm:$0xff] %v18856_v13 }
 0x409   : > { %10567 = vrot.lane.b32.xlu0 %v17205_v6, %s16921_s29 }
 0x40b   : > { %15713 = vmatpush3.xpose.msk.msra.mxu1 %vm628_vm1, %v22539_v3  ;;  %v22546_v3 = vld [vmem:[#allocation76_spill] sm:$0xff]  ;;  %v18862_v33 = vpop.permute.xlu0 %8094  ;;  %v18872_v13 = vpop.permute.xlu1 %8272 }
 0x40c   : > { %15724 = vmatprep.subr.msk.mxu1 %vm628_vm1, %v22542_v58  ;;  %22549 = vst [vmem:[#allocation49_spill] sm:$0xff] %v18862_v33  ;;  %22552 = vst [vmem:[#allocation14_spill] sm:$0xff] %v18872_v13  ;;  %v22558_v13 = vld [vmem:[#allocation96_spill] sm:$0xff] }
 0x40d   : > { %10753 = vrot.lane.b32.xlu0 %v17309_v34, %s16920_s28 }
 0x40e   : > { %15715 = vmatmul.mubr.msk.f32.vlgmr.msra.gmra.mxu1 %vm628_vm1, %v22543_v1  ;;  %v22548_v1 = vld [vmem:[#allocation87_spill] sm:$0xff] }
 0x40f   : > { %15725 = vmatpush3.xpose.msk.msra.mxu1 %vm628_vm1, %v22542_v58  ;;  %15728 = vmatprep.mubr.msk.f32.mxu1 %vm628_vm1, %v22545_v2  ;;  %v22550_v2 = vld [vmem:[#allocation82_spill] sm:$0xff]  ;;  %v18878_v25 = vpop.permute.xlu0 %8001 }
 0x410   : > { %15726 = vmatprep.subr.msk.mxu1 %vm628_vm1, %v22546_v3  ;;  %v22551_v58 = vld [vmem:[#allocation86_spill] sm:$0xff]  ;;  %22554 = vst [vmem:[#allocation48_spill] sm:$0xff] %v18878_v25 }
 0x411   : > { %10658 = vrot.lane.b32.xlu0 %v17241_v14, %s16921_s29 }
 0x413   : > { %15727 = vmatpush3.xpose.msk.msra.mxu1 %vm628_vm1, %v22546_v3  ;;  %v22553_v3 = vld [vmem:[#allocation91_spill] sm:$0xff]  ;;  %v18891_v11 = vpop.permute.xlu0 %8185 }
 0x414   : > { %15738 = vmatprep.subr.msk.mxu1 %vm628_vm1, %v22548_v1  ;;  %22559 = vst [vmem:[#allocation58_spill] sm:$0xff] %v18891_v11 }
 0x415   : > { %10844 = vrot.lane.b32.xlu0 %v17350_v63, %s16920_s28 }
 0x416   : > { %15729 = vmatmul.mubr.msk.f32.vlgmr.msra.gmra.mxu1 %vm628_vm1, %v22550_v2  ;;  %v22555_v2 = vld [vmem:[#allocation100_spill] sm:$0xff] }
 0x417   : > { %15739 = vmatpush3.xpose.msk.msra.mxu1 %vm628_vm1, %v22548_v1  ;;  %15742 = vmatprep.mubr.msk.f32.mxu1 %vm628_vm1, %v22551_v58  ;;  %v18885_v1 = vpop.permute.xlu1 %8367  ;;  %v22557_v58 = vld [vmem:[#allocation94_spill] sm:$0xff] }
 0x418   : > { %15740 = vmatprep.subr.msk.mxu1 %vm628_vm1, %v22553_v3  ;;  %22556 = vst [vmem:[#allocation65_spill] sm:$0xff] %v18885_v1  ;;  %v18901_v1 = vpop.permute.xlu0 %8092 }
 0x419   : > { %10749 = vrot.lane.b32.xlu0 %v17309_v34, %s16921_s29  ;;  %22562 = vst [vmem:[#allocation54_spill] sm:$0xff] %v18901_v1 }
 0x41b   : > { %15741 = vmatpush3.xpose.msk.msra.mxu1 %vm628_vm1, %v22553_v3  ;;  %v22560_v3 = vld [vmem:[#allocation102_spill] sm:$0xff]  ;;  %v18897_v25 = vpop.permute.xlu1 %8365 }
 0x41c   : > { %15752 = vmatprep.subr.mxu1 %v22555_v2  ;;  %22561 = vst [vmem:[#allocation67_spill] sm:$0xff] %v18897_v25 }
 0x41d   : > { %10935 = vrot.lane.b32.xlu0 %v17067_v42, %s16920_s28 }
 0x41e   : > { %15743 = vmatmul.mubr.msk.f32.vlgmr.msra.gmra.mxu1 %vm628_vm1, %v22557_v58  ;;  %v18907_v58 = vpop.permute.xlu0 %8276 }
 0x41f   : > { %15753 = vmatpush3.msra.mxu1 %v22555_v2  ;;  %v18905_v2 = vpop.permute.xlu1 %8744  ;;  %22564 = vst [vmem:[#allocation19_spill] sm:$0xff] %v18907_v58 }
 0x420   : > { %15754 = vmatprep.subr.mxu1 %v22558_v13  ;;  %22563 = vst [vmem:[#allocation62_spill] sm:$0xff] %v18905_v2 }
 0x421   : > { %10840 = vrot.lane.b32.xlu0 %v17350_v63, %s16921_s29  ;;  %15755 = vmatpush3.msra.mxu1 %v22558_v13 }
 0x422   : > { %15766 = vmatprep.subr.mxu1 %v22560_v3  ;;  %v18911_v33 = vpop.permute.xlu0 %8183 }
 0x423   : > { %v18909_v11 = vpop.permute.xlu1 %8831  ;;  %22566 = vst [vmem:[#allocation64_spill] sm:$0xff] %v18911_v33 }
 0x424   : > { %22565 = vst [vmem:[#allocation73_spill] sm:$0xff] %v18909_v11  ;;  %v18931_v11 = vpop.f32.mrf.mxu0 }
 0x425   : > { %11026 = vrot.lane.b32.xlu0 %v17097_v46, %s16920_s28  ;;  %22576 = vst [vmem:[#allocation35_spill] sm:$0xff] %v18931_v11 }
 0x426   : > { %v18915_v9 = vpop.permute.xlu0 %8274 }
 0x427   : > { %v18913_v13 = vpop.permute.xlu1 %9005  ;;  %22568 = vst [vmem:[#allocation23_spill] sm:$0xff] %v18915_v9 }
 0x428   : > { %22567 = vst [vmem:[#allocation22_spill] sm:$0xff] %v18913_v13  ;;  %v18935_v13 = vpop.f32.mrf.mxu0 }
 0x429   : > { %10931 = vrot.lane.b32.xlu0 %v17067_v42, %s16921_s29  ;;  %22578 = vst [vmem:[#allocation44_spill] sm:$0xff] %v18935_v13 }
 0x42a   : > { %v18919_v54 = vpop.permute.xlu0 %8363 }
 0x42b   : > { %v18917_v25 = vpop.permute.xlu1 %9092  ;;  %22570 = vst [vmem:[#allocation30_spill] sm:$0xff] %v18919_v54 }
 0x42c   : > { %22569 = vst [vmem:[#allocation75_spill] sm:$0xff] %v18917_v25  ;;  %v18939_v25 = vpop.f32.mrf.mxu0 }
 0x42d   : > { %22580 = vst [vmem:[#allocation32_spill] sm:$0xff] %v18939_v25 }
 0x42e   : > { %v18923_v62 = vpop.permute.xlu0 %8742 }
 0x42f   : > { %v18921_v1 = vpop.permute.xlu1 %9090  ;;  %22572 = vst [vmem:[#allocation20_spill] sm:$0xff] %v18923_v62 }
 0x430   : > { %22571 = vst [vmem:[#allocation70_spill] sm:$0xff] %v18921_v1  ;;  %v18943_v1 = vpop.f32.mrf.mxu0 }
 0x431   : > { %22582 = vst [vmem:[#allocation47_spill] sm:$0xff] %v18943_v1 }
 0x432   : > { %v18927_v2 = vpop.permute.xlu0 %8918 }
 0x433   : > { %v18925_v37 = vpop.permute.xlu1 %9179  ;;  %22574 = vst [vmem:[#allocation33_spill] sm:$0xff] %v18927_v2 }
 0x434   : > { %22573 = vst [vmem:[#allocation81_spill] sm:$0xff] %v18925_v37  ;;  %v18947_v37 = vpop.f32.mrf.mxu0 }
 0x435   : > { %22584 = vst [vmem:[#allocation46_spill] sm:$0xff] %v18947_v37 }
 0x436   : > { %v18933_v33 = vpop.permute.xlu0 %8829  ;;  %v18953_v11 = vpop.f32.mrf.mxu0 }
 0x437   : > { %v18929_v58 = vpop.permute.xlu1 %9266  ;;  %22577 = vst [vmem:[#allocation83_spill] sm:$0xff] %v18933_v33  ;;  %22587 = vst [vmem:[#allocation84_spill] sm:$0xff] %v18953_v11 }
 0x438   : > { %22575 = vst [vmem:[#allocation72_spill] sm:$0xff] %v18929_v58 }
 0x43a   : > { %v18941_v54 = vpop.permute.xlu0 %8916 }
 0x43b   : > { %v18937_v9 = vpop.permute.xlu1 %9177  ;;  %22581 = vst [vmem:[#allocation89_spill] sm:$0xff] %v18941_v54 }
 0x43c   : > { %22579 = vst [vmem:[#allocation78_spill] sm:$0xff] %v18937_v9 }
 0x43e   : > { %v18949_v2 = vpop.permute.xlu0 %9003 }
 0x43f   : > { %v18945_v62 = vpop.permute.xlu1 %9264  ;;  %22585 = vst [vmem:[#allocation97_spill] sm:$0xff] %v18949_v2 }
 0x440   : > { %22583 = vst [vmem:[#allocation80_spill] sm:$0xff] %v18945_v62 }
 0x442   : > { %v18957_v13 = vpop.permute.xlu0 %9353 }
 0x443   : > { %v18951_v58 = vpop.permute.xlu1 %9440  ;;  %22589 = vst [vmem:[#allocation61_spill] sm:$0xff] %v18957_v13 }
 0x444   : > { %22586 = vst [vmem:[#allocation57_spill] sm:$0xff] %v18951_v58 }
 0x446   : > { %v18967_v62 = vpop.permute.xlu0 %9351 }
 0x447   : > { %v18961_v25 = vpop.permute.xlu1 %9438  ;;  %22594 = vst [vmem:[#allocation59_spill] sm:$0xff] %v18967_v62 }
 0x448   : > { %22591 = vst [vmem:[#allocation56_spill] sm:$0xff] %v18961_v25  ;;  %v18983_v25 = vpop.f32.mrf.mxu1 }
 0x449   : > { %22602 = vst [vmem:[#allocation74_spill] sm:$0xff] %v18983_v25 }
 0x44a   : > { %v18989_v62 = vpop.f32.mrf.mxu1 }
 0x44b   : > { %v18971_v2 = vpop.permute.xlu1 %9614  ;;  %22605 = vst [vmem:[#allocation87_spill] sm:$0xff] %v18989_v62 }
 0x44c   : > { %22596 = vst [vmem:[#allocation60_spill] sm:$0xff] %v18971_v2 }
 0x462   : > { %v18955_v33 = vpop.f32.mrf.mxu0 }
 0x463   : > { %22588 = vst [vmem:[#allocation43_spill] sm:$0xff] %v18955_v33  ;;  %v18977_v33 = vpop.permute.xlu0 %9527 }
 0x464   : > { %v18959_v9 = vpop.f32.mrf.mxu0  ;;  %22599 = vst [vmem:[#allocation77_spill] sm:$0xff] %v18977_v33 }
 0x465   : > { %22590 = vst [vmem:[#allocation90_spill] sm:$0xff] %v18959_v9  ;;  %v18981_v9 = vpop.permute.xlu1 %9612 }
 0x466   : > { %v18963_v54 = vpop.f32.mrf.mxu0  ;;  %22601 = vst [vmem:[#allocation79_spill] sm:$0xff] %v18981_v9 }
 0x467   : > { %22592 = vst [vmem:[#allocation93_spill] sm:$0xff] %v18963_v54 }
 0x468   : > { %v18965_v1 = vpop.f32.mrf.mxu0 }
 0x469   : > { %22593 = vst [vmem:[#allocation63_spill] sm:$0xff] %v18965_v1  ;;  %v18987_v1 = vpop.permute.xlu0 %9525 }
 0x46a   : > { %v18969_v37 = vpop.f32.mrf.mxu0  ;;  %22604 = vst [vmem:[#allocation76_spill] sm:$0xff] %v18987_v1 }
 0x46b   : > { %22595 = vst [vmem:[#allocation69_spill] sm:$0xff] %v18969_v37  ;;  %v18991_v37 = vpop.permute.xlu1 %9788 }
 0x46c   : > { %v18973_v58 = vpop.f32.mrf.mxu0  ;;  %22606 = vst [vmem:[#allocation82_spill] sm:$0xff] %v18991_v37 }
 0x46d   : > { %22597 = vst [vmem:[#allocation71_spill] sm:$0xff] %v18973_v58  ;;  %v19007_v25 = vpop.permute.xlu0 %9701 }
 0x46e   : > { %v18975_v11 = vpop.f32.mrf.mxu0  ;;  %22609 = vst [vmem:[#allocation100_spill] sm:$0xff] %v19007_v25 }
 0x46f   : > { %22598 = vst [vmem:[#allocation66_spill] sm:$0xff] %v18975_v11  ;;  %v18998_v11 = vld [vmem:[%s21931_s3 + $0x18] sm:$0xff]  ;;  %v19019_v33 = vpop.permute.xlu1 %9786 }
 0x470   : > { %v18979_v13 = vpop.f32.mrf.mxu0  ;;  %22611 = vst [vmem:[#allocation96_spill] sm:$0xff] %v19019_v33 }
 0x471   : > { %22600 = vst [vmem:[#allocation68_spill] sm:$0xff] %v18979_v13  ;;  %v19000_v13 = vpop.f32.mrf.mxu1 }
 0x472   : > { %v18985_v54 = vpop.f32.mrf.mxu0  ;;  %22608 = vst [vmem:[#allocation91_spill] sm:$0xff] %v19000_v13 }
 0x473   : > { %22603 = vst [vmem:[#allocation85_spill] sm:$0xff] %v18985_v54  ;;  %v19005_v54 = vld [vmem:[%s21931_s3 + $0x10] sm:$0xff] }
 0x474   : > { %v18993_v2 = vpop.f32.mrf.mxu0 }
 0x475   : > { %22607 = vst [vmem:[#allocation86_spill] sm:$0xff] %v18993_v2  ;;  %v19012_v2 = vpop.f32.mrf.mxu1 }
 0x476   : > { %22610 = vst [vmem:[#allocation94_spill] sm:$0xff] %v19012_v2  ;;  %v19032_v2 = vpop.permute.xlu1 %9962 }
 0x477   : > { %v19021_v9 = vpop.f32.mrf.mxu1  ;;  %22615 = vst [vmem:[#allocation173_spill] sm:$0xff] %v19032_v2 }
 0x478   : > { %22612 = vst [vmem:[#allocation102_spill] sm:$0xff] %v19021_v9 }
 0x479   : > { %v19027_v59 = vpop.f32.mrf.mxu1 }
 0x47a   : > { %v15639_v58 = vpop.f32.mrf.mxu0  ;;  %22614 = vst [vmem:[#allocation172_spill] sm:$0xff] %v19027_v59  ;;  %v19047_v59 = vpop.permute.xlu1 %9960 }
 0x47b   : > { %v19010_v62 = vadd.f32 %v15639_v58, %v18998_v11  ;;  %v19025_v58 = vpop.permute.xlu0 %9699  ;;  %v19034_v19 = vpop.f32.mrf.mxu1  ;;  %22619 = vst [vmem:[#allocation177_spill] sm:$0xff] %v19047_v59 }
 0x47c   : > { %v3877_v1 = vpop.f32.mrf.mxu0  ;;  %22613 = vst [vmem:[#allocation171_spill] sm:$0xff] %v19025_v58  ;;  %22616 = vst [vmem:[#allocation174_spill] sm:$0xff] %v19034_v19 }
 0x47d   : > { %v19015_v37 = vadd.f32 %v19005_v54, %v3877_v1  ;;  %v5254_v13 = vsel %vm2047_vm2, %v19010_v62, -inf  ;;  %v19043_v58 = vpop.f32.mrf.mxu1 }
 0x47e   : > { %5255 = vmax.xlane.f32.xlu1 %v5254_v13  ;;  %22618 = vst [vmem:[#allocation176_spill] sm:$0xff] %v19043_v58  ;;  %v19063_v59 = vpop.permute.xlu1 %10207 }
 0x47f   : > { %v5251_v25 = vsel %vm2047_vm2, %v19015_v37, -inf  ;;  %v19049_v33 = vpop.f32.mrf.mxu1  ;;  %22623 = vst [vmem:[#allocation181_spill] sm:$0xff] %v19063_v59 }
 0x480   : > { %5252 = vmax.xlane.f32.xlu0 %v5251_v25  ;;  %v19041_v25 = vpop.permute.xlu0 %9875  ;;  %22620 = vst [vmem:[#allocation178_spill] sm:$0xff] %v19049_v33 }
 0x481   : > { %22617 = vst [vmem:[#allocation175_spill] sm:$0xff] %v19041_v25  ;;  %v19061_v25 = vpop.f32.mrf.mxu1 }
 0x482   : > { %v15653_v41 = vpop.f32.mrf.mxu0  ;;  %22622 = vst [vmem:[#allocation180_spill] sm:$0xff] %v19061_v25  ;;  %v19078_v25 = vpop.permute.xlu1 %10205 }
 0x483   : > { %v19030_v1 = vadd.f32 %v15653_v41, %v18998_v11  ;;  %22627 = vst [vmem:[#allocation185_spill] sm:$0xff] %v19078_v25 }
 0x484   : > { %v4059_v51 = vpop.f32.mrf.mxu0  ;;  %v19054_v15 = vpop.permute.xlu0 %9873 }
 0x485   : > { %v19037_v13 = vadd.f32 %v19005_v54, %v4059_v51  ;;  %v5266_v9 = vsel %vm2047_vm2, %v19030_v1, -inf  ;;  %22621 = vst [vmem:[#allocation179_spill] sm:$0xff] %v19054_v15 }
 0x486   : > { %5267 = vmax.xlane.f32.xlu0 %v5266_v9 }
 0x487   : > { %v5263_v41 = vsel %vm2047_vm2, %v19037_v13, -inf }
 0x488   : > { %v19069_v43 = vpop.permute.xlu0 %10049 }
 0x489   : > { %22625 = vst [vmem:[#allocation183_spill] sm:$0xff] %v19069_v43 }
 0x48a   : > { %v15667_v2 = vpop.f32.mrf.mxu0  ;;  %5264 = vmax.xlane.f32.xlu0 %v5263_v41  ;;  %v19065_v41 = vpop.f32.mrf.mxu1 }
 0x48b   : > { %v19052_v51 = vadd.f32 %v15667_v2, %v18998_v11  ;;  %22624 = vst [vmem:[#allocation182_spill] sm:$0xff] %v19065_v41 }
 0x48c   : > { %v4241_v19 = vpop.f32.mrf.mxu0  ;;  %v19074_v15 = vpop.f32.mrf.mxu1 }
 0x48d   : > { %v19057_v9 = vadd.f32 %v19005_v54, %v4241_v19  ;;  %v5278_v58 = vsel %vm2047_vm2, %v19052_v51, -inf  ;;  %22626 = vst [vmem:[#allocation184_spill] sm:$0xff] %v19074_v15  ;;  %v19082_v41 = vpop.permute.xlu0 %10047 }
 0x48e   : > { %5279 = vmax.xlane.f32.xlu0 %v5278_v58  ;;  %22629 = vst [vmem:[#allocation187_spill] sm:$0xff] %v19082_v41 }
 0x48f   : > { %v5275_v2 = vsel %vm2047_vm2, %v19057_v9, -inf }
 0x491   : > { %v19088_v43 = vpop.permute.xlu0 %10298 }
 0x492   : > { %v15681_v33 = vpop.f32.mrf.mxu0  ;;  %5276 = vmax.xlane.f32.xlu0 %v5275_v2  ;;  %v19086_v2 = vpop.permute.xlu1 %10201  ;;  %22632 = vst [vmem:[#allocation190_spill] sm:$0xff] %v19088_v43 }
 0x493   : > { %v19072_v19 = vadd.f32 %v15681_v33, %v18998_v11  ;;  %22631 = vst [vmem:[#allocation189_spill] sm:$0xff] %v19086_v2 }
 0x495   : > { %v5290_v58 = vsel %vm2047_vm2, %v19072_v19, -inf  ;;  %v19096_v35 = vpop.permute.xlu0 %10203 }
 0x496   : > { %5291 = vmax.xlane.f32.xlu0 %v5290_v58  ;;  %v19092_v57 = vpop.permute.xlu1 %10296  ;;  %22636 = vst [vmem:[#allocation194_spill] sm:$0xff] %v19096_v35 }
 0x497   : > { %v19080_v59 = vpop.f32.mrf.mxu1  ;;  %22634 = vst [vmem:[#allocation192_spill] sm:$0xff] %v19092_v57 }
 0x498   : > { %22628 = vst [vmem:[#allocation186_spill] sm:$0xff] %v19080_v59  ;;  %v4423_v59 = vpop.f32.mrf.mxu0 }
 0x499   : > { %v19084_v36 = vpop.f32.mrf.mxu1  ;;  %v19109_v57 = vadd.f32 %v19005_v54, %v4423_v59  ;;  %v19113_v43 = vpop.permute.xlu0 %10389 }
 0x49a   : > { %22630 = vst [vmem:[#allocation188_spill] sm:$0xff] %v19084_v36  ;;  %v19101_v61 = vpop.permute.xlu1 %10292  ;;  %22638 = vst [vmem:[#allocation196_spill] sm:$0xff] %v19113_v43 }
 0x49b   : > { %22637 = vst [vmem:[#allocation195_spill] sm:$0xff] %v19101_v61  ;;  %v5287_v59 = vsel %vm2047_vm2, %v19109_v57, -inf }
 0x49d   : > { %v19090_v33 = vpop.f32.mrf.mxu1  ;;  %v19130_v43 = vpop.permute.xlu0 %10294 }
 0x49e   : > { %22633 = vst [vmem:[#allocation191_spill] sm:$0xff] %v19090_v33  ;;  %v19115_v2 = vpop.permute.xlu1 %10387  ;;  %22640 = vst [vmem:[#allocation198_spill] sm:$0xff] %v19130_v43 }
 0x49f   : > { %v19094_v15 = vpop.f32.mrf.mxu1  ;;  %22639 = vst [vmem:[#allocation197_spill] sm:$0xff] %v19115_v2 }
 0x4a0   : > { %22635 = vst [vmem:[#allocation193_spill] sm:$0xff] %v19094_v15 }
 0x4a2   : > { %v19139_v30 = vpop.permute.xlu1 %10383 }
 0x4a3   : > { %22641 = vst [vmem:[#allocation199_spill] sm:$0xff] %v19139_v30 }
 0x4a5   : > { %v15646_v25 = vpop.f32.mrf.mxu1 }
 0x4a6   : > { %v19099_v58 = vadd.f32 %v15646_v25, %v18998_v11  ;;  %v15695_v25 = vpop.f32.mrf.mxu0 }
 0x4a7   : > { %v3968_v41 = vpop.f32.mrf.mxu1 }
 0x4a8   : > { %v19104_v36 = vadd.f32 %v19005_v54, %v3968_v41  ;;  %v5260_v33 = vsel %vm2047_vm2, %v19099_v58, -inf  ;;  %v19118_v41 = vadd.f32 %v15695_v25, %v18998_v11 }
 0x4a9   : > { %5261 = vmax.xlane.f32.xlu1 %v5260_v33  ;;  %v4605_v33 = vpop.f32.mrf.mxu0 }
 0x4aa   : > { %v5257_v15 = vsel %vm2047_vm2, %v19104_v36, -inf  ;;  %v19133_v25 = vadd.f32 %v19005_v54, %v4605_v33  ;;  %v19146_v33 = vpop.permute.xlu0 %10480 }
 0x4ab   : > { %5258 = vmax.xlane.f32.xlu0 %v5257_v15  ;;  %v15709_v2 = vpop.f32.mrf.mxu0  ;;  %22642 = vst [vmem:[#allocation200_spill] sm:$0xff] %v19146_v33  ;;  %v19161_v33 = vpop.permute.xlu1 %10478 }
 0x4ac   : > { %22644 = vst [vmem:[#allocation202_spill] sm:$0xff] %v19161_v33 }
 0x4ad   : > { %v15660_v35 = vpop.f32.mrf.mxu1  ;;  %v4787_v43 = vpop.f32.mrf.mxu0 }
 0x4ae   : > { %v19121_v61 = vadd.f32 %v15660_v35, %v18998_v11  ;;  %v5302_v35 = vsel %vm2047_vm2, %v19118_v41, -inf }
 0x4af   : > { %v4150_v32 = vpop.f32.mrf.mxu1  ;;  %5288 = vmax.xlane.f32.xlu0 %v5287_v59  ;;  %v15723_v50 = vpop.f32.mrf.mxu0 }
 0x4b0   : > { %v19126_v23 = vadd.f32 %v19005_v54, %v4150_v32  ;;  %v5272_v15 = vsel %vm2047_vm2, %v19121_v61, -inf  ;;  %v19142_v32 = vadd.f32 %v15709_v2, %v18998_v11  ;;  %v19157_v2 = vadd.f32 %v19005_v54, %v4787_v43 }
 0x4b1   : > { %5273 = vmax.xlane.f32.xlu1 %v5272_v15  ;;  %v5299_v15 = vsel %vm2047_vm2, %v19133_v25, -inf }
 0x4b2   : > { %v5269_v59 = vsel %vm2047_vm2, %v19126_v23, -inf  ;;  %22643 = vst [vmem:[#allocation201_spill] sm:$0xff] %v19157_v2  ;;  %v5314_v30 = vsel %vm2047_vm2, %v19142_v32, -inf  ;;  %v5311_v43 = vsel %vm2047_vm2, %v19157_v2, -inf }
 0x4b3   : > { %5303 = vmax.xlane.f32.xlu0 %v5302_v35 }
 0x4b5   : > { %5270 = vmax.xlane.f32.xlu1 %v5269_v59 }
 0x4b6   : > { %v15674_v45 = vpop.f32.mrf.mxu1 }
 0x4b7   : > { %v19149_v39 = vadd.f32 %v15674_v45, %v18998_v11  ;;  %5300 = vmax.xlane.f32.xlu0 %v5299_v15  ;;  %v19163_v45 = vpop.permute.xlu0 %10385 }
 0x4b8   : > { %v4332_v35 = vpop.f32.mrf.mxu1  ;;  %22645 = vst [vmem:[#allocation203_spill] sm:$0xff] %v19163_v45 }
 0x4b9   : > { %v19152_v28 = vadd.f32 %v19005_v54, %v4332_v35  ;;  %v5284_v59 = vsel %vm2047_vm2, %v19149_v39, -inf  ;;  %v19168_v35 = vadd.f32 %v15723_v50, %v18998_v11 }
 0x4ba   : > { %5285 = vmax.xlane.f32.xlu1 %v5284_v59  ;;  %v4969_v59 = vpop.f32.mrf.mxu0 }
 0x4bb   : > { %5315 = vmax.xlane.f32.xlu0 %v5314_v30  ;;  %v5281_v15 = vsel %vm2047_vm2, %v19152_v28, -inf  ;;  %22646 = vst [vmem:[#allocation204_spill] sm:$0xff] %v19168_v35  ;;  %v19175_v30 = vpop.permute.xlu1 %10474  ;;  %v19183_v44 = vadd.f32 %v19005_v54, %v4969_v59  ;;  %v19187_v2 = vpop.permute.xlu0 %10571 }
 0x4bc   : > { %22648 = vst [vmem:[#allocation206_spill] sm:$0xff] %v19175_v30  ;;  %22651 = vst [vmem:[#allocation209_spill] sm:$0xff] %v19187_v2 }
 0x4bd   : > { %22650 = vst [vmem:[#allocation208_spill] sm:$0xff] %v19183_v44  ;;  %v5323_v59 = vsel %vm2047_vm2, %v19183_v44, -inf }
 0x4be   : > { %v15688_v29 = vpop.f32.mrf.mxu1  ;;  %5282 = vmax.xlane.f32.xlu1 %v5281_v15  ;;  %v5326_v15 = vsel %vm2047_vm2, %v19168_v35, -inf }
 0x4bf   : > { %v19173_v21 = vadd.f32 %v15688_v29, %v18998_v11  ;;  %5312 = vmax.xlane.f32.xlu0 %v5311_v43  ;;  %v15737_v29 = vpop.f32.mrf.mxu0 }
 0x4c0   : > { %v4514_v33 = vpop.f32.mrf.mxu1 }
 0x4c1   : > { %22647 = vst [vmem:[#allocation205_spill] sm:$0xff] %v19173_v21  ;;  %v19178_v45 = vadd.f32 %v19005_v54, %v4514_v33  ;;  %v5296_v50 = vsel %vm2047_vm2, %v19173_v21, -inf  ;;  %v19192_v33 = vadd.f32 %v15737_v29, %v18998_v11  ;;  %v19196_v21 = vpop.permute.xlu1 %10569 }
 0x4c2   : > { %5297 = vmax.xlane.f32.xlu1 %v5296_v50  ;;  %22653 = vst [vmem:[#allocation211_spill] sm:$0xff] %v19196_v21  ;;  %v5151_v50 = vpop.f32.mrf.mxu0 }
 0x4c3   : > { %22649 = vst [vmem:[#allocation207_spill] sm:$0xff] %v19178_v45  ;;  %5327 = vmax.xlane.f32.xlu0 %v5326_v15  ;;  %v5293_v43 = vsel %vm2047_vm2, %v19178_v45, -inf  ;;  %22652 = vst [vmem:[#allocation210_spill] sm:$0xff] %v19192_v33  ;;  %v19201_v15 = vpop.permute.xlu0 %10476  ;;  %v5338_v21 = vsel %vm2047_vm2, %v19192_v33, -inf }
 0x4c4   : > { %22654 = vst [vmem:[#allocation212_spill] sm:$0xff] %v19201_v15 }
 0x4c6   : > { %v15702_v30 = vpop.f32.mrf.mxu1  ;;  %5294 = vmax.xlane.f32.xlu1 %v5293_v43  ;;  %v19209_v43 = vadd.f32 %v19005_v54, %v5151_v50 }
 0x4c7   : > { %v19199_v35 = vadd.f32 %v15702_v30, %v18998_v11  ;;  %5324 = vmax.xlane.f32.xlu0 %v5323_v59  ;;  %v19213_v30 = vpop.permute.xlu1 %10565  ;;  %v19219_v44 = vpop.permute.xlu0 %10662 }
 0x4c8   : > { %v4696_v2 = vpop.f32.mrf.mxu1  ;;  %22656 = vst [vmem:[#allocation214_spill] sm:$0xff] %v19209_v43  ;;  %22657 = vst [vmem:[#allocation215_spill] sm:$0xff] %v19213_v30 }
 0x4c9   : > { %v19204_v45 = vadd.f32 %v19005_v54, %v4696_v2  ;;  %v5308_v29 = vsel %vm2047_vm2, %v19199_v35, -inf  ;;  %v5335_v2 = vsel %vm2047_vm2, %v19209_v43, -inf  ;;  %22658 = vst [vmem:[#allocation216_spill] sm:$0xff] %v19219_v44 }
 0x4ca   : > { %5309 = vmax.xlane.f32.xlu1 %v5308_v29 }
 0x4cb   : > { %22655 = vst [vmem:[#allocation213_spill] sm:$0xff] %v19204_v45  ;;  %5339 = vmax.xlane.f32.xlu0 %v5338_v21  ;;  %v5305_v59 = vsel %vm2047_vm2, %v19204_v45, -inf  ;;  %v19229_v30 = vpop.permute.xlu1 %10660 }
 0x4cc   : > { %22661 = vst [vmem:[#allocation219_spill] sm:$0xff] %v19229_v30 }
 0x4ce   : > { %v15716_v15 = vpop.f32.mrf.mxu1  ;;  %5306 = vmax.xlane.f32.xlu1 %v5305_v59  ;;  %v19231_v59 = vpop.permute.xlu0 %10567 }
 0x4cf   : > { %v19222_v50 = vadd.f32 %v15716_v15, %v18998_v11  ;;  %5336 = vmax.xlane.f32.xlu0 %v5335_v2  ;;  %22662 = vst [vmem:[#allocation220_spill] sm:$0xff] %v19231_v59  ;;  %v19238_v45 = vpop.permute.xlu1 %10656 }
 0x4d0   : > { %v4878_v29 = vpop.f32.mrf.mxu1  ;;  %22663 = vst [vmem:[#allocation221_spill] sm:$0xff] %v19238_v45 }
 0x4d1   : > { %22659 = vst [vmem:[#allocation217_spill] sm:$0xff] %v19222_v50  ;;  %v19225_v33 = vadd.f32 %v19005_v54, %v4878_v29  ;;  %v5320_v21 = vsel %vm2047_vm2, %v19222_v50, -inf }
 0x4d2   : > { %5321 = vmax.xlane.f32.xlu1 %v5320_v21  ;;  %v19245_v30 = vpop.permute.xlu0 %10753 }
 0x4d3   : > { %22660 = vst [vmem:[#allocation218_spill] sm:$0xff] %v19225_v33  ;;  %v5317_v43 = vsel %vm2047_vm2, %v19225_v33, -inf  ;;  %22664 = vst [vmem:[#allocation222_spill] sm:$0xff] %v19245_v30  ;;  %v19249_v33 = vpop.permute.xlu1 %10751 }
 0x4d4   : > { %22665 = vst [vmem:[#allocation223_spill] sm:$0xff] %v19249_v33 }
 0x4d6   : > { %v15730_v44 = vpop.f32.mrf.mxu1  ;;  %5318 = vmax.xlane.f32.xlu1 %v5317_v43  ;;  %v19254_v50 = vpop.permute.xlu0 %10658 }
 0x4d7   : > { %v19236_v15 = vadd.f32 %v15730_v44, %v18998_v11  ;;  %22666 = vst [vmem:[#allocation224_spill] sm:$0xff] %v19254_v50 }
 0x4d8   : > { %v5060_v2 = vpop.f32.mrf.mxu1 }
 0x4d9   : > { %v19241_v29 = vadd.f32 %v19005_v54, %v5060_v2  ;;  %v5332_v21 = vsel %vm2047_vm2, %v19236_v15, -inf }
 0x4da   : > { %5333 = vmax.xlane.f32.xlu1 %v5332_v21  ;;  %v19265_v33 = vpop.permute.xlu0 %10844 }
 0x4db   : > { %v5329_v59 = vsel %vm2047_vm2, %v19241_v29, -inf  ;;  %22667 = vst [vmem:[#allocation225_spill] sm:$0xff] %v19265_v33 }
 0x4dc   : > { %5330 = vmax.xlane.f32.xlu0 %v5329_v59  ;;  %v19263_v59 = vpop.permute.xlu1 %10747 }
 0x4de   : > { %v15744_v43 = vpop.f32.mrf.mxu1 }
 0x4df   : > { %v19252_v44 = vadd.f32 %v15744_v43, %v18998_v11  ;;  %v19269_v43 = vpop.permute.xlu0 %10749 }
 0x4e0   : > { %v5242_v45 = vpop.f32.mrf.mxu1  ;;  %v19267_v11 = vpop.permute.xlu1 %10842  ;;  %22669 = vst [vmem:[#allocation227_spill] sm:$0xff] %v19269_v43 }
 0x4e1   : > { %v19257_v2 = vadd.f32 %v19005_v54, %v5242_v45  ;;  %v5344_v21 = vsel %vm2047_vm2, %v19252_v44, -inf  ;;  %22668 = vst [vmem:[#allocation226_spill] sm:$0xff] %v19267_v11 }
 0x4e2   : > { %5345 = vmax.xlane.f32.xlu0 %v5344_v21 }
 0x4e3   : > { %v5341_v30 = vsel %vm2047_vm2, %v19257_v2, -inf  ;;  %v19273_v54 = vpop.permute.xlu0 %10935 }
 0x4e4   : > { %5342 = vmax.xlane.f32.xlu1 %v5341_v30  ;;  %v19271_v50 = vpop.permute.xlu1 %10838  ;;  %22671 = vst [vmem:[#allocation229_spill] sm:$0xff] %v19273_v54 }
 0x4e5   : > { %22670 = vst [vmem:[#allocation228_spill] sm:$0xff] %v19271_v50 }
 0x4e7   : > { %v19281_v30 = vpop.permute.xlu0 %10840 }
 0x4e8   : > { %v19277_v45 = vpop.permute.xlu1 %10933  ;;  %22673 = vst [vmem:[#allocation231_spill] sm:$0xff] %v19281_v30 }
 0x4e9   : > { %22672 = vst [vmem:[#allocation230_spill] sm:$0xff] %v19277_v45 }
 0x4eb   : > { %v19291_v11 = vpop.permute.xlu0 %11026 }
 0x4ec   : > { %v19287_v21 = vpop.permute.xlu1 %10929  ;;  %22675 = vst [vmem:[#allocation233_spill] sm:$0xff] %v19291_v11 }
 0x4ed   : > { %22674 = vst [vmem:[#allocation232_spill] sm:$0xff] %v19287_v21 }
 0x4ef   : > { %v19301_v50 = vpop.permute.xlu0 %10931 }
 0x4f0   : > { %v19297_v30 = vpop.permute.xlu1 %11024  ;;  %22677 = vst [vmem:[#allocation235_spill] sm:$0xff] %v19301_v50 }
 0x4f1   : > { %22676 = vst [vmem:[#allocation234_spill] sm:$0xff] %v19297_v30 }
 0x4f5   : > { %11020 = vrot.lane.b32.xlu1 %v17126_v52, %s16921_s29 }
 0x4f8   : > { %11117 = vrot.lane.b32.xlu0 %v17140_v56, %s16920_s28 }
 0x4f9   : > { %11115 = vrot.lane.b32.xlu1 %v17162_v60, %s16920_s28 }
 0x4fc   : > { %11022 = vrot.lane.b32.xlu0 %v17097_v46, %s16921_s29 }
 0x4fd   : > { %11111 = vrot.lane.b32.xlu1 %v17162_v60, %s16921_s29 }
 0x500   : > { %11208 = vrot.lane.b32.xlu0 %v17180_v0, %s16920_s28 }
 0x501   : > { %11206 = vrot.lane.b32.xlu1 %v17198_v4, %s16920_s28 }
 0x504   : > { %11113 = vrot.lane.b32.xlu0 %v17140_v56, %s16921_s29 }
 0x505   : > { %11202 = vrot.lane.b32.xlu1 %v17198_v4, %s16921_s29 }
 0x507   : > { %v5256_v33 = vpop.xlane.xlu1 %5255 }
 0x508   : > { %11299 = vrot.lane.b32.xlu0 %v17212_v8, %s16920_s28  ;;  %v5348_v11 = vsub.f32 %v19010_v62, %v5256_v33 }
 0x509   : > { %11297 = vrot.lane.b32.xlu1 %v17234_v12, %s16920_s28  ;;  %v5253_v45 = vpop.xlane.xlu0 %5252 }
 0x50a   : > { %v5347_v30 = vsub.f32 %v19015_v37, %v5253_v45  ;;  %v5381_v21 = vmul.f32 1.442695, %v5348_v11 }
 0x50c   : > { %11204 = vrot.lane.b32.xlu0 %v17180_v0, %s16921_s29  ;;  %v5379_v50 = vmul.f32 1.442695, %v5347_v30 }
 0x50d   : > { %11293 = vrot.lane.b32.xlu1 %v17234_v12, %s16921_s29 }
 0x50e   : > { %16455 = vpow2.f32 %v5379_v50 }
 0x50f   : > { %16457 = vpow2.f32 %v5381_v21  ;;  %v5268_v43 = vpop.xlane.xlu0 %5267 }
 0x510   : > { %11390 = vrot.lane.b32.xlu0 %v17252_v18, %s16920_s28  ;;  %v5352_v62 = vsub.f32 %v19030_v1, %v5268_v43 }
 0x511   : > { %11388 = vrot.lane.b32.xlu1 %v17279_v26, %s16920_s28 }
 0x512   : > { %v5389_v11 = vmul.f32 1.442695, %v5352_v62 }
 0x513   : > { %v5265_v37 = vpop.xlane.xlu0 %5264 }
 0x514   : > { %11295 = vrot.lane.b32.xlu0 %v17212_v8, %s16921_s29  ;;  %v5351_v33 = vsub.f32 %v19037_v13, %v5265_v37  ;;  %v22678_v37 = vld [vmem:[#allocation99_spill] sm:$0xff] }
 0x515   : > { %11384 = vrot.lane.b32.xlu1 %v17279_v26, %s16921_s29 }
 0x516   : > { %v5387_v50 = vmul.f32 1.442695, %v5351_v33 }
 0x517   : > { %v5280_v45 = vpop.xlane.xlu0 %5279 }
 0x518   : > { %16459 = vpow2.f32 %v5387_v50  ;;  %11481 = vrot.lane.b32.xlu0 %v17320_v40, %s16920_s28  ;;  %v5356_v1 = vsub.f32 %v19052_v51, %v5280_v45  ;;  %v22681_v50 = vld [vmem:[#allocation110_spill] sm:$0xff] }
 0x519   : > { %16461 = vpow2.f32 %v5389_v11  ;;  %11479 = vrot.lane.b32.xlu1 %v17386_v24, %s16920_s28  ;;  %v22680_v11 = vld [vmem:[#allocation106_spill] sm:$0xff] }
 0x51a   : > { %v5397_v62 = vmul.f32 1.442695, %v5356_v1 }
 0x51b   : > { %v19330_v43 = vpop.eup %16455  ;;  %v5277_v30 = vpop.xlane.xlu0 %5276 }
 0x51c   : > { %v19332_v13 = vpop.eup %16457  ;;  %11386 = vrot.lane.b32.xlu0 %v17252_v18, %s16921_s29  ;;  %v5355_v21 = vsub.f32 %v19057_v9, %v5277_v30  ;;  %15749 = vmatprep.mubr.msk.f32.mxu0 %vm2047_vm2, %v19330_v43  ;;  %v22679_v9 = vld [vmem:[#allocation104_spill] sm:$0xff] }
 0x51d   : > { %11475 = vrot.lane.b32.xlu1 %v17386_v24, %s16921_s29  ;;  %15750 = vmatmul.mubr.msk.f32.vlgmr.msra.gmra.mxu0 %vm2047_vm2, %v19332_v13 }
 0x51e   : > { %v5395_v51 = vmul.f32 1.442695, %v5355_v21  ;;  %15760 = vmatpush3.msra.mxu0 %v22527_v17  ;;  %v22683_v21 = vld [vmem:[#allocation118_spill] sm:$0xff] }
 0x51f   : > { %15761 = vmatprep.subr.mxu0 %v22678_v37 }
 0x520   : > { %16463 = vpow2.f32 %v5395_v51  ;;  %11572 = vrot.lane.b32.xlu0 %v17361_v7, %s16920_s28  ;;  %15762 = vmatpush3.msra.mxu0 %v22678_v37 }
 0x521   : > { %16465 = vpow2.f32 %v5397_v62  ;;  %11570 = vrot.lane.b32.xlu1 %v17406_v47, %s16920_s28  ;;  %15773 = vmatprep.subr.mxu0 %v22679_v9 }
 0x524   : > { %11477 = vrot.lane.b32.xlu0 %v17320_v40, %s16921_s29 }
 0x525   : > { %v19353_v33 = vpop.eup %16459  ;;  %11568 = vrot.lane.b32.xlu1 %v17361_v7, %s16921_s29 }
 0x526   : > { %v19357_v17 = vpop.eup %16461  ;;  %15763 = vmatprep.mubr.msk.f32.mxu0 %vm2047_vm2, %v19353_v33 }
 0x527   : > { %15764 = vmatmul.mubr.msk.f32.vlgmr.msra.gmra.mxu0 %vm2047_vm2, %v19357_v17 }
 0x528   : > { %11566 = vrot.lane.b32.xlu0 %v17406_v47, %s16921_s29  ;;  %15774 = vmatpush3.msra.mxu0 %v22679_v9 }
 0x529   : > { %11947 = vrot.lane.b32.xlu1 %v17061_v38, %s16922_s11  ;;  %15775 = vmatprep.subr.mxu0 %v22680_v11  ;;  %v5292_v38 = vpop.xlane.xlu0 %5291 }
 0x52a   : > { %15776 = vmatpush3.msra.mxu0 %v22680_v11 }
 0x52b   : > { %15787 = vmatprep.subr.mxu0 %v22681_v50 }
 0x52c   : > { %11945 = vrot.lane.b32.xlu0 %v22434_v5, %s16922_s11  ;;  %v22682_v5 = vld [vmem:[#allocation115_spill] sm:$0xff] }
 0x52d   : > { %v19373_v45 = vpop.eup %16463  ;;  %12034 = vrot.lane.b32.xlu1 %v22394_v55, %s16922_s11 }
 0x52e   : > { %v19377_v1 = vpop.eup %16465  ;;  %15777 = vmatprep.mubr.msk.f32.mxu0 %vm2047_vm2, %v19373_v45 }
 0x52f   : > { %15778 = vmatmul.mubr.msk.f32.vlgmr.msra.gmra.mxu0 %vm2047_vm2, %v19377_v1 }
 0x530   : > { %12121 = vrot.lane.b32.xlu0 %v22439_v48, %s16922_s11  ;;  %15788 = vmatpush3.msra.mxu0 %v22681_v50 }
 0x531   : > { %12032 = vrot.lane.b32.xlu1 %v22444_v31, %s16922_s11  ;;  %15789 = vmatprep.subr.mxu0 %v22682_v5  ;;  %v5360_v31 = vsub.f32 %v19072_v19, %v5292_v38 }
 0x532   : > { %v5262_v55 = vpop.xlane.xlu1 %5261  ;;  %15790 = vmatpush3.msra.mxu0 %v22682_v5 }
 0x533   : > { %v5350_v30 = vsub.f32 %v19099_v58, %v5262_v55  ;;  %15801 = vmatprep.subr.mxu0 %v22683_v21  ;;  %v5405_v11 = vmul.f32 1.442695, %v5360_v31 }
 0x534   : > { %12208 = vrot.lane.b32.xlu0 %v22396_v49, %s16922_s11  ;;  %v5259_v62 = vpop.xlane.xlu0 %5258 }
 0x535   : > { %12119 = vrot.lane.b32.xlu1 %v22449_v20, %s16922_s11  ;;  %v5349_v48 = vsub.f32 %v19104_v36, %v5259_v62  ;;  %v5385_v51 = vmul.f32 1.442695, %v5350_v30 }
 0x537   : > { %v5383_v37 = vmul.f32 1.442695, %v5349_v48 }
 0x538   : > { %12295 = vrot.lane.b32.xlu0 %v17205_v6, %s16922_s11  ;;  %v5289_v9 = vpop.xlane.xlu0 %5288 }
 0x539   : > { %16467 = vpow2.f32 %v5383_v37  ;;  %12206 = vrot.lane.b32.xlu1 %v22454_v16, %s16922_s11  ;;  %v5359_v49 = vsub.f32 %v19109_v57, %v5289_v9 }
 0x53a   : > { %16469 = vpow2.f32 %v5385_v51  ;;  %v5274_v58 = vpop.xlane.xlu1 %5273 }
 0x53b   : > { %v5403_v20 = vmul.f32 1.442695, %v5359_v49  ;;  %v5354_v36 = vsub.f32 %v19121_v61, %v5274_v58  ;;  %v22687_v49 = vld [vmem:[#allocation108_spill] sm:$0xff] }
 0x53c   : > { %12382 = vrot.lane.b32.xlu0 %v17241_v14, %s16922_s11  ;;  %v5304_v19 = vpop.xlane.xlu0 %5303 }
 0x53d   : > { %16471 = vpow2.f32 %v5403_v20  ;;  %12293 = vrot.lane.b32.xlu1 %v22398_v22, %s16922_s11  ;;  %v5393_v50 = vmul.f32 1.442695, %v5354_v36  ;;  %v5364_v57 = vsub.f32 %v19118_v41, %v5304_v19  ;;  %v22689_v20 = vld [vmem:[#allocation204_spill] sm:$0xff] }
 0x53e   : > { %v5271_v6 = vpop.xlane.xlu1 %5270  ;;  %16473 = vpow2.f32 %v5405_v11  ;;  %v22688_v11 = vld [vmem:[#allocation3_spill] sm:$0xff] }
 0x53f   : > { %v5353_v16 = vsub.f32 %v19126_v23, %v5271_v6  ;;  %v5413_v55 = vmul.f32 1.442695, %v5364_v57  ;;  %v22690_v6 = vld [vmem:[#allocation120_spill] sm:$0xff] }
 0x540   : > { %12469 = vrot.lane.b32.xlu0 %v17309_v34, %s16922_s11  ;;  %v5301_v38 = vpop.xlane.xlu0 %5300 }
 0x541   : > { %v5391_v61 = vmul.f32 1.442695, %v5353_v16  ;;  %12380 = vrot.lane.b32.xlu1 %v22403_v10, %s16922_s11  ;;  %v5363_v14 = vsub.f32 %v19133_v25, %v5301_v38 }
 0x543   : > { %16475 = vpow2.f32 %v5391_v61  ;;  %v5411_v5 = vmul.f32 1.442695, %v5363_v14  ;;  %v5286_v22 = vpop.xlane.xlu1 %5285  ;;  %v22693_v14 = vld [vmem:[#allocation208_spill] sm:$0xff] }
 0x544   : > { %16477 = vpow2.f32 %v5393_v50  ;;  %v5358_v23 = vsub.f32 %v19149_v39, %v5286_v22  ;;  %12556 = vrot.lane.b32.xlu0 %v17350_v63, %s16922_s11  ;;  %v5316_v41 = vpop.xlane.xlu0 %5315  ;;  %v22684_v63 = vld [vmem:[#allocation201_spill] sm:$0xff] }
 0x545   : > { %16479 = vpow2.f32 %v5411_v5  ;;  %12467 = vrot.lane.b32.xlu1 %v17339_v53, %s16922_s11  ;;  %v5368_v39 = vsub.f32 %v19142_v32, %v5316_v41  ;;  %v22685_v32 = vld [vmem:[#allocation101_spill] sm:$0xff] }
 0x546   : > { %v19420_v34 = vpop.eup %16467  ;;  %v5401_v25 = vmul.f32 1.442695, %v5358_v23  ;;  %16481 = vpow2.f32 %v5413_v55 }
 0x547   : > { %v19422_v10 = vpop.eup %16469  ;;  %v5283_v30 = vpop.xlane.xlu1 %5282  ;;  %15756 = vmatprep.mubr.msk.f32.mxu1 %vm2047_vm2, %v19420_v34 }
 0x548   : > { %v5357_v62 = vsub.f32 %v19152_v28, %v5283_v30  ;;  %12643 = vrot.lane.b32.xlu0 %v17067_v42, %s16922_s11  ;;  %15757 = vmatmul.mubr.msk.f32.vlgmr.msra.gmra.mxu1 %vm2047_vm2, %v19422_v10  ;;  %v5313_v53 = vpop.xlane.xlu0 %5312  ;;  %16483 = vpow2.f32 %v5401_v25 }
 0x549   : > { %12554 = vrot.lane.b32.xlu1 %v17394_v27, %s16922_s11  ;;  %15767 = vmatpush3.msra.mxu1 %v22560_v3  ;;  %v5367_v48 = vsub.f32 %v22684_v63, %v5313_v53  ;;  %v5421_v27 = vmul.f32 1.442695, %v5368_v39  ;;  %v22686_v3 = vld [vmem:[#allocation205_spill] sm:$0xff]  ;;  %v22694_v39 = vld [vmem:[#allocation112_spill] sm:$0xff] }
 0x54a   : > { %v19436_v51 = vpop.eup %16471  ;;  %v5399_v31 = vmul.f32 1.442695, %v5357_v62  ;;  %15768 = vmatprep.subr.mxu1 %v22685_v32 }
 0x54b   : > { %v5419_v28 = vmul.f32 1.442695, %v5367_v48  ;;  %v5298_v37 = vpop.xlane.xlu1 %5297  ;;  %15769 = vmatpush3.msra.mxu1 %v22685_v32  ;;  %15791 = vmatprep.mubr.msk.f32.mxu0 %vm2047_vm2, %v19436_v51  ;;  %v19442_v42 = vpop.eup %16473  ;;  %v22698_v32 = vld [vmem:[#allocation213_spill] sm:$0xff] }
 0x54c   : > { %16485 = vpow2.f32 %v5399_v31  ;;  %v5362_v9 = vsub.f32 %v22686_v3, %v5298_v37  ;;  %12730 = vrot.lane.b32.xlu0 %v17097_v46, %s16922_s11  ;;  %15780 = vmatprep.subr.mxu1 %v22687_v49  ;;  %v5328_v58 = vpop.xlane.xlu0 %5327  ;;  %v22691_v46 = vld [vmem:[#allocation207_spill] sm:$0xff]  ;;  %v22697_v31 = vld [vmem:[#allocation124_spill] sm:$0xff] }
 0x54d   : > { %16487 = vpow2.f32 %v5419_v28  ;;  %12641 = vrot.lane.b32.xlu1 %v22688_v11, %s16922_s11  ;;  %15792 = vmatmul.mubr.msk.f32.vlgmr.msra.gmra.mxu0 %vm2047_vm2, %v19442_v42  ;;  %v5372_v36 = vsub.f32 %v22689_v20, %v5328_v58  ;;  %v22701_v11 = vld [vmem:[#allocation126_spill] sm:$0xff] }
 0x54e   : > { %15802 = vmatpush3.msra.mxu0 %v22683_v21  ;;  %v5409_v19 = vmul.f32 1.442695, %v5362_v9  ;;  %16489 = vpow2.f32 %v5421_v27  ;;  %v22692_v21 = vld [vmem:[#allocation122_spill] sm:$0xff] }
 0x54f   : > { %15803 = vmatprep.subr.mxu0 %v22690_v6  ;;  %v5295_v16 = vpop.xlane.xlu1 %5294  ;;  %v5429_v55 = vmul.f32 1.442695, %v5372_v36  ;;  %v22699_v27 = vld [vmem:[#allocation214_spill] sm:$0xff]  ;;  %v22703_v36 = vld [vmem:[#allocation217_spill] sm:$0xff] }
 0x550   : > { %v19455_v50 = vpop.eup %16475  ;;  %v5361_v57 = vsub.f32 %v22691_v46, %v5295_v16  ;;  %15804 = vmatpush3.msra.mxu0 %v22690_v6  ;;  %12904 = vrot.lane.b32.xlu0 %v17180_v0, %s16922_s11  ;;  %v5325_v38 = vpop.xlane.xlu0 %5324  ;;  %16491 = vpow2.f32 %v5409_v19  ;;  %v22704_v6 = vld [vmem:[#allocation105_spill] sm:$0xff]  ;;  %v22705_v16 = vld [vmem:[#allocation107_spill] sm:$0xff] }
 0x551   : > { %v19461_v61 = vpop.eup %16477  ;;  %15815 = vmatprep.subr.mxu0 %v22692_v21  ;;  %12728 = vrot.lane.b32.xlu1 %v17126_v52, %s16922_s11  ;;  %v5371_v5 = vsub.f32 %v22693_v14, %v5325_v38  ;;  %v22707_v38 = vld [vmem:[#allocation218_spill] sm:$0xff] }
 0x552   : > { %v19467_v22 = vpop.eup %16479  ;;  %v5407_v23 = vmul.f32 1.442695, %v5361_v57  ;;  %15770 = vmatprep.mubr.msk.f32.mxu1 %vm2047_vm2, %v19455_v50  ;;  %v22706_v57 = vld [vmem:[#allocation128_spill] sm:$0xff] }
 0x553   : > { %v5427_v41 = vmul.f32 1.442695, %v5371_v5  ;;  %v5310_v0 = vpop.xlane.xlu1 %5309  ;;  %15771 = vmatmul.mubr.msk.f32.vlgmr.msra.gmra.mxu1 %vm2047_vm2, %v19461_v61  ;;  %15805 = vmatprep.mubr.msk.f32.mxu0 %vm2047_vm2, %v19467_v22  ;;  %v19479_v30 = vpop.eup %16481 }
 0x554   : > { %16493 = vpow2.f32 %v5407_v23  ;;  %v5366_v52 = vsub.f32 %v19199_v35, %v5310_v0  ;;  %15781 = vmatpush3.msra.mxu1 %v22687_v49  ;;  %12991 = vrot.lane.b32.xlu0 %v17212_v8, %s16922_s11  ;;  %v5340_v25 = vpop.xlane.xlu0 %5339  ;;  %v22695_v35 = vld [vmem:[#allocation210_spill] sm:$0xff]  ;;  %v22696_v8 = vld [vmem:[#allocation103_spill] sm:$0xff] }
 0x555   : > { %16495 = vpow2.f32 %v5427_v41  ;;  %15782 = vmatprep.subr.mxu1 %v22694_v39  ;;  %12817 = vrot.lane.b32.xlu1 %v17140_v56, %s16922_s11  ;;  %v5376_v62 = vsub.f32 %v22695_v35, %v5340_v25  ;;  %v19490_v48 = vpop.eup %16483  ;;  %v22709_v23 = vld [vmem:[#allocation130_spill] sm:$0xff] }
 0x556   : > { %16497 = vpow2.f32 %v5429_v55  ;;  %15783 = vmatpush3.msra.mxu1 %v22694_v39  ;;  %15806 = vmatmul.mubr.msk.f32.vlgmr.msra.gmra.mxu0 %vm2047_vm2, %v19479_v30  ;;  %v5417_v53 = vmul.f32 1.442695, %v5366_v52  ;;  %v22711_v52 = vld [vmem:[#allocation109_spill] sm:$0xff] }
 0x557   : > { %15816 = vmatpush3.msra.mxu0 %v22692_v21  ;;  %15794 = vmatprep.subr.mxu1 %v22696_v8  ;;  %v5307_v63 = vpop.xlane.xlu1 %5306  ;;  %v5437_v49 = vmul.f32 1.442695, %v5376_v62  ;;  %v22713_v62 = vld [vmem:[#allocation132_spill] sm:$0xff] }
 0x558   : > { %15817 = vmatprep.subr.mxu0 %v22697_v31  ;;  %v5365_v56 = vsub.f32 %v22698_v32, %v5307_v63  ;;  %13078 = vrot.lane.b32.xlu0 %v17252_v18, %s16922_s11  ;;  %v5337_v28 = vpop.xlane.xlu0 %5336  ;;  %16499 = vpow2.f32 %v5417_v53 }
 0x559   : > { %v19496_v37 = vpop.eup %16485  ;;  %15818 = vmatpush3.msra.mxu0 %v22697_v31  ;;  %12815 = vrot.lane.b32.xlu1 %v17162_v60, %s16922_s11  ;;  %v5375_v3 = vsub.f32 %v22699_v27, %v5337_v28 }
 0x55a   : > { %v19502_v9 = vpop.eup %16487  ;;  %v5415_v58 = vmul.f32 1.442695, %v5365_v56  ;;  %15829 = vmatprep.subr.mxu0 %v22701_v11  ;;  %15784 = vmatprep.mubr.msk.f32.mxu1 %vm2047_vm2, %v19496_v37  ;;  %v22719_v56 = vld [vmem:[#allocation114_spill] sm:$0xff] }
 0x55b   : > { %22700 = vst [vmem:[#allocation99_spill] sm:$0xff] %v19502_v9  ;;  %v5435_v18 = vmul.f32 1.442695, %v5375_v3  ;;  %v5322_v20 = vpop.xlane.xlu1 %5321  ;;  %15785 = vmatmul.mubr.msk.f32.vlgmr.msra.gmra.mxu1 %vm2047_vm2, %v19490_v48  ;;  %15819 = vmatprep.mubr.msk.f32.mxu0 %vm2047_vm2, %v19502_v9  ;;  %v19514_v60 = vpop.eup %16489  ;;  %v22720_v3 = vld [vmem:[#allocation138_spill] sm:$0xff] }
 0x55c   : > { %16501 = vpow2.f32 %v5415_v58  ;;  %15795 = vmatpush3.msra.mxu1 %v22696_v8  ;;  %13165 = vrot.lane.b32.xlu0 %v17320_v40, %s16922_s11  ;;  %22702 = vst [vmem:[#allocation104_spill] sm:$0xff] %v19514_v60  ;;  %v5370_v19 = vsub.f32 %v22703_v36, %v5322_v20  ;;  %v22721_v58 = vld [vmem:[#allocation117_spill] sm:$0xff] }
 0x55d   : > { %16503 = vpow2.f32 %v5435_v18  ;;  %15796 = vmatprep.subr.mxu1 %v22704_v6  ;;  %12902 = vrot.lane.b32.xlu1 %v17198_v4, %s16922_s11  ;;  %v19525_v46 = vpop.eup %16491  ;;  %v22726_v36 = vld [vmem:[#allocation129_spill] sm:$0xff] }
 0x55e   : > { %16505 = vpow2.f32 %v5437_v49  ;;  %15797 = vmatpush3.msra.mxu1 %v22704_v6  ;;  %15820 = vmatmul.mubr.msk.f32.vlgmr.msra.gmra.mxu0 %vm2047_vm2, %v19514_v60  ;;  %v5425_v4 = vmul.f32 1.442695, %v5370_v19  ;;  %v22727_v19 = vld [vmem:[#allocation119_spill] sm:$0xff]  ;;  %v22728_v6 = vld [vmem:[#allocation148_spill] sm:$0xff] }
 0x55f   : > { %15830 = vmatpush3.msra.mxu0 %v22701_v11  ;;  %15808 = vmatprep.subr.mxu1 %v22705_v16  ;;  %v5319_v40 = vpop.xlane.xlu1 %5318 }
 0x560   : > { %15831 = vmatprep.subr.mxu0 %v22706_v57  ;;  %v5369_v21 = vsub.f32 %v22707_v38, %v5319_v40  ;;  %v22730_v40 = vld [vmem:[#allocation121_spill] sm:$0xff] }
 0x561   : > { %v19529_v14 = vpop.eup %16493  ;;  %15832 = vmatpush3.msra.mxu0 %v22706_v57  ;;  %12989 = vrot.lane.b32.xlu1 %v17234_v12, %s16922_s11  ;;  %v22731_v57 = vld [vmem:[#allocation131_spill] sm:$0xff] }
 0x562   : > { %v19534_v5 = vpop.eup %16495  ;;  %v5423_v55 = vmul.f32 1.442695, %v5369_v21  ;;  %15843 = vmatprep.subr.mxu0 %v22709_v23  ;;  %15798 = vmatprep.mubr.msk.f32.mxu1 %vm2047_vm2, %v19529_v14  ;;  %v22733_v21 = vld [vmem:[#allocation149_spill] sm:$0xff] }
 0x563   : > { %22708 = vst [vmem:[#allocation106_spill] sm:$0xff] %v19534_v5  ;;  %v19539_v41 = vpop.eup %16497  ;;  %v5334_v0 = vpop.xlane.xlu1 %5333  ;;  %15799 = vmatmul.mubr.msk.f32.vlgmr.msra.gmra.mxu1 %vm2047_vm2, %v19525_v46  ;;  %15833 = vmatprep.mubr.msk.f32.mxu0 %vm2047_vm2, %v19534_v5 }
 0x564   : > { %22710 = vst [vmem:[#allocation110_spill] sm:$0xff] %v19539_v41  ;;  %16507 = vpow2.f32 %v5423_v55  ;;  %v5374_v12 = vsub.f32 %v19236_v15, %v5334_v0  ;;  %15809 = vmatpush3.msra.mxu1 %v22705_v16  ;;  %15834 = vmatmul.mubr.msk.f32.vlgmr.msra.gmra.mxu0 %vm2047_vm2, %v19539_v41  ;;  %v22712_v15 = vld [vmem:[#allocation111_spill] sm:$0xff]  ;;  %v22737_v0 = vld [vmem:[#allocation165_spill] sm:$0xff] }
 0x565   : > { %16509 = vpow2.f32 %v5425_v4  ;;  %15810 = vmatprep.subr.mxu1 %v22711_v52  ;;  %13076 = vrot.lane.b32.xlu1 %v17279_v26, %s16922_s11  ;;  %v5331_v25 = vpop.xlane.xlu0 %5330  ;;  %v19557_v53 = vpop.eup %16499  ;;  %v22716_v26 = vld [vmem:[#allocation135_spill] sm:$0xff] }
 0x566   : > { %15811 = vmatpush3.msra.mxu1 %v22711_v52  ;;  %15844 = vmatpush3.msra.mxu0 %v22709_v23  ;;  %v5373_v39 = vsub.f32 %v19241_v29, %v5331_v25  ;;  %v5433_v35 = vmul.f32 1.442695, %v5374_v12  ;;  %22714 = vst [vmem:[#allocation115_spill] sm:$0xff] %v19557_v53  ;;  %v22734_v4 = vld [vmem:[#allocation123_spill] sm:$0xff]  ;;  %v22736_v23 = vld [vmem:[#allocation125_spill] sm:$0xff] }
 0x567   : > { %15822 = vmatprep.subr.mxu1 %v22712_v15  ;;  %15845 = vmatprep.subr.mxu0 %v22713_v62  ;;  %v22735_v55 = vld [vmem:[#allocation139_spill] sm:$0xff]  ;;  %v22738_v12 = vld [vmem:[#allocation141_spill] sm:$0xff] }
 0x568   : > { %v5431_v8 = vmul.f32 1.442695, %v5373_v39  ;;  %15846 = vmatpush3.msra.mxu0 %v22713_v62  ;;  %v22741_v39 = vld [vmem:[#allocation144_spill] sm:$0xff]  ;;  %v22744_v62 = vld [vmem:[#allocation113_spill] sm:$0xff] }
 0x569   : > { %v19560_v63 = vpop.eup %16501  ;;  %15857 = vmatprep.subr.msk.mxu0 %vm628_vm1, %v22716_v26  ;;  %13163 = vrot.lane.b32.xlu1 %v17386_v24, %s16922_s11 }
 0x56a   : > { %22715 = vst [vmem:[#allocation118_spill] sm:$0xff] %v19560_v63  ;;  %v19566_v31 = vpop.eup %16503  ;;  %16511 = vpow2.f32 %v5431_v8  ;;  %15812 = vmatprep.mubr.msk.f32.mxu1 %vm2047_vm2, %v19560_v63  ;;  %v22745_v8 = vld [vmem:[#allocation34_spill] sm:$0xff] }
 0x56b   : > { %22717 = vst [vmem:[#allocation201_spill] sm:$0xff] %v19566_v31  ;;  %v19570_v29 = vpop.eup %16505  ;;  %16513 = vpow2.f32 %v5433_v35  ;;  %15813 = vmatmul.mubr.msk.f32.vlgmr.msra.gmra.mxu1 %vm2047_vm2, %v19557_v53  ;;  %v5346_v32 = vpop.xlane.xlu0 %5345  ;;  %15847 = vmatprep.mubr.msk.f32.mxu0 %vm2047_vm2, %v19566_v31  ;;  %v22742_v35 = vld [vmem:[#allocation127_spill] sm:$0xff] }
 0x56c   : > { %22718 = vst [vmem:[#allocation101_spill] sm:$0xff] %v19570_v29  ;;  %15823 = vmatpush3.msra.mxu1 %v22712_v15  ;;  %v5378_v24 = vsub.f32 %v19252_v44, %v5346_v32  ;;  %15848 = vmatmul.mubr.msk.f32.vlgmr.msra.gmra.mxu0 %vm2047_vm2, %v19570_v29  ;;  %v22722_v44 = vld [vmem:[#allocation140_spill] sm:$0xff]  ;;  %v22743_v15 = vld [vmem:[#allocation166_spill] sm:$0xff]  ;;  %v22747_v32 = vld [vmem:[#allocation145_spill] sm:$0xff] }
 0x56d   : > { %15824 = vmatprep.subr.mxu1 %v22719_v56  ;;  %v5343_v28 = vpop.xlane.xlu1 %5342  ;;  %15858 = vmatpush3.xpose.msk.msra.mxu0 %vm628_vm1, %v22716_v26  ;;  %v22746_v26 = vld [vmem:[#allocation45_spill] sm:$0xff] }
 0x56e   : > { %v5377_v27 = vsub.f32 %v19257_v2, %v5343_v28  ;;  %15825 = vmatpush3.msra.mxu1 %v22719_v56  ;;  %15859 = vmatprep.subr.msk.mxu0 %vm628_vm1, %v22720_v3  ;;  %v5441_v49 = vmul.f32 1.442695, %v5378_v24  ;;  %v22725_v2 = vld [vmem:[#allocation142_spill] sm:$0xff]  ;;  %v22749_v56 = vld [vmem:[#allocation153_spill] sm:$0xff] }
 0x56f   : > { %15836 = vmatprep.subr.mxu1 %v22721_v58  ;;  %15861 = vmatprep.mubr.msk.f32.mxu0 %vm628_vm1, %v22722_v44  ;;  %v22748_v24 = vld [vmem:[#allocation134_spill] sm:$0xff]  ;;  %v22750_v28 = vld [vmem:[#allocation137_spill] sm:$0xff]  ;;  %v22755_v44 = vld [vmem:[#allocation155_spill] sm:$0xff] }
 0x570   : > { %v5439_v11 = vmul.f32 1.442695, %v5377_v27  ;;  %v22751_v27 = vld [vmem:[#allocation42_spill] sm:$0xff] }
 0x571   : > { %v19590_v18 = vpop.eup %16507  ;;  %15860 = vmatpush3.xpose.msk.msra.mxu0 %vm628_vm1, %v22720_v3  ;;  %v22752_v3 = vld [vmem:[#allocation50_spill] sm:$0xff] }
 0x572   : > { %22723 = vst [vmem:[#allocation205_spill] sm:$0xff] %v19590_v18  ;;  %v19594_v20 = vpop.eup %16509  ;;  %16515 = vpow2.f32 %v5439_v11  ;;  %15826 = vmatprep.mubr.msk.f32.mxu1 %vm2047_vm2, %v19590_v18  ;;  %15871 = vmatprep.subr.msk.mxu0 %vm628_vm1, %v22725_v2  ;;  %v22756_v11 = vld [vmem:[#allocation4_spill] sm:$0xff] }
 0x573   : > { %22724 = vst [vmem:[#allocation108_spill] sm:$0xff] %v19594_v20  ;;  %16517 = vpow2.f32 %v5441_v49  ;;  %15827 = vmatmul.mubr.msk.f32.vlgmr.msra.gmra.mxu1 %vm2047_vm2, %v19594_v20  ;;  %v22753_v49 = vld [vmem:[#allocation52_spill] sm:$0xff] }
 0x574   : > { %15837 = vmatpush3.msra.mxu1 %v22721_v58  ;;  %15862 = vmatmul.mubr.msk.f32.vlgmr.msra.gmra.mxu0 %vm628_vm1, %v22726_v36  ;;  %v22754_v58 = vld [vmem:[#allocation7_spill] sm:$0xff]  ;;  %v22758_v36 = vld [vmem:[#allocation8_spill] sm:$0xff] }
 0x575   : > { %15838 = vmatprep.subr.mxu1 %v22727_v19  ;;  %15872 = vmatpush3.xpose.msk.msra.mxu0 %vm628_vm1, %v22725_v2  ;;  %v22757_v2 = vld [vmem:[#allocation11_spill] sm:$0xff] }
 0x576   : > { %15839 = vmatpush3.msra.mxu1 %v22727_v19  ;;  %15875 = vmatprep.mubr.msk.f32.mxu0 %vm628_vm1, %v22728_v6  ;;  %v22759_v19 = vld [vmem:[#allocation27_spill] sm:$0xff]  ;;  %v22760_v6 = vld [vmem:[#allocation13_spill] sm:$0xff] }
 0x577   : > { %v19611_v16 = vpop.eup %16511  ;;  %15850 = vmatprep.subr.mxu1 %v22730_v40  ;;  %15873 = vmatprep.subr.msk.mxu0 %vm628_vm1, %v22731_v57 }
 0x578   : > { %22729 = vst [vmem:[#allocation3_spill] sm:$0xff] %v19611_v16  ;;  %v19616_v38 = vpop.eup %16513  ;;  %15840 = vmatprep.mubr.msk.f32.mxu1 %vm2047_vm2, %v19611_v16 }
 0x579   : > { %22732 = vst [vmem:[#allocation204_spill] sm:$0xff] %v19616_v38  ;;  %15841 = vmatmul.mubr.msk.f32.vlgmr.msra.gmra.mxu1 %vm2047_vm2, %v19616_v38  ;;  %15874 = vmatpush3.xpose.msk.msra.mxu0 %vm628_vm1, %v22731_v57  ;;  %v22762_v57 = vld [vmem:[#allocation28_spill] sm:$0xff] }
 0x57a   : > { %15851 = vmatpush3.msra.mxu1 %v22730_v40  ;;  %15885 = vmatprep.subr.msk.mxu0 %vm628_vm1, %v22733_v21  ;;  %v22761_v40 = vld [vmem:[#allocation12_spill] sm:$0xff] }
 0x57b   : > { %15852 = vmatprep.subr.mxu1 %v22734_v4 }
 0x57c   : > { %15853 = vmatpush3.msra.mxu1 %v22734_v4  ;;  %15876 = vmatmul.mubr.msk.f32.vlgmr.msra.gmra.mxu0 %vm628_vm1, %v22735_v55  ;;  %v22764_v4 = vld [vmem:[#allocation15_spill] sm:$0xff]  ;;  %v22765_v55 = vld [vmem:[#allocation136_spill] sm:$0xff] }
 0x57d   : > { %15864 = vmatprep.subr.msk.mxu1 %vm628_vm1, %v22736_v23  ;;  %15886 = vmatpush3.xpose.msk.msra.mxu0 %vm628_vm1, %v22733_v21  ;;  %v22763_v21 = vld [vmem:[#allocation116_spill] sm:$0xff] }
 0x57e   : > { %15889 = vmatprep.mubr.msk.f32.mxu0 %vm628_vm1, %v22737_v0  ;;  %15887 = vmatprep.subr.msk.mxu0 %vm628_vm1, %v22738_v12  ;;  %v22767_v0 = vld [vmem:[#allocation17_spill] sm:$0xff] }
 0x57f   : > { %v19639_v52 = vpop.eup %16515 }
 0x580   : > { %22739 = vst [vmem:[#allocation120_spill] sm:$0xff] %v19639_v52  ;;  %v19641_v25 = vpop.eup %16517  ;;  %15854 = vmatprep.mubr.msk.f32.mxu1 %vm2047_vm2, %v19639_v52 }
 0x581   : > { %22740 = vst [vmem:[#allocation207_spill] sm:$0xff] %v19641_v25  ;;  %15855 = vmatmul.mubr.msk.f32.vlgmr.msra.gmra.mxu1 %vm2047_vm2, %v19641_v25  ;;  %15888 = vmatpush3.xpose.msk.msra.mxu0 %vm628_vm1, %v22738_v12  ;;  %v22768_v12 = vld [vmem:[#allocation38_spill] sm:$0xff] }
 0x582   : > { %15865 = vmatpush3.xpose.msk.msra.mxu1 %vm628_vm1, %v22736_v23  ;;  %15868 = vmatprep.mubr.msk.f32.mxu1 %vm628_vm1, %v22741_v39  ;;  %v22766_v23 = vld [vmem:[#allocation36_spill] sm:$0xff]  ;;  %v22769_v39 = vld [vmem:[#allocation37_spill] sm:$0xff] }
 0x583   : > { %15866 = vmatprep.subr.msk.mxu1 %vm628_vm1, %v22742_v35  ;;  %15899 = vmatprep.subr.msk.mxu0 %vm628_vm1, %v22743_v15 }
 0x584   : > { %15890 = vmatmul.mubr.msk.f32.vlgmr.msra.gmra.mxu0 %vm628_vm1, %v22744_v62  ;;  %v22772_v62 = vld [vmem:[#allocation18_spill] sm:$0xff] }
 0x585   : > { %15900 = vmatpush3.xpose.msk.msra.mxu0 %vm628_vm1, %v22743_v15  ;;  %15903 = vmatprep.mubr.msk.f32.mxu0 %vm628_vm1, %v22745_v8  ;;  %v22771_v15 = vld [vmem:[#allocation133_spill] sm:$0xff] }
 0x586   : > { %15867 = vmatpush3.xpose.msk.msra.mxu1 %vm628_vm1, %v22742_v35  ;;  %15901 = vmatprep.subr.msk.mxu0 %vm628_vm1, %v22746_v26  ;;  %v22770_v35 = vld [vmem:[#allocation49_spill] sm:$0xff] }
 0x587   : > { %15878 = vmatprep.subr.msk.mxu1 %vm628_vm1, %v22747_v32  ;;  %v22773_v8 = vld [vmem:[#allocation5_spill] sm:$0xff] }
 0x589   : > { %15869 = vmatmul.mubr.msk.f32.vlgmr.msra.gmra.mxu1 %vm628_vm1, %v22748_v24  ;;  %15902 = vmatpush3.xpose.msk.msra.mxu0 %vm628_vm1, %v22746_v26  ;;  %v22774_v26 = vld [vmem:[#allocation9_spill] sm:$0xff]  ;;  %v22776_v24 = vld [vmem:[#allocation54_spill] sm:$0xff] }
 0x58a   : > { %15879 = vmatpush3.xpose.msk.msra.mxu1 %vm628_vm1, %v22747_v32  ;;  %15882 = vmatprep.mubr.msk.f32.mxu1 %vm628_vm1, %v22749_v56  ;;  %v22775_v32 = vld [vmem:[#allocation41_spill] sm:$0xff]  ;;  %v22777_v56 = vld [vmem:[#allocation14_spill] sm:$0xff] }
 0x58b   : > { %15880 = vmatprep.subr.msk.mxu1 %vm628_vm1, %v22750_v28  ;;  %15913 = vmatprep.subr.msk.mxu0 %vm628_vm1, %v22751_v27 }
 0x58c   : > { %15904 = vmatmul.mubr.msk.f32.vlgmr.msra.gmra.mxu0 %vm628_vm1, %v22752_v3  ;;  %v22780_v3 = vld [vmem:[#allocation26_spill] sm:$0xff] }
 0x58d   : > { %15914 = vmatpush3.xpose.msk.msra.mxu0 %vm628_vm1, %v22751_v27  ;;  %15917 = vmatprep.mubr.msk.f32.mxu0 %vm628_vm1, %v22753_v49  ;;  %v22779_v27 = vld [vmem:[#allocation53_spill] sm:$0xff] }
 0x58e   : > { %15881 = vmatpush3.xpose.msk.msra.mxu1 %vm628_vm1, %v22750_v28  ;;  %15915 = vmatprep.subr.msk.mxu0 %vm628_vm1, %v22754_v58  ;;  %v22778_v28 = vld [vmem:[#allocation19_spill] sm:$0xff]  ;;  %v22781_v49 = vld [vmem:[#allocation25_spill] sm:$0xff] }
 0x58f   : > { %15892 = vmatprep.subr.msk.mxu1 %vm628_vm1, %v22755_v44 }
 0x591   : > { %15883 = vmatmul.mubr.msk.f32.vlgmr.msra.gmra.mxu1 %vm628_vm1, %v22756_v11  ;;  %15916 = vmatpush3.xpose.msk.msra.mxu0 %vm628_vm1, %v22754_v58  ;;  %v22782_v58 = vld [vmem:[#allocation39_spill] sm:$0xff] }
 0x592   : > { %15893 = vmatpush3.xpose.msk.msra.mxu1 %vm628_vm1, %v22755_v44  ;;  %15896 = vmatprep.mubr.msk.f32.mxu1 %vm628_vm1, %v22757_v2  ;;  %v22783_v44 = vld [vmem:[#allocation62_spill] sm:$0xff]  ;;  %v22784_v11 = vld [vmem:[#allocation23_spill] sm:$0xff]  ;;  %v22785_v2 = vld [vmem:[#allocation20_spill] sm:$0xff] }
 0x593   : > { %15894 = vmatprep.subr.msk.mxu1 %vm628_vm1, %v22758_v36  ;;  %15927 = vmatprep.subr.msk.mxu0 %vm628_vm1, %v22759_v19 }
 0x594   : > { %15918 = vmatmul.mubr.msk.f32.vlgmr.msra.gmra.mxu0 %vm628_vm1, %v22760_v6  ;;  %v22788_v6 = vld [vmem:[#allocation48_spill] sm:$0xff] }
 0x595   : > { %15928 = vmatpush3.xpose.msk.msra.mxu0 %vm628_vm1, %v22759_v19  ;;  %15931 = vmatprep.mubr.msk.f32.mxu0 %vm628_vm1, %v22761_v40  ;;  %v22787_v19 = vld [vmem:[#allocation33_spill] sm:$0xff]  ;;  %v22789_v40 = vld [vmem:[#allocation51_spill] sm:$0xff] }
 0x596   : > { %15895 = vmatpush3.xpose.msk.msra.mxu1 %vm628_vm1, %v22758_v36  ;;  %15929 = vmatprep.subr.msk.mxu0 %vm628_vm1, %v22762_v57  ;;  %v22786_v36 = vld [vmem:[#allocation29_spill] sm:$0xff] }
 0x597   : > { %15906 = vmatprep.subr.msk.mxu1 %vm628_vm1, %v22763_v21 }
 0x599   : > { %15897 = vmatmul.mubr.msk.f32.vlgmr.msra.gmra.mxu1 %vm628_vm1, %v22764_v4  ;;  %15930 = vmatpush3.xpose.msk.msra.mxu0 %vm628_vm1, %v22762_v57  ;;  %v22790_v57 = vld [vmem:[#allocation58_spill] sm:$0xff]  ;;  %v22792_v4 = vld [vmem:[#allocation64_spill] sm:$0xff] }
 0x59a   : > { %15907 = vmatpush3.xpose.msk.msra.mxu1 %vm628_vm1, %v22763_v21  ;;  %15910 = vmatprep.mubr.msk.f32.mxu1 %vm628_vm1, %v22765_v55  ;;  %v22791_v21 = vld [vmem:[#allocation55_spill] sm:$0xff]  ;;  %v22793_v55 = vld [vmem:[#allocation30_spill] sm:$0xff] }
 0x59b   : > { %15908 = vmatprep.subr.msk.mxu1 %vm628_vm1, %v22766_v23  ;;  %15941 = vmatprep.subr.msk.mxu0 %vm628_vm1, %v22767_v0 }
 0x59c   : > { %15932 = vmatmul.mubr.msk.f32.vlgmr.msra.gmra.mxu0 %vm628_vm1, %v22768_v12  ;;  %v22796_v12 = vld [vmem:[#allocation67_spill] sm:$0xff] }
 0x59d   : > { %15942 = vmatpush3.xpose.msk.msra.mxu0 %vm628_vm1, %v22767_v0  ;;  %15945 = vmatprep.mubr.msk.f32.mxu0 %vm628_vm1, %v22769_v39  ;;  %v22795_v0 = vld [vmem:[#allocation73_spill] sm:$0xff]  ;;  %v22797_v39 = vld [vmem:[#allocation83_spill] sm:$0xff] }
 0x59e   : > { %15909 = vmatpush3.xpose.msk.msra.mxu1 %vm628_vm1, %v22766_v23  ;;  %15943 = vmatprep.subr.msk.mxu0 %vm628_vm1, %v22770_v35  ;;  %v22794_v23 = vld [vmem:[#allocation65_spill] sm:$0xff] }
 0x59f   : > { %15920 = vmatprep.subr.msk.mxu1 %vm628_vm1, %v22771_v15 }
 0x5a1   : > { %15911 = vmatmul.mubr.msk.f32.vlgmr.msra.gmra.mxu1 %vm628_vm1, %v22772_v62  ;;  %15944 = vmatpush3.xpose.msk.msra.mxu0 %vm628_vm1, %v22770_v35  ;;  %v22798_v35 = vld [vmem:[#allocation22_spill] sm:$0xff] }
 0x5a2   : > { %15921 = vmatpush3.xpose.msk.msra.mxu1 %vm628_vm1, %v22771_v15  ;;  %15924 = vmatprep.mubr.msk.f32.mxu1 %vm628_vm1, %v22773_v8 }
 0x5a3   : > { %15922 = vmatprep.subr.msk.mxu1 %vm628_vm1, %v22774_v26  ;;  %15955 = vmatprep.subr.msk.mxu0 %vm628_vm1, %v22775_v32 }
 0x5a4   : > { %15946 = vmatmul.mubr.msk.f32.vlgmr.msra.gmra.mxu0 %vm628_vm1, %v22776_v24 }
 0x5a5   : > { %15956 = vmatpush3.xpose.msk.msra.mxu0 %vm628_vm1, %v22775_v32  ;;  %15959 = vmatprep.mubr.msk.f32.mxu0 %vm628_vm1, %v22777_v56  ;;  %v19823_v32 = vpop.permute.xlu1 %11020 }
 0x5a6   : > { %15923 = vmatpush3.xpose.msk.msra.mxu1 %vm628_vm1, %v22774_v26  ;;  %15957 = vmatprep.subr.msk.mxu0 %vm628_vm1, %v22778_v28  ;;  %22803 = vst [vmem:[#allocation103_spill] sm:$0xff] %v19823_v32 }
 0x5a7   : > { %15934 = vmatprep.subr.msk.mxu1 %vm628_vm1, %v22779_v27 }
 0x5a9   : > { %15925 = vmatmul.mubr.msk.f32.vlgmr.msra.gmra.mxu1 %vm628_vm1, %v22780_v3  ;;  %15958 = vmatpush3.xpose.msk.msra.mxu0 %vm628_vm1, %v22778_v28  ;;  %v19829_v28 = vpop.permute.xlu1 %11115 }
 0x5aa   : > { %15935 = vmatpush3.xpose.msk.msra.mxu1 %vm628_vm1, %v22779_v27  ;;  %15938 = vmatprep.mubr.msk.f32.mxu1 %vm628_vm1, %v22781_v49  ;;  %22806 = vst [vmem:[#allocation214_spill] sm:$0xff] %v19829_v28 }
 0x5ab   : > { %15936 = vmatprep.subr.msk.mxu1 %vm628_vm1, %v22782_v58  ;;  %15969 = vmatprep.subr.mxu0 %v22783_v44 }
 0x5ac   : > { %15960 = vmatmul.mubr.msk.f32.vlgmr.msra.gmra.mxu0 %vm628_vm1, %v22784_v11 }
 0x5ad   : > { %15970 = vmatpush3.msra.mxu0 %v22783_v44 }
 0x5ae   : > { %15937 = vmatpush3.xpose.msk.msra.mxu1 %vm628_vm1, %v22782_v58  ;;  %15971 = vmatprep.subr.mxu0 %v22785_v2  ;;  %v19837_v58 = vpop.permute.xlu1 %11111 }
 0x5af   : > { %15948 = vmatprep.subr.msk.mxu1 %vm628_vm1, %v22786_v36  ;;  %15972 = vmatpush3.msra.mxu0 %v22785_v2  ;;  %22810 = vst [vmem:[#allocation107_spill] sm:$0xff] %v19837_v58 }
 0x5b0   : > { %15983 = vmatprep.subr.mxu0 %v22787_v19 }
 0x5b1   : > { %15939 = vmatmul.mubr.msk.f32.vlgmr.msra.gmra.mxu1 %vm628_vm1, %v22788_v6 }
 0x5b2   : > { %15949 = vmatpush3.xpose.msk.msra.mxu1 %vm628_vm1, %v22786_v36  ;;  %15952 = vmatprep.mubr.msk.f32.mxu1 %vm628_vm1, %v22789_v40  ;;  %v19847_v6 = vpop.permute.xlu1 %11206 }
 0x5b3   : > { %15950 = vmatprep.subr.msk.mxu1 %vm628_vm1, %v22790_v57  ;;  %22815 = vst [vmem:[#allocation111_spill] sm:$0xff] %v19847_v6 }
 0x5b6   : > { %15951 = vmatpush3.xpose.msk.msra.mxu1 %vm628_vm1, %v22790_v57 }
 0x5b7   : > { %15962 = vmatprep.subr.msk.mxu1 %vm628_vm1, %v22791_v21 }
 0x5b9   : > { %15953 = vmatmul.mubr.msk.f32.vlgmr.msra.gmra.mxu1 %vm628_vm1, %v22792_v4 }
 0x5ba   : > { %15963 = vmatpush3.xpose.msk.msra.mxu1 %vm628_vm1, %v22791_v21  ;;  %15966 = vmatprep.mubr.msk.f32.mxu1 %vm628_vm1, %v22793_v55  ;;  %v19857_v55 = vpop.permute.xlu1 %11202 }
 0x5bb   : > { %15964 = vmatprep.subr.msk.mxu1 %vm628_vm1, %v22794_v23  ;;  %22820 = vst [vmem:[#allocation117_spill] sm:$0xff] %v19857_v55 }
 0x5be   : > { %15965 = vmatpush3.xpose.msk.msra.mxu1 %vm628_vm1, %v22794_v23 }
 0x5bf   : > { %15976 = vmatprep.subr.mxu1 %v22795_v0 }
 0x5c1   : > { %15967 = vmatmul.mubr.msk.f32.vlgmr.msra.gmra.mxu1 %vm628_vm1, %v22796_v12 }
 0x5c2   : > { %15977 = vmatpush3.msra.mxu1 %v22795_v0  ;;  %v19861_v0 = vpop.permute.xlu0 %11117 }
 0x5c3   : > { %15978 = vmatprep.subr.mxu1 %v22797_v39  ;;  %22822 = vst [vmem:[#allocation142_spill] sm:$0xff] %v19861_v0 }
 0x5c4   : > { %15979 = vmatpush3.msra.mxu1 %v22797_v39 }
 0x5c5   : > { %15990 = vmatprep.subr.mxu1 %v22798_v35 }
 0x5dd   : > { %v19815_v15 = vpop.f32.mrf.mxu0 }
 0x5de   : > { %22799 = vst [vmem:[#allocation122_spill] sm:$0xff] %v19815_v15 }
 0x5df   : > { %v19817_v62 = vpop.f32.mrf.mxu0 }
 0x5e0   : > { %22800 = vst [vmem:[#allocation208_spill] sm:$0xff] %v19817_v62 }
 0x5e7   : > { %v19819_v8 = vpop.f32.mrf.mxu0 }
 0x5e8   : > { %22801 = vst [vmem:[#allocation112_spill] sm:$0xff] %v19819_v8 }
 0x5e9   : > { %v19821_v26 = vpop.f32.mrf.mxu0 }
 0x5ea   : > { %22802 = vst [vmem:[#allocation210_spill] sm:$0xff] %v19821_v26 }
 0x5ef   : > { %v19825_v24 = vpop.f32.mrf.mxu0 }
 0x5f0   : > { %22804 = vst [vmem:[#allocation124_spill] sm:$0xff] %v19825_v24 }
 0x5f1   : > { %v19827_v56 = vpop.f32.mrf.mxu0 }
 0x5f2   : > { %22805 = vst [vmem:[#allocation213_spill] sm:$0xff] %v19827_v56 }
 0x608   : > { %v19833_v3 = vpop.f32.mrf.mxu1 }
 0x609   : > { %22808 = vst [vmem:[#allocation217_spill] sm:$0xff] %v19833_v3 }
 0x60a   : > { %v19841_v11 = vpop.f32.mrf.mxu1 }
 0x60b   : > { %22812 = vst [vmem:[#allocation218_spill] sm:$0xff] %v19841_v11 }
 0x60d   : > { %v19831_v27 = vpop.f32.mrf.mxu0 }
 0x60e   : > { %22807 = vst [vmem:[#allocation126_spill] sm:$0xff] %v19831_v27  ;;  %v19873_v27 = vpop.permute.xlu0 %11022 }
 0x60f   : > { %v19835_v49 = vpop.f32.mrf.mxu0  ;;  %22828 = vst [vmem:[#allocation149_spill] sm:$0xff] %v19873_v27 }
 0x610   : > { %22809 = vst [vmem:[#allocation105_spill] sm:$0xff] %v19835_v49 }
 0x613   : > { %v19843_v2 = vpop.f32.mrf.mxu1 }
 0x614   : > { %22813 = vst [vmem:[#allocation130_spill] sm:$0xff] %v19843_v2 }
 0x615   : > { %v19851_v57 = vpop.f32.mrf.mxu1 }
 0x616   : > { %v19839_v44 = vpop.f32.mrf.mxu0  ;;  %22817 = vst [vmem:[#allocation135_spill] sm:$0xff] %v19851_v57 }
 0x617   : > { %22811 = vst [vmem:[#allocation128_spill] sm:$0xff] %v19839_v44 }
 0x618   : > { %v19845_v36 = vpop.f32.mrf.mxu0 }
 0x619   : > { %22814 = vst [vmem:[#allocation109_spill] sm:$0xff] %v19845_v36  ;;  %v19869_v36 = vpop.permute.xlu1 %11297 }
 0x61a   : > { %22826 = vst [vmem:[#allocation121_spill] sm:$0xff] %v19869_v36 }
 0x61b   : > { %v19853_v21 = vpop.f32.mrf.mxu1 }
 0x61c   : > { %22818 = vst [vmem:[#allocation114_spill] sm:$0xff] %v19853_v21 }
 0x61d   : > { %v19863_v12 = vpop.f32.mrf.mxu1 }
 0x61e   : > { %v19849_v40 = vpop.f32.mrf.mxu0  ;;  %22823 = vst [vmem:[#allocation129_spill] sm:$0xff] %v19863_v12  ;;  %v19893_v12 = vpop.permute.xlu0 %11208 }
 0x61f   : > { %22816 = vst [vmem:[#allocation132_spill] sm:$0xff] %v19849_v40  ;;  %22833 = vst [vmem:[#allocation141_spill] sm:$0xff] %v19893_v12 }
 0x620   : > { %v19855_v4 = vpop.f32.mrf.mxu0 }
 0x621   : > { %22819 = vst [vmem:[#allocation138_spill] sm:$0xff] %v19855_v4 }
 0x623   : > { %v19865_v39 = vpop.f32.mrf.mxu1 }
 0x624   : > { %v19859_v23 = vpop.f32.mrf.mxu0  ;;  %22824 = vst [vmem:[#allocation119_spill] sm:$0xff] %v19865_v39  ;;  %v19886_v39 = vpop.permute.xlu1 %11293 }
 0x625   : > { %22821 = vst [vmem:[#allocation140_spill] sm:$0xff] %v19859_v23  ;;  %v19875_v49 = vpop.f32.mrf.mxu1  ;;  %v19884_v23 = vld [vmem:[%s21931_s3 + $0x28] sm:$0xff]  ;;  %22832 = vst [vmem:[#allocation165_spill] sm:$0xff] %v19886_v39 }
 0x626   : > { %v19867_v44 = vpop.f32.mrf.mxu0  ;;  %22829 = vst [vmem:[#allocation123_spill] sm:$0xff] %v19875_v49 }
 0x627   : > { %22825 = vst [vmem:[#allocation148_spill] sm:$0xff] %v19867_v44 }
 0x628   : > { %v19907_v57 = vpop.permute.xlu1 %11388 }
 0x629   : > { %22836 = vst [vmem:[#allocation166_spill] sm:$0xff] %v19907_v57 }
 0x62b   : > { %v19877_v4 = vpop.f32.mrf.mxu1 }
 0x62c   : > { %v19871_v40 = vpop.f32.mrf.mxu0  ;;  %22830 = vst [vmem:[#allocation139_spill] sm:$0xff] %v19877_v4  ;;  %v19920_v11 = vpop.permute.xlu1 %11384 }
 0x62d   : > { %22827 = vst [vmem:[#allocation131_spill] sm:$0xff] %v19871_v40  ;;  %v19891_v40 = vld [vmem:[%s21931_s3 + $0x20] sm:$0xff]  ;;  %v19895_v49 = vpop.f32.mrf.mxu1  ;;  %22840 = vst [vmem:[#allocation145_spill] sm:$0xff] %v19920_v11 }
 0x62e   : > { %v19879_v21 = vpop.f32.mrf.mxu0  ;;  %22834 = vst [vmem:[#allocation144_spill] sm:$0xff] %v19895_v49  ;;  %v19911_v49 = vpop.permute.xlu0 %11113 }
 0x62f   : > { %22831 = vst [vmem:[#allocation125_spill] sm:$0xff] %v19879_v21  ;;  %22837 = vst [vmem:[#allocation113_spill] sm:$0xff] %v19911_v49 }
 0x630   : > { %v19935_v52 = vpop.permute.xlu1 %11479 }
 0x631   : > { %22844 = vst [vmem:[#allocation42_spill] sm:$0xff] %v19935_v52 }
 0x633   : > { %v19900_v24 = vpop.f32.mrf.mxu1 }
 0x634   : > { %v15863_v44 = vpop.f32.mrf.mxu0  ;;  %22835 = vst [vmem:[#allocation127_spill] sm:$0xff] %v19900_v24  ;;  %v19952_v38 = vpop.permute.xlu1 %11475 }
 0x635   : > { %v19898_v4 = vadd.f32 %v15863_v44, %v19884_v23  ;;  %v19913_v44 = vpop.f32.mrf.mxu1  ;;  %22847 = vst [vmem:[#allocation7_spill] sm:$0xff] %v19952_v38 }
 0x636   : > { %v7080_v21 = vpop.f32.mrf.mxu0  ;;  %22838 = vst [vmem:[#allocation34_spill] sm:$0xff] %v19913_v44 }
 0x637   : > { %v19903_v56 = vadd.f32 %v19891_v40, %v7080_v21  ;;  %v8457_v2 = vsel %vm2047_vm2, %v19898_v4, -inf }
 0x638   : > { %8458 = vmax.xlane.f32.xlu1 %v8457_v2  ;;  %v19968_v18 = vpop.permute.xlu1 %11570 }
 0x639   : > { %v8454_v8 = vsel %vm2047_vm2, %v19903_v56, -inf  ;;  %v19915_v3 = vpop.f32.mrf.mxu1  ;;  %22849 = vst [vmem:[#allocation4_spill] sm:$0xff] %v19968_v18 }
 0x63a   : > { %8455 = vmax.xlane.f32.xlu0 %v8454_v8  ;;  %22839 = vst [vmem:[#allocation45_spill] sm:$0xff] %v19915_v3  ;;  %v19927_v8 = vpop.permute.xlu0 %11299 }
 0x63b   : > { %22841 = vst [vmem:[#allocation134_spill] sm:$0xff] %v19927_v8  ;;  %v19929_v15 = vpop.f32.mrf.mxu1 }
 0x63c   : > { %v15877_v26 = vpop.f32.mrf.mxu0  ;;  %22842 = vst [vmem:[#allocation153_spill] sm:$0xff] %v19929_v15 }
 0x63d   : > { %v19918_v21 = vadd.f32 %v15877_v26, %v19884_v23 }
 0x63e   : > { %v7262_v24 = vpop.f32.mrf.mxu0  ;;  %v19940_v29 = vpop.permute.xlu0 %11204 }
 0x63f   : > { %v19923_v2 = vadd.f32 %v19891_v40, %v7262_v24  ;;  %v8469_v62 = vsel %vm2047_vm2, %v19918_v21, -inf  ;;  %22845 = vst [vmem:[#allocation50_spill] sm:$0xff] %v19940_v29 }
 0x640   : > { %8470 = vmax.xlane.f32.xlu0 %v8469_v62 }
 0x641   : > { %v19931_v44 = vpop.f32.mrf.mxu1  ;;  %v8466_v26 = vsel %vm2047_vm2, %v19923_v2, -inf }
 0x642   : > { %22843 = vst [vmem:[#allocation137_spill] sm:$0xff] %v19931_v44 }
 0x643   : > { %v19942_v62 = vpop.f32.mrf.mxu1 }
 0x644   : > { %v15891_v3 = vpop.f32.mrf.mxu0  ;;  %8467 = vmax.xlane.f32.xlu0 %v8466_v26  ;;  %22846 = vst [vmem:[#allocation52_spill] sm:$0xff] %v19942_v62  ;;  %v19958_v62 = vpop.permute.xlu0 %11390 }
 0x645   : > { %v19938_v24 = vadd.f32 %v15891_v3, %v19884_v23  ;;  %22848 = vst [vmem:[#allocation155_spill] sm:$0xff] %v19958_v62 }
 0x646   : > { %v7444_v25 = vpop.f32.mrf.mxu0 }
 0x647   : > { %v19945_v31 = vadd.f32 %v19891_v40, %v7444_v25  ;;  %v8481_v44 = vsel %vm2047_vm2, %v19938_v24, -inf }
 0x648   : > { %8482 = vmax.xlane.f32.xlu0 %v8481_v44  ;;  %v19973_v9 = vpop.permute.xlu0 %11295 }
 0x649   : > { %v15870_v15 = vpop.f32.mrf.mxu1  ;;  %v8478_v3 = vsel %vm2047_vm2, %v19945_v31, -inf  ;;  %22850 = vst [vmem:[#allocation11_spill] sm:$0xff] %v19973_v9 }
 0x64a   : > { %v19950_v26 = vadd.f32 %v15870_v15, %v19884_v23 }
 0x64b   : > { %v7171_v16 = vpop.f32.mrf.mxu1 }
 0x64c   : > { %v15905_v41 = vpop.f32.mrf.mxu0  ;;  %8479 = vmax.xlane.f32.xlu0 %v8478_v3  ;;  %v8463_v25 = vsel %vm2047_vm2, %v19950_v26, -inf  ;;  %v19964_v15 = vadd.f32 %v19891_v40, %v7171_v16 }
 0x64d   : > { %v19961_v5 = vadd.f32 %v15905_v41, %v19884_v23  ;;  %8464 = vmax.xlane.f32.xlu1 %v8463_v25 }
 0x64e   : > { %v7626_v20 = vpop.f32.mrf.mxu0  ;;  %v8460_v16 = vsel %vm2047_vm2, %v19964_v15, -inf }
 0x64f   : > { %v8493_v44 = vsel %vm2047_vm2, %v19961_v5, -inf  ;;  %v19976_v41 = vadd.f32 %v19891_v40, %v7626_v20 }
 0x650   : > { %8494 = vmax.xlane.f32.xlu0 %v8493_v44 }
 0x651   : > { %v15884_v3 = vpop.f32.mrf.mxu1  ;;  %v8490_v20 = vsel %vm2047_vm2, %v19976_v41, -inf }
 0x652   : > { %v19971_v60 = vadd.f32 %v15884_v3, %v19884_v23  ;;  %v19985_v3 = vpop.permute.xlu1 %11568 }
 0x653   : > { %v7353_v25 = vpop.f32.mrf.mxu1  ;;  %22851 = vst [vmem:[#allocation8_spill] sm:$0xff] %v19985_v3 }
 0x654   : > { %v19981_v53 = vadd.f32 %v19891_v40, %v7353_v25  ;;  %v15919_v63 = vpop.f32.mrf.mxu0  ;;  %v8475_v44 = vsel %vm2047_vm2, %v19971_v60, -inf  ;;  %8461 = vmax.xlane.f32.xlu0 %v8460_v16  ;;  %v19994_v25 = vpop.permute.xlu0 %11481 }
 0x655   : > { %8476 = vmax.xlane.f32.xlu1 %v8475_v44  ;;  %v19988_v18 = vadd.f32 %v15919_v63, %v19884_v23  ;;  %22852 = vst [vmem:[#allocation27_spill] sm:$0xff] %v19994_v25 }
 0x656   : > { %v7808_v57 = vpop.f32.mrf.mxu0  ;;  %v8472_v11 = vsel %vm2047_vm2, %v19981_v53, -inf  ;;  %v20009_v55 = vpop.permute.xlu1 %11947 }
 0x657   : > { %v20000_v44 = vadd.f32 %v19891_v40, %v7808_v57  ;;  %v8505_v3 = vsel %vm2047_vm2, %v19988_v18, -inf  ;;  %22853 = vst [vmem:[#allocation13_spill] sm:$0xff] %v20009_v55 }
 0x658   : > { %8491 = vmax.xlane.f32.xlu0 %v8490_v20 }
 0x659   : > { %v15898_v29 = vpop.f32.mrf.mxu1  ;;  %8473 = vmax.xlane.f32.xlu1 %v8472_v11  ;;  %v8502_v57 = vsel %vm2047_vm2, %v20000_v44, -inf }
 0x65a   : > { %v19997_v16 = vadd.f32 %v15898_v29, %v19884_v23  ;;  %v20011_v29 = vpop.permute.xlu0 %11386  ;;  %v20023_v32 = vpop.permute.xlu1 %12034 }
 0x65b   : > { %v7535_v63 = vpop.f32.mrf.mxu1  ;;  %22854 = vst [vmem:[#allocation12_spill] sm:$0xff] %v20011_v29  ;;  %22855 = vst [vmem:[#allocation28_spill] sm:$0xff] %v20023_v32 }
 0x65c   : > { %v20005_v62 = vadd.f32 %v19891_v40, %v7535_v63  ;;  %v15933_v6 = vpop.f32.mrf.mxu0  ;;  %v8487_v20 = vsel %vm2047_vm2, %v19997_v16, -inf  ;;  %8506 = vmax.xlane.f32.xlu0 %v8505_v3 }
 0x65d   : > { %8488 = vmax.xlane.f32.xlu1 %v8487_v20  ;;  %v20014_v11 = vadd.f32 %v15933_v6, %v19884_v23 }
 0x65e   : > { %v7990_v27 = vpop.f32.mrf.mxu0  ;;  %v8484_v63 = vsel %vm2047_vm2, %v20005_v62, -inf }
 0x65f   : > { %v20026_v20 = vadd.f32 %v19891_v40, %v7990_v27  ;;  %v8517_v29 = vsel %vm2047_vm2, %v20014_v11, -inf }
 0x660   : > { %8503 = vmax.xlane.f32.xlu0 %v8502_v57 }
 0x661   : > { %v15912_v12 = vpop.f32.mrf.mxu1  ;;  %8485 = vmax.xlane.f32.xlu1 %v8484_v63  ;;  %v20035_v63 = vpop.permute.xlu0 %11572  ;;  %v8514_v27 = vsel %vm2047_vm2, %v20026_v20, -inf }
 0x662   : > { %v20021_v3 = vadd.f32 %v15912_v12, %v19884_v23  ;;  %22856 = vst [vmem:[#allocation116_spill] sm:$0xff] %v20035_v63 }
 0x663   : > { %v7717_v6 = vpop.f32.mrf.mxu1 }
 0x664   : > { %v20031_v55 = vadd.f32 %v19891_v40, %v7717_v6  ;;  %v15947_v52 = vpop.f32.mrf.mxu0  ;;  %v8499_v57 = vsel %vm2047_vm2, %v20021_v3, -inf  ;;  %8518 = vmax.xlane.f32.xlu0 %v8517_v29  ;;  %v20044_v6 = vpop.permute.xlu1 %12032 }
 0x665   : > { %8500 = vmax.xlane.f32.xlu1 %v8499_v57  ;;  %v20038_v12 = vadd.f32 %v15947_v52, %v19884_v23  ;;  %22857 = vst [vmem:[#allocation15_spill] sm:$0xff] %v20044_v6  ;;  %v20049_v63 = vpop.permute.xlu0 %11477 }
 0x666   : > { %v8172_v32 = vpop.f32.mrf.mxu0  ;;  %v8496_v38 = vsel %vm2047_vm2, %v20031_v55, -inf  ;;  %22858 = vst [vmem:[#allocation136_spill] sm:$0xff] %v20049_v63 }
 0x667   : > { %v20052_v52 = vadd.f32 %v19891_v40, %v8172_v32  ;;  %v8529_v25 = vsel %vm2047_vm2, %v20038_v12, -inf }
 0x668   : > { %8515 = vmax.xlane.f32.xlu0 %v8514_v27 }
 0x669   : > { %v15926_v9 = vpop.f32.mrf.mxu1  ;;  %8497 = vmax.xlane.f32.xlu1 %v8496_v38  ;;  %v8526_v32 = vsel %vm2047_vm2, %v20052_v52, -inf }
 0x66a   : > { %v20047_v29 = vadd.f32 %v15926_v9, %v19884_v23  ;;  %v20061_v9 = vpop.permute.xlu1 %12119 }
 0x66b   : > { %v7899_v57 = vpop.f32.mrf.mxu1  ;;  %22859 = vst [vmem:[#allocation36_spill] sm:$0xff] %v20061_v9 }
 0x66c   : > { %v20057_v36 = vadd.f32 %v19891_v40, %v7899_v57  ;;  %v15961_v27 = vpop.f32.mrf.mxu0  ;;  %v8511_v6 = vsel %vm2047_vm2, %v20047_v29, -inf  ;;  %8530 = vmax.xlane.f32.xlu0 %v8529_v25  ;;  %v20070_v57 = vpop.permute.xlu0 %11566 }
 0x66d   : > { %8512 = vmax.xlane.f32.xlu1 %v8511_v6  ;;  %v20064_v38 = vadd.f32 %v15961_v27, %v19884_v23  ;;  %22860 = vst [vmem:[#allocation17_spill] sm:$0xff] %v20070_v57 }
 0x66e   : > { %v8354_v63 = vpop.f32.mrf.mxu0  ;;  %v8508_v39 = vsel %vm2047_vm2, %v20057_v36, -inf  ;;  %v20085_v57 = vpop.permute.xlu1 %12206 }
 0x66f   : > { %v20076_v6 = vadd.f32 %v19891_v40, %v8354_v63  ;;  %v8541_v9 = vsel %vm2047_vm2, %v20064_v38, -inf  ;;  %22861 = vst [vmem:[#allocation38_spill] sm:$0xff] %v20085_v57 }
 0x670   : > { %8527 = vmax.xlane.f32.xlu0 %v8526_v32 }
 0x671   : > { %v15940_v49 = vpop.f32.mrf.mxu1  ;;  %8509 = vmax.xlane.f32.xlu1 %v8508_v39  ;;  %v20087_v39 = vpop.permute.xlu0 %11945 }
 0x672   : > { %v20073_v25 = vadd.f32 %v15940_v49, %v19884_v23  ;;  %22862 = vst [vmem:[#allocation37_spill] sm:$0xff] %v20087_v39  ;;  %v8538_v49 = vsel %vm2047_vm2, %v20076_v6, -inf  ;;  %v20096_v58 = vpop.permute.xlu1 %12293 }
 0x673   : > { %v8081_v27 = vpop.f32.mrf.mxu1  ;;  %22863 = vst [vmem:[#allocation49_spill] sm:$0xff] %v20096_v58 }
 0x674   : > { %v20081_v8 = vadd.f32 %v19891_v40, %v8081_v27  ;;  %v8523_v32 = vsel %vm2047_vm2, %v20073_v25, -inf  ;;  %8542 = vmax.xlane.f32.xlu0 %v8541_v9 }
 0x675   : > { %8524 = vmax.xlane.f32.xlu1 %v8523_v32  ;;  %v20103_v39 = vpop.permute.xlu0 %12121 }
 0x676   : > { %v8520_v63 = vsel %vm2047_vm2, %v20081_v8, -inf  ;;  %22864 = vst [vmem:[#allocation133_spill] sm:$0xff] %v20103_v39 }
 0x678   : > { %8539 = vmax.xlane.f32.xlu0 %v8538_v49 }
 0x679   : > { %v15954_v28 = vpop.f32.mrf.mxu1  ;;  %8521 = vmax.xlane.f32.xlu1 %v8520_v63  ;;  %v20107_v63 = vpop.permute.xlu1 %12380 }
 0x67a   : > { %v20094_v27 = vadd.f32 %v15954_v28, %v19884_v23  ;;  %22865 = vst [vmem:[#allocation18_spill] sm:$0xff] %v20107_v63  ;;  %v20112_v58 = vpop.permute.xlu0 %12208 }
 0x67b   : > { %v8263_v9 = vpop.f32.mrf.mxu1  ;;  %22866 = vst [vmem:[#allocation5_spill] sm:$0xff] %v20112_v58 }
 0x67c   : > { %v20099_v57 = vadd.f32 %v19891_v40, %v8263_v9  ;;  %v8535_v32 = vsel %vm2047_vm2, %v20094_v27, -inf }
 0x67d   : > { %8536 = vmax.xlane.f32.xlu1 %v8535_v32  ;;  %v20116_v54 = vpop.permute.xlu1 %12467 }
 0x67e   : > { %v8532_v49 = vsel %vm2047_vm2, %v20099_v57, -inf  ;;  %22867 = vst [vmem:[#allocation9_spill] sm:$0xff] %v20116_v54  ;;  %v20118_v39 = vpop.permute.xlu0 %12295 }
 0x67f   : > { %8533 = vmax.xlane.f32.xlu0 %v8532_v49  ;;  %22868 = vst [vmem:[#allocation41_spill] sm:$0xff] %v20118_v39 }
 0x681   : > { %v15968_v28 = vpop.f32.mrf.mxu1  ;;  %v20120_v32 = vpop.permute.xlu1 %12554 }
 0x682   : > { %v20110_v0 = vadd.f32 %v15968_v28, %v19884_v23  ;;  %22869 = vst [vmem:[#allocation54_spill] sm:$0xff] %v20120_v32  ;;  %v20124_v49 = vpop.permute.xlu0 %12382 }
 0x683   : > { %22870 = vst [vmem:[#allocation14_spill] sm:$0xff] %v20124_v49  ;;  %v8445_v49 = vpop.f32.mrf.mxu1 }
 0x684   : > { %v8547_v9 = vsel %vm2047_vm2, %v20110_v0, -inf }
 0x685   : > { %8548 = vmax.xlane.f32.xlu0 %v8547_v9  ;;  %v20126_v63 = vpop.permute.xlu1 %12641 }
 0x686   : > { %22871 = vst [vmem:[#allocation19_spill] sm:$0xff] %v20126_v63  ;;  %v20128_v23 = vpop.permute.xlu0 %12469 }
 0x689   : > { %v20130_v28 = vpop.permute.xlu1 %12728 }
 0x68a   : > { %22872 = vst [vmem:[#allocation53_spill] sm:$0xff] %v20130_v28  ;;  %v20132_v58 = vpop.permute.xlu0 %12556  ;;  %v20149_v28 = vadd.f32 %v19891_v40, %v8445_v49  ;;  %v5449_v40 = vsel %vm2047_vm2, %v19420_v34, 0.0  ;;  %v5443_v49 = vsel %vm2047_vm2, %v19330_v43, 0.0  ;;  %v5461_v34 = vsel %vm2047_vm2, %v19455_v50, 0.0 }
 0x68b   : > { %22873 = vst [vmem:[#allocation26_spill] sm:$0xff] %v20132_v58  ;;  %v5458_v43 = vsel %vm2047_vm2, %v19357_v17, 0.0  ;;  %v5473_v17 = vsel %vm2047_vm2, %v19496_v37, 0.0  ;;  %v5470_v50 = vsel %vm2047_vm2, %v19377_v1, 0.0  ;;  %v5485_v1 = vsel %vm2047_vm2, %v19529_v14, 0.0 }
 0x68d   : > { %v20136_v9 = vpop.permute.xlu1 %12817 }
 0x68e   : > { %13250 = vrot.lane.b32.xlu1 %v17406_v47, %s16922_s11  ;;  %22874 = vst [vmem:[#allocation25_spill] sm:$0xff] %v20136_v9  ;;  %v20138_v54 = vpop.permute.xlu0 %12643 }
 0x691   : > { %v20140_v32 = vpop.permute.xlu1 %12815 }
 0x692   : > { %22875 = vst [vmem:[#allocation39_spill] sm:$0xff] %v20140_v32  ;;  %v20142_v47 = vpop.permute.xlu0 %12730  ;;  %v5446_v32 = vsel %vm2047_vm2, %v19332_v13, 0.0  ;;  %v5452_v13 = vsel %vm2047_vm2, %v19422_v10, 0.0  ;;  %v5467_v10 = vsel %vm2047_vm2, %v19373_v45, 0.0 }
 0x693   : > { %22876 = vst [vmem:[#allocation62_spill] sm:$0xff] %v20142_v47 }
 0x695   : > { %v20144_v39 = vpop.permute.xlu1 %12902 }
 0x696   : > { %22877 = vst [vmem:[#allocation23_spill] sm:$0xff] %v20144_v39  ;;  %v20146_v63 = vpop.permute.xlu0 %12904 }
 0x697   : > { %22878 = vst [vmem:[#allocation20_spill] sm:$0xff] %v20146_v63 }
 0x699   : > { %v20151_v58 = vpop.permute.xlu1 %12989 }
 0x69a   : > { %v20155_v9 = vpop.permute.xlu0 %12991 }
 0x69b   : > { %13252 = vrot.lane.b32.xlu0 %v17361_v7, %s16922_s11  ;;  %v8544_v7 = vsel %vm2047_vm2, %v20149_v28, -inf }
 0x69d   : > { %v20159_v47 = vpop.permute.xlu1 %13076 }
 0x69e   : > { %22879 = vst [vmem:[#allocation29_spill] sm:$0xff] %v20159_v47  ;;  %v20161_v39 = vpop.permute.xlu0 %13078 }
 0x69f   : > { %22880 = vst [vmem:[#allocation33_spill] sm:$0xff] %v20161_v39 }
 0x6a1   : > { %v20167_v63 = vpop.permute.xlu1 %13163 }
 0x6b2   : > { %8545 = vmax.xlane.f32.xlu1 %v8544_v7  ;;  %v5455_v7 = vsel %vm2047_vm2, %v19353_v33, 0.0 }
 0x6b6   : > { %5447 = vadd.xlane.f32.xlu1 %v5446_v32  ;;  %v20173_v32 = vpop.permute.xlu0 %13165 }
 0x6ba   : > { %5450 = vadd.xlane.f32.xlu1 %v5449_v40  ;;  %5444 = vadd.xlane.f32.xlu0 %v5443_v49 }
 0x6be   : > { %5456 = vadd.xlane.f32.xlu1 %v5455_v7  ;;  %5453 = vadd.xlane.f32.xlu0 %v5452_v13  ;;  %v5464_v7 = vsel %vm2047_vm2, %v19461_v61, 0.0  ;;  %v5479_v61 = vsel %vm2047_vm2, %v19436_v51, 0.0 }
 0x6c1   : > { %v8459_v47 = vpop.xlane.xlu1 %8458 }
 0x6c2   : > { %v8551_v40 = vsub.f32 %v19898_v4, %v8459_v47  ;;  %5462 = vadd.xlane.f32.xlu1 %v5461_v34  ;;  %5459 = vadd.xlane.f32.xlu0 %v5458_v43  ;;  %v5482_v43 = vsel %vm2047_vm2, %v19442_v42, 0.0 }
 0x6c3   : > { %v8456_v49 = vpop.xlane.xlu0 %8455 }
 0x6c4   : > { %v8550_v33 = vsub.f32 %v19903_v56, %v8456_v49  ;;  %v8584_v13 = vmul.f32 1.442695, %v8551_v40  ;;  %v5476_v56 = vsel %vm2047_vm2, %v19490_v48, 0.0  ;;  %v5488_v49 = vsel %vm2047_vm2, %v19525_v46, 0.0 }
 0x6c6   : > { %v8582_v39 = vmul.f32 1.442695, %v8550_v33  ;;  %5468 = vadd.xlane.f32.xlu1 %v5467_v10  ;;  %5465 = vadd.xlane.f32.xlu0 %v5464_v7 }
 0x6c8   : > { %16519 = vpow2.f32 %v8582_v39 }
 0x6c9   : > { %v8471_v4 = vpop.xlane.xlu0 %8470  ;;  %16521 = vpow2.f32 %v8584_v13 }
 0x6ca   : > { %5474 = vadd.xlane.f32.xlu1 %v5473_v17  ;;  %5471 = vadd.xlane.f32.xlu0 %v5470_v50  ;;  %v8555_v45 = vsub.f32 %v19918_v21, %v8471_v4  ;;  %v22881_v17 = vld [vmem:[#allocation89_spill] sm:$0xff] }
 0x6cc   : > { %v8592_v39 = vmul.f32 1.442695, %v8555_v45 }
 0x6cd   : > { %v8468_v47 = vpop.xlane.xlu0 %8467 }
 0x6ce   : > { %5480 = vadd.xlane.f32.xlu1 %v5479_v61  ;;  %5477 = vadd.xlane.f32.xlu0 %v5476_v56  ;;  %v8554_v37 = vsub.f32 %v19923_v2, %v8468_v47  ;;  %v5491_v2 = vsel %vm2047_vm2, %v19467_v22, 0.0  ;;  %v5494_v22 = vsel %vm2047_vm2, %v19479_v30, 0.0 }
 0x6d0   : > { %v8590_v34 = vmul.f32 1.442695, %v8554_v37 }
 0x6d1   : > { %v8483_v21 = vpop.xlane.xlu0 %8482 }
 0x6d2   : > { %16523 = vpow2.f32 %v8590_v34  ;;  %5486 = vadd.xlane.f32.xlu1 %v5485_v1  ;;  %5483 = vadd.xlane.f32.xlu0 %v5482_v43  ;;  %v8559_v51 = vsub.f32 %v19938_v24, %v8483_v21  ;;  %v22883_v21 = vld [vmem:[#allocation70_spill] sm:$0xff] }
 0x6d3   : > { %16525 = vpow2.f32 %v8592_v39 }
 0x6d4   : > { %v8600_v40 = vmul.f32 1.442695, %v8559_v51 }
 0x6d5   : > { %v16520_v48 = vpop.eup %16519  ;;  %v8480_v33 = vpop.xlane.xlu0 %8479 }
 0x6d6   : > { %v8465_v14 = vpop.xlane.xlu1 %8464  ;;  %5492 = vadd.xlane.f32.xlu1 %v5491_v2  ;;  %5489 = vadd.xlane.f32.xlu0 %v5488_v49  ;;  %v8558_v42 = vsub.f32 %v19945_v31, %v8480_v33  ;;  %v16522_v10 = vpop.eup %16521  ;;  %16527 = vpow2.f32 %v8600_v40  ;;  %v8646_v34 = vsel %vm2047_vm2, %v16520_v48, 0.0  ;;  %v22884_v40 = vld [vmem:[#allocation72_spill] sm:$0xff] }
 0x6d7   : > { %v8553_v7 = vsub.f32 %v19950_v26, %v8465_v14  ;;  %15973 = vmatprep.mubr.msk.f32.mxu0 %vm2047_vm2, %v16520_v48  ;;  %v22882_v26 = vld [vmem:[#allocation75_spill] sm:$0xff]  ;;  %v8649_v4 = vsel %vm2047_vm2, %v16522_v10, 0.0 }
 0x6d8   : > { %v8598_v24 = vmul.f32 1.442695, %v8558_v42  ;;  %15974 = vmatmul.mubr.msk.f32.vlgmr.msra.gmra.mxu0 %vm2047_vm2, %v16522_v10 }
 0x6d9   : > { %v8588_v13 = vmul.f32 1.442695, %v8553_v7  ;;  %15984 = vmatpush3.msra.mxu0 %v22787_v19  ;;  %v8495_v46 = vpop.xlane.xlu0 %8494 }
 0x6da   : > { %16529 = vpow2.f32 %v8598_v24  ;;  %15985 = vmatprep.subr.mxu0 %v22881_v17  ;;  %5495 = vadd.xlane.f32.xlu0 %v5494_v22  ;;  %v8563_v31 = vsub.f32 %v19961_v5, %v8495_v46 }
 0x6db   : > { %15986 = vmatpush3.msra.mxu0 %v22881_v17  ;;  %16531 = vpow2.f32 %v8588_v13  ;;  %v22885_v17 = vld [vmem:[#allocation80_spill] sm:$0xff] }
 0x6dc   : > { %15997 = vmatprep.subr.mxu0 %v22882_v26  ;;  %v8608_v50 = vmul.f32 1.442695, %v8563_v31 }
 0x6dd   : > { %v8462_v45 = vpop.xlane.xlu0 %8461 }
 0x6de   : > { %v8477_v19 = vpop.xlane.xlu1 %8476  ;;  %8650 = vadd.xlane.f32.xlu0 %v8649_v4  ;;  %v8552_v30 = vsub.f32 %v19964_v15, %v8462_v45  ;;  %16533 = vpow2.f32 %v8608_v50  ;;  %v22886_v4 = vld [vmem:[#allocation57_spill] sm:$0xff] }
 0x6df   : > { %v16524_v61 = vpop.eup %16523  ;;  %v8557_v56 = vsub.f32 %v19971_v60, %v8477_v19 }
 0x6e0   : > { %v16526_v47 = vpop.eup %16525  ;;  %v8586_v37 = vmul.f32 1.442695, %v8552_v30  ;;  %15987 = vmatprep.mubr.msk.f32.mxu0 %vm2047_vm2, %v16524_v61  ;;  %v8658_v5 = vsel %vm2047_vm2, %v16524_v61, 0.0 }
 0x6e1   : > { %v8596_v39 = vmul.f32 1.442695, %v8557_v56  ;;  %15988 = vmatmul.mubr.msk.f32.vlgmr.msra.gmra.mxu0 %vm2047_vm2, %v16526_v47  ;;  %8659 = vadd.xlane.f32.xlu1 %v8658_v5  ;;  %v8492_v1 = vpop.xlane.xlu0 %8491  ;;  %v8661_v2 = vsel %vm2047_vm2, %v16526_v47, 0.0 }
 0x6e2   : > { %16535 = vpow2.f32 %v8586_v37  ;;  %v8474_v43 = vpop.xlane.xlu1 %8473  ;;  %8647 = vadd.xlane.f32.xlu0 %v8646_v34  ;;  %15998 = vmatpush3.msra.mxu0 %v22882_v26  ;;  %v8562_v60 = vsub.f32 %v19976_v41, %v8492_v1 }
 0x6e3   : > { %v8556_v15 = vsub.f32 %v19981_v53, %v8474_v43  ;;  %15999 = vmatprep.subr.mxu0 %v22883_v21  ;;  %16537 = vpow2.f32 %v8596_v39  ;;  %v16528_v33 = vpop.eup %16527 }
 0x6e4   : > { %v8606_v51 = vmul.f32 1.442695, %v8562_v60  ;;  %16000 = vmatpush3.msra.mxu0 %v22883_v21  ;;  %v8673_v24 = vsel %vm2047_vm2, %v16528_v33, 0.0 }
 0x6e5   : > { %v8594_v48 = vmul.f32 1.442695, %v8556_v15  ;;  %16011 = vmatprep.subr.mxu0 %v22884_v40  ;;  %v8507_v49 = vpop.xlane.xlu0 %8506  ;;  %v22887_v15 = vld [vmem:[#allocation97_spill] sm:$0xff] }
 0x6e6   : > { %16539 = vpow2.f32 %v8606_v51  ;;  %v8489_v14 = vpop.xlane.xlu1 %8488  ;;  %8662 = vadd.xlane.f32.xlu0 %v8661_v2  ;;  %v8567_v41 = vsub.f32 %v19988_v18, %v8507_v49 }
 0x6e7   : > { %v16530_v42 = vpop.eup %16529  ;;  %16541 = vpow2.f32 %v8594_v48  ;;  %v8561_v53 = vsub.f32 %v19997_v16, %v8489_v14 }
 0x6e8   : > { %16001 = vmatprep.mubr.msk.f32.mxu0 %vm2047_vm2, %v16530_v42  ;;  %v8670_v10 = vsel %vm2047_vm2, %v16530_v42, 0.0  ;;  %v16532_v22 = vpop.eup %16531  ;;  %v8616_v31 = vmul.f32 1.442695, %v8567_v41  ;;  %v22890_v41 = vld [vmem:[#allocation56_spill] sm:$0xff] }
 0x6e9   : > { %v8604_v7 = vmul.f32 1.442695, %v8561_v53  ;;  %16002 = vmatmul.mubr.msk.f32.vlgmr.msra.gmra.mxu0 %vm2047_vm2, %v16528_v33  ;;  %8671 = vadd.xlane.f32.xlu1 %v8670_v10  ;;  %v8504_v13 = vpop.xlane.xlu0 %8503  ;;  %v8655_v45 = vsel %vm2047_vm2, %v16532_v22, 0.0  ;;  %v22889_v53 = vld [vmem:[#allocation78_spill] sm:$0xff] }
 0x6ea   : > { %v8486_v46 = vpop.xlane.xlu1 %8485  ;;  %8674 = vadd.xlane.f32.xlu0 %v8673_v24  ;;  %16012 = vmatpush3.msra.mxu0 %v22884_v40  ;;  %v8566_v16 = vsub.f32 %v20000_v44, %v8504_v13  ;;  %v22888_v40 = vld [vmem:[#allocation81_spill] sm:$0xff] }
 0x6eb   : > { %16543 = vpow2.f32 %v8604_v7  ;;  %v8560_v18 = vsub.f32 %v20005_v62, %v8486_v46  ;;  %16013 = vmatprep.subr.mxu0 %v22885_v17  ;;  %v16534_v30 = vpop.eup %16533 }
 0x6ec   : > { %v8614_v26 = vmul.f32 1.442695, %v8566_v16  ;;  %16014 = vmatpush3.msra.mxu0 %v22885_v17  ;;  %v8685_v39 = vsel %vm2047_vm2, %v16534_v30, 0.0 }
 0x6ed   : > { %v8602_v50 = vmul.f32 1.442695, %v8560_v18  ;;  %16025 = vmatprep.subr.mxu0 %v22886_v4  ;;  %v8519_v19 = vpop.xlane.xlu0 %8518 }
 0x6ee   : > { %16545 = vpow2.f32 %v8614_v26  ;;  %v8501_v61 = vpop.xlane.xlu1 %8500  ;;  %8656 = vadd.xlane.f32.xlu0 %v8655_v45  ;;  %v8571_v44 = vsub.f32 %v20014_v11, %v8519_v19 }
 0x6ef   : > { %v16536_v56 = vpop.eup %16535  ;;  %16547 = vpow2.f32 %v8602_v50  ;;  %v8565_v62 = vsub.f32 %v20021_v3, %v8501_v61  ;;  %v22893_v61 = vld [vmem:[#allocation59_spill] sm:$0xff] }
 0x6f0   : > { %16549 = vpow2.f32 %v8616_v31  ;;  %15980 = vmatprep.mubr.msk.f32.mxu1 %vm2047_vm2, %v16536_v56  ;;  %v8652_v47 = vsel %vm2047_vm2, %v16536_v56, 0.0  ;;  %v8624_v5 = vmul.f32 1.442695, %v8571_v44  ;;  %v16538_v1 = vpop.eup %16537  ;;  %v22894_v56 = vld [vmem:[#allocation79_spill] sm:$0xff] }
 0x6f1   : > { %v8612_v37 = vmul.f32 1.442695, %v8565_v62  ;;  %15981 = vmatmul.mubr.msk.f32.vlgmr.msra.gmra.mxu1 %vm2047_vm2, %v16532_v22  ;;  %8653 = vadd.xlane.f32.xlu1 %v8652_v47  ;;  %v8516_v34 = vpop.xlane.xlu0 %8515  ;;  %v22892_v22 = vld [vmem:[#allocation60_spill] sm:$0xff] }
 0x6f2   : > { %v8498_v43 = vpop.xlane.xlu1 %8497  ;;  %8686 = vadd.xlane.f32.xlu0 %v8685_v39  ;;  %15991 = vmatpush3.msra.mxu1 %v22798_v35  ;;  %v8570_v11 = vsub.f32 %v20026_v20, %v8516_v34  ;;  %v8667_v35 = vsel %vm2047_vm2, %v16538_v1, 0.0  ;;  %v22896_v34 = vld [vmem:[#allocation82_spill] sm:$0xff] }
 0x6f3   : > { %v16540_v3 = vpop.eup %16539  ;;  %16551 = vpow2.f32 %v8612_v37  ;;  %v8564_v60 = vsub.f32 %v20031_v55, %v8498_v43  ;;  %15992 = vmatprep.subr.mxu1 %v22887_v15  ;;  %v22895_v37 = vld [vmem:[#allocation77_spill] sm:$0xff] }
 0x6f4   : > { %v16542_v21 = vpop.eup %16541  ;;  %v8622_v51 = vmul.f32 1.442695, %v8570_v11  ;;  %15993 = vmatpush3.msra.mxu1 %v22887_v15  ;;  %16015 = vmatprep.mubr.msk.f32.mxu0 %vm2047_vm2, %v16540_v3  ;;  %16553 = vpow2.f32 %v8624_v5  ;;  %v8682_v20 = vsel %vm2047_vm2, %v16540_v3, 0.0 }
 0x6f5   : > { %v8610_v48 = vmul.f32 1.442695, %v8564_v60  ;;  %15994 = vmatprep.mubr.msk.f32.mxu1 %vm2047_vm2, %v16542_v21  ;;  %16004 = vmatprep.subr.mxu1 %v22888_v40  ;;  %v8531_v2 = vpop.xlane.xlu0 %8530  ;;  %v8664_v16 = vsel %vm2047_vm2, %v16542_v21, 0.0 }
 0x6f6   : > { %16555 = vpow2.f32 %v8622_v51  ;;  %v8513_v55 = vpop.xlane.xlu1 %8512  ;;  %8668 = vadd.xlane.f32.xlu0 %v8667_v35  ;;  %15995 = vmatmul.mubr.msk.f32.vlgmr.msra.gmra.mxu1 %vm2047_vm2, %v16538_v1  ;;  %v8575_v49 = vsub.f32 %v20038_v12, %v8531_v2  ;;  %v22897_v51 = vld [vmem:[#allocation96_spill] sm:$0xff] }
 0x6f7   : > { %16557 = vpow2.f32 %v8610_v48  ;;  %16005 = vmatpush3.msra.mxu1 %v22888_v40  ;;  %16016 = vmatmul.mubr.msk.f32.vlgmr.msra.gmra.mxu0 %vm2047_vm2, %v16534_v30  ;;  %v8569_v14 = vsub.f32 %v20047_v29, %v8513_v55  ;;  %v22891_v29 = vld [vmem:[#allocation61_spill] sm:$0xff]  ;;  %v22898_v48 = vld [vmem:[#allocation76_spill] sm:$0xff] }
 0x6f8   : > { %v16544_v33 = vpop.eup %16543  ;;  %16026 = vmatpush3.msra.mxu0 %v22886_v4  ;;  %8683 = vadd.xlane.f32.xlu1 %v8682_v20  ;;  %v8632_v42 = vmul.f32 1.442695, %v8575_v49  ;;  %v22899_v55 = vld [vmem:[#allocation100_spill] sm:$0xff] }
 0x6f9   : > { %16006 = vmatprep.subr.mxu1 %v22889_v53  ;;  %16027 = vmatprep.subr.mxu0 %v22890_v41  ;;  %v8679_v10 = vsel %vm2047_vm2, %v16544_v33, 0.0  ;;  %v8528_v7 = vpop.xlane.xlu0 %8527  ;;  %v8620_v17 = vmul.f32 1.442695, %v8569_v14 }
 0x6fa   : > { %16007 = vmatpush3.msra.mxu1 %v22889_v53  ;;  %16028 = vmatpush3.msra.mxu0 %v22890_v41  ;;  %v8510_v12 = vpop.xlane.xlu1 %8509  ;;  %v8574_v24 = vsub.f32 %v20052_v52, %v8528_v7  ;;  %16559 = vpow2.f32 %v8632_v42  ;;  %v22902_v53 = vld [vmem:[#allocation171_spill] sm:$0xff]  ;;  %v22903_v41 = vld [vmem:[#allocation181_spill] sm:$0xff] }
 0x6fb   : > { %v16546_v13 = vpop.eup %16545  ;;  %16018 = vmatprep.subr.mxu1 %v22891_v29  ;;  %16039 = vmatprep.subr.mxu0 %v22892_v22  ;;  %v8568_v46 = vsub.f32 %v20057_v36, %v8510_v12  ;;  %v22904_v7 = vld [vmem:[#allocation175_spill] sm:$0xff] }
 0x6fc   : > { %v16548_v18 = vpop.eup %16547  ;;  %8680 = vadd.xlane.f32.xlu0 %v8679_v10  ;;  %8665 = vadd.xlane.f32.xlu1 %v8664_v16  ;;  %v8630_v31 = vmul.f32 1.442695, %v8574_v24  ;;  %v8694_v52 = vsel %vm2047_vm2, %v16546_v13, 0.0 }
 0x6fd   : > { %v20274_v26 = vpop.eup %16549  ;;  %v8618_v50 = vmul.f32 1.442695, %v8568_v46  ;;  %16008 = vmatprep.mubr.msk.f32.mxu1 %vm2047_vm2, %v16548_v18  ;;  %16029 = vmatprep.mubr.msk.f32.mxu0 %vm2047_vm2, %v16546_v13  ;;  %v8543_v4 = vpop.xlane.xlu0 %8542  ;;  %v8676_v43 = vsel %vm2047_vm2, %v16548_v18, 0.0  ;;  %v22907_v46 = vld [vmem:[#allocation189_spill] sm:$0xff]  ;;  %v22908_v18 = vld [vmem:[#allocation183_spill] sm:$0xff] }
 0x6fe   : > { %16561 = vpow2.f32 %v8630_v31  ;;  %v8525_v36 = vpop.xlane.xlu1 %8524  ;;  %16009 = vmatmul.mubr.msk.f32.vlgmr.msra.gmra.mxu1 %vm2047_vm2, %v16544_v33  ;;  %16030 = vmatmul.mubr.msk.f32.vlgmr.msra.gmra.mxu0 %vm2047_vm2, %v20274_v26  ;;  %v8579_v45 = vsub.f32 %v20064_v38, %v8543_v4  ;;  %v22909_v31 = vld [vmem:[#allocation196_spill] sm:$0xff]  ;;  %v22912_v4 = vld [vmem:[#allocation199_spill] sm:$0xff] }
 0x6ff   : > { %16563 = vpow2.f32 %v8618_v50  ;;  %16019 = vmatpush3.msra.mxu1 %v22891_v29  ;;  %16040 = vmatpush3.msra.mxu0 %v22892_v22  ;;  %v8573_v30 = vsub.f32 %v20073_v25, %v8525_v36  ;;  %v22905_v29 = vld [vmem:[#allocation185_spill] sm:$0xff]  ;;  %v22906_v22 = vld [vmem:[#allocation179_spill] sm:$0xff]  ;;  %v22910_v50 = vld [vmem:[#allocation194_spill] sm:$0xff] }
 0x700   : > { %v16552_v19 = vpop.eup %16551  ;;  %16565 = vpow2.f32 %v8620_v17  ;;  %8695 = vadd.xlane.f32.xlu1 %v8694_v52  ;;  %16020 = vmatprep.subr.mxu1 %v22893_v61  ;;  %v8640_v44 = vmul.f32 1.442695, %v8579_v45  ;;  %v22911_v52 = vld [vmem:[#allocation187_spill] sm:$0xff]  ;;  %v22913_v36 = vld [vmem:[#allocation190_spill] sm:$0xff]  ;;  %v22914_v45 = vld [vmem:[#allocation197_spill] sm:$0xff] }
 0x701   : > { %16041 = vmatprep.subr.mxu0 %v22894_v56  ;;  %16021 = vmatpush3.msra.mxu1 %v22893_v61  ;;  %v8691_v62 = vsel %vm2047_vm2, %v16552_v19, 0.0  ;;  %v8540_v38 = vpop.xlane.xlu0 %8539  ;;  %v20290_v47 = vpop.eup %16553  ;;  %v8628_v3 = vmul.f32 1.442695, %v8573_v30  ;;  %v22916_v30 = vld [vmem:[#allocation203_spill] sm:$0xff] }
 0x702   : > { %16042 = vmatpush3.msra.mxu0 %v22894_v56  ;;  %16032 = vmatprep.subr.mxu1 %v22895_v37  ;;  %v8522_v5 = vpop.xlane.xlu1 %8521  ;;  %v8578_v25 = vsub.f32 %v20076_v6, %v8540_v38  ;;  %16567 = vpow2.f32 %v8640_v44  ;;  %v22917_v61 = vld [vmem:[#allocation215_spill] sm:$0xff]  ;;  %v22919_v56 = vld [vmem:[#allocation222_spill] sm:$0xff] }
 0x703   : > { %v20295_v39 = vpop.eup %16555  ;;  %16053 = vmatprep.subr.mxu0 %v22896_v34  ;;  %v8572_v1 = vsub.f32 %v20081_v8, %v8522_v5  ;;  %8692 = vadd.xlane.f32.xlu0 %v8691_v62  ;;  %v22918_v44 = vld [vmem:[#allocation211_spill] sm:$0xff]  ;;  %v22920_v62 = vld [vmem:[#allocation220_spill] sm:$0xff] }
 0x704   : > { %v16558_v11 = vpop.eup %16557  ;;  %8677 = vadd.xlane.f32.xlu1 %v8676_v43  ;;  %v8638_v60 = vmul.f32 1.442695, %v8578_v25  ;;  %16043 = vmatprep.mubr.msk.f32.mxu0 %vm2047_vm2, %v20295_v39  ;;  %v22921_v38 = vld [vmem:[#allocation223_spill] sm:$0xff] }
 0x705   : > { %v8626_v15 = vmul.f32 1.442695, %v8572_v1  ;;  %16022 = vmatprep.mubr.msk.f32.mxu1 %vm2047_vm2, %v16558_v11  ;;  %v8688_v6 = vsel %vm2047_vm2, %v16558_v11, 0.0  ;;  %16044 = vmatmul.mubr.msk.f32.vlgmr.msra.gmra.mxu0 %vm2047_vm2, %v20290_v47  ;;  %v22923_v5 = vld [vmem:[#allocation227_spill] sm:$0xff]  ;;  %v22926_v1 = vld [vmem:[#allocation230_spill] sm:$0xff] }
 0x706   : > { %16569 = vpow2.f32 %v8638_v60  ;;  %v8537_v8 = vpop.xlane.xlu1 %8536  ;;  %16023 = vmatmul.mubr.msk.f32.vlgmr.msra.gmra.mxu1 %vm2047_vm2, %v16552_v19  ;;  %16054 = vmatpush3.msra.mxu0 %v22896_v34  ;;  %v22915_v19 = vld [vmem:[#allocation209_spill] sm:$0xff]  ;;  %v22924_v34 = vld [vmem:[#allocation232_spill] sm:$0xff] }
 0x707   : > { %16571 = vpow2.f32 %v8626_v15  ;;  %v8577_v21 = vsub.f32 %v20094_v27, %v8537_v8  ;;  %16033 = vmatpush3.msra.mxu1 %v22895_v37  ;;  %16055 = vmatprep.subr.mxu0 %v22897_v51  ;;  %v20315_v20 = vpop.eup %16559  ;;  %v22900_v27 = vld [vmem:[#allocation173_spill] sm:$0xff] }
 0x708   : > { %16573 = vpow2.f32 %v8628_v3  ;;  %8689 = vadd.xlane.f32.xlu1 %v8688_v6  ;;  %16034 = vmatprep.subr.mxu1 %v22898_v48  ;;  %v8534_v40 = vpop.xlane.xlu0 %8533  ;;  %v22922_v37 = vld [vmem:[#allocation229_spill] sm:$0xff]  ;;  %v22927_v3 = vld [vmem:[#allocation142_spill] sm:$0xff]  ;;  %v22928_v6 = vld [vmem:[#allocation235_spill] sm:$0xff] }
 0x709   : > { %16035 = vmatpush3.msra.mxu1 %v22898_v48  ;;  %16056 = vmatpush3.msra.mxu0 %v22897_v51  ;;  %v8576_v35 = vsub.f32 %v20099_v57, %v8534_v40  ;;  %v8636_v2 = vmul.f32 1.442695, %v8577_v21  ;;  %v22901_v57 = vld [vmem:[#allocation177_spill] sm:$0xff]  ;;  %v22929_v21 = vld [vmem:[#allocation107_spill] sm:$0xff] }
 0x70a   : > { %16046 = vmatprep.subr.mxu1 %v22899_v55  ;;  %16067 = vmatprep.subr.mxu0 %v22900_v27  ;;  %v22932_v51 = vld [vmem:[#allocation113_spill] sm:$0xff] }
 0x70b   : > { %v20319_v49 = vpop.eup %16561  ;;  %v8634_v33 = vmul.f32 1.442695, %v8576_v35  ;;  %v22933_v48 = vld [vmem:[#allocation165_spill] sm:$0xff]  ;;  %v22935_v35 = vld [vmem:[#allocation27_spill] sm:$0xff] }
 0x70c   : > { %v20321_v14 = vpop.eup %16563  ;;  %16057 = vmatprep.mubr.msk.f32.mxu0 %vm2047_vm2, %v20319_v49  ;;  %v22934_v40 = vld [vmem:[#allocation121_spill] sm:$0xff] }
 0x70d   : > { %v20325_v42 = vpop.eup %16565  ;;  %16575 = vpow2.f32 %v8634_v33  ;;  %16036 = vmatprep.mubr.msk.f32.mxu1 %vm2047_vm2, %v20321_v14  ;;  %16058 = vmatmul.mubr.msk.f32.vlgmr.msra.gmra.mxu0 %vm2047_vm2, %v20315_v20  ;;  %v22937_v33 = vld [vmem:[#allocation7_spill] sm:$0xff] }
 0x70e   : > { %16577 = vpow2.f32 %v8636_v2  ;;  %16037 = vmatmul.mubr.msk.f32.vlgmr.msra.gmra.mxu1 %vm2047_vm2, %v20325_v42  ;;  %16068 = vmatpush3.msra.mxu0 %v22900_v27  ;;  %v8549_v25 = vpop.xlane.xlu0 %8548 }
 0x70f   : > { %16047 = vmatpush3.msra.mxu1 %v22899_v55  ;;  %16069 = vmatprep.subr.mxu0 %v22901_v57  ;;  %v20341_v10 = vpop.eup %16567  ;;  %v8581_v43 = vsub.f32 %v20110_v0, %v8549_v25  ;;  %v22930_v0 = vld [vmem:[#allocation214_spill] sm:$0xff]  ;;  %v22936_v55 = vld [vmem:[#allocation11_spill] sm:$0xff]  ;;  %v22961_v25 = vld [vmem:[#allocation141_spill] sm:$0xff] }
 0x710   : > { %16048 = vmatprep.subr.mxu1 %v22902_v53  ;;  %16070 = vmatpush3.msra.mxu0 %v22901_v57  ;;  %v22938_v57 = vld [vmem:[#allocation42_spill] sm:$0xff] }
 0x711   : > { %16049 = vmatpush3.msra.mxu1 %v22902_v53  ;;  %16081 = vmatprep.subr.msk.mxu0 %vm628_vm1, %v22903_v41  ;;  %v8644_v15 = vmul.f32 1.442695, %v8581_v43  ;;  %v22939_v53 = vld [vmem:[#allocation192_spill] sm:$0xff]  ;;  %v22964_v43 = vld [vmem:[#allocation111_spill] sm:$0xff] }
 0x712   : > { %16060 = vmatprep.subr.mxu1 %v22904_v7 }
 0x713   : > { %v20344_v12 = vpop.eup %16569 }
 0x714   : > { %v20346_v24 = vpop.eup %16571  ;;  %16071 = vmatprep.mubr.msk.f32.mxu0 %vm2047_vm2, %v20344_v12 }
 0x715   : > { %v20350_v13 = vpop.eup %16573  ;;  %16050 = vmatprep.mubr.msk.f32.mxu1 %vm2047_vm2, %v20346_v24  ;;  %16072 = vmatmul.mubr.msk.f32.vlgmr.msra.gmra.mxu0 %vm2047_vm2, %v20341_v10 }
 0x716   : > { %16051 = vmatmul.mubr.msk.f32.vlgmr.msra.gmra.mxu1 %vm2047_vm2, %v20350_v13  ;;  %16082 = vmatpush3.xpose.msk.msra.mxu0 %vm628_vm1, %v22903_v41  ;;  %v22940_v41 = vld [vmem:[#allocation195_spill] sm:$0xff] }
 0x717   : > { %16061 = vmatpush3.msra.mxu1 %v22904_v7  ;;  %16083 = vmatprep.subr.msk.mxu0 %vm628_vm1, %v22905_v29  ;;  %v22941_v7 = vld [vmem:[#allocation13_spill] sm:$0xff] }
 0x718   : > { %16062 = vmatprep.subr.mxu1 %v22906_v22  ;;  %16085 = vmatprep.mubr.msk.f32.mxu0 %vm628_vm1, %v22907_v46  ;;  %v22944_v46 = vld [vmem:[#allocation198_spill] sm:$0xff] }
 0x719   : > { %16063 = vmatpush3.msra.mxu1 %v22906_v22  ;;  %v22943_v22 = vld [vmem:[#allocation136_spill] sm:$0xff] }
 0x71a   : > { %v20367_v16 = vpop.eup %16575  ;;  %16074 = vmatprep.subr.mxu1 %v22908_v18  ;;  %16084 = vmatpush3.xpose.msk.msra.mxu0 %vm628_vm1, %v22905_v29  ;;  %v22942_v29 = vld [vmem:[#allocation200_spill] sm:$0xff] }
 0x71b   : > { %v20372_v17 = vpop.eup %16577  ;;  %16064 = vmatprep.mubr.msk.f32.mxu1 %vm2047_vm2, %v20367_v16  ;;  %16095 = vmatprep.subr.msk.mxu0 %vm628_vm1, %v22909_v31 }
 0x71c   : > { %16065 = vmatmul.mubr.msk.f32.vlgmr.msra.gmra.mxu1 %vm2047_vm2, %v20372_v17 }
 0x71d   : > { %16075 = vmatpush3.msra.mxu1 %v22908_v18  ;;  %16086 = vmatmul.mubr.msk.f32.vlgmr.msra.gmra.mxu0 %vm628_vm1, %v22910_v50  ;;  %v22945_v18 = vld [vmem:[#allocation37_spill] sm:$0xff]  ;;  %v22947_v50 = vld [vmem:[#allocation202_spill] sm:$0xff] }
 0x71e   : > { %16076 = vmatprep.subr.mxu1 %v22911_v52  ;;  %16096 = vmatpush3.xpose.msk.msra.mxu0 %vm628_vm1, %v22909_v31  ;;  %v22946_v31 = vld [vmem:[#allocation206_spill] sm:$0xff] }
 0x71f   : > { %16077 = vmatpush3.msra.mxu1 %v22911_v52  ;;  %16099 = vmatprep.mubr.msk.f32.mxu0 %vm628_vm1, %v22912_v4  ;;  %v22948_v52 = vld [vmem:[#allocation133_spill] sm:$0xff]  ;;  %v22949_v4 = vld [vmem:[#allocation216_spill] sm:$0xff] }
 0x720   : > { %16088 = vmatprep.subr.msk.mxu1 %vm628_vm1, %v22913_v36  ;;  %16097 = vmatprep.subr.msk.mxu0 %vm628_vm1, %v22914_v45 }
 0x722   : > { %16098 = vmatpush3.xpose.msk.msra.mxu0 %vm628_vm1, %v22914_v45  ;;  %v22951_v45 = vld [vmem:[#allocation221_spill] sm:$0xff] }
 0x723   : > { %16109 = vmatprep.subr.msk.mxu0 %vm628_vm1, %v22915_v19 }
 0x725   : > { %16100 = vmatmul.mubr.msk.f32.vlgmr.msra.gmra.mxu0 %vm628_vm1, %v22916_v30  ;;  %v22953_v30 = vld [vmem:[#allocation225_spill] sm:$0xff] }
 0x726   : > { %16110 = vmatpush3.xpose.msk.msra.mxu0 %vm628_vm1, %v22915_v19  ;;  %16113 = vmatprep.mubr.msk.f32.mxu0 %vm628_vm1, %v22917_v61  ;;  %v22952_v19 = vld [vmem:[#allocation219_spill] sm:$0xff]  ;;  %v22954_v61 = vld [vmem:[#allocation224_spill] sm:$0xff] }
 0x727   : > { %16111 = vmatprep.subr.msk.mxu0 %vm628_vm1, %v22918_v44 }
 0x72a   : > { %16112 = vmatpush3.xpose.msk.msra.mxu0 %vm628_vm1, %v22918_v44  ;;  %v22955_v44 = vld [vmem:[#allocation228_spill] sm:$0xff] }
 0x72b   : > { %16123 = vmatprep.subr.msk.mxu0 %vm628_vm1, %v22919_v56 }
 0x72d   : > { %16114 = vmatmul.mubr.msk.f32.vlgmr.msra.gmra.mxu0 %vm628_vm1, %v22920_v62  ;;  %v22957_v62 = vld [vmem:[#allocation233_spill] sm:$0xff] }
 0x72e   : > { %16124 = vmatpush3.xpose.msk.msra.mxu0 %vm628_vm1, %v22919_v56  ;;  %16127 = vmatprep.mubr.msk.f32.mxu0 %vm628_vm1, %v19263_v59  ;;  %v20427_v59 = vpop.permute.xlu1 %13250  ;;  %v22956_v56 = vld [vmem:[#allocation226_spill] sm:$0xff] }
 0x72f   : > { %16125 = vmatprep.subr.msk.mxu0 %vm628_vm1, %v22921_v38  ;;  %22925 = vst [vmem:[#allocation48_spill] sm:$0xff] %v20427_v59 }
 0x732   : > { %16126 = vmatpush3.xpose.msk.msra.mxu0 %vm628_vm1, %v22921_v38  ;;  %v22958_v38 = vld [vmem:[#allocation231_spill] sm:$0xff] }
 0x733   : > { %16137 = vmatprep.subr.msk.mxu0 %vm628_vm1, %v22922_v37 }
 0x735   : > { %16128 = vmatmul.mubr.msk.f32.vlgmr.msra.gmra.mxu0 %vm628_vm1, %v22923_v5  ;;  %v22960_v5 = vld [vmem:[#allocation234_spill] sm:$0xff] }
 0x736   : > { %16138 = vmatpush3.xpose.msk.msra.mxu0 %vm628_vm1, %v22922_v37  ;;  %16141 = vmatprep.mubr.msk.f32.mxu0 %vm628_vm1, %v22924_v34  ;;  %v22959_v37 = vld [vmem:[#allocation103_spill] sm:$0xff]  ;;  %v22962_v34 = vld [vmem:[#allocation149_spill] sm:$0xff] }
 0x737   : > { %16139 = vmatprep.subr.msk.mxu0 %vm628_vm1, %v22926_v1 }
 0x73a   : > { %16140 = vmatpush3.xpose.msk.msra.mxu0 %vm628_vm1, %v22926_v1  ;;  %v22963_v1 = vld [vmem:[#allocation117_spill] sm:$0xff] }
 0x73b   : > { %v8546_v11 = vpop.xlane.xlu1 %8545  ;;  %16151 = vmatprep.subr.msk.mxu0 %vm628_vm1, %v22927_v3 }
 0x73c   : > { %v8580_v60 = vsub.f32 %v20149_v28, %v8546_v11  ;;  %v22931_v28 = vld [vmem:[#allocation134_spill] sm:$0xff]  ;;  %v22965_v11 = vld [vmem:[#allocation155_spill] sm:$0xff] }
 0x73d   : > { %16142 = vmatmul.mubr.msk.f32.vlgmr.msra.gmra.mxu0 %vm628_vm1, %v22928_v6  ;;  %v22969_v6 = vld [vmem:[#allocation116_spill] sm:$0xff] }
 0x73e   : > { %v8642_v8 = vmul.f32 1.442695, %v8580_v60  ;;  %16152 = vmatpush3.xpose.msk.msra.mxu0 %vm628_vm1, %v22927_v3  ;;  %16155 = vmatprep.mubr.msk.f32.mxu0 %vm628_vm1, %v22929_v21  ;;  %v22966_v3 = vld [vmem:[#allocation50_spill] sm:$0xff]  ;;  %v22967_v60 = vld [vmem:[#allocation145_spill] sm:$0xff] }
 0x73f   : > { %16153 = vmatprep.subr.msk.mxu0 %vm628_vm1, %v22930_v0  ;;  %v22971_v21 = vld [vmem:[#allocation17_spill] sm:$0xff] }
 0x740   : > { %16579 = vpow2.f32 %v8642_v8  ;;  %v22970_v8 = vld [vmem:[#allocation12_spill] sm:$0xff] }
 0x741   : > { %16581 = vpow2.f32 %v8644_v15  ;;  %v22968_v15 = vld [vmem:[#allocation166_spill] sm:$0xff] }
 0x742   : > { %16154 = vmatpush3.xpose.msk.msra.mxu0 %vm628_vm1, %v22930_v0  ;;  %v22972_v0 = vld [vmem:[#allocation4_spill] sm:$0xff] }
 0x743   : > { %16165 = vmatprep.subr.msk.mxu0 %vm628_vm1, %v22931_v28 }
 0x745   : > { %16156 = vmatmul.mubr.msk.f32.vlgmr.msra.gmra.mxu0 %vm628_vm1, %v22932_v51  ;;  %v22974_v51 = vld [vmem:[#allocation8_spill] sm:$0xff] }
 0x746   : > { %16166 = vmatpush3.xpose.msk.msra.mxu0 %vm628_vm1, %v22931_v28  ;;  %16169 = vmatprep.mubr.msk.f32.mxu0 %vm628_vm1, %v22933_v48  ;;  %v22973_v28 = vld [vmem:[#allocation28_spill] sm:$0xff]  ;;  %v22975_v48 = vld [vmem:[#allocation15_spill] sm:$0xff] }
 0x747   : > { %16167 = vmatprep.subr.msk.mxu0 %vm628_vm1, %v22934_v40 }
 0x74a   : > { %16168 = vmatpush3.xpose.msk.msra.mxu0 %vm628_vm1, %v22934_v40  ;;  %v22976_v40 = vld [vmem:[#allocation5_spill] sm:$0xff] }
 0x74b   : > { %16179 = vmatprep.subr.msk.mxu0 %vm628_vm1, %v22935_v35 }
 0x74d   : > { %v20461_v2 = vpop.eup %16579  ;;  %16170 = vmatmul.mubr.msk.f32.vlgmr.msra.gmra.mxu0 %vm628_vm1, %v22936_v55 }
 0x74e   : > { %v20465_v27 = vpop.eup %16581  ;;  %16078 = vmatprep.mubr.msk.f32.mxu1 %vm2047_vm2, %v20461_v2  ;;  %16180 = vmatpush3.xpose.msk.msra.mxu0 %vm628_vm1, %v22935_v35 }
 0x74f   : > { %16183 = vmatprep.mubr.msk.f32.mxu0 %vm628_vm1, %v22937_v33  ;;  %16079 = vmatmul.mubr.msk.f32.vlgmr.msra.gmra.mxu1 %vm2047_vm2, %v20465_v27 }
 0x750   : > { %16089 = vmatpush3.xpose.msk.msra.mxu1 %vm628_vm1, %v22913_v36  ;;  %16181 = vmatprep.subr.msk.mxu0 %vm628_vm1, %v22938_v57  ;;  %v22950_v36 = vld [vmem:[#allocation212_spill] sm:$0xff] }
 0x751   : > { %16090 = vmatprep.subr.msk.mxu1 %vm628_vm1, %v22939_v53  ;;  %16092 = vmatprep.mubr.msk.f32.mxu1 %vm628_vm1, %v22940_v41 }
 0x752   : > { %16182 = vmatpush3.xpose.msk.msra.mxu0 %vm628_vm1, %v22938_v57 }
 0x753   : > { %16193 = vmatprep.subr.mxu0 %v22941_v7 }
 0x754   : > { %16091 = vmatpush3.xpose.msk.msra.mxu1 %vm628_vm1, %v22939_v53 }
 0x755   : > { %16102 = vmatprep.subr.msk.mxu1 %vm628_vm1, %v22942_v29  ;;  %16184 = vmatmul.mubr.msk.f32.vlgmr.msra.gmra.mxu0 %vm628_vm1, %v22943_v22 }
 0x756   : > { %16194 = vmatpush3.msra.mxu0 %v22941_v7 }
 0x757   : > { %16093 = vmatmul.mubr.msk.f32.vlgmr.msra.gmra.mxu1 %vm628_vm1, %v22944_v46  ;;  %16195 = vmatprep.subr.mxu0 %v22945_v18 }
 0x758   : > { %16103 = vmatpush3.xpose.msk.msra.mxu1 %vm628_vm1, %v22942_v29  ;;  %16106 = vmatprep.mubr.msk.f32.mxu1 %vm628_vm1, %v22946_v31 }
 0x759   : > { %16104 = vmatprep.subr.msk.mxu1 %vm628_vm1, %v22947_v50  ;;  %16196 = vmatpush3.msra.mxu0 %v22945_v18 }
 0x75a   : > { %16207 = vmatprep.subr.mxu0 %v22948_v52 }
 0x75c   : > { %16105 = vmatpush3.xpose.msk.msra.mxu1 %vm628_vm1, %v22947_v50 }
 0x75d   : > { %16116 = vmatprep.subr.msk.mxu1 %vm628_vm1, %v22949_v4 }
 0x75f   : > { %16107 = vmatmul.mubr.msk.f32.vlgmr.msra.gmra.mxu1 %vm628_vm1, %v22950_v36 }
 0x760   : > { %16117 = vmatpush3.xpose.msk.msra.mxu1 %vm628_vm1, %v22949_v4  ;;  %16120 = vmatprep.mubr.msk.f32.mxu1 %vm628_vm1, %v22951_v45 }
 0x761   : > { %16118 = vmatprep.subr.msk.mxu1 %vm628_vm1, %v22952_v19 }
 0x764   : > { %16119 = vmatpush3.xpose.msk.msra.mxu1 %vm628_vm1, %v22952_v19  ;;  %v20620_v19 = vld [vmem:[%s21931_s3 + $0x38] sm:$0xff] }
 0x765   : > { %16130 = vmatprep.subr.msk.mxu1 %vm628_vm1, %v22953_v30 }
 0x767   : > { %16121 = vmatmul.mubr.msk.f32.vlgmr.msra.gmra.mxu1 %vm628_vm1, %v22954_v61  ;;  %v20625_v61 = vld [vmem:[%s21931_s3 + $0x30] sm:$0xff] }
 0x768   : > { %16131 = vmatpush3.xpose.msk.msra.mxu1 %vm628_vm1, %v22953_v30  ;;  %16134 = vmatprep.mubr.msk.f32.mxu1 %vm628_vm1, %v22955_v44 }
 0x769   : > { %16132 = vmatprep.subr.msk.mxu1 %vm628_vm1, %v22956_v56 }
 0x76c   : > { %16133 = vmatpush3.xpose.msk.msra.mxu1 %vm628_vm1, %v22956_v56 }
 0x76d   : > { %16144 = vmatprep.subr.msk.mxu1 %vm628_vm1, %v22957_v62 }
 0x76f   : > { %16135 = vmatmul.mubr.msk.f32.vlgmr.msra.gmra.mxu1 %vm628_vm1, %v22958_v38 }
 0x770   : > { %16145 = vmatpush3.xpose.msk.msra.mxu1 %vm628_vm1, %v22957_v62  ;;  %16148 = vmatprep.mubr.msk.f32.mxu1 %vm628_vm1, %v22959_v37 }
 0x771   : > { %16146 = vmatprep.subr.msk.mxu1 %vm628_vm1, %v22960_v5 }
 0x774   : > { %16147 = vmatpush3.xpose.msk.msra.mxu1 %vm628_vm1, %v22960_v5 }
 0x775   : > { %16158 = vmatprep.subr.msk.mxu1 %vm628_vm1, %v22961_v25 }
 0x777   : > { %16149 = vmatmul.mubr.msk.f32.vlgmr.msra.gmra.mxu1 %vm628_vm1, %v22962_v34 }
 0x778   : > { %16159 = vmatpush3.xpose.msk.msra.mxu1 %vm628_vm1, %v22961_v25  ;;  %16162 = vmatprep.mubr.msk.f32.mxu1 %vm628_vm1, %v22963_v1 }
 0x779   : > { %16160 = vmatprep.subr.msk.mxu1 %vm628_vm1, %v22964_v43 }
 0x77c   : > { %16161 = vmatpush3.xpose.msk.msra.mxu1 %vm628_vm1, %v22964_v43 }
 0x77d   : > { %16172 = vmatprep.subr.msk.mxu1 %vm628_vm1, %v22965_v11 }
 0x77f   : > { %16163 = vmatmul.mubr.msk.f32.vlgmr.msra.gmra.mxu1 %vm628_vm1, %v22966_v3 }
 0x780   : > { %16173 = vmatpush3.xpose.msk.msra.mxu1 %vm628_vm1, %v22965_v11  ;;  %16176 = vmatprep.mubr.msk.f32.mxu1 %vm628_vm1, %v22967_v60 }
 0x781   : > { %16174 = vmatprep.subr.msk.mxu1 %vm628_vm1, %v22968_v15 }
 0x784   : > { %16175 = vmatpush3.xpose.msk.msra.mxu1 %vm628_vm1, %v22968_v15 }
 0x785   : > { %16186 = vmatprep.subr.msk.mxu1 %vm628_vm1, %v22969_v6 }
 0x787   : > { %16177 = vmatmul.mubr.msk.f32.vlgmr.msra.gmra.mxu1 %vm628_vm1, %v22970_v8 }
 0x788   : > { %16187 = vmatpush3.xpose.msk.msra.mxu1 %vm628_vm1, %v22969_v6  ;;  %16190 = vmatprep.mubr.msk.f32.mxu1 %vm628_vm1, %v22971_v21 }
 0x789   : > { %16188 = vmatprep.subr.msk.mxu1 %vm628_vm1, %v22972_v0 }
 0x78c   : > { %16189 = vmatpush3.xpose.msk.msra.mxu1 %vm628_vm1, %v22972_v0 }
 0x78d   : > { %16200 = vmatprep.subr.mxu1 %v22973_v28 }
 0x78f   : > { %16191 = vmatmul.mubr.msk.f32.vlgmr.msra.gmra.mxu1 %vm628_vm1, %v22974_v51 }
 0x790   : > { %16201 = vmatpush3.msra.mxu1 %v22973_v28 }
 0x791   : > { %16202 = vmatprep.subr.mxu1 %v22975_v48 }
 0x792   : > { %16203 = vmatpush3.msra.mxu1 %v22975_v48 }
 0x793   : > { %16214 = vmatprep.subr.mxu1 %v22976_v40 }
 0x798   : > { %v20585_v35 = vpop.f32.mrf.mxu0 }
 0x799   : > { %22977 = vst [vmem:[#allocation51_spill] sm:$0xff] %v20585_v35 }
 0x79a   : > { %v20587_v55 = vpop.f32.mrf.mxu0 }
 0x79b   : > { %22978 = vst [vmem:[#allocation58_spill] sm:$0xff] %v20587_v55 }
 0x7a1   : > { %v20589_v33 = vpop.f32.mrf.mxu0 }
 0x7a2   : > { %22979 = vst [vmem:[#allocation55_spill] sm:$0xff] %v20589_v33 }
 0x7a3   : > { %v20591_v57 = vpop.f32.mrf.mxu0 }
 0x7a4   : > { %22980 = vst [vmem:[#allocation64_spill] sm:$0xff] %v20591_v57 }
 0x7a9   : > { %v20593_v53 = vpop.f32.mrf.mxu0 }
 0x7aa   : > { %22981 = vst [vmem:[#allocation30_spill] sm:$0xff] %v20593_v53 }
 0x7ab   : > { %v20595_v41 = vpop.f32.mrf.mxu0 }
 0x7ac   : > { %22982 = vst [vmem:[#allocation65_spill] sm:$0xff] %v20595_v41 }
 0x7b1   : > { %v20637_v5 = vpop.f32.mrf.mxu1 }
 0x7b2   : > { %22993 = vst [vmem:[#allocation97_spill] sm:$0xff] %v20637_v5 }
 0x7b3   : > { %v20647_v3 = vpop.f32.mrf.mxu1 }
 0x7b4   : > { %22994 = vst [vmem:[#allocation81_spill] sm:$0xff] %v20647_v3 }
 0x7b6   : > { %v20651_v15 = vpop.f32.mrf.mxu1 }
 0x7b7   : > { %v20597_v7 = vpop.f32.mrf.mxu0  ;;  %22995 = vst [vmem:[#allocation78_spill] sm:$0xff] %v20651_v15 }
 0x7b8   : > { %22983 = vst [vmem:[#allocation73_spill] sm:$0xff] %v20597_v7  ;;  %v20661_v51 = vpop.f32.mrf.mxu1 }
 0x7b9   : > { %v20599_v29 = vpop.f32.mrf.mxu0  ;;  %22996 = vst [vmem:[#allocation56_spill] sm:$0xff] %v20661_v51 }
 0x7ba   : > { %22984 = vst [vmem:[#allocation67_spill] sm:$0xff] %v20599_v29 }
 0x7be   : > { %v20601_v22 = vpop.f32.mrf.mxu0 }
 0x7bf   : > { %22985 = vst [vmem:[#allocation83_spill] sm:$0xff] %v20601_v22 }
 0x7c0   : > { %v20603_v46 = vpop.f32.mrf.mxu0 }
 0x7c1   : > { %22986 = vst [vmem:[#allocation22_spill] sm:$0xff] %v20603_v46 }
 0x7c5   : > { %v20605_v18 = vpop.f32.mrf.mxu0 }
 0x7c6   : > { %22987 = vst [vmem:[#allocation89_spill] sm:$0xff] %v20605_v18 }
 0x7c7   : > { %v20607_v31 = vpop.f32.mrf.mxu0 }
 0x7c8   : > { %22988 = vst [vmem:[#allocation75_spill] sm:$0xff] %v20607_v31 }
 0x7cd   : > { %v20609_v50 = vpop.f32.mrf.mxu0 }
 0x7ce   : > { %22989 = vst [vmem:[#allocation70_spill] sm:$0xff] %v20609_v50  ;;  %v20694_v50 = vpop.xlane.xlu1 %5447 }
 0x7cf   : > { %v20611_v4 = vpop.f32.mrf.mxu0  ;;  %23009 = vst [vmem:[#allocation181_spill] sm:$0xff] %v20694_v50 }
 0x7d0   : > { %22990 = vst [vmem:[#allocation72_spill] sm:$0xff] %v20611_v4 }
 0x7d5   : > { %v20613_v36 = vpop.f32.mrf.mxu0 }
 0x7d6   : > { %22991 = vst [vmem:[#allocation80_spill] sm:$0xff] %v20613_v36 }
 0x7d7   : > { %v20615_v45 = vpop.f32.mrf.mxu0 }
 0x7d8   : > { %22992 = vst [vmem:[#allocation57_spill] sm:$0xff] %v20615_v45 }
 0x7dd   : > { %v16087_v30 = vpop.f32.mrf.mxu0 }
 0x7de   : > { %v20628_v44 = vadd.f32 %v16087_v30, %v20620_v19  ;;  %v20665_v30 = vpop.f32.mrf.mxu1 }
 0x7df   : > { %v10283_v56 = vpop.f32.mrf.mxu0  ;;  %22997 = vst [vmem:[#allocation61_spill] sm:$0xff] %v20665_v30 }
 0x7e0   : > { %v20631_v62 = vadd.f32 %v20625_v61, %v10283_v56  ;;  %v11660_v38 = vsel %vm2047_vm2, %v20628_v44, -inf }
 0x7e1   : > { %11661 = vmax.xlane.f32.xlu1 %v11660_v38  ;;  %v20667_v38 = vpop.f32.mrf.mxu1 }
 0x7e2   : > { %v11657_v37 = vsel %vm2047_vm2, %v20631_v62, -inf  ;;  %22998 = vst [vmem:[#allocation60_spill] sm:$0xff] %v20667_v38 }
 0x7e3   : > { %11658 = vmax.xlane.f32.xlu0 %v11657_v37 }
 0x7e5   : > { %v16101_v25 = vpop.f32.mrf.mxu0 }
 0x7e6   : > { %v20640_v34 = vadd.f32 %v16101_v25, %v20620_v19 }
 0x7e7   : > { %v10465_v1 = vpop.f32.mrf.mxu0 }
 0x7e8   : > { %v20643_v43 = vadd.f32 %v20625_v61, %v10465_v1  ;;  %v11672_v11 = vsel %vm2047_vm2, %v20640_v34, -inf  ;;  %v20672_v1 = vpop.f32.mrf.mxu1 }
 0x7e9   : > { %11673 = vmax.xlane.f32.xlu0 %v11672_v11  ;;  %22999 = vst [vmem:[#allocation59_spill] sm:$0xff] %v20672_v1 }
 0x7ea   : > { %v11669_v60 = vsel %vm2047_vm2, %v20643_v43, -inf }
 0x7eb   : > { %11670 = vmax.xlane.f32.xlu1 %v11669_v60  ;;  %v20676_v60 = vpop.f32.mrf.mxu1 }
 0x7ec   : > { %23000 = vst [vmem:[#allocation79_spill] sm:$0xff] %v20676_v60 }
 0x7ed   : > { %v16115_v6 = vpop.f32.mrf.mxu0 }
 0x7ee   : > { %v20654_v8 = vadd.f32 %v16115_v6, %v20620_v19  ;;  %v20678_v6 = vpop.f32.mrf.mxu1 }
 0x7ef   : > { %v10647_v21 = vpop.f32.mrf.mxu0  ;;  %23001 = vst [vmem:[#allocation77_spill] sm:$0xff] %v20678_v6  ;;  %v20702_v6 = vpop.xlane.xlu1 %5450 }
 0x7f0   : > { %v20657_v0 = vadd.f32 %v20625_v61, %v10647_v21  ;;  %v11684_v28 = vsel %vm2047_vm2, %v20654_v8, -inf  ;;  %v20680_v21 = vpop.permute.xlu0 %13252  ;;  %23013 = vst [vmem:[#allocation189_spill] sm:$0xff] %v20702_v6 }
 0x7f1   : > { %11685 = vmax.xlane.f32.xlu0 %v11684_v28  ;;  %23002 = vst [vmem:[#allocation82_spill] sm:$0xff] %v20680_v21  ;;  %v20682_v28 = vpop.f32.mrf.mxu1 }
 0x7f2   : > { %v11681_v48 = vsel %vm2047_vm2, %v20657_v0, -inf  ;;  %23003 = vst [vmem:[#allocation96_spill] sm:$0xff] %v20682_v28 }
 0x7f3   : > { %11682 = vmax.xlane.f32.xlu1 %v11681_v48  ;;  %v20686_v45 = vpop.f32.mrf.mxu1 }
 0x7f4   : > { %v20684_v48 = vpop.xlane.xlu0 %5444  ;;  %23005 = vst [vmem:[#allocation100_spill] sm:$0xff] %v20686_v45 }
 0x7f5   : > { %v16129_v56 = vpop.f32.mrf.mxu0  ;;  %23004 = vst [vmem:[#allocation76_spill] sm:$0xff] %v20684_v48 }
 0x7f7   : > { %v10829_v37 = vpop.f32.mrf.mxu0 }
 0x7f8   : > { %v20670_v25 = vadd.f32 %v20625_v61, %v10829_v37  ;;  %v20688_v37 = vpop.f32.mrf.mxu1  ;;  %v20690_v36 = vpop.xlane.xlu0 %5453 }
 0x7f9   : > { %23006 = vst [vmem:[#allocation173_spill] sm:$0xff] %v20688_v37  ;;  %23007 = vst [vmem:[#allocation177_spill] sm:$0xff] %v20690_v36  ;;  %v20708_v37 = vpop.xlane.xlu1 %5456 }
 0x7fa   : > { %v11693_v11 = vsel %vm2047_vm2, %v20670_v25, -inf  ;;  %v20692_v4 = vpop.f32.mrf.mxu1  ;;  %23016 = vst [vmem:[#allocation194_spill] sm:$0xff] %v20708_v37 }
 0x7fb   : > { %11694 = vmax.xlane.f32.xlu1 %v11693_v11  ;;  %23008 = vst [vmem:[#allocation171_spill] sm:$0xff] %v20692_v4  ;;  %v20714_v4 = vadd.f32 %v16129_v56, %v20620_v19 }
 0x7fc   : > { %v20696_v11 = vpop.f32.mrf.mxu1  ;;  %v20698_v31 = vpop.xlane.xlu0 %5459 }
 0x7fd   : > { %23010 = vst [vmem:[#allocation175_spill] sm:$0xff] %v20696_v11  ;;  %23011 = vst [vmem:[#allocation185_spill] sm:$0xff] %v20698_v31  ;;  %v16143_v60 = vpop.f32.mrf.mxu0 }
 0x7ff   : > { %v11011_v56 = vpop.f32.mrf.mxu0 }
 0x800   : > { %v20706_v22 = vpop.xlane.xlu0 %5465 }
 0x801   : > { %23015 = vst [vmem:[#allocation196_spill] sm:$0xff] %v20706_v22 }
 0x80f   : > { %v20700_v18 = vpop.f32.mrf.mxu1 }
 0x810   : > { %23012 = vst [vmem:[#allocation179_spill] sm:$0xff] %v20700_v18  ;;  %v20718_v18 = vpop.xlane.xlu0 %5471 }
 0x811   : > { %v20704_v28 = vpop.f32.mrf.mxu1  ;;  %23017 = vst [vmem:[#allocation187_spill] sm:$0xff] %v20718_v18 }
 0x812   : > { %23014 = vst [vmem:[#allocation183_spill] sm:$0xff] %v20704_v28  ;;  %v20720_v28 = vpop.xlane.xlu1 %5462 }
 0x813   : > { %23018 = vst [vmem:[#allocation199_spill] sm:$0xff] %v20720_v28 }
 0x814   : > { %v20727_v38 = vpop.xlane.xlu0 %5477 }
 0x815   : > { %23019 = vst [vmem:[#allocation190_spill] sm:$0xff] %v20727_v38 }
 0x816   : > { %v20737_v18 = vpop.xlane.xlu1 %5468 }
 0x817   : > { %v16094_v45 = vpop.f32.mrf.mxu1  ;;  %23020 = vst [vmem:[#allocation197_spill] sm:$0xff] %v20737_v18 }
 0x818   : > { %v20711_v46 = vadd.f32 %v16094_v45, %v20620_v19  ;;  %v11696_v45 = vsel %vm2047_vm2, %v20714_v4, -inf  ;;  %v20749_v22 = vpop.xlane.xlu0 %5483 }
 0x819   : > { %v10374_v1 = vpop.f32.mrf.mxu1  ;;  %23021 = vst [vmem:[#allocation209_spill] sm:$0xff] %v20749_v22 }
 0x81a   : > { %v11666_v11 = vsel %vm2047_vm2, %v20711_v46, -inf  ;;  %v20723_v7 = vadd.f32 %v20625_v61, %v10374_v1  ;;  %v16157_v1 = vpop.f32.mrf.mxu0  ;;  %v20753_v33 = vpop.xlane.xlu1 %5474 }
 0x81b   : > { %11667 = vmax.xlane.f32.xlu0 %v11666_v11  ;;  %23022 = vst [vmem:[#allocation203_spill] sm:$0xff] %v20753_v33 }
 0x81c   : > { %v11663_v41 = vsel %vm2047_vm2, %v20723_v7, -inf  ;;  %v11193_v38 = vpop.f32.mrf.mxu0 }
 0x81e   : > { %v20775_v31 = vpop.xlane.xlu1 %5480 }
 0x81f   : > { %11697 = vmax.xlane.f32.xlu0 %v11696_v45  ;;  %v16108_v29 = vpop.f32.mrf.mxu1  ;;  %v20740_v45 = vadd.f32 %v20625_v61, %v11011_v56  ;;  %v16171_v56 = vpop.f32.mrf.mxu0  ;;  %23024 = vst [vmem:[#allocation211_spill] sm:$0xff] %v20775_v31 }
 0x820   : > { %v20730_v53 = vadd.f32 %v16108_v29, %v20620_v19  ;;  %v20745_v29 = vadd.f32 %v16143_v60, %v20620_v19  ;;  %v20794_v3 = vadd.f32 %v16171_v56, %v20620_v19 }
 0x821   : > { %v10556_v30 = vpop.f32.mrf.mxu1  ;;  %v11375_v28 = vpop.f32.mrf.mxu0 }
 0x822   : > { %v20733_v11 = vadd.f32 %v20625_v61, %v10556_v30  ;;  %v11678_v30 = vsel %vm2047_vm2, %v20730_v53, -inf  ;;  %v11708_v57 = vsel %vm2047_vm2, %v20745_v29, -inf }
 0x823   : > { %11664 = vmax.xlane.f32.xlu0 %v11663_v41  ;;  %v11705_v41 = vsel %vm2047_vm2, %v20740_v45, -inf  ;;  %v16185_v31 = vpop.f32.mrf.mxu0 }
 0x824   : > { %v11675_v15 = vsel %vm2047_vm2, %v20733_v11, -inf }
 0x825   : > { %11676 = vmax.xlane.f32.xlu1 %v11675_v15  ;;  %v11557_v37 = vpop.f32.mrf.mxu0 }
 0x827   : > { %v16122_v51 = vpop.f32.mrf.mxu1  ;;  %11679 = vmax.xlane.f32.xlu0 %v11678_v30  ;;  %v20764_v30 = vadd.f32 %v20625_v61, %v11193_v38 }
 0x828   : > { %v20756_v15 = vadd.f32 %v16122_v51, %v20620_v19  ;;  %v20771_v51 = vadd.f32 %v16157_v1, %v20620_v19 }
 0x829   : > { %v10738_v18 = vpop.f32.mrf.mxu1  ;;  %11706 = vmax.xlane.f32.xlu1 %v11705_v41  ;;  %v20768_v41 = vpop.xlane.xlu0 %5489  ;;  %v11717_v38 = vsel %vm2047_vm2, %v20764_v30, -inf }
 0x82a   : > { %v20759_v60 = vadd.f32 %v20625_v61, %v10738_v18  ;;  %23023 = vst [vmem:[#allocation215_spill] sm:$0xff] %v20768_v41  ;;  %v11690_v18 = vsel %vm2047_vm2, %v20756_v15, -inf  ;;  %v11720_v1 = vsel %vm2047_vm2, %v20771_v51, -inf }
 0x82b   : > { %11709 = vmax.xlane.f32.xlu0 %v11708_v57  ;;  %v20778_v57 = vadd.f32 %v20625_v61, %v11375_v28  ;;  %v20791_v28 = vpop.xlane.xlu1 %5486 }
 0x82c   : > { %v11687_v22 = vsel %vm2047_vm2, %v20759_v60, -inf  ;;  %23026 = vst [vmem:[#allocation220_spill] sm:$0xff] %v20791_v28  ;;  %v20811_v28 = vadd.f32 %v20625_v61, %v11557_v37 }
 0x82d   : > { %11688 = vmax.xlane.f32.xlu1 %v11687_v22  ;;  %v20787_v41 = vpop.xlane.xlu0 %5495 }
 0x82e   : > { %23025 = vst [vmem:[#allocation222_spill] sm:$0xff] %v20787_v41  ;;  %v11741_v37 = vsel %vm2047_vm2, %v20811_v28, -inf }
 0x82f   : > { %v16136_v33 = vpop.f32.mrf.mxu1  ;;  %11691 = vmax.xlane.f32.xlu0 %v11690_v18  ;;  %v11729_v18 = vsel %vm2047_vm2, %v20778_v57, -inf  ;;  %v20808_v56 = vpop.xlane.xlu1 %5492 }
 0x830   : > { %v20783_v22 = vadd.f32 %v16136_v33, %v20620_v19  ;;  %23028 = vst [vmem:[#allocation229_spill] sm:$0xff] %v20808_v56 }
 0x831   : > { %11718 = vmax.xlane.f32.xlu1 %v11717_v38  ;;  %v10920_v5 = vpop.f32.mrf.mxu1  ;;  %v20798_v36 = vpop.xlane.xlu0 %8650 }
 0x832   : > { %v11702_v33 = vsel %vm2047_vm2, %v20783_v22, -inf  ;;  %23027 = vst [vmem:[#allocation223_spill] sm:$0xff] %v20798_v36  ;;  %v20801_v41 = vadd.f32 %v20625_v61, %v10920_v5  ;;  %v20827_v36 = vadd.f32 %v16185_v31, %v20620_v19 }
 0x833   : > { %11721 = vmax.xlane.f32.xlu0 %v11720_v1  ;;  %v20820_v6 = vpop.xlane.xlu1 %8659 }
 0x834   : > { %v11699_v5 = vsel %vm2047_vm2, %v20801_v41, -inf  ;;  %23029 = vst [vmem:[#allocation227_spill] sm:$0xff] %v20820_v6  ;;  %v11744_v31 = vsel %vm2047_vm2, %v20827_v36, -inf }
 0x835   : > { %11730 = vmax.xlane.f32.xlu1 %v11729_v18  ;;  %v11732_v18 = vsel %vm2047_vm2, %v20794_v3, -inf }
 0x837   : > { %v16150_v38 = vpop.f32.mrf.mxu1  ;;  %11703 = vmax.xlane.f32.xlu0 %v11702_v33 }
 0x838   : > { %v20816_v35 = vadd.f32 %v16150_v38, %v20620_v19 }
 0x839   : > { %v11102_v1 = vpop.f32.mrf.mxu1 }
 0x83a   : > { %v20804_v55 = vadd.f32 %v20625_v61, %v11102_v1 }
 0x83b   : > { %11733 = vmax.xlane.f32.xlu0 %v11732_v18  ;;  %v20822_v18 = vpop.xlane.xlu0 %8647 }
 0x83c   : > { %v11711_v33 = vsel %vm2047_vm2, %v20804_v55, -inf  ;;  %23030 = vst [vmem:[#allocation232_spill] sm:$0xff] %v20822_v18 }
 0x83d   : > { %11712 = vmax.xlane.f32.xlu1 %v11711_v33  ;;  %v11714_v33 = vsel %vm2047_vm2, %v20816_v35, -inf }
 0x83f   : > { %v16164_v1 = vpop.f32.mrf.mxu1  ;;  %11700 = vmax.xlane.f32.xlu0 %v11699_v5  ;;  %v20834_v5 = vpop.xlane.xlu1 %8671 }
 0x840   : > { %23031 = vst [vmem:[#allocation230_spill] sm:$0xff] %v20834_v5  ;;  %v20838_v18 = vpop.xlane.xlu0 %8662 }
 0x841   : > { %v11284_v56 = vpop.f32.mrf.mxu1  ;;  %11742 = vmax.xlane.f32.xlu1 %v11741_v37  ;;  %23032 = vst [vmem:[#allocation142_spill] sm:$0xff] %v20838_v18  ;;  %v20841_v37 = vadd.f32 %v16164_v1, %v20620_v19 }
 0x842   : > { %v20830_v38 = vadd.f32 %v20625_v61, %v11284_v56 }
 0x843   : > { %11715 = vmax.xlane.f32.xlu0 %v11714_v33  ;;  %v20845_v48 = vpop.xlane.xlu1 %8653 }
 0x844   : > { %v11723_v6 = vsel %vm2047_vm2, %v20830_v38, -inf  ;;  %23033 = vst [vmem:[#allocation235_spill] sm:$0xff] %v20845_v48  ;;  %v20855_v1 = vpop.xlane.xlu0 %8674 }
 0x845   : > { %11724 = vmax.xlane.f32.xlu1 %v11723_v6  ;;  %v11726_v6 = vsel %vm2047_vm2, %v20841_v37, -inf  ;;  %23034 = vst [vmem:[#allocation107_spill] sm:$0xff] %v20855_v1 }
 0x847   : > { %v16178_v56 = vpop.f32.mrf.mxu1  ;;  %11745 = vmax.xlane.f32.xlu0 %v11744_v31  ;;  %v20859_v31 = vpop.xlane.xlu1 %8683 }
 0x848   : > { %v20848_v33 = vadd.f32 %v16178_v56, %v20620_v19  ;;  %23035 = vst [vmem:[#allocation214_spill] sm:$0xff] %v20859_v31  ;;  %v20866_v21 = vpop.xlane.xlu0 %8656 }
 0x849   : > { %v11466_v50 = vpop.f32.mrf.mxu1  ;;  %23036 = vst [vmem:[#allocation134_spill] sm:$0xff] %v20866_v21  ;;  %v23041_v21 = vld [vmem:[#allocation115_spill] sm:$0xff] }
 0x84a   : > { %v20851_v5 = vadd.f32 %v20625_v61, %v11466_v50  ;;  %v11738_v48 = vsel %vm2047_vm2, %v20848_v33, -inf }
 0x84b   : > { %11727 = vmax.xlane.f32.xlu0 %v11726_v6 }
 0x84c   : > { %v11735_v18 = vsel %vm2047_vm2, %v20851_v5, -inf }
 0x84d   : > { %11736 = vmax.xlane.f32.xlu1 %v11735_v18  ;;  %v20873_v18 = vpop.xlane.xlu1 %8665 }
 0x84e   : > { %23037 = vst [vmem:[#allocation113_spill] sm:$0xff] %v20873_v18  ;;  %v8700_v18 = vsel %vm2047_vm2, %v20321_v14, 0.0  ;;  %v8706_v14 = vsel %vm2047_vm2, %v20295_v39, 0.0  ;;  %v8712_v39 = vsel %vm2047_vm2, %v20346_v24, 0.0 }
 0x84f   : > { %v16192_v56 = vpop.f32.mrf.mxu1  ;;  %11739 = vmax.xlane.f32.xlu0 %v11738_v48  ;;  %v20879_v48 = vpop.xlane.xlu0 %8686 }
 0x850   : > { %v20864_v50 = vadd.f32 %v16192_v56, %v20620_v19  ;;  %v8697_v19 = vsel %vm2047_vm2, %v20274_v26, 0.0  ;;  %23038 = vst [vmem:[#allocation165_spill] sm:$0xff] %v20879_v48  ;;  %v23039_v56 = vld [vmem:[#allocation118_spill] sm:$0xff]  ;;  %v8703_v26 = vsel %vm2047_vm2, %v20325_v42, 0.0  ;;  %v8709_v42 = vsel %vm2047_vm2, %v20290_v47, 0.0 }
 0x851   : > { %v11648_v59 = vpop.f32.mrf.mxu1 }
 0x852   : > { %v20869_v6 = vadd.f32 %v20625_v61, %v11648_v59  ;;  %v11750_v1 = vsel %vm2047_vm2, %v20864_v50, -inf  ;;  %v5497_v59 = vsel %vm2047_vm2, %v23039_v56, 0.0  ;;  %v20883_v61 = vpop.xlane.xlu1 %8695  ;;  %v23042_v56 = vld [vmem:[#allocation99_spill] sm:$0xff] }
 0x853   : > { %11751 = vmax.xlane.f32.xlu0 %v11750_v1  ;;  %23040 = vst [vmem:[#allocation121_spill] sm:$0xff] %v20883_v61  ;;  %v5500_v1 = vsel %vm2047_vm2, %v23041_v21, 0.0  ;;  %v23043_v61 = vld [vmem:[#allocation104_spill] sm:$0xff] }
 0x854   : > { %v11747_v31 = vsel %vm2047_vm2, %v20869_v6, -inf  ;;  %v5506_v21 = vsel %vm2047_vm2, %v23043_v61, 0.0 }
 0x855   : > { %11748 = vmax.xlane.f32.xlu1 %v11747_v31  ;;  %v20889_v31 = vpop.xlane.xlu0 %8668 }
 0x857   : > { %8698 = vadd.xlane.f32.xlu0 %v8697_v19  ;;  %v20893_v19 = vpop.xlane.xlu1 %8677 }
 0x859   : > { %5498 = vadd.xlane.f32.xlu1 %v5497_v59  ;;  %v5503_v59 = vsel %vm2047_vm2, %v23042_v56, 0.0  ;;  %v23047_v56 = vld [vmem:[#allocation205_spill] sm:$0xff] }
 0x85b   : > { %5501 = vadd.xlane.f32.xlu0 %v5500_v1  ;;  %v20899_v1 = vpop.xlane.xlu0 %8680 }
 0x85c   : > { %23044 = vst [vmem:[#allocation27_spill] sm:$0xff] %v20899_v1 }
 0x85d   : > { %8701 = vadd.xlane.f32.xlu1 %v8700_v18  ;;  %v20903_v18 = vpop.xlane.xlu1 %8689 }
 0x85e   : > { %23045 = vst [vmem:[#allocation11_spill] sm:$0xff] %v20903_v18 }
 0x85f   : > { %8704 = vadd.xlane.f32.xlu0 %v8703_v26  ;;  %v20907_v26 = vpop.xlane.xlu0 %8692 }
 0x860   : > { %23046 = vst [vmem:[#allocation7_spill] sm:$0xff] %v20907_v26  ;;  %v8715_v26 = vsel %vm2047_vm2, %v20350_v13, 0.0 }
 0x861   : > { %5504 = vadd.xlane.f32.xlu1 %v5503_v59  ;;  %v5509_v59 = vsel %vm2047_vm2, %v23047_v56, 0.0 }
 0x863   : > { %5507 = vadd.xlane.f32.xlu0 %v5506_v21  ;;  %v23048_v21 = vld [vmem:[#allocation108_spill] sm:$0xff] }
 0x864   : > { %v5512_v48 = vsel %vm2047_vm2, %v23048_v21, 0.0  ;;  %v8721_v21 = vsel %vm2047_vm2, %v20315_v20, 0.0 }
 0x865   : > { %8707 = vadd.xlane.f32.xlu1 %v8706_v14 }
 0x867   : > { %8710 = vadd.xlane.f32.xlu0 %v8709_v42 }
 0x869   : > { %5510 = vadd.xlane.f32.xlu1 %v5509_v59  ;;  %v23049_v59 = vld [vmem:[#allocation106_spill] sm:$0xff] }
 0x86a   : > { %v11662_v61 = vpop.xlane.xlu1 %11661  ;;  %v5515_v18 = vsel %vm2047_vm2, %v23049_v59, 0.0 }
 0x86b   : > { %v11754_v1 = vsub.f32 %v20628_v44, %v11662_v61  ;;  %5513 = vadd.xlane.f32.xlu0 %v5512_v48  ;;  %v23050_v44 = vld [vmem:[#allocation110_spill] sm:$0xff] }
 0x86c   : > { %v11659_v14 = vpop.xlane.xlu0 %11658  ;;  %v5518_v48 = vsel %vm2047_vm2, %v23050_v44, 0.0 }
 0x86d   : > { %8713 = vadd.xlane.f32.xlu1 %v8712_v39  ;;  %v11753_v47 = vsub.f32 %v20631_v62, %v11659_v14  ;;  %v11787_v42 = vmul.f32 1.442695, %v11754_v1  ;;  %v8718_v1 = vsel %vm2047_vm2, %v20319_v49, 0.0  ;;  %v23051_v39 = vld [vmem:[#allocation3_spill] sm:$0xff] }
 0x86e   : > { %v5521_v14 = vsel %vm2047_vm2, %v23051_v39, 0.0 }
 0x86f   : > { %v11785_v56 = vmul.f32 1.442695, %v11753_v47  ;;  %8716 = vadd.xlane.f32.xlu0 %v8715_v26 }
 0x871   : > { %16583 = vpow2.f32 %v11785_v56  ;;  %5516 = vadd.xlane.f32.xlu1 %v5515_v18  ;;  %v8724_v56 = vsel %vm2047_vm2, %v20367_v16, 0.0  ;;  %v23054_v16 = vld [vmem:[#allocation36_spill] sm:$0xff] }
 0x872   : > { %16585 = vpow2.f32 %v11787_v42  ;;  %v11674_v24 = vpop.xlane.xlu0 %11673 }
 0x873   : > { %5519 = vadd.xlane.f32.xlu0 %v5518_v48  ;;  %v11758_v61 = vsub.f32 %v20640_v34, %v11674_v24  ;;  %v23052_v34 = vld [vmem:[#allocation204_spill] sm:$0xff]  ;;  %v8727_v48 = vsel %vm2047_vm2, %v20372_v17, 0.0 }
 0x874   : > { %v11671_v62 = vpop.xlane.xlu1 %11670  ;;  %v5524_v47 = vsel %vm2047_vm2, %v23052_v34, 0.0 }
 0x875   : > { %v11757_v13 = vsub.f32 %v20643_v43, %v11671_v62  ;;  %8719 = vadd.xlane.f32.xlu1 %v8718_v1  ;;  %v11795_v26 = vmul.f32 1.442695, %v11758_v61  ;;  %v23056_v1 = vld [vmem:[#allocation41_spill] sm:$0xff] }
 0x877   : > { %v11793_v18 = vmul.f32 1.442695, %v11757_v13  ;;  %8722 = vadd.xlane.f32.xlu0 %v8721_v21 }
 0x879   : > { %16587 = vpow2.f32 %v11793_v18  ;;  %5522 = vadd.xlane.f32.xlu1 %v5521_v14 }
 0x87a   : > { %16589 = vpow2.f32 %v11795_v26  ;;  %v11686_v42 = vpop.xlane.xlu0 %11685  ;;  %v8730_v26 = vsel %vm2047_vm2, %v20344_v12, 0.0  ;;  %v23058_v12 = vld [vmem:[#allocation49_spill] sm:$0xff] }
 0x87b   : > { %5525 = vadd.xlane.f32.xlu0 %v5524_v47  ;;  %v11762_v49 = vsub.f32 %v20654_v8, %v11686_v42  ;;  %v23053_v8 = vld [vmem:[#allocation201_spill] sm:$0xff]  ;;  %v8733_v47 = vsel %vm2047_vm2, %v20341_v10, 0.0 }
 0x87c   : > { %v11683_v43 = vpop.xlane.xlu1 %11682  ;;  %v5527_v62 = vsel %vm2047_vm2, %v23053_v8, 0.0  ;;  %v23063_v8 = vld [vmem:[#allocation9_spill] sm:$0xff] }
 0x87d   : > { %v11761_v20 = vsub.f32 %v20657_v0, %v11683_v43  ;;  %8725 = vadd.xlane.f32.xlu1 %v8724_v56  ;;  %v11803_v44 = vmul.f32 1.442695, %v11762_v49  ;;  %v23055_v0 = vld [vmem:[#allocation101_spill] sm:$0xff]  ;;  %v23060_v49 = vld [vmem:[#allocation159_spill] sm:$0xff] }
 0x87e   : > { %v20937_v59 = vpop.eup %16583  ;;  %v5530_v17 = vsel %vm2047_vm2, %v23055_v0, 0.0  ;;  %v2243_v43 = vsel %vm2047_vm2, %v23060_v49, 0.0  ;;  %v23061_v56 = vld [vmem:[#allocation157_spill] sm:$0xff] }
 0x87f   : > { %v16586_v24 = vpop.eup %16585  ;;  %v11801_v61 = vmul.f32 1.442695, %v11761_v20  ;;  %8728 = vadd.xlane.f32.xlu0 %v8727_v48  ;;  %16197 = vmatprep.mubr.msk.f32.mxu0 %vm2047_vm2, %v20937_v59  ;;  %v2246_v20 = vsel %vm2047_vm2, %v23061_v56, 0.0  ;;  %v23062_v48 = vld [vmem:[#allocation120_spill] sm:$0xff]  ;;  %v23068_v56 = vld [vmem:[#allocation161_spill] sm:$0xff] }
 0x880   : > { %16198 = vmatmul.mubr.msk.f32.vlgmr.msra.gmra.mxu0 %vm2047_vm2, %v16586_v24 }
 0x881   : > { %16591 = vpow2.f32 %v11801_v61  ;;  %5528 = vadd.xlane.f32.xlu1 %v5527_v62  ;;  %16208 = vmatpush3.msra.mxu0 %v22948_v52  ;;  %v23057_v52 = vld [vmem:[#allocation151_spill] sm:$0xff]  ;;  %v5533_v61 = vsel %vm2047_vm2, %v23062_v48, 0.0  ;;  %v11852_v62 = vsel %vm2047_vm2, %v16586_v24, 0.0 }
 0x882   : > { %16593 = vpow2.f32 %v11803_v44  ;;  %16209 = vmatprep.subr.mxu0 %v23054_v16  ;;  %v2240_v39 = vsel %vm2047_vm2, %v23057_v52, 0.0  ;;  %v11849_v52 = vsel %vm2047_vm2, %v20937_v59, 0.0 }
 0x883   : > { %5531 = vadd.xlane.f32.xlu0 %v5530_v17  ;;  %16210 = vmatpush3.msra.mxu0 %v23054_v16  ;;  %v8736_v16 = vsel %vm2047_vm2, %v20461_v2, 0.0  ;;  %v23064_v17 = vld [vmem:[#allocation164_spill] sm:$0xff] }
 0x884   : > { %16221 = vmatprep.subr.mxu0 %v23056_v1  ;;  %v11695_v13 = vpop.xlane.xlu1 %11694 }
 0x885   : > { %v11765_v21 = vsub.f32 %v20670_v25, %v11695_v13  ;;  %8731 = vadd.xlane.f32.xlu1 %v8730_v26  ;;  %v23059_v25 = vld [vmem:[#allocation207_spill] sm:$0xff]  ;;  %v23065_v13 = vld [vmem:[#allocation160_spill] sm:$0xff]  ;;  %v23066_v26 = vld [vmem:[#allocation162_spill] sm:$0xff] }
 0x886   : > { %v16588_v18 = vpop.eup %16587  ;;  %v5536_v42 = vsel %vm2047_vm2, %v23059_v25, 0.0  ;;  %v2249_v2 = vsel %vm2047_vm2, %v23065_v13, 0.0 }
 0x887   : > { %v16590_v14 = vpop.eup %16589  ;;  %v11809_v34 = vmul.f32 1.442695, %v11765_v21  ;;  %2241 = vadd.xlane.f32.xlu0 %v2240_v39  ;;  %16211 = vmatprep.mubr.msk.f32.mxu0 %vm2047_vm2, %v16588_v18  ;;  %v2261_v21 = vsel %vm2047_vm2, %v23066_v26, 0.0 }
 0x888   : > { %16212 = vmatmul.mubr.msk.f32.vlgmr.msra.gmra.mxu0 %vm2047_vm2, %v16590_v14  ;;  %v11864_v24 = vsel %vm2047_vm2, %v16590_v14, 0.0 }
 0x889   : > { %16595 = vpow2.f32 %v11809_v34  ;;  %8734 = vadd.xlane.f32.xlu1 %v8733_v47  ;;  %16222 = vmatpush3.msra.mxu0 %v23056_v1  ;;  %v2255_v1 = vsel %vm2047_vm2, %v23064_v17, 0.0  ;;  %v23067_v34 = vld [vmem:[#allocation163_spill] sm:$0xff] }
 0x88a   : > { %16223 = vmatprep.subr.mxu0 %v23058_v12  ;;  %v2252_v14 = vsel %vm2047_vm2, %v23067_v34, 0.0 }
 0x88b   : > { %5537 = vadd.xlane.f32.xlu0 %v5536_v42  ;;  %16224 = vmatpush3.msra.mxu0 %v23058_v12  ;;  %v11861_v42 = vsel %vm2047_vm2, %v16588_v18, 0.0 }
 0x88c   : > { %16235 = vmatprep.subr.mxu0 %v20128_v23 }
 0x88d   : > { %2244 = vadd.xlane.f32.xlu1 %v2243_v43 }
 0x88e   : > { %v16592_v10 = vpop.eup %16591 }
 0x88f   : > { %v16594_v44 = vpop.eup %16593  ;;  %2247 = vadd.xlane.f32.xlu0 %v2246_v20  ;;  %16225 = vmatprep.mubr.msk.f32.mxu0 %vm2047_vm2, %v16592_v10  ;;  %v2258_v20 = vsel %vm2047_vm2, %v23068_v56, 0.0  ;;  %v11873_v18 = vsel %vm2047_vm2, %v16592_v10, 0.0 }
 0x890   : > { %16226 = vmatmul.mubr.msk.f32.vlgmr.msra.gmra.mxu0 %vm2047_vm2, %v16594_v44  ;;  %v11876_v39 = vsel %vm2047_vm2, %v16594_v44, 0.0 }
 0x891   : > { %5534 = vadd.xlane.f32.xlu1 %v5533_v61  ;;  %16236 = vmatpush3.msra.mxu0 %v20128_v23  ;;  %v8739_v23 = vsel %vm2047_vm2, %v20465_v27, 0.0 }
 0x892   : > { %16237 = vmatprep.subr.mxu0 %v23063_v8 }
 0x893   : > { %11853 = vadd.xlane.f32.xlu0 %v11852_v62  ;;  %16238 = vmatpush3.msra.mxu0 %v23063_v8 }
 0x894   : > { %16249 = vmatprep.subr.mxu0 %v20138_v54 }
 0x895   : > { %8737 = vadd.xlane.f32.xlu1 %v8736_v16 }
 0x896   : > { %v20982_v0 = vpop.eup %16595 }
 0x897   : > { %2256 = vadd.xlane.f32.xlu0 %v2255_v1  ;;  %16239 = vmatprep.mubr.msk.f32.mxu0 %vm2047_vm2, %v20982_v0 }
 0x899   : > { %8740 = vadd.xlane.f32.xlu1 %v8739_v23 }
 0x89b   : > { %11865 = vadd.xlane.f32.xlu0 %v11864_v24 }
 0x89d   : > { %2250 = vadd.xlane.f32.xlu1 %v2249_v2 }
 0x89f   : > { %2262 = vadd.xlane.f32.xlu0 %v2261_v21 }
 0x8a1   : > { %11850 = vadd.xlane.f32.xlu1 %v11849_v52 }
 0x8a3   : > { %11877 = vadd.xlane.f32.xlu0 %v11876_v39 }
 0x8a4   : > { %v11668_v27 = vpop.xlane.xlu0 %11667 }
 0x8a5   : > { %v11756_v47 = vsub.f32 %v20711_v46, %v11668_v27  ;;  %2253 = vadd.xlane.f32.xlu1 %v2252_v14 }
 0x8a7   : > { %v11791_v12 = vmul.f32 1.442695, %v11756_v47  ;;  %v23069_v47 = vld [vmem:[#allocation19_spill] sm:$0xff] }
 0x8a8   : > { %v11698_v25 = vpop.xlane.xlu0 %11697 }
 0x8a9   : > { %16597 = vpow2.f32 %v11791_v12  ;;  %v11766_v49 = vsub.f32 %v20714_v4, %v11698_v25  ;;  %11862 = vadd.xlane.f32.xlu1 %v11861_v42 }
 0x8ab   : > { %v11811_v59 = vmul.f32 1.442695, %v11766_v49  ;;  %v23070_v49 = vld [vmem:[#allocation25_spill] sm:$0xff] }
 0x8ac   : > { %v11665_v43 = vpop.xlane.xlu0 %11664 }
 0x8ad   : > { %16599 = vpow2.f32 %v11811_v59  ;;  %v11755_v44 = vsub.f32 %v20723_v7, %v11665_v43  ;;  %2259 = vadd.xlane.f32.xlu1 %v2258_v20  ;;  %v23071_v20 = vld [vmem:[#allocation38_spill] sm:$0xff] }
 0x8ae   : > { %v11677_v48 = vpop.xlane.xlu1 %11676 }
 0x8af   : > { %v11789_v46 = vmul.f32 1.442695, %v11755_v44  ;;  %v11759_v61 = vsub.f32 %v20733_v11, %v11677_v48  ;;  %v11885_v48 = vsel %vm2047_vm2, %v20982_v0, 0.0 }
 0x8b0   : > { %v11680_v8 = vpop.xlane.xlu0 %11679 }
 0x8b1   : > { %16601 = vpow2.f32 %v11789_v46  ;;  %v11797_v62 = vmul.f32 1.442695, %v11759_v61  ;;  %v11760_v4 = vsub.f32 %v20730_v53, %v11680_v8  ;;  %11874 = vadd.xlane.f32.xlu1 %v11873_v18  ;;  %v23072_v8 = vld [vmem:[#allocation14_spill] sm:$0xff] }
 0x8b2   : > { %v11707_v16 = vpop.xlane.xlu1 %11706 }
 0x8b3   : > { %16603 = vpow2.f32 %v11797_v62  ;;  %v11799_v17 = vmul.f32 1.442695, %v11760_v4  ;;  %v11769_v1 = vsub.f32 %v20740_v45, %v11707_v16  ;;  %v23073_v4 = vld [vmem:[#allocation18_spill] sm:$0xff] }
 0x8b4   : > { %v11710_v23 = vpop.xlane.xlu0 %11709 }
 0x8b5   : > { %16605 = vpow2.f32 %v11799_v17  ;;  %v11817_v7 = vmul.f32 1.442695, %v11769_v1  ;;  %v11770_v24 = vsub.f32 %v20745_v29, %v11710_v23 }
 0x8b6   : > { %v16598_v13 = vpop.eup %16597  ;;  %v11689_v11 = vpop.xlane.xlu1 %11688 }
 0x8b7   : > { %16607 = vpow2.f32 %v11817_v7  ;;  %v11819_v2 = vmul.f32 1.442695, %v11770_v24  ;;  %v11763_v10 = vsub.f32 %v20759_v60, %v11689_v11  ;;  %v11858_v26 = vsel %vm2047_vm2, %v16598_v13, 0.0  ;;  %v23074_v7 = vld [vmem:[#allocation26_spill] sm:$0xff]  ;;  %v23075_v11 = vld [vmem:[#allocation39_spill] sm:$0xff] }
 0x8b8   : > { %11859 = vadd.xlane.f32.xlu0 %v11858_v26  ;;  %v11692_v53 = vpop.xlane.xlu0 %11691 }
 0x8b9   : > { %16609 = vpow2.f32 %v11819_v2  ;;  %v11805_v21 = vmul.f32 1.442695, %v11763_v10  ;;  %v11764_v52 = vsub.f32 %v20756_v15, %v11692_v53 }
 0x8ba   : > { %v16600_v45 = vpop.eup %16599  ;;  %v11719_v39 = vpop.xlane.xlu1 %11718 }
 0x8bb   : > { %16611 = vpow2.f32 %v11805_v21  ;;  %v11807_v27 = vmul.f32 1.442695, %v11764_v52  ;;  %v11773_v29 = vsub.f32 %v20764_v30, %v11719_v39  ;;  %16240 = vmatmul.mubr.msk.f32.vlgmr.msra.gmra.mxu0 %vm2047_vm2, %v16600_v45  ;;  %v11888_v34 = vsel %vm2047_vm2, %v16600_v45, 0.0 }
 0x8bc   : > { %16250 = vmatpush3.msra.mxu0 %v20138_v54  ;;  %11889 = vadd.xlane.f32.xlu0 %v11888_v34  ;;  %v11722_v60 = vpop.xlane.xlu0 %11721 }
 0x8bd   : > { %16613 = vpow2.f32 %v11807_v27  ;;  %v11825_v14 = vmul.f32 1.442695, %v11773_v29  ;;  %16251 = vmatprep.subr.mxu0 %v23069_v47  ;;  %v11774_v15 = vsub.f32 %v20771_v51, %v11722_v60 }
 0x8be   : > { %v16602_v12 = vpop.eup %16601  ;;  %16252 = vmatpush3.msra.mxu0 %v23069_v47  ;;  %v11731_v25 = vpop.xlane.xlu1 %11730 }
 0x8bf   : > { %16615 = vpow2.f32 %v11825_v14  ;;  %v11827_v30 = vmul.f32 1.442695, %v11774_v15  ;;  %v11777_v42 = vsub.f32 %v20778_v57, %v11731_v25  ;;  %16263 = vmatprep.subr.mxu0 %v23070_v49  ;;  %16204 = vmatprep.mubr.msk.f32.mxu1 %vm2047_vm2, %v16602_v12  ;;  %v11855_v54 = vsel %vm2047_vm2, %v16602_v12, 0.0  ;;  %v23077_v15 = vld [vmem:[#allocation62_spill] sm:$0xff] }
 0x8c0   : > { %v16604_v59 = vpop.eup %16603  ;;  %16205 = vmatmul.mubr.msk.f32.vlgmr.msra.gmra.mxu1 %vm2047_vm2, %v16598_v13  ;;  %11856 = vadd.xlane.f32.xlu1 %v11855_v54  ;;  %v11704_v43 = vpop.xlane.xlu0 %11703 }
 0x8c1   : > { %16617 = vpow2.f32 %v11827_v30  ;;  %v11833_v51 = vmul.f32 1.442695, %v11777_v42  ;;  %16215 = vmatpush3.msra.mxu1 %v22976_v40  ;;  %v11768_v56 = vsub.f32 %v20783_v22, %v11704_v43  ;;  %16218 = vmatprep.mubr.msk.f32.mxu1 %vm2047_vm2, %v16604_v59 }
 0x8c2   : > { %v16606_v57 = vpop.eup %16605  ;;  %16216 = vmatprep.subr.mxu1 %v23071_v20 }
 0x8c3   : > { %16619 = vpow2.f32 %v11833_v51  ;;  %v11815_v44 = vmul.f32 1.442695, %v11768_v56  ;;  %16217 = vmatpush3.msra.mxu1 %v23071_v20  ;;  %v11870_v46 = vsel %vm2047_vm2, %v16606_v57, 0.0 }
 0x8c4   : > { %v16608_v61 = vpop.eup %16607  ;;  %16228 = vmatprep.subr.mxu1 %v23072_v8  ;;  %11886 = vadd.xlane.f32.xlu1 %v11885_v48  ;;  %v11734_v40 = vpop.xlane.xlu0 %11733 }
 0x8c5   : > { %16621 = vpow2.f32 %v11815_v44  ;;  %16219 = vmatmul.mubr.msk.f32.vlgmr.msra.gmra.mxu1 %vm2047_vm2, %v16606_v57  ;;  %11871 = vadd.xlane.f32.xlu0 %v11870_v46  ;;  %v11778_v22 = vsub.f32 %v20794_v3, %v11734_v40  ;;  %v11867_v3 = vsel %vm2047_vm2, %v16604_v59, 0.0 }
 0x8c6   : > { %v16610_v18 = vpop.eup %16609  ;;  %16229 = vmatpush3.msra.mxu1 %v23072_v8  ;;  %16253 = vmatprep.mubr.msk.f32.mxu0 %vm2047_vm2, %v16608_v61  ;;  %v11713_v62 = vpop.xlane.xlu1 %11712  ;;  %v23078_v8 = vld [vmem:[#allocation170_spill] sm:$0xff] }
 0x8c7   : > { %v11835_v0 = vmul.f32 1.442695, %v11778_v22  ;;  %16230 = vmatprep.subr.mxu1 %v23073_v4  ;;  %v11771_v16 = vsub.f32 %v20804_v55, %v11713_v62  ;;  %16254 = vmatmul.mubr.msk.f32.vlgmr.msra.gmra.mxu0 %vm2047_vm2, %v16610_v18  ;;  %v11900_v17 = vsel %vm2047_vm2, %v16610_v18, 0.0  ;;  %v23079_v22 = vld [vmem:[#allocation53_spill] sm:$0xff] }
 0x8c8   : > { %v16612_v1 = vpop.eup %16611  ;;  %16231 = vmatpush3.msra.mxu1 %v23073_v4  ;;  %16264 = vmatpush3.msra.mxu0 %v23070_v49  ;;  %v11701_v23 = vpop.xlane.xlu0 %11700 }
 0x8c9   : > { %16623 = vpow2.f32 %v11835_v0  ;;  %16242 = vmatprep.subr.mxu1 %v23074_v7  ;;  %11868 = vadd.xlane.f32.xlu1 %v11867_v3  ;;  %v11767_v24 = vsub.f32 %v20801_v41, %v11701_v23  ;;  %v11821_v55 = vmul.f32 1.442695, %v11771_v16  ;;  %v11897_v41 = vsel %vm2047_vm2, %v16608_v61, 0.0 }
 0x8ca   : > { %v16614_v13 = vpop.eup %16613  ;;  %16265 = vmatprep.subr.mxu0 %v23075_v11  ;;  %11901 = vadd.xlane.f32.xlu0 %v11900_v17  ;;  %v11743_v2 = vpop.xlane.xlu1 %11742 }
 0x8cb   : > { %v11813_v10 = vmul.f32 1.442695, %v11767_v24  ;;  %16232 = vmatprep.mubr.msk.f32.mxu1 %vm2047_vm2, %v16612_v1  ;;  %16266 = vmatpush3.msra.mxu0 %v23075_v11  ;;  %v11781_v26 = vsub.f32 %v20811_v28, %v11743_v2  ;;  %v11882_v53 = vsel %vm2047_vm2, %v16614_v13, 0.0  ;;  %v23076_v28 = vld [vmem:[#allocation54_spill] sm:$0xff] }
 0x8cc   : > { %v16616_v21 = vpop.eup %16615  ;;  %16277 = vmatprep.subr.mxu0 %v20155_v9  ;;  %16233 = vmatmul.mubr.msk.f32.vlgmr.msra.gmra.mxu1 %vm2047_vm2, %v16614_v13  ;;  %v11716_v52 = vpop.xlane.xlu0 %11715  ;;  %v23083_v13 = vld [vmem:[#allocation33_spill] sm:$0xff] }
 0x8cd   : > { %16625 = vpow2.f32 %v11813_v10  ;;  %v11841_v45 = vmul.f32 1.442695, %v11781_v26  ;;  %16243 = vmatpush3.msra.mxu1 %v23074_v7  ;;  %11898 = vadd.xlane.f32.xlu1 %v11897_v41  ;;  %v11772_v39 = vsub.f32 %v20816_v35, %v11716_v52  ;;  %v11879_v35 = vsel %vm2047_vm2, %v16612_v1, 0.0  ;;  %v23082_v7 = vld [vmem:[#allocation169_spill] sm:$0xff]  ;;  %v23084_v10 = vld [vmem:[#allocation168_spill] sm:$0xff]  ;;  %v23086_v52 = vld [vmem:[#allocation82_spill] sm:$0xff] }
 0x8ce   : > { %v16618_v27 = vpop.eup %16617  ;;  %16627 = vpow2.f32 %v11821_v55  ;;  %16244 = vmatprep.subr.mxu1 %v23076_v28  ;;  %11883 = vadd.xlane.f32.xlu0 %v11882_v53  ;;  %v11725_v29 = vpop.xlane.xlu1 %11724  ;;  %v11909_v54 = vsel %vm2047_vm2, %v16616_v21, 0.0  ;;  %v2264_v24 = vsel %vm2047_vm2, %v23082_v7, 0.0  ;;  %v2273_v26 = vsel %vm2047_vm2, %v23084_v10, 0.0  ;;  %v23085_v53 = vld [vmem:[#allocation29_spill] sm:$0xff] }
 0x8cf   : > { %16629 = vpow2.f32 %v11841_v45  ;;  %v11823_v34 = vmul.f32 1.442695, %v11772_v39  ;;  %16245 = vmatpush3.msra.mxu1 %v23076_v28  ;;  %16267 = vmatprep.mubr.msk.f32.mxu0 %vm2047_vm2, %v16616_v21  ;;  %v11775_v60 = vsub.f32 %v20830_v38, %v11725_v29  ;;  %v11912_v14 = vsel %vm2047_vm2, %v16618_v27, 0.0  ;;  %v23087_v45 = vld [vmem:[#allocation167_spill] sm:$0xff]  ;;  %v23088_v28 = vld [vmem:[#allocation48_spill] sm:$0xff] }
 0x8d0   : > { %v16620_v47 = vpop.eup %16619  ;;  %16256 = vmatprep.subr.mxu1 %v23077_v15  ;;  %16268 = vmatmul.mubr.msk.f32.vlgmr.msra.gmra.mxu0 %vm2047_vm2, %v16618_v27  ;;  %v11746_v12 = vpop.xlane.xlu0 %11745  ;;  %v2270_v39 = vsel %vm2047_vm2, %v23087_v45, 0.0 }
 0x8d1   : > { %16631 = vpow2.f32 %v11823_v34  ;;  %v11829_v25 = vmul.f32 1.442695, %v11775_v60  ;;  %16278 = vmatpush3.msra.mxu0 %v20155_v9  ;;  %11880 = vadd.xlane.f32.xlu1 %v11879_v35  ;;  %v11782_v30 = vsub.f32 %v20827_v36, %v11746_v12  ;;  %v11921_v0 = vsel %vm2047_vm2, %v16620_v47, 0.0  ;;  %v23090_v12 = vld [vmem:[#allocation146_spill] sm:$0xff] }
 0x8d2   : > { %v16622_v42 = vpop.eup %16621  ;;  %16279 = vmatprep.subr.mxu0 %v20151_v58  ;;  %11913 = vadd.xlane.f32.xlu0 %v11912_v14 }
 0x8d3   : > { %16633 = vpow2.f32 %v11829_v25  ;;  %v11843_v38 = vmul.f32 1.442695, %v11782_v30  ;;  %16280 = vmatpush3.msra.mxu0 %v20151_v58  ;;  %16281 = vmatprep.mubr.msk.f32.mxu0 %vm2047_vm2, %v16620_v47  ;;  %v11894_v49 = vsel %vm2047_vm2, %v16622_v42, 0.0  ;;  %v2279_v25 = vsel %vm2047_vm2, %v23090_v12, 0.0  ;;  %v23118_v12 = vld [vmem:[#allocation235_spill] sm:$0xff] }
 0x8d4   : > { %16291 = vmatprep.subr.mxu0 %v20173_v32  ;;  %v11728_v9 = vpop.xlane.xlu0 %11727 }
 0x8d5   : > { %16635 = vpow2.f32 %v11843_v38  ;;  %11910 = vadd.xlane.f32.xlu1 %v11909_v54  ;;  %v11776_v36 = vsub.f32 %v20841_v37, %v11728_v9  ;;  %v23091_v9 = vld [vmem:[#allocation150_spill] sm:$0xff] }
 0x8d6   : > { %v16624_v59 = vpop.eup %16623  ;;  %11895 = vadd.xlane.f32.xlu0 %v11894_v49  ;;  %v11737_v43 = vpop.xlane.xlu1 %11736 }
 0x8d7   : > { %v11831_v51 = vmul.f32 1.442695, %v11776_v36  ;;  %v11779_v56 = vsub.f32 %v20851_v5, %v11737_v43  ;;  %16282 = vmatmul.mubr.msk.f32.vlgmr.msra.gmra.mxu0 %vm2047_vm2, %v16624_v59  ;;  %v11924_v58 = vsel %vm2047_vm2, %v16624_v59, 0.0  ;;  %v2282_v36 = vsel %vm2047_vm2, %v23091_v9, 0.0  ;;  %v23121_v9 = vld [vmem:[#allocation134_spill] sm:$0xff] }
 0x8d8   : > { %16292 = vmatpush3.msra.mxu0 %v20173_v32  ;;  %v11740_v57 = vpop.xlane.xlu0 %11739 }
 0x8d9   : > { %16637 = vpow2.f32 %v11831_v51  ;;  %v11837_v20 = vmul.f32 1.442695, %v11779_v56  ;;  %16293 = vmatprep.subr.mxu0 %v20167_v63  ;;  %v11780_v44 = vsub.f32 %v20848_v33, %v11740_v57  ;;  %v2267_v33 = vsel %vm2047_vm2, %v23078_v8, 0.0  ;;  %v23092_v51 = vld [vmem:[#allocation181_spill] sm:$0xff]  ;;  %v23093_v56 = vld [vmem:[#allocation10_spill] sm:$0xff] }
 0x8da   : > { %v16626_v37 = vpop.eup %16625  ;;  %11925 = vadd.xlane.f32.xlu0 %v11924_v58  ;;  %16294 = vmatpush3.msra.mxu0 %v20167_v63  ;;  %v2285_v58 = vsel %vm2047_vm2, %v23093_v56, 0.0 }
 0x8db   : > { %v16628_v48 = vpop.eup %16627  ;;  %16639 = vpow2.f32 %v11837_v20  ;;  %v11839_v5 = vmul.f32 1.442695, %v11780_v44  ;;  %16246 = vmatprep.mubr.msk.f32.mxu1 %vm2047_vm2, %v16626_v37  ;;  %v11891_v46 = vsel %vm2047_vm2, %v16626_v37, 0.0  ;;  %v23094_v37 = vld [vmem:[#allocation76_spill] sm:$0xff] }
 0x8dc   : > { %v16630_v61 = vpop.eup %16629  ;;  %16247 = vmatmul.mubr.msk.f32.vlgmr.msra.gmra.mxu1 %vm2047_vm2, %v16622_v42  ;;  %11892 = vadd.xlane.f32.xlu1 %v11891_v46  ;;  %v11752_v32 = vpop.xlane.xlu0 %11751  ;;  %v11903_v2 = vsel %vm2047_vm2, %v16628_v48, 0.0 }
 0x8dd   : > { %16641 = vpow2.f32 %v11839_v5  ;;  %16257 = vmatpush3.msra.mxu1 %v23077_v15  ;;  %v11784_v63 = vsub.f32 %v20864_v50, %v11752_v32  ;;  %16260 = vmatprep.mubr.msk.f32.mxu1 %vm2047_vm2, %v16628_v48  ;;  %v23080_v50 = vld [vmem:[#allocation20_spill] sm:$0xff]  ;;  %v11933_v27 = vsel %vm2047_vm2, %v16630_v61, 0.0  ;;  %v23089_v15 = vld [vmem:[#allocation158_spill] sm:$0xff]  ;;  %v23095_v48 = vld [vmem:[#allocation223_spill] sm:$0xff] }
 0x8de   : > { %v16632_v40 = vpop.eup %16631  ;;  %2268 = vadd.xlane.f32.xlu0 %v2267_v33  ;;  %16258 = vmatprep.subr.mxu1 %v23079_v22  ;;  %v11749_v18 = vpop.xlane.xlu1 %11748  ;;  %v2276_v35 = vsel %vm2047_vm2, %v23089_v15, 0.0  ;;  %v23096_v5 = vld [vmem:[#allocation189_spill] sm:$0xff]  ;;  %v23097_v32 = vld [vmem:[#allocation232_spill] sm:$0xff] }
 0x8df   : > { %16295 = vmatprep.mubr.msk.f32.mxu0 %vm2047_vm2, %v16630_v61  ;;  %v11783_v62 = vsub.f32 %v20869_v6, %v11749_v18  ;;  %16259 = vmatpush3.msra.mxu1 %v23079_v22  ;;  %v11906_v4 = vsel %vm2047_vm2, %v16632_v40, 0.0  ;;  %v11847_v17 = vmul.f32 1.442695, %v11784_v63  ;;  %v23081_v6 = vld [vmem:[#allocation23_spill] sm:$0xff]  ;;  %v23117_v15 = vld [vmem:[#allocation177_spill] sm:$0xff] }
 0x8e0   : > { %v16634_v16 = vpop.eup %16633  ;;  %16270 = vmatprep.subr.mxu1 %v23080_v50  ;;  %11922 = vadd.xlane.f32.xlu1 %v11921_v0  ;;  %v21113_v41 = vpop.xlane.xlu0 %8698  ;;  %v23099_v0 = vld [vmem:[#allocation51_spill] sm:$0xff] }
 0x8e1   : > { %v11845_v1 = vmul.f32 1.442695, %v11783_v62  ;;  %16261 = vmatmul.mubr.msk.f32.vlgmr.msra.gmra.mxu1 %vm2047_vm2, %v16632_v40  ;;  %v11915_v60 = vsel %vm2047_vm2, %v16634_v16, 0.0  ;;  %v23098_v40 = vld [vmem:[#allocation122_spill] sm:$0xff] }
 0x8e2   : > { %v16636_v3 = vpop.eup %16635  ;;  %16271 = vmatpush3.msra.mxu1 %v23080_v50  ;;  %11907 = vadd.xlane.f32.xlu0 %v11906_v4  ;;  %v21137_v42 = vpop.xlane.xlu1 %5498 }
 0x8e3   : > { %16643 = vpow2.f32 %v11845_v1  ;;  %16272 = vmatprep.subr.mxu1 %v23081_v6  ;;  %16274 = vmatprep.mubr.msk.f32.mxu1 %vm2047_vm2, %v16634_v16  ;;  %v11936_v23 = vsel %vm2047_vm2, %v16636_v3, 0.0  ;;  %v23101_v1 = vld [vmem:[#allocation208_spill] sm:$0xff] }
 0x8e4   : > { %16645 = vpow2.f32 %v11847_v17  ;;  %16273 = vmatpush3.msra.mxu1 %v23081_v6  ;;  %16296 = vmatmul.mubr.msk.f32.vlgmr.msra.gmra.mxu0 %vm2047_vm2, %v16636_v3  ;;  %v21125_v34 = vpop.xlane.xlu0 %5501  ;;  %v23102_v6 = vld [vmem:[#allocation218_spill] sm:$0xff] }
 0x8e5   : > { %16284 = vmatprep.subr.mxu1 %v23083_v13  ;;  %2265 = vadd.xlane.f32.xlu1 %v2264_v24  ;;  %16647 = vrcp.f32 %v23092_v51  ;;  %v23103_v24 = vld [vmem:[#allocation58_spill] sm:$0xff] }
 0x8e6   : > { %v16638_v55 = vpop.eup %16637  ;;  %11937 = vadd.xlane.f32.xlu0 %v11936_v23  ;;  %v21146_v43 = vpop.xlane.xlu1 %8701  ;;  %16649 = vrcp.f32 %v23094_v37 }
 0x8e7   : > { %16275 = vmatmul.mubr.msk.f32.vlgmr.msra.gmra.mxu1 %vm2047_vm2, %v16638_v55  ;;  %v11918_v47 = vsel %vm2047_vm2, %v16638_v55, 0.0  ;;  %16651 = vrcp.f32 %v23095_v48  ;;  %v23124_v48 = vld [vmem:[#allocation217_spill] sm:$0xff] }
 0x8e8   : > { %v16640_v11 = vpop.eup %16639  ;;  %16285 = vmatpush3.msra.mxu1 %v23083_v13  ;;  %v21135_v30 = vpop.xlane.xlu0 %8704  ;;  %16653 = vrcp.f32 %v23096_v5 }
 0x8e9   : > { %11904 = vadd.xlane.f32.xlu1 %v11903_v2  ;;  %16286 = vmatprep.subr.mxu1 %v23085_v53  ;;  %v11927_v38 = vsel %vm2047_vm2, %v16640_v11, 0.0  ;;  %16655 = vrcp.f32 %v23097_v32  ;;  %v23125_v32 = vld [vmem:[#allocation210_spill] sm:$0xff] }
 0x8ea   : > { %v16642_v21 = vpop.eup %16641  ;;  %2274 = vadd.xlane.f32.xlu0 %v2273_v26  ;;  %16287 = vmatpush3.msra.mxu1 %v23085_v53  ;;  %v21154_v44 = vpop.xlane.xlu1 %5504  ;;  %16657 = vrcp.f32 %v23117_v15 }
 0x8eb   : > { %16288 = vmatprep.mubr.msk.f32.mxu1 %vm2047_vm2, %v16640_v11  ;;  %16298 = vmatprep.subr.mxu1 %v23086_v52  ;;  %v11930_v49 = vsel %vm2047_vm2, %v16642_v21, 0.0  ;;  %16659 = vrcp.f32 %v23118_v12 }
 0x8ec   : > { %16289 = vmatmul.mubr.msk.f32.vlgmr.msra.gmra.mxu1 %vm2047_vm2, %v16642_v21  ;;  %v21141_v54 = vpop.xlane.xlu0 %5507 }
 0x8ed   : > { %16299 = vmatpush3.msra.mxu1 %v23086_v52  ;;  %2271 = vadd.xlane.f32.xlu1 %v2270_v39 }
 0x8ee   : > { %11934 = vadd.xlane.f32.xlu0 %v11933_v27  ;;  %16300 = vmatprep.subr.mxu1 %v23088_v28  ;;  %v21161_v61 = vpop.xlane.xlu1 %8707 }
 0x8ef   : > { %16301 = vmatpush3.msra.mxu1 %v23088_v28 }
 0x8f0   : > { %v16644_v29 = vpop.eup %16643  ;;  %v21152_v20 = vpop.xlane.xlu0 %8710 }
 0x8f1   : > { %v16646_v14 = vpop.eup %16645  ;;  %11916 = vadd.xlane.f32.xlu1 %v11915_v60  ;;  %16302 = vmatprep.mubr.msk.f32.mxu1 %vm2047_vm2, %v16644_v29  ;;  %v11939_v57 = vsel %vm2047_vm2, %v16644_v29, 0.0  ;;  %v23115_v29 = vld [vmem:[#allocation92_spill] sm:$0xff] }
 0x8f2   : > { %11919 = vadd.xlane.f32.xlu0 %v11918_v47  ;;  %16303 = vmatmul.mubr.msk.f32.vlgmr.msra.gmra.mxu1 %vm2047_vm2, %v16646_v14  ;;  %v11942_v59 = vsel %vm2047_vm2, %v16646_v14, 0.0  ;;  %v16648_v8 = vpop.eup %16647  ;;  %v21166_v63 = vpop.xlane.xlu1 %5510  ;;  %v2288_v60 = vsel %vm2047_vm2, %v23115_v29, 0.0  ;;  %v23116_v14 = vld [vmem:[#allocation21_spill] sm:$0xff] }
 0x8f3   : > { %v6964_v22 = vmul.f32 %v16648_v8, %v23098_v40  ;;  %v16650_v18 = vpop.eup %16649  ;;  %v2291_v47 = vsel %vm2047_vm2, %v23116_v14, 0.0 }
 0x8f4   : > { %v21159_v46 = vpop.xlane.xlu0 %5513  ;;  %v16652_v62 = vpop.eup %16651  ;;  %v6963_v3 = vmul.f32 %v16650_v18, %v23101_v1 }
 0x8f5   : > { %2277 = vadd.xlane.f32.xlu1 %v2276_v35  ;;  %v10167_v4 = vmul.f32 %v16652_v62, %v23099_v0  ;;  %v16654_v17 = vpop.eup %16653  ;;  %v23127_v62 = vld [vmem:[#allocation97_spill] sm:$0xff] }
 0x8f6   : > { %2280 = vadd.xlane.f32.xlu0 %v2279_v25  ;;  %v21173_v50 = vpop.xlane.xlu1 %8713  ;;  %v6965_v23 = vmul.f32 %v16654_v17, %v23102_v6  ;;  %v16656_v7 = vpop.eup %16655 }
 0x8f7   : > { %v10166_v13 = vmul.f32 %v16656_v7, %v23103_v24 }
 0x8f8   : > { %v21164_v33 = vpop.xlane.xlu0 %8716 }
 0x8f9   : > { %11928 = vadd.xlane.f32.xlu1 %v11927_v38  ;;  %v23120_v38 = vld [vmem:[#allocation194_spill] sm:$0xff] }
 0x8fa   : > { %11931 = vadd.xlane.f32.xlu0 %v11930_v49  ;;  %v21183_v11 = vpop.xlane.xlu1 %5516  ;;  %16661 = vrcp.f32 %v23120_v38  ;;  %v13885_v38 = vld [vmem:[%s21932_s4 + $0x18] sm:$0xff] }
 0x8fb   : > { %23105 = vst [vmem:[#allocation195_spill] sm:$0xff] %v21183_v11  ;;  %16663 = vrcp.f32 %v23121_v9  ;;  %16305 = vmatprep.subr.mxu0 %v13885_v38 }
 0x8fc   : > { %v21171_v16 = vpop.xlane.xlu0 %5519  ;;  %16306 = vmatpush3.msra.mxu0 %v13885_v38 }
 0x8fd   : > { %2283 = vadd.xlane.f32.xlu1 %v2282_v36  ;;  %23100 = vst [vmem:[#allocation42_spill] sm:$0xff] %v21171_v16 }
 0x8fe   : > { %11943 = vadd.xlane.f32.xlu0 %v11942_v59  ;;  %v21188_v10 = vpop.xlane.xlu1 %8719  ;;  %v16658_v59 = vpop.eup %16657 }
 0x8ff   : > { %23107 = vst [vmem:[#allocation200_spill] sm:$0xff] %v21188_v10  ;;  %v16660_v51 = vpop.eup %16659  ;;  %v6966_v5 = vmul.f32 %v16658_v59, %v23124_v48  ;;  %v23131_v59 = vld [vmem:[#allocation185_spill] sm:$0xff]  ;;  %v23132_v48 = vld [vmem:[#allocation227_spill] sm:$0xff] }
 0x900   : > { %v21180_v55 = vpop.xlane.xlu0 %8722 }
 0x901   : > { %2286 = vadd.xlane.f32.xlu1 %v2285_v58  ;;  %23104 = vst [vmem:[#allocation192_spill] sm:$0xff] %v21180_v55  ;;  %v23123_v58 = vld [vmem:[#allocation81_spill] sm:$0xff] }
 0x902   : > { %11940 = vadd.xlane.f32.xlu0 %v11939_v57  ;;  %v21192_v53 = vpop.xlane.xlu1 %5522  ;;  %v10168_v57 = vmul.f32 %v16660_v51, %v23123_v58  ;;  %v13884_v58 = vld [vmem:[%s21932_s4 + $0x10] sm:$0xff] }
 0x903   : > { %23109 = vst [vmem:[#allocation198_spill] sm:$0xff] %v21192_v53  ;;  %16307 = vmatprep.subr.mxu0 %v13884_v58 }
 0x904   : > { %v21186_v2 = vpop.xlane.xlu0 %5525  ;;  %16308 = vmatpush3.msra.mxu0 %v13884_v58  ;;  %v23136_v58 = vld [vmem:[#allocation64_spill] sm:$0xff] }
 0x905   : > { %23106 = vst [vmem:[#allocation13_spill] sm:$0xff] %v21186_v2 }
 0x906   : > { %v21196_v52 = vpop.xlane.xlu1 %8725 }
 0x907   : > { %23111 = vst [vmem:[#allocation206_spill] sm:$0xff] %v21196_v52  ;;  %v16662_v37 = vpop.eup %16661 }
 0x908   : > { %v21190_v26 = vpop.xlane.xlu0 %8728  ;;  %v6967_v8 = vmul.f32 %v16662_v37, %v23125_v32  ;;  %v16664_v40 = vpop.eup %16663  ;;  %v13882_v32 = vld [vmem:[%s21932_s4] sm:$0xff] }
 0x909   : > { %23108 = vst [vmem:[#allocation136_spill] sm:$0xff] %v21190_v26  ;;  %v10169_v0 = vmul.f32 %v16664_v40, %v23127_v62 }
 0x90a   : > { %v21200_v39 = vpop.xlane.xlu1 %5528 }
 0x90b   : > { %23112 = vst [vmem:[#allocation202_spill] sm:$0xff] %v21200_v39 }
 0x90c   : > { %v21194_v21 = vpop.xlane.xlu0 %5531 }
 0x90d   : > { %23110 = vst [vmem:[#allocation37_spill] sm:$0xff] %v21194_v21 }
 0x90e   : > { %v21204_v28 = vpop.xlane.xlu1 %8731 }
 0x90f   : > { %23114 = vst [vmem:[#allocation216_spill] sm:$0xff] %v21204_v28 }
 0x910   : > { %v21198_v45 = vpop.xlane.xlu0 %2241 }
 0x912   : > { %13435 = vrot.lane.b32.xlu1 %v6964_v22, %s16923_s20  ;;  %v21214_v25 = vpop.xlane.xlu1 %8734 }
 0x913   : > { %23119 = vst [vmem:[#allocation212_spill] sm:$0xff] %v21214_v25 }
 0x914   : > { %v21202_v27 = vpop.xlane.xlu0 %5537 }
 0x915   : > { %23113 = vst [vmem:[#allocation133_spill] sm:$0xff] %v21202_v27  ;;  %v23145_v27 = vld [vmem:[#allocation113_spill] sm:$0xff] }
 0x916   : > { %13563 = vrot.lane.b32.xlu1 %v10167_v4, %s16924_s22  ;;  %v21218_v36 = vpop.xlane.xlu1 %2244 }
 0x918   : > { %13433 = vrot.lane.b32.xlu0 %v6963_v3, %s16923_s20  ;;  %v21211_v35 = vpop.xlane.xlu0 %2247 }
 0x91a   : > { %13437 = vrot.lane.b32.xlu1 %v6965_v23, %s16923_s20  ;;  %v21220_v56 = vpop.xlane.xlu1 %5534 }
 0x91b   : > { %23122 = vst [vmem:[#allocation221_spill] sm:$0xff] %v21220_v56 }
 0x91c   : > { %13561 = vrot.lane.b32.xlu0 %v10166_v13, %s16924_s22  ;;  %v11854_v49 = vpop.xlane.xlu0 %11853 }
 0x91d   : > { %16665 = vrcp.f32 %v11854_v49  ;;  %v23130_v49 = vld [vmem:[#allocation154_spill] sm:$0xff] }
 0x91e   : > { %v21227_v22 = vpop.xlane.xlu1 %8737  ;;  %v2297_v9 = vsel %vm2047_vm2, %v23130_v49, 0.0 }
 0x91f   : > { %23126 = vst [vmem:[#allocation219_spill] sm:$0xff] %v21227_v22  ;;  %v23143_v22 = vld [vmem:[#allocation143_spill] sm:$0xff] }
 0x920   : > { %v21237_v6 = vpop.xlane.xlu0 %2256  ;;  %v2303_v56 = vsel %vm2047_vm2, %v23143_v22, 0.0 }
 0x922   : > { %v21233_v1 = vpop.xlane.xlu1 %8740 }
 0x923   : > { %23128 = vst [vmem:[#allocation225_spill] sm:$0xff] %v21233_v1  ;;  %v23144_v1 = vld [vmem:[#allocation196_spill] sm:$0xff] }
 0x924   : > { %v11866_v7 = vpop.xlane.xlu0 %11865 }
 0x926   : > { %v21235_v3 = vpop.xlane.xlu1 %2250 }
 0x928   : > { %v21241_v13 = vpop.xlane.xlu0 %2262 }
 0x92a   : > { %v16666_v4 = vpop.eup %16665  ;;  %v11851_v23 = vpop.xlane.xlu1 %11850 }
 0x92b   : > { %16667 = vrcp.f32 %v11851_v23 }
 0x92c   : > { %16669 = vrcp.f32 %v23131_v59 }
 0x92e   : > { %v21239_v24 = vpop.xlane.xlu1 %2253 }
 0x932   : > { %v11863_v29 = vpop.xlane.xlu1 %11862 }
 0x936   : > { %v21247_v15 = vpop.xlane.xlu1 %2259 }
 0x93a   : > { %v21255_v51 = vpop.xlane.xlu1 %11874 }
 0x93b   : > { %2289 = vadd.xlane.f32.xlu0 %v2288_v60  ;;  %v23129_v60 = vld [vmem:[#allocation152_spill] sm:$0xff] }
 0x93c   : > { %v2294_v14 = vsel %vm2047_vm2, %v23129_v60, 0.0 }
 0x93e   : > { %2292 = vadd.xlane.f32.xlu1 %v2291_v47  ;;  %v21245_v47 = vpop.xlane.xlu0 %11877 }
 0x940   : > { %v16199_v18 = vpop.f32.mrf.mxu0 }
 0x941   : > { %v13370_v17 = vmul.f32 %v16666_v4, %v16199_v18  ;;  %v23134_v18 = vld [vmem:[#allocation199_spill] sm:$0xff]  ;;  %v16668_v4 = vpop.eup %16667 }
 0x942   : > { %v11860_v12 = vpop.xlane.xlu0 %11859  ;;  %v12023_v62 = vpop.f32.mrf.mxu0 }
 0x943   : > { %16671 = vrcp.f32 %v11860_v12  ;;  %v16670_v23 = vpop.eup %16669  ;;  %v13369_v60 = vmul.f32 %v16668_v4, %v12023_v62 }
 0x944   : > { %16673 = vrcp.f32 %v23132_v48 }
 0x946   : > { %v21263_v37 = vpop.xlane.xlu0 %11889 }
 0x94e   : > { %v21270_v40 = vpop.xlane.xlu0 %11871 }
 0x94f   : > { %13565 = vrot.lane.b32.xlu1 %v10168_v57, %s16924_s22  ;;  %v13883_v57 = vld [vmem:[%s21932_s4 + $0x8] sm:$0xff] }
 0x950   : > { %16309 = vmatprep.subr.mxu0 %v13883_v57 }
 0x951   : > { %13439 = vrot.lane.b32.xlu0 %v6966_v5, %s16923_s20  ;;  %v11857_v5 = vpop.xlane.xlu1 %11856  ;;  %16310 = vmatpush3.msra.mxu0 %v13883_v57 }
 0x952   : > { %16311 = vmatprep.subr.mxu0 %v13882_v32 }
 0x953   : > { %13441 = vrot.lane.b32.xlu1 %v6967_v8, %s16923_s20  ;;  %v23133_v8 = vld [vmem:[#allocation142_spill] sm:$0xff]  ;;  %16312 = vmatpush3.msra.mxu0 %v13882_v32  ;;  %v21275_v12 = vpop.xlane.xlu0 %11901 }
 0x954   : > { %16675 = vrcp.f32 %v23133_v8  ;;  %v23137_v8 = vld [vmem:[#allocation55_spill] sm:$0xff] }
 0x955   : > { %13567 = vrot.lane.b32.xlu0 %v10169_v0, %s16924_s22  ;;  %16677 = vrcp.f32 %v11866_v7  ;;  %v21273_v0 = vpop.xlane.xlu1 %11886  ;;  %v23135_v7 = vld [vmem:[#allocation112_spill] sm:$0xff] }
 0x956   : > { %16679 = vrcp.f32 %v23134_v18 }
 0x957   : > { %13691 = vrot.lane.b32.xlu1 %v13370_v17, %s16925_s23  ;;  %16681 = vrcp.f32 %v11857_v5  ;;  %v16213_v5 = vpop.f32.mrf.mxu0  ;;  %v21282_v32 = vpop.xlane.xlu0 %11883 }
 0x958   : > { %16683 = vrcp.f32 %v11863_v29 }
 0x959   : > { %v11869_v49 = vpop.xlane.xlu1 %11868  ;;  %16685 = vrcp.f32 %v23144_v1 }
 0x95a   : > { %16687 = vrcp.f32 %v23145_v27 }
 0x95b   : > { %16689 = vrcp.f32 %v21270_v40  ;;  %v23152_v40 = vld [vmem:[#allocation130_spill] sm:$0xff] }
 0x974   : > { %2295 = vadd.xlane.f32.xlu0 %v2294_v14  ;;  %v16672_v14 = vpop.eup %16671 }
 0x975   : > { %v16674_v59 = vpop.eup %16673 }
 0x976   : > { %v10170_v57 = vmul.f32 %v16674_v59, %v23136_v58  ;;  %v16676_v48 = vpop.eup %16675 }
 0x977   : > { %v10171_v18 = vmul.f32 %v16676_v48, %v23137_v8  ;;  %v16678_v29 = vpop.eup %16677 }
 0x978   : > { %v16680_v4 = vpop.eup %16679 }
 0x97b   : > { %2298 = vadd.xlane.f32.xlu1 %v2297_v9  ;;  %v6968_v9 = vmul.f32 %v16670_v23, %v23135_v7  ;;  %v16682_v23 = vpop.eup %16681  ;;  %v21290_v7 = vpop.xlane.xlu0 %11913 }
 0x97c   : > { %v16684_v58 = vpop.eup %16683 }
 0x97d   : > { %v16686_v22 = vpop.eup %16685 }
 0x97e   : > { %v16688_v1 = vpop.eup %16687 }
 0x97f   : > { %v16690_v52 = vpop.eup %16689 }
 0x980   : > { %v16206_v17 = vpop.f32.mrf.mxu1 }
 0x981   : > { %v13372_v38 = vmul.f32 %v16672_v14, %v16206_v17  ;;  %v13374_v17 = vmul.f32 %v16678_v29, %v16213_v5  ;;  %v21298_v5 = vpop.xlane.xlu0 %11895 }
 0x982   : > { %v12110_v62 = vpop.f32.mrf.mxu1 }
 0x983   : > { %v13371_v14 = vmul.f32 %v16682_v23, %v12110_v62 }
 0x985   : > { %v16220_v21 = vpop.f32.mrf.mxu1 }
 0x986   : > { %v13376_v53 = vmul.f32 %v16690_v52, %v16220_v21 }
 0x98a   : > { %13689 = vrot.lane.b32.xlu0 %v13369_v60, %s16925_s23  ;;  %v21286_v60 = vpop.xlane.xlu1 %11898 }
 0x98c   : > { %13695 = vrot.lane.b32.xlu1 %v13372_v38, %s16925_s23  ;;  %v12197_v38 = vpop.f32.mrf.mxu0 }
 0x98e   : > { %13443 = vrot.lane.b32.xlu0 %v6968_v9, %s16923_s20  ;;  %v23138_v9 = vld [vmem:[#allocation135_spill] sm:$0xff]  ;;  %v21294_v48 = vpop.xlane.xlu1 %11880 }
 0x98f   : > { %v6969_v59 = vmul.f32 %v16680_v4, %v23138_v9  ;;  %v23142_v9 = vld [vmem:[#allocation31_spill] sm:$0xff] }
 0x990   : > { %13569 = vrot.lane.b32.xlu1 %v10170_v57, %s16924_s22  ;;  %v13373_v57 = vmul.f32 %v16684_v58, %v12197_v38 }
 0x992   : > { %13571 = vrot.lane.b32.xlu0 %v10171_v18, %s16924_s22  ;;  %v21300_v8 = vpop.xlane.xlu1 %11910  ;;  %v21302_v18 = vpop.xlane.xlu0 %11925 }
 0x993   : > { %23139 = vst [vmem:[#allocation224_spill] sm:$0xff] %v21302_v18 }
 0x994   : > { %13699 = vrot.lane.b32.xlu1 %v13374_v17, %s16925_s23 }
 0x996   : > { %13693 = vrot.lane.b32.xlu0 %v13371_v14, %s16925_s23  ;;  %v21304_v29 = vpop.xlane.xlu1 %11892  ;;  %v21306_v62 = vpop.xlane.xlu0 %2268 }
 0x998   : > { %13445 = vrot.lane.b32.xlu1 %v6969_v59, %s16923_s20  ;;  %v2300_v59 = vsel %vm2047_vm2, %v23142_v9, 0.0  ;;  %v23148_v9 = vld [vmem:[#allocation197_spill] sm:$0xff] }
 0x999   : > { %16691 = vrcp.f32 %v23148_v9  ;;  %v6970_v9 = vmul.f32 %v16686_v22, %v23152_v40 }
 0x99a   : > { %13697 = vrot.lane.b32.xlu0 %v13373_v57, %s16925_s23  ;;  %v21308_v17 = vpop.xlane.xlu1 %11922  ;;  %v21310_v4 = vpop.xlane.xlu0 %11907  ;;  %16693 = vrcp.f32 %v20889_v31 }
 0x99b   : > { %23140 = vst [vmem:[#allocation228_spill] sm:$0xff] %v21308_v17  ;;  %16695 = vrcp.f32 %v11869_v49  ;;  %v23153_v49 = vld [vmem:[#allocation78_spill] sm:$0xff] }
 0x99c   : > { %16697 = vrcp.f32 %v21198_v45 }
 0x99d   : > { %16699 = vrcp.f32 %v21218_v36 }
 0x99e   : > { %v21312_v23 = vpop.xlane.xlu1 %2265  ;;  %v21314_v14 = vpop.xlane.xlu0 %11937 }
 0x99f   : > { %23141 = vst [vmem:[#allocation226_spill] sm:$0xff] %v21314_v14 }
 0x9a2   : > { %v21316_v38 = vpop.xlane.xlu1 %11904  ;;  %v21320_v58 = vpop.xlane.xlu0 %2274 }
 0x9a6   : > { %v21322_v57 = vpop.xlane.xlu1 %2271  ;;  %v21328_v28 = vpop.xlane.xlu0 %11934 }
 0x9a7   : > { %23146 = vst [vmem:[#allocation233_spill] sm:$0xff] %v21328_v28  ;;  %v16692_v31 = vpop.eup %16691 }
 0x9a8   : > { %v16694_v17 = vpop.eup %16693 }
 0x9a9   : > { %v10173_v26 = vmul.f32 %v16694_v17, %v23153_v49  ;;  %v16696_v22 = vpop.eup %16695 }
 0x9aa   : > { %v21330_v14 = vpop.xlane.xlu1 %11916 }
 0x9ab   : > { %23147 = vst [vmem:[#allocation231_spill] sm:$0xff] %v21330_v14 }
 0x9ae   : > { %v21337_v39 = vpop.xlane.xlu1 %2277 }
 0x9b2   : > { %v21342_v28 = vpop.xlane.xlu1 %11928 }
 0x9b3   : > { %23151 = vst [vmem:[#allocation234_spill] sm:$0xff] %v21342_v28 }
 0x9b9   : > { %2301 = vadd.xlane.f32.xlu0 %v2300_v59  ;;  %v21335_v59 = vpop.xlane.xlu0 %11919 }
 0x9ba   : > { %23149 = vst [vmem:[#allocation103_spill] sm:$0xff] %v21335_v59  ;;  %v23177_v59 = vld [vmem:[#allocation30_spill] sm:$0xff] }
 0x9bc   : > { %2304 = vadd.xlane.f32.xlu1 %v2303_v56  ;;  %v23150_v56 = vld [vmem:[#allocation56_spill] sm:$0xff] }
 0x9bd   : > { %v10172_v25 = vmul.f32 %v16688_v1, %v23150_v56  ;;  %v21340_v27 = vpop.xlane.xlu0 %2280  ;;  %v21351_v1 = vpop.xlane.xlu1 %2283 }
 0x9be   : > { %23155 = vst [vmem:[#allocation149_spill] sm:$0xff] %v21351_v1  ;;  %v12284_v56 = vpop.f32.mrf.mxu1 }
 0x9bf   : > { %v13375_v40 = vmul.f32 %v16696_v22, %v12284_v56 }
 0x9c1   : > { %v21348_v2 = vpop.xlane.xlu0 %11931  ;;  %v21359_v52 = vpop.xlane.xlu1 %2286 }
 0x9c2   : > { %23154 = vst [vmem:[#allocation141_spill] sm:$0xff] %v21348_v2  ;;  %23158 = vst [vmem:[#allocation111_spill] sm:$0xff] %v21359_v52  ;;  %v23165_v52 = vld [vmem:[#allocation230_spill] sm:$0xff] }
 0x9c5   : > { %v21356_v21 = vpop.xlane.xlu0 %11943 }
 0x9c6   : > { %23157 = vst [vmem:[#allocation117_spill] sm:$0xff] %v21356_v21 }
 0x9c9   : > { %v21361_v17 = vpop.xlane.xlu0 %11940 }
 0x9ca   : > { %23159 = vst [vmem:[#allocation155_spill] sm:$0xff] %v21361_v17  ;;  %v23164_v17 = vld [vmem:[#allocation16_spill] sm:$0xff] }
 0x9cb   : > { %v2309_v21 = vsel %vm2047_vm2, %v23164_v17, 0.0  ;;  %v23167_v17 = vld [vmem:[#allocation44_spill] sm:$0xff] }
 0x9cd   : > { %13573 = vrot.lane.b32.xlu1 %v10172_v25, %s16924_s22  ;;  %v23156_v25 = vld [vmem:[#allocation213_spill] sm:$0xff] }
 0x9ce   : > { %v6971_v28 = vmul.f32 %v16692_v31, %v23156_v25  ;;  %v23162_v25 = vld [vmem:[#allocation156_spill] sm:$0xff] }
 0x9cf   : > { %13447 = vrot.lane.b32.xlu0 %v6970_v9, %s16923_s20  ;;  %v13434_v9 = vpop.permute.xlu0 %13433  ;;  %v2306_v22 = vsel %vm2047_vm2, %v23162_v25, 0.0 }
 0x9d1   : > { %13703 = vrot.lane.b32.xlu1 %v13376_v53, %s16925_s23  ;;  %v13436_v53 = vpop.permute.xlu1 %13435 }
 0x9d3   : > { %13575 = vrot.lane.b32.xlu0 %v10173_v26, %s16924_s22  ;;  %v13562_v1 = vpop.permute.xlu0 %13561 }
 0x9d5   : > { %13449 = vrot.lane.b32.xlu1 %v6971_v28, %s16923_s20  ;;  %v13564_v49 = vpop.permute.xlu1 %13563 }
 0x9d7   : > { %13701 = vrot.lane.b32.xlu0 %v13375_v40, %s16925_s23  ;;  %v21363_v26 = vpop.xlane.xlu0 %2289  ;;  %v23163_v40 = vld [vmem:[#allocation187_spill] sm:$0xff] }
 0x9d8   : > { %23160 = vst [vmem:[#allocation50_spill] sm:$0xff] %v21363_v26  ;;  %16701 = vrcp.f32 %v23163_v40 }
 0x9d9   : > { %v13438_v2 = vpop.permute.xlu1 %13437  ;;  %16703 = vrcp.f32 %v23165_v52  ;;  %v23168_v52 = vld [vmem:[#allocation203_spill] sm:$0xff] }
 0x9da   : > { %16705 = vrcp.f32 %v21211_v35  ;;  %v23170_v35 = vld [vmem:[#allocation107_spill] sm:$0xff] }
 0x9db   : > { %v13440_v28 = vpop.permute.xlu0 %13439  ;;  %16707 = vrcp.f32 %v21235_v3 }
 0x9dc   : > { %16709 = vrcp.f32 %v21237_v6 }
 0x9dd   : > { %v21366_v31 = vpop.xlane.xlu1 %2292  ;;  %16711 = vrcp.f32 %v21245_v47 }
 0x9de   : > { %23161 = vst [vmem:[#allocation145_spill] sm:$0xff] %v21366_v31  ;;  %v16698_v31 = vpop.eup %16697  ;;  %16713 = vrcp.f32 %v21239_v24 }
 0x9df   : > { %v13568_v26 = vpop.permute.xlu0 %13567  ;;  %v16700_v36 = vpop.eup %16699  ;;  %16715 = vrcp.f32 %v23168_v52 }
 0x9e0   : > { %16717 = vrcp.f32 %v23170_v35  ;;  %v23173_v35 = vld [vmem:[#allocation87_spill] sm:$0xff] }
 0x9e1   : > { %v13566_v56 = vpop.permute.xlu1 %13565  ;;  %16719 = vrcp.f32 %v21255_v51  ;;  %v23174_v51 = vld [vmem:[#allocation124_spill] sm:$0xff] }
 0x9e5   : > { %v13442_v45 = vpop.permute.xlu1 %13441 }
 0x9e9   : > { %v13692_v3 = vpop.permute.xlu1 %13691 }
 0x9f6   : > { %2307 = vadd.xlane.f32.xlu0 %v2306_v22  ;;  %v3760_v22 = vmul.f32 %v16698_v31, %v23167_v17 }
 0x9f8   : > { %v13785_v18 = vsel %vm628_vm1, %v3760_v22, %v13434_v9 }
 0x9f9   : > { %2310 = vadd.xlane.f32.xlu1 %v2309_v21  ;;  %v23169_v21 = vld [vmem:[#allocation35_spill] sm:$0xff]  ;;  %v13817_v47 = vsel %vm2047_vm2, %v13785_v18, %v13562_v1  ;;  %v23172_v1 = vld [vmem:[#allocation65_spill] sm:$0xff] }
 0x9fa   : > { %v3761_v40 = vmul.f32 %v16700_v36, %v23169_v21  ;;  %v16702_v36 = vpop.eup %16701 }
 0x9fc   : > { %v13786_v6 = vsel %vm628_vm1, %v3761_v40, %v13436_v53  ;;  %v16704_v53 = vpop.eup %16703 }
 0x9fd   : > { %v21379_v25 = vpop.xlane.xlu0 %2295  ;;  %v16706_v22 = vpop.eup %16705  ;;  %v10174_v52 = vmul.f32 %v16704_v53, %v23172_v1 }
 0x9fe   : > { %23166 = vst [vmem:[#allocation166_spill] sm:$0xff] %v21379_v25  ;;  %v13818_v25 = vsel %vm2047_vm2, %v13786_v6, %v13564_v49  ;;  %v16708_v18 = vpop.eup %16707  ;;  %v6972_v6 = vmul.f32 %v16702_v36, %v23174_v51 }
 0x9ff   : > { %v13851_v31 = vsel %vm13849_vm3, %v13818_v25, %v13692_v3  ;;  %v16710_v21 = vpop.eup %16709  ;;  %v3762_v3 = vmul.f32 %v16706_v22, %v23173_v35  ;;  %v23176_v22 = vld [vmem:[#allocation32_spill] sm:$0xff] }
 0xa00   : > { %v16712_v25 = vpop.eup %16711  ;;  %v3765_v35 = vmul.f32 %v16710_v21, %v23176_v22 }
 0xa01   : > { %v13690_v10 = vpop.permute.xlu0 %13689  ;;  %v13787_v14 = vsel %vm628_vm1, %v3762_v3, %v13438_v2 }
 0xa02   : > { %v13850_v24 = vsel %vm13849_vm3, %v13817_v47, %v13690_v10  ;;  %v16227_v10 = vpop.f32.mrf.mxu0  ;;  %v16714_v47 = vpop.eup %16713  ;;  %v13819_v16 = vsel %vm2047_vm2, %v13787_v14, %v13566_v56 }
 0xa03   : > { %16313 = vmatprep.mubr.msk.f32.mxu0 %vm298_vm0, %v13850_v24  ;;  %v23175_v24 = vld [vmem:[#allocation74_spill] sm:$0xff]  ;;  %v13378_v11 = vmul.f32 %v16712_v25, %v16227_v10 }
 0xa04   : > { %16314 = vmatmul.mubr.msk.f32.vlgmr.msra.gmra.mxu0 %vm298_vm0, %v13851_v31  ;;  %v21395_v9 = vpop.xlane.xlu1 %2298  ;;  %v3763_v31 = vmul.f32 %v16708_v18, %v23175_v24  ;;  %v23178_v18 = vld [vmem:[#allocation47_spill] sm:$0xff]  ;;  %v12371_v2 = vpop.f32.mrf.mxu0 }
 0xa05   : > { %23171 = vst [vmem:[#allocation116_spill] sm:$0xff] %v21395_v9  ;;  %v13444_v17 = vpop.permute.xlu0 %13443  ;;  %v16716_v9 = vpop.eup %16715  ;;  %v3764_v24 = vmul.f32 %v16714_v47, %v23178_v18  ;;  %v23182_v47 = vld [vmem:[#allocation190_spill] sm:$0xff] }
 0xa06   : > { %v16718_v1 = vpop.eup %16717  ;;  %v13788_v55 = vsel %vm628_vm1, %v3763_v31, %v13440_v28  ;;  %v13790_v25 = vsel %vm628_vm1, %v3765_v35, %v13444_v17  ;;  %16721 = vrcp.f32 %v23182_v47  ;;  %v23183_v31 = vld [vmem:[#allocation211_spill] sm:$0xff]  ;;  %v16234_v18 = vpop.f32.mrf.mxu1 }
 0xa07   : > { %v10175_v36 = vmul.f32 %v16718_v1, %v23177_v59  ;;  %v13820_v51 = vsel %vm2047_vm2, %v13788_v55, %v13568_v26  ;;  %v13789_v14 = vsel %vm628_vm1, %v3764_v24, %v13442_v45  ;;  %v23179_v59 = vld [vmem:[#allocation129_spill] sm:$0xff]  ;;  %v16720_v26 = vpop.eup %16719  ;;  %v23180_v45 = vld [vmem:[#allocation88_spill] sm:$0xff]  ;;  %16723 = vrcp.f32 %v20893_v19 }
 0xa08   : > { %v13696_v49 = vpop.permute.xlu1 %13695  ;;  %16725 = vrcp.f32 %v21241_v13 }
 0xa09   : > { %v13572_v40 = vpop.permute.xlu0 %13571  ;;  %v13853_v28 = vsel %vm13849_vm3, %v13820_v51, %v13696_v49  ;;  %v13377_v49 = vmul.f32 %v16720_v26, %v12371_v2  ;;  %16727 = vrcp.f32 %v21247_v15 }
 0xa0a   : > { %13577 = vrot.lane.b32.xlu1 %v10174_v52, %s16924_s22  ;;  %v13822_v56 = vsel %vm2047_vm2, %v13790_v25, %v13572_v40  ;;  %v23181_v40 = vld [vmem:[#allocation98_spill] sm:$0xff]  ;;  %16729 = vrcp.f32 %v21282_v32 }
 0xa0b   : > { %16731 = vrcp.f32 %v23183_v31  ;;  %v23186_v32 = vld [vmem:[#allocation114_spill] sm:$0xff] }
 0xa0c   : > { %13451 = vrot.lane.b32.xlu0 %v6972_v6, %s16923_s20  ;;  %v13570_v53 = vpop.permute.xlu1 %13569  ;;  %v2315_v6 = vsel %vm2047_vm2, %v23181_v40, 0.0  ;;  %v23190_v40 = vld [vmem:[#allocation105_spill] sm:$0xff] }
 0xa0d   : > { %v13694_v52 = vpop.permute.xlu0 %13693 }
 0xa0e   : > { %v13852_v10 = vsel %vm13849_vm3, %v13819_v16, %v13694_v52  ;;  %13707 = vrot.lane.b32.xlu1 %v13378_v11, %s16925_s23  ;;  %v6973_v16 = vmul.f32 %v16716_v9, %v23179_v59  ;;  %v13821_v11 = vsel %vm2047_vm2, %v13789_v14, %v13570_v53  ;;  %v2312_v9 = vsel %vm2047_vm2, %v23180_v45, 0.0  ;;  %v23184_v53 = vld [vmem:[#allocation27_spill] sm:$0xff] }
 0xa0f   : > { %16316 = vmatprep.mubr.msk.f32.mxu0 %vm298_vm0, %v13852_v10  ;;  %16733 = vrcp.f32 %v23184_v53 }
 0xa10   : > { %13579 = vrot.lane.b32.xlu0 %v10175_v36, %s16924_s22  ;;  %16317 = vmatmul.mubr.msk.f32.gmra.mxu0 %vm298_vm0, %v13853_v28  ;;  %v13700_v55 = vpop.permute.xlu1 %13699  ;;  %16735 = vrcp.f32 %v21294_v48  ;;  %v23185_v36 = vld [vmem:[#allocation60_spill] sm:$0xff] }
 0xa11   : > { %v13855_v17 = vsel %vm13849_vm3, %v13822_v56, %v13700_v55  ;;  %v13698_v21 = vpop.permute.xlu0 %13697  ;;  %v23187_v56 = vld [vmem:[#allocation91_spill] sm:$0xff] }
 0xa12   : > { %v13854_v3 = vsel %vm13849_vm3, %v13821_v11, %v13698_v21  ;;  %13453 = vrot.lane.b32.xlu1 %v6973_v16, %s16923_s20  ;;  %v23188_v16 = vld [vmem:[#allocation61_spill] sm:$0xff]  ;;  %v23189_v11 = vld [vmem:[#allocation94_spill] sm:$0xff]  ;;  %v12458_v21 = vpop.f32.mrf.mxu1 }
 0xa13   : > { %16319 = vmatprep.mubr.msk.f32.mxu0 %vm298_vm0, %v13854_v3  ;;  %v16722_v35 = vpop.eup %16721 }
 0xa14   : > { %13705 = vrot.lane.b32.xlu0 %v13377_v49, %s16925_s23  ;;  %16320 = vmatmul.mubr.msk.f32.gmra.mxu0 %vm298_vm0, %v13855_v17  ;;  %v13446_v1 = vpop.permute.xlu1 %13445  ;;  %v16724_v52 = vpop.eup %16723  ;;  %v6974_v10 = vmul.f32 %v16722_v35, %v23186_v32  ;;  %v23195_v32 = vld [vmem:[#allocation220_spill] sm:$0xff] }
 0xa15   : > { %v10176_v51 = vmul.f32 %v16724_v52, %v23185_v36  ;;  %v16726_v13 = vpop.eup %16725 }
 0xa16   : > { %v16728_v24 = vpop.eup %16727  ;;  %v3767_v55 = vmul.f32 %v16726_v13, %v23187_v56  ;;  %v23192_v13 = vld [vmem:[#allocation24_spill] sm:$0xff] }
 0xa17   : > { %v16730_v2 = vpop.eup %16729  ;;  %v3766_v17 = vmul.f32 %v16728_v24, %v23189_v11  ;;  %v23194_v24 = vld [vmem:[#allocation214_spill] sm:$0xff] }
 0xa18   : > { %v16732_v25 = vpop.eup %16731  ;;  %v13380_v48 = vmul.f32 %v16730_v2, %v16234_v18  ;;  %v2321_v18 = vsel %vm2047_vm2, %v23192_v13, 0.0 }
 0xa19   : > { %v13791_v3 = vsel %vm628_vm1, %v3766_v17, %v13446_v1  ;;  %v23191_v1 = vld [vmem:[#allocation2_spill] sm:$0xff] }
 0xa1c   : > { %v16734_v14 = vpop.eup %16733 }
 0xa1d   : > { %v10177_v26 = vmul.f32 %v16734_v14, %v23188_v16  ;;  %v16736_v47 = vpop.eup %16735  ;;  %v23197_v14 = vld [vmem:[#allocation67_spill] sm:$0xff] }
 0xa1e   : > { %v13379_v52 = vmul.f32 %v16736_v47, %v12458_v21  ;;  %v23201_v47 = vld [vmem:[#allocation84_spill] sm:$0xff] }
 0xa33   : > { %2313 = vadd.xlane.f32.xlu0 %v2312_v9 }
 0xa36   : > { %2316 = vadd.xlane.f32.xlu1 %v2315_v6  ;;  %v6975_v6 = vmul.f32 %v16732_v25, %v23190_v40  ;;  %v23200_v40 = vld [vmem:[#allocation73_spill] sm:$0xff] }
 0xa42   : > { %v21439_v22 = vpop.xlane.xlu0 %2301 }
 0xa45   : > { %v21442_v19 = vpop.xlane.xlu1 %2304 }
 0xa46   : > { %v13448_v15 = vpop.permute.xlu0 %13447 }
 0xa47   : > { %13581 = vrot.lane.b32.xlu1 %v10176_v51, %s16924_s22  ;;  %v13792_v49 = vsel %vm628_vm1, %v3767_v55, %v13448_v15  ;;  %v2318_v51 = vsel %vm2047_vm2, %v23191_v1, 0.0  ;;  %v23193_v15 = vld [vmem:[#allocation209_spill] sm:$0xff] }
 0xa48   : > { %16737 = vrcp.f32 %v23193_v15 }
 0xa49   : > { %13455 = vrot.lane.b32.xlu0 %v6974_v10, %s16923_s20  ;;  %v13574_v28 = vpop.permute.xlu1 %13573  ;;  %16739 = vrcp.f32 %v23194_v24  ;;  %v23196_v10 = vld [vmem:[#allocation165_spill] sm:$0xff] }
 0xa4a   : > { %v13576_v59 = vpop.permute.xlu0 %13575  ;;  %v13823_v31 = vsel %vm2047_vm2, %v13791_v3, %v13574_v28  ;;  %16741 = vrcp.f32 %v21263_v37  ;;  %v23199_v3 = vld [vmem:[#allocation46_spill] sm:$0xff] }
 0xa4b   : > { %13711 = vrot.lane.b32.xlu1 %v13380_v48, %s16925_s23  ;;  %v13824_v45 = vsel %vm2047_vm2, %v13792_v49, %v13576_v59  ;;  %16743 = vrcp.f32 %v21306_v62  ;;  %v16241_v59 = vpop.f32.mrf.mxu0 }
 0xa4c   : > { %16745 = vrcp.f32 %v21312_v23  ;;  %v23198_v23 = vld [vmem:[#allocation126_spill] sm:$0xff] }
 0xa4d   : > { %13583 = vrot.lane.b32.xlu0 %v10177_v26, %s16924_s22  ;;  %v13704_v9 = vpop.permute.xlu1 %13703  ;;  %16747 = vrcp.f32 %v23195_v32 }
 0xa4e   : > { %v13857_v53 = vsel %vm13849_vm3, %v13824_v45, %v13704_v9  ;;  %v13702_v35 = vpop.permute.xlu0 %13701  ;;  %16749 = vrcp.f32 %v23196_v10 }
 0xa4f   : > { %v13856_v36 = vsel %vm13849_vm3, %v13823_v31, %v13702_v35  ;;  %13457 = vrot.lane.b32.xlu1 %v6975_v6, %s16923_s20  ;;  %16751 = vrcp.f32 %v21273_v0 }
 0xa50   : > { %16322 = vmatprep.mubr.msk.f32.mxu0 %vm298_vm0, %v13856_v36 }
 0xa51   : > { %13709 = vrot.lane.b32.xlu0 %v13379_v52, %s16925_s23  ;;  %16323 = vmatmul.mubr.msk.f32.gmra.mxu0 %vm298_vm0, %v13857_v53  ;;  %v13450_v2 = vpop.permute.xlu1 %13449  ;;  %v12545_v53 = vpop.f32.mrf.mxu0 }
 0xa55   : > { %v16738_v48 = vpop.eup %16737 }
 0xa56   : > { %v16740_v28 = vpop.eup %16739  ;;  %v6976_v26 = vmul.f32 %v16738_v48, %v23198_v23 }
 0xa57   : > { %v10178_v56 = vmul.f32 %v16740_v28, %v23197_v14  ;;  %v16742_v37 = vpop.eup %16741  ;;  %v23203_v28 = vld [vmem:[#allocation147_spill] sm:$0xff] }
 0xa58   : > { %v16744_v16 = vpop.eup %16743  ;;  %v13382_v0 = vmul.f32 %v16742_v37, %v16241_v59  ;;  %v2324_v14 = vsel %vm2047_vm2, %v23203_v28, 0.0  ;;  %v23205_v59 = vld [vmem:[#allocation215_spill] sm:$0xff] }
 0xa59   : > { %v16746_v11 = vpop.eup %16745  ;;  %v3769_v45 = vmul.f32 %v16744_v16, %v23199_v3  ;;  %16753 = vrcp.f32 %v23205_v59  ;;  %v23206_v16 = vld [vmem:[#allocation11_spill] sm:$0xff] }
 0xa5a   : > { %v16748_v17 = vpop.eup %16747  ;;  %v3768_v31 = vmul.f32 %v16746_v11, %v23201_v47  ;;  %16755 = vrcp.f32 %v23206_v16  ;;  %v16248_v47 = vpop.f32.mrf.mxu1  ;;  %v23212_v28 = vld [vmem:[#allocation59_spill] sm:$0xff] }
 0xa5b   : > { %v16750_v49 = vpop.eup %16749  ;;  %16757 = vrcp.f32 %v21298_v5 }
 0xa5c   : > { %v10179_v6 = vmul.f32 %v16750_v49, %v23200_v40  ;;  %v13793_v52 = vsel %vm628_vm1, %v3768_v31, %v13450_v2  ;;  %v21499_v2 = vpop.f32.mrf.mxu0  ;;  %16759 = vrcp.f32 %v21320_v58  ;;  %v12632_v16 = vpop.f32.mrf.mxu1 }
 0xa5d   : > { %16761 = vrcp.f32 %v21322_v57  ;;  %v23209_v57 = vld [vmem:[#allocation79_spill] sm:$0xff] }
 0xa70   : > { %2319 = vadd.xlane.f32.xlu0 %v2318_v51  ;;  %v23202_v51 = vld [vmem:[#allocation123_spill] sm:$0xff] }
 0xa71   : > { %v6977_v13 = vmul.f32 %v16748_v17, %v23202_v51  ;;  %v23208_v17 = vld [vmem:[#allocation7_spill] sm:$0xff] }
 0xa73   : > { %2322 = vadd.xlane.f32.xlu1 %v2321_v18  ;;  %v16752_v18 = vpop.eup %16751 }
 0xa74   : > { %v13381_v10 = vmul.f32 %v16752_v18, %v12545_v53  ;;  %v16754_v5 = vpop.eup %16753 }
 0xa7f   : > { %v21475_v25 = vpop.xlane.xlu0 %2307 }
 0xa82   : > { %v21478_v55 = vpop.xlane.xlu1 %2310 }
 0xa83   : > { %v13452_v62 = vpop.permute.xlu0 %13451 }
 0xa84   : > { %13585 = vrot.lane.b32.xlu1 %v10178_v56, %s16924_s22  ;;  %v13794_v35 = vsel %vm628_vm1, %v3769_v45, %v13452_v62  ;;  %v23204_v56 = vld [vmem:[#allocation95_spill] sm:$0xff]  ;;  %v21506_v62 = vpop.f32.mrf.mxu0  ;;  %v16756_v45 = vpop.eup %16755 }
 0xa85   : > { %v2327_v37 = vsel %vm2047_vm2, %v23204_v56, 0.0  ;;  %v23213_v56 = vld [vmem:[#allocation172_spill] sm:$0xff] }
 0xa86   : > { %13459 = vrot.lane.b32.xlu0 %v6976_v26, %s16923_s20  ;;  %v13578_v21 = vpop.permute.xlu1 %13577  ;;  %v21509_v23 = vpop.f32.mrf.mxu0  ;;  %v23207_v26 = vld [vmem:[#allocation229_spill] sm:$0xff] }
 0xa87   : > { %v13580_v9 = vpop.permute.xlu0 %13579  ;;  %v13825_v15 = vsel %vm2047_vm2, %v13793_v52, %v13578_v21  ;;  %16763 = vrcp.f32 %v23207_v26 }
 0xa88   : > { %13715 = vrot.lane.b32.xlu1 %v13382_v0, %s16925_s23  ;;  %v13826_v36 = vsel %vm2047_vm2, %v13794_v35, %v13580_v9  ;;  %v21515_v11 = vpop.f32.mrf.mxu0  ;;  %16765 = vrcp.f32 %v23208_v17  ;;  %v10180_v9 = vmul.f32 %v16756_v45, %v23209_v57 }
 0xa89   : > { %16767 = vrcp.f32 %v21304_v29  ;;  %v23210_v29 = vld [vmem:[#allocation119_spill] sm:$0xff] }
 0xa8a   : > { %13587 = vrot.lane.b32.xlu0 %v10179_v6, %s16924_s22  ;;  %v13708_v1 = vpop.permute.xlu1 %13707  ;;  %v21518_v0 = vpop.f32.mrf.mxu0  ;;  %v6978_v35 = vmul.f32 %v16754_v5, %v23210_v29 }
 0xa8b   : > { %v13859_v24 = vsel %vm13849_vm3, %v13826_v36, %v13708_v1  ;;  %v13706_v32 = vpop.permute.xlu0 %13705  ;;  %v16758_v6 = vpop.eup %16757  ;;  %v21537_v1 = vld [vmem:[%s21933_s5] ss:$0 sm:$0xff] }
 0xa8c   : > { %v13858_v48 = vsel %vm13849_vm3, %v13825_v15, %v13706_v32  ;;  %13461 = vrot.lane.b32.xlu1 %v6977_v13, %s16923_s20  ;;  %v21521_v49 = vpop.f32.mrf.mxu0  ;;  %v16760_v53 = vpop.eup %16759  ;;  %v13384_v13 = vmul.f32 %v16758_v6, %v16248_v47  ;;  %v23214_v6 = vld [vmem:[#allocation109_spill] sm:$0xff] }
 0xa8d   : > { %16325 = vmatprep.mubr.msk.f32.mxu0 %vm298_vm0, %v13858_v48  ;;  %v16762_v52 = vpop.eup %16761 }
 0xa8e   : > { %13713 = vrot.lane.b32.xlu0 %v13381_v10, %s16925_s23  ;;  %16326 = vmatmul.mubr.msk.f32.gmra.mxu0 %vm298_vm0, %v13859_v24  ;;  %v13454_v21 = vpop.permute.xlu1 %13453  ;;  %v21525_v58 = vpop.f32.mrf.mxu0  ;;  %v23211_v24 = vld [vmem:[#allocation102_spill] sm:$0xff] }
 0xa8f   : > { %v3771_v32 = vmul.f32 %v16760_v53, %v23211_v24 }
 0xa90   : > { %v21532_v36 = vpop.f32.mrf.mxu0 }
 0xa94   : > { %v16764_v51 = vpop.eup %16763 }
 0xa95   : > { %v16766_v15 = vpop.eup %16765  ;;  %v6979_v47 = vmul.f32 %v16764_v51, %v23214_v6 }
 0xa96   : > { %v16768_v53 = vpop.eup %16767 }
 0xaad   : > { %2325 = vadd.xlane.f32.xlu0 %v2324_v14  ;;  %v10181_v14 = vmul.f32 %v16766_v15, %v23212_v28  ;;  %v23215_v28 = vld [vmem:[#allocation6_spill] sm:$0xff] }
 0xab0   : > { %2328 = vadd.xlane.f32.xlu1 %v2327_v37  ;;  %v3770_v37 = vmul.f32 %v16762_v52, %v23213_v56  ;;  %v23216_v56 = vld [vmem:[#allocation40_spill] sm:$0xff] }
 0xab2   : > { %v13795_v5 = vsel %vm628_vm1, %v3770_v37, %v13454_v21  ;;  %v13383_v21 = vmul.f32 %v16768_v53, %v12632_v16  ;;  %v2333_v37 = vsel %vm2047_vm2, %v23216_v56, 0.0  ;;  %v23218_v16 = vld [vmem:[#allocation121_spill] sm:$0xff] }
 0xab3   : > { %v23225_v56 = vld [vmem:[#allocation77_spill] sm:$0xff] }
 0xabc   : > { %v21523_v3 = vpop.xlane.xlu0 %2313 }
 0xabf   : > { %v21528_v40 = vpop.xlane.xlu1 %2316 }
 0xac0   : > { %v13456_v31 = vpop.permute.xlu0 %13455 }
 0xac1   : > { %13589 = vrot.lane.b32.xlu1 %v10180_v9, %s16924_s22  ;;  %v13796_v26 = vsel %vm628_vm1, %v3771_v32, %v13456_v31 }
 0xac3   : > { %13463 = vrot.lane.b32.xlu0 %v6978_v35, %s16923_s20  ;;  %v13582_v18 = vpop.permute.xlu1 %13581 }
 0xac4   : > { %v16315_v10 = vpop.f32.mrf.mxu0  ;;  %v13584_v48 = vpop.permute.xlu0 %13583  ;;  %v13827_v29 = vsel %vm2047_vm2, %v13795_v5, %v13582_v18 }
 0xac5   : > { %v14061_v59 = vadd.f32 %v16315_v10, %v21537_v1  ;;  %13719 = vrot.lane.b32.xlu1 %v13384_v13, %s16925_s23  ;;  %v13828_v45 = vsel %vm2047_vm2, %v13796_v26, %v13584_v48 }
 0xac6   : > { %v14055_v17 = vpop.f32.mrf.mxu0 }
 0xac7   : > { %14215 = vst.msk [vmem:[%s21545_s14 + $0x8] sm:$0xff] %vm298_vm0, %v14061_v59  ;;  %v14056_v57 = vadd.f32 %v21537_v1, %v14055_v17  ;;  %13591 = vrot.lane.b32.xlu0 %v10181_v14, %s16924_s22  ;;  %v13712_v9 = vpop.permute.xlu1 %13711  ;;  %v2330_v14 = vsel %vm2047_vm2, %v23215_v28, 0.0  ;;  %v23217_v59 = vld [vmem:[#allocation222_spill] sm:$0xff] }
 0xac8   : > { %v13861_v31 = vsel %vm13849_vm3, %v13828_v45, %v13712_v9  ;;  %v13710_v35 = vpop.permute.xlu0 %13709  ;;  %16769 = vrcp.f32 %v23217_v59  ;;  %v16262_v59 = vpop.f32.mrf.mxu1 }
 0xac9   : > { %14214 = vst.msk [vmem:[%s21545_s14] sm:$0xff] %vm298_vm0, %v14056_v57  ;;  %v13860_v52 = vsel %vm13849_vm3, %v13827_v29, %v13710_v35  ;;  %13465 = vrot.lane.b32.xlu1 %v6979_v47, %s16923_s20  ;;  %16771 = vrcp.f32 %v23218_v16  ;;  %v23219_v57 = vld [vmem:[#allocation22_spill] sm:$0xff]  ;;  %v23221_v29 = vld [vmem:[#allocation43_spill] sm:$0xff] }
 0xaca   : > { %16328 = vmatprep.mubr.msk.f32.mxu0 %vm298_vm0, %v13860_v52  ;;  %16773 = vrcp.f32 %v21113_v41  ;;  %v23222_v35 = vld [vmem:[#allocation90_spill] sm:$0xff] }
 0xacb   : > { %13717 = vrot.lane.b32.xlu0 %v13383_v21, %s16925_s23  ;;  %16329 = vmatmul.mubr.msk.f32.gmra.mxu0 %vm298_vm0, %v13861_v31  ;;  %16775 = vrcp.f32 %v21275_v12  ;;  %v13458_v26 = vpop.permute.xlu1 %13457 }
 0xacc   : > { %16777 = vrcp.f32 %v21340_v27 }
 0xacd   : > { %16779 = vrcp.f32 %v21337_v39 }
 0xace   : > { %16781 = vrcp.f32 %v21125_v34 }
 0xacf   : > { %16783 = vrcp.f32 %v21135_v30  ;;  %v23220_v30 = vld [vmem:[#allocation128_spill] sm:$0xff] }
 0xad0   : > { %v16318_v51 = vpop.f32.mrf.mxu0  ;;  %16785 = vrcp.f32 %v21286_v60 }
 0xad1   : > { %v14071_v13 = vadd.f32 %v16318_v51, %v21537_v1  ;;  %16787 = vrcp.f32 %v21137_v42 }
 0xad2   : > { %v14065_v18 = vpop.f32.mrf.mxu0  ;;  %16789 = vrcp.f32 %v21146_v43 }
 0xad3   : > { %14217 = vst.msk [vmem:[%s21545_s14 + $0x18] sm:$0xff] %vm298_vm0, %v14071_v13  ;;  %v14066_v15 = vadd.f32 %v21537_v1, %v14065_v18  ;;  %16791 = vrcp.f32 %v21310_v4  ;;  %v23223_v4 = vld [vmem:[#allocation83_spill] sm:$0xff] }
 0xad4   : > { %v16321_v24 = vpop.f32.mrf.mxu0  ;;  %16793 = vrcp.f32 %v21141_v54 }
 0xad5   : > { %14216 = vst.msk [vmem:[%s21545_s14 + $0x10] sm:$0xff] %vm298_vm0, %v14066_v15  ;;  %v14081_v32 = vadd.f32 %v16321_v24, %v21537_v1  ;;  %v16770_v5 = vpop.eup %16769  ;;  %16795 = vrcp.f32 %v21152_v20  ;;  %v23224_v15 = vld [vmem:[#allocation139_spill] sm:$0xff] }
 0xad6   : > { %v14075_v10 = vpop.f32.mrf.mxu0  ;;  %v16772_v45 = vpop.eup %16771  ;;  %v6980_v60 = vmul.f32 %v16770_v5, %v23220_v30  ;;  %16797 = vrcp.f32 %v21316_v38 }
 0xad7   : > { %14219 = vst.msk [vmem:[%s21545_s14 + $0x28] sm:$0xff] %vm298_vm0, %v14081_v32  ;;  %v14076_v48 = vadd.f32 %v21537_v1, %v14075_v10  ;;  %v16774_v41 = vpop.eup %16773  ;;  %v10182_v12 = vmul.f32 %v16772_v45, %v23219_v57  ;;  %16799 = vrcp.f32 %v21154_v44  ;;  %v23226_v44 = vld [vmem:[#allocation144_spill] sm:$0xff]  ;;  %v12806_v57 = vpop.f32.mrf.mxu1 }
 0xad8   : > { %v16776_v27 = vpop.eup %16775  ;;  %v10183_v52 = vmul.f32 %v16774_v41, %v23223_v4  ;;  %16801 = vrcp.f32 %v21161_v61  ;;  %v23227_v41 = vld [vmem:[#allocation96_spill] sm:$0xff] }
 0xad9   : > { %14218 = vst.msk [vmem:[%s21545_s14 + $0x20] sm:$0xff] %vm298_vm0, %v14076_v48  ;;  %v16778_v39 = vpop.eup %16777  ;;  %v13386_v42 = vmul.f32 %v16776_v27, %v21499_v2  ;;  %16803 = vrcp.f32 %v21290_v7 }
 0xada   : > { %v16780_v6 = vpop.eup %16779  ;;  %v3773_v31 = vmul.f32 %v16778_v39, %v23221_v29  ;;  %16805 = vrcp.f32 %v21159_v46 }
 0xadb   : > { %v16782_v53 = vpop.eup %16781  ;;  %v3772_v21 = vmul.f32 %v16780_v6, %v23222_v35  ;;  %16807 = vrcp.f32 %v21164_v33  ;;  %v23229_v6 = vld [vmem:[#allocation89_spill] sm:$0xff] }
 0xadc   : > { %v16784_v54 = vpop.eup %16783  ;;  %v6982_v24 = vmul.f32 %v16782_v53, %v23224_v15  ;;  %16809 = vrcp.f32 %v21300_v8  ;;  %v23230_v53 = vld [vmem:[#allocation103_spill] sm:$0xff] }
 0xadd   : > { %v13797_v2 = vsel %vm628_vm1, %v3772_v21, %v13458_v26  ;;  %v16786_v32 = vpop.eup %16785  ;;  %16811 = vrcp.f32 %v21166_v63  ;;  %v23231_v63 = vld [vmem:[#allocation138_spill] sm:$0xff]  ;;  %v23237_v15 = vld [vmem:[#allocation195_spill] sm:$0xff] }
 0xade   : > { %v13385_v28 = vmul.f32 %v16786_v32, %v21506_v62  ;;  %16813 = vrcp.f32 %v21173_v50  ;;  %v23233_v50 = vld [vmem:[#allocation75_spill] sm:$0xff]  ;;  %v23238_v32 = vld [vmem:[#allocation100_spill] sm:$0xff] }
 0xadf   : > { %16815 = vrcp.f32 %v23230_v53  ;;  %v23253_v53 = vld [vmem:[#allocation149_spill] sm:$0xff] }
 0xaea   : > { %2331 = vadd.xlane.f32.xlu0 %v2330_v14  ;;  %v16788_v14 = vpop.eup %16787 }
 0xaeb   : > { %v16790_v16 = vpop.eup %16789  ;;  %v6981_v62 = vmul.f32 %v16788_v14, %v23226_v44  ;;  %v23241_v14 = vld [vmem:[#allocation34_spill] sm:$0xff]  ;;  %v23243_v44 = vld [vmem:[#allocation173_spill] sm:$0xff] }
 0xaec   : > { %v16792_v26 = vpop.eup %16791  ;;  %v10184_v61 = vmul.f32 %v16790_v16, %v23227_v41  ;;  %v23245_v41 = vld [vmem:[#allocation228_spill] sm:$0xff] }
 0xaed   : > { %2334 = vadd.xlane.f32.xlu1 %v2333_v37  ;;  %v10185_v37 = vmul.f32 %v16784_v54, %v23225_v56  ;;  %v13388_v5 = vmul.f32 %v16792_v26, %v16262_v59  ;;  %v16794_v45 = vpop.eup %16793  ;;  %v23235_v54 = vld [vmem:[#allocation231_spill] sm:$0xff]  ;;  %v23242_v59 = vld [vmem:[#allocation13_spill] sm:$0xff]  ;;  %v23244_v26 = vld [vmem:[#allocation136_spill] sm:$0xff] }
 0xaee   : > { %v16796_v7 = vpop.eup %16795 }
 0xaef   : > { %v16798_v46 = vpop.eup %16797 }
 0xaf0   : > { %v13387_v39 = vmul.f32 %v16798_v46, %v12806_v57 }
 0xaf9   : > { %v21594_v17 = vpop.xlane.xlu0 %2319 }
 0xafc   : > { %v21598_v9 = vpop.xlane.xlu1 %2322 }
 0xafd   : > { %v13460_v34 = vpop.permute.xlu0 %13459 }
 0xafe   : > { %13593 = vrot.lane.b32.xlu1 %v10182_v12, %s16924_s22  ;;  %v13798_v51 = vsel %vm628_vm1, %v3773_v31, %v13460_v34  ;;  %v23228_v12 = vld [vmem:[#allocation132_spill] sm:$0xff] }
 0xaff   : > { %v6984_v27 = vmul.f32 %v16794_v45, %v23228_v12  ;;  %v23247_v12 = vld [vmem:[#allocation198_spill] sm:$0xff] }
 0xb00   : > { %13467 = vrot.lane.b32.xlu0 %v6980_v60, %s16923_s20  ;;  %v13586_v47 = vpop.permute.xlu1 %13585  ;;  %v16800_v60 = vpop.eup %16799 }
 0xb01   : > { %v13588_v43 = vpop.permute.xlu0 %13587  ;;  %v13829_v10 = vsel %vm2047_vm2, %v13797_v2, %v13586_v47  ;;  %v16802_v47 = vpop.eup %16801  ;;  %v6983_v29 = vmul.f32 %v16800_v60, %v23231_v63  ;;  %v23236_v2 = vld [vmem:[#allocation127_spill] sm:$0xff]  ;;  %v23250_v60 = vld [vmem:[#allocation141_spill] sm:$0xff] }
 0xb02   : > { %13723 = vrot.lane.b32.xlu1 %v13386_v42, %s16925_s23  ;;  %v13830_v13 = vsel %vm2047_vm2, %v13798_v51, %v13588_v43  ;;  %v10187_v42 = vmul.f32 %v16796_v7, %v23229_v6  ;;  %v16804_v31 = vpop.eup %16803  ;;  %v23232_v43 = vld [vmem:[#allocation42_spill] sm:$0xff]  ;;  %v10186_v4 = vmul.f32 %v16802_v47, %v23233_v50  ;;  %v23252_v6 = vld [vmem:[#allocation148_spill] sm:$0xff]  ;;  %v23254_v63 = vld [vmem:[#allocation37_spill] sm:$0xff] }
 0xb03   : > { %16817 = vrcp.f32 %v23232_v43  ;;  %v13390_v35 = vmul.f32 %v16804_v31, %v21509_v23  ;;  %v16806_v21 = vpop.eup %16805  ;;  %v23255_v43 = vld [vmem:[#allocation72_spill] sm:$0xff] }
 0xb04   : > { %13595 = vrot.lane.b32.xlu0 %v10183_v52, %s16924_s22  ;;  %v13716_v18 = vpop.permute.xlu1 %13715  ;;  %v23234_v52 = vld [vmem:[#allocation192_spill] sm:$0xff]  ;;  %v16808_v51 = vpop.eup %16807 }
 0xb05   : > { %v13863_v48 = vsel %vm13849_vm3, %v13830_v13, %v13716_v18  ;;  %v13714_v20 = vpop.permute.xlu0 %13713  ;;  %16819 = vrcp.f32 %v23234_v52  ;;  %v6986_v13 = vmul.f32 %v16806_v21, %v23236_v2  ;;  %v16810_v18 = vpop.eup %16809  ;;  %v23256_v21 = vld [vmem:[#allocation212_spill] sm:$0xff]  ;;  %v23258_v52 = vld [vmem:[#allocation45_spill] sm:$0xff] }
 0xb06   : > { %v13862_v38 = vsel %vm13849_vm3, %v13829_v10, %v13714_v20  ;;  %13471 = vrot.lane.b32.xlu1 %v6982_v24, %s16923_s20  ;;  %16821 = vrcp.f32 %v23235_v54  ;;  %v13389_v23 = vmul.f32 %v16810_v18, %v21515_v11  ;;  %v16812_v24 = vpop.eup %16811  ;;  %v10189_v10 = vmul.f32 %v16808_v51, %v23238_v32  ;;  %v16276_v20 = vpop.f32.mrf.mxu1 }
 0xb07   : > { %16331 = vmatprep.mubr.msk.f32.mxu0 %vm298_vm0, %v13862_v38  ;;  %16823 = vrcp.f32 %v23237_v15  ;;  %v23240_v38 = vld [vmem:[#allocation224_spill] sm:$0xff]  ;;  %v6985_v56 = vmul.f32 %v16812_v24, %v23241_v14 }
 0xb08   : > { %13721 = vrot.lane.b32.xlu0 %v13385_v28, %s16925_s23  ;;  %16332 = vmatmul.mubr.msk.f32.gmra.mxu0 %vm298_vm0, %v13863_v48  ;;  %v23239_v48 = vld [vmem:[#allocation200_spill] sm:$0xff]  ;;  %v16814_v28 = vpop.eup %16813  ;;  %v13462_v2 = vpop.permute.xlu1 %13461 }
 0xb09   : > { %16825 = vrcp.f32 %v23239_v48 }
 0xb0a   : > { %13599 = vrot.lane.b32.xlu1 %v10185_v37, %s16924_s22  ;;  %16827 = vrcp.f32 %v23240_v38  ;;  %v16816_v37 = vpop.eup %16815  ;;  %v23262_v38 = vld [vmem:[#allocation226_spill] sm:$0xff] }
 0xb0b   : > { %16829 = vrcp.f32 %v23242_v59  ;;  %v13392_v11 = vmul.f32 %v16816_v37, %v16276_v20 }
 0xb0c   : > { %13469 = vrot.lane.b32.xlu0 %v6981_v62, %s16923_s20  ;;  %v10188_v62 = vmul.f32 %v16814_v28, %v23243_v44  ;;  %16831 = vrcp.f32 %v23244_v26  ;;  %v23265_v26 = vld [vmem:[#allocation174_spill] sm:$0xff] }
 0xb0d   : > { %16833 = vrcp.f32 %v23245_v41  ;;  %v23266_v41 = vld [vmem:[#allocation175_spill] sm:$0xff] }
 0xb0e   : > { %13727 = vrot.lane.b32.xlu1 %v13388_v5, %s16925_s23  ;;  %v12980_v5 = vpop.f32.mrf.mxu1  ;;  %16835 = vrcp.f32 %v23247_v12  ;;  %v23268_v12 = vld [vmem:[#allocation176_spill] sm:$0xff] }
 0xb10   : > { %13597 = vrot.lane.b32.xlu0 %v10184_v61, %s16924_s22  ;;  %v16818_v16 = vpop.eup %16817  ;;  %v23246_v61 = vld [vmem:[#allocation140_spill] sm:$0xff]  ;;  %v16290_v48 = vpop.f32.mrf.mxu1 }
 0xb11   : > { %v16324_v34 = vpop.f32.mrf.mxu0  ;;  %v6988_v57 = vmul.f32 %v16818_v16, %v23246_v61 }
 0xb12   : > { %v14091_v30 = vadd.f32 %v16324_v34, %v21537_v1  ;;  %13475 = vrot.lane.b32.xlu1 %v6984_v27, %s16923_s20  ;;  %v16820_v45 = vpop.eup %16819  ;;  %v23248_v34 = vld [vmem:[#allocation206_spill] sm:$0xff] }
 0xb13   : > { %v14085_v33 = vpop.f32.mrf.mxu0  ;;  %v16822_v7 = vpop.eup %16821  ;;  %16837 = vrcp.f32 %v23248_v34  ;;  %v23269_v34 = vld [vmem:[#allocation233_spill] sm:$0xff] }
 0xb14   : > { %14221 = vst.msk [vmem:[%s21545_s14 + $0x38] sm:$0xff] %vm298_vm0, %v14091_v30  ;;  %v14086_v8 = vadd.f32 %v21537_v1, %v14085_v33  ;;  %13725 = vrot.lane.b32.xlu0 %v13387_v39, %s16925_s23  ;;  %v13391_v27 = vmul.f32 %v16822_v7, %v12980_v5  ;;  %v16824_v46 = vpop.eup %16823  ;;  %v23249_v39 = vld [vmem:[#allocation70_spill] sm:$0xff]  ;;  %16839 = vrcp.f32 %v23250_v60  ;;  %v13154_v7 = vpop.f32.mrf.mxu1 }
 0xb15   : > { %v10191_v30 = vmul.f32 %v16820_v45, %v23249_v39 }
 0xb16   : > { %14220 = vst.msk [vmem:[%s21545_s14 + $0x30] sm:$0xff] %vm298_vm0, %v14086_v8  ;;  %13603 = vrot.lane.b32.xlu1 %v10187_v42, %s16924_s22  ;;  %v16826_v33 = vpop.eup %16825  ;;  %v23251_v8 = vld [vmem:[#allocation111_spill] sm:$0xff]  ;;  %v6987_v42 = vmul.f32 %v16824_v46, %v23252_v6 }
 0xb17   : > { %16841 = vrcp.f32 %v23251_v8  ;;  %v16828_v47 = vpop.eup %16827 }
 0xb18   : > { %13473 = vrot.lane.b32.xlu0 %v6983_v29, %s16923_s20  ;;  %16843 = vrcp.f32 %v23253_v53  ;;  %v13394_v29 = vmul.f32 %v16828_v47, %v21518_v0  ;;  %v16830_v31 = vpop.eup %16829  ;;  %v23271_v47 = vld [vmem:[#allocation221_spill] sm:$0xff] }
 0xb19   : > { %16845 = vrcp.f32 %v23254_v63  ;;  %v16832_v50 = vpop.eup %16831  ;;  %v6990_v51 = vmul.f32 %v16830_v31, %v23258_v52 }
 0xb1a   : > { %13731 = vrot.lane.b32.xlu1 %v13390_v35, %s16925_s23  ;;  %v10190_v35 = vmul.f32 %v16826_v33, %v23255_v43  ;;  %16847 = vrcp.f32 %v23256_v21  ;;  %v16834_v54 = vpop.eup %16833  ;;  %v23272_v21 = vld [vmem:[#allocation80_spill] sm:$0xff] }
 0xb1b   : > { %v13393_v0 = vmul.f32 %v16834_v54, %v21521_v49  ;;  %v16836_v15 = vpop.eup %16835  ;;  %v23263_v49 = vld [vmem:[#allocation153_spill] sm:$0xff] }
 0xb1c   : > { %13601 = vrot.lane.b32.xlu0 %v10186_v4, %s16924_s22  ;;  %v23257_v4 = vld [vmem:[#allocation234_spill] sm:$0xff]  ;;  %v23275_v54 = vld [vmem:[#allocation125_spill] sm:$0xff] }
 0xb1d   : > { %16849 = vrcp.f32 %v23257_v4  ;;  %v23273_v4 = vld [vmem:[#allocation219_spill] sm:$0xff] }
 0xb1e   : > { %13479 = vrot.lane.b32.xlu1 %v6986_v13, %s16923_s20  ;;  %v23259_v13 = vld [vmem:[#allocation202_spill] sm:$0xff] }
 0xb1f   : > { %16851 = vrcp.f32 %v23259_v13 }
 0xb20   : > { %13729 = vrot.lane.b32.xlu0 %v13389_v23, %s16925_s23  ;;  %v23260_v23 = vld [vmem:[#allocation171_spill] sm:$0xff]  ;;  %v16838_v32 = vpop.eup %16837 }
 0xb21   : > { %v10193_v24 = vmul.f32 %v16832_v50, %v23260_v23  ;;  %v16840_v28 = vpop.eup %16839  ;;  %v10192_v61 = vmul.f32 %v16838_v32, %v23266_v41  ;;  %v23276_v23 = vld [vmem:[#allocation57_spill] sm:$0xff]  ;;  %v23281_v41 = vld [vmem:[#allocation183_spill] sm:$0xff] }
 0xb22   : > { %13607 = vrot.lane.b32.xlu1 %v10189_v10, %s16924_s22  ;;  %v23261_v10 = vld [vmem:[#allocation216_spill] sm:$0xff]  ;;  %v13396_v16 = vmul.f32 %v16840_v28, %v16290_v48  ;;  %v23278_v48 = vld [vmem:[#allocation137_spill] sm:$0xff] }
 0xb23   : > { %16853 = vrcp.f32 %v23261_v10  ;;  %v23277_v10 = vld [vmem:[#allocation155_spill] sm:$0xff] }
 0xb24   : > { %13477 = vrot.lane.b32.xlu0 %v6985_v56, %s16923_s20  ;;  %16855 = vrcp.f32 %v23262_v38  ;;  %v6989_v56 = vmul.f32 %v16836_v15, %v23263_v49  ;;  %v16842_v37 = vpop.eup %16841 }
 0xb25   : > { %v16844_v59 = vpop.eup %16843  ;;  %v3775_v5 = vmul.f32 %v16842_v37, %v23265_v26 }
 0xb26   : > { %13735 = vrot.lane.b32.xlu1 %v13392_v11, %s16925_s23  ;;  %v23264_v11 = vld [vmem:[#allocation133_spill] sm:$0xff]  ;;  %v16846_v44 = vpop.eup %16845 }
 0xb27   : > { %16857 = vrcp.f32 %v23264_v11  ;;  %v16848_v46 = vpop.eup %16847 }
 0xb28   : > { %13605 = vrot.lane.b32.xlu0 %v10188_v62, %s16924_s22  ;;  %v10195_v50 = vmul.f32 %v16848_v46, %v23272_v21  ;;  %v23283_v46 = vld [vmem:[#allocation50_spill] sm:$0xff] }
 0xb2a   : > { %13483 = vrot.lane.b32.xlu1 %v6988_v57, %s16923_s20  ;;  %v23267_v57 = vld [vmem:[#allocation225_spill] sm:$0xff]  ;;  %v16850_v33 = vpop.eup %16849 }
 0xb2b   : > { %16859 = vrcp.f32 %v23267_v57  ;;  %v13395_v53 = vmul.f32 %v16850_v33, %v13154_v7 }
 0xb2c   : > { %13733 = vrot.lane.b32.xlu0 %v13391_v27, %s16925_s23  ;;  %v3774_v27 = vmul.f32 %v16844_v59, %v23268_v12  ;;  %16861 = vrcp.f32 %v23269_v34  ;;  %v16852_v43 = vpop.eup %16851  ;;  %v23279_v59 = vld [vmem:[#allocation179_spill] sm:$0xff] }
 0xb2d   : > { %16863 = vrcp.f32 %v23271_v47 }
 0xb2e   : > { %13611 = vrot.lane.b32.xlu1 %v10191_v30, %s16924_s22  ;;  %v23270_v30 = vld [vmem:[#allocation131_spill] sm:$0xff]  ;;  %v13799_v8 = vsel %vm628_vm1, %v3774_v27, %v13462_v2  ;;  %16865 = vrcp.f32 %v23273_v4  ;;  %v6991_v2 = vmul.f32 %v16852_v43, %v23275_v54  ;;  %v23282_v27 = vld [vmem:[#allocation145_spill] sm:$0xff] }
 0xb2f   : > { %v6992_v60 = vmul.f32 %v16846_v44, %v23270_v30 }
 0xb30   : > { %13481 = vrot.lane.b32.xlu0 %v6987_v42, %s16923_s20  ;;  %v16854_v52 = vpop.eup %16853 }
 0xb31   : > { %v16856_v13 = vpop.eup %16855 }
 0xb32   : > { %13739 = vrot.lane.b32.xlu1 %v13394_v29, %s16925_s23 }
 0xb34   : > { %13609 = vrot.lane.b32.xlu0 %v10190_v35, %s16924_s22  ;;  %v16858_v15 = vpop.eup %16857 }
 0xb35   : > { %v6994_v28 = vmul.f32 %v16858_v15, %v23278_v48 }
 0xb36   : > { %v21701_v18 = vpop.xlane.xlu0 %2325  ;;  %13487 = vrot.lane.b32.xlu1 %v6990_v51, %s16923_s20  ;;  %v23274_v51 = vld [vmem:[#allocation117_spill] sm:$0xff] }
 0xb37   : > { %16867 = vrcp.f32 %v23274_v51 }
 0xb38   : > { %13737 = vrot.lane.b32.xlu0 %v13393_v0, %s16925_s23  ;;  %v13398_v0 = vmul.f32 %v16856_v13, %v21525_v58  ;;  %v16860_v32 = vpop.eup %16859  ;;  %16869 = vrcp.f32 %v23277_v10 }
 0xb39   : > { %v21707_v20 = vpop.xlane.xlu1 %2328  ;;  %v16862_v38 = vpop.eup %16861  ;;  %v10197_v11 = vmul.f32 %v16860_v32, %v23279_v59  ;;  %16871 = vrcp.f32 %v23282_v27  ;;  %v23288_v32 = vld [vmem:[#allocation178_spill] sm:$0xff] }
 0xb3a   : > { %v13464_v14 = vpop.permute.xlu0 %13463  ;;  %13615 = vrot.lane.b32.xlu1 %v10193_v24, %s16924_s22  ;;  %v10194_v24 = vmul.f32 %v16854_v52, %v23276_v23  ;;  %v16864_v49 = vpop.eup %16863  ;;  %16873 = vrcp.f32 %v23283_v46 }
 0xb3b   : > { %v13800_v39 = vsel %vm628_vm1, %v3775_v5, %v13464_v14  ;;  %v13397_v14 = vmul.f32 %v16862_v38, %v21532_v36  ;;  %v23280_v36 = vld [vmem:[#allocation52_spill] sm:$0xff] }
 0xb3c   : > { %13485 = vrot.lane.b32.xlu0 %v6989_v56, %s16923_s20  ;;  %v6993_v26 = vmul.f32 %v16864_v49, %v23280_v36 }
 0xb3d   : > { %v13590_v62 = vpop.permute.xlu1 %13589 }
 0xb3e   : > { %v13592_v45 = vpop.permute.xlu0 %13591  ;;  %13743 = vrot.lane.b32.xlu1 %v13396_v16, %s16925_s23  ;;  %v13831_v63 = vsel %vm2047_vm2, %v13799_v8, %v13590_v62  ;;  %v16304_v16 = vpop.f32.mrf.mxu1 }
 0xb3f   : > { %v13832_v6 = vsel %vm2047_vm2, %v13800_v39, %v13592_v45  ;;  %v16866_v62 = vpop.eup %16865 }
 0xb40   : > { %13613 = vrot.lane.b32.xlu0 %v10192_v61, %s16924_s22  ;;  %v10196_v61 = vmul.f32 %v16866_v62, %v23281_v41  ;;  %v13328_v57 = vpop.f32.mrf.mxu1 }
 0xb41   : > { %v13720_v42 = vpop.permute.xlu1 %13719 }
 0xb42   : > { %v13865_v29 = vsel %vm13849_vm3, %v13832_v6, %v13720_v42  ;;  %v13718_v31 = vpop.permute.xlu0 %13717  ;;  %13491 = vrot.lane.b32.xlu1 %v6992_v60, %s16923_s20  ;;  %v23284_v60 = vld [vmem:[#allocation116_spill] sm:$0xff]  ;;  %v23285_v6 = vld [vmem:[#allocation166_spill] sm:$0xff] }
 0xb43   : > { %v13864_v35 = vsel %vm13849_vm3, %v13831_v63, %v13718_v31  ;;  %16875 = vrcp.f32 %v23284_v60  ;;  %v23287_v31 = vld [vmem:[#allocation63_spill] sm:$0xff] }
 0xb44   : > { %13741 = vrot.lane.b32.xlu0 %v13395_v53, %s16925_s23  ;;  %16334 = vmatprep.mubr.msk.f32.mxu0 %vm298_vm0, %v13864_v35  ;;  %v16868_v5 = vpop.eup %16867  ;;  %16877 = vrcp.f32 %v23285_v6  ;;  %v23286_v53 = vld [vmem:[#allocation93_spill] sm:$0xff] }
 0xb45   : > { %16335 = vmatmul.mubr.msk.f32.gmra.mxu0 %vm298_vm0, %v13865_v29  ;;  %v13400_v45 = vmul.f32 %v16868_v5, %v16304_v16  ;;  %v16870_v7 = vpop.eup %16869  ;;  %v13466_v34 = vpop.permute.xlu1 %13465  ;;  %16879 = vrcp.f32 %v21442_v19 }
 0xb46   : > { %13619 = vrot.lane.b32.xlu1 %v10195_v50, %s16924_s22  ;;  %v13399_v12 = vmul.f32 %v16870_v7, %v13328_v57  ;;  %v16872_v8 = vpop.eup %16871  ;;  %16881 = vrcp.f32 %v21439_v22 }
 0xb47   : > { %v16874_v42 = vpop.eup %16873  ;;  %v3777_v63 = vmul.f32 %v16872_v8, %v23286_v53  ;;  %16883 = vrcp.f32 %v21478_v55 }
 0xb48   : > { %13489 = vrot.lane.b32.xlu0 %v6991_v2, %s16923_s20  ;;  %v3776_v43 = vmul.f32 %v16874_v42, %v23287_v31  ;;  %16885 = vrcp.f32 %v21475_v25  ;;  %v23292_v31 = vld [vmem:[#allocation182_spill] sm:$0xff] }
 0xb49   : > { %16887 = vrcp.f32 %v21528_v40 }
 0xb4a   : > { %13747 = vrot.lane.b32.xlu1 %v13398_v0, %s16925_s23  ;;  %v13801_v21 = vsel %vm628_vm1, %v3776_v43, %v13466_v34  ;;  %16889 = vrcp.f32 %v21523_v3 }
 0xb4b   : > { %16891 = vrcp.f32 %v21598_v9 }
 0xb4c   : > { %13617 = vrot.lane.b32.xlu0 %v10194_v24, %s16924_s22  ;;  %16893 = vrcp.f32 %v21594_v17 }
 0xb4d   : > { %16895 = vrcp.f32 %v21707_v20 }
 0xb4e   : > { %v16327_v58 = vpop.f32.mrf.mxu0  ;;  %13495 = vrot.lane.b32.xlu1 %v6994_v28, %s16923_s20  ;;  %v23289_v28 = vld [vmem:[#allocation180_spill] sm:$0xff]  ;;  %16897 = vrcp.f32 %v21701_v18 }
 0xb4f   : > { %v14101_v56 = vadd.f32 %v16327_v58, %v21537_v1 }
 0xb50   : > { %13745 = vrot.lane.b32.xlu0 %v13397_v14, %s16925_s23  ;;  %v14095_v37 = vpop.f32.mrf.mxu0  ;;  %v16876_v15 = vpop.eup %16875 }
 0xb51   : > { %14223 = vst.msk [vmem:[%s21545_s14 + $0x48] sm:$0xff] %vm298_vm0, %v14101_v56  ;;  %v14096_v44 = vadd.f32 %v21537_v1, %v14095_v37  ;;  %v16878_v23 = vpop.eup %16877  ;;  %v3779_v10 = vmul.f32 %v16876_v15, %v23288_v32 }
 0xb52   : > { %13623 = vrot.lane.b32.xlu1 %v10197_v11, %s16924_s22  ;;  %v3778_v38 = vmul.f32 %v16878_v23, %v23289_v28  ;;  %v16880_v5 = vpop.eup %16879 }
 0xb53   : > { %14222 = vst.msk [vmem:[%s21545_s14 + $0x40] sm:$0xff] %vm298_vm0, %v14096_v44 }
 0xb54   : > { %13493 = vrot.lane.b32.xlu0 %v6993_v26, %s16923_s20 }
 0xb56   : > { %13751 = vrot.lane.b32.xlu1 %v13400_v45, %s16925_s23  ;;  %v16882_v45 = vpop.eup %16881 }
 0xb57   : > { %v16884_v53 = vpop.eup %16883 }
 0xb58   : > { %13621 = vrot.lane.b32.xlu0 %v10196_v61, %s16924_s22  ;;  %v23290_v61 = vld [vmem:[#allocation69_spill] sm:$0xff]  ;;  %v3783_v43 = vmul.f32 %v16884_v53, %v23292_v31 }
 0xb59   : > { %v3781_v57 = vmul.f32 %v16880_v5, %v23290_v61 }
 0xb5c   : > { %13749 = vrot.lane.b32.xlu0 %v13399_v12, %s16925_s23  ;;  %v23291_v12 = vld [vmem:[#allocation71_spill] sm:$0xff] }
 0xb5d   : > { %v3780_v27 = vmul.f32 %v16882_v45, %v23291_v12  ;;  %v23297_v45 = vld [vmem:[#allocation188_spill] sm:$0xff] }
 0xb73   : > { %v21764_v39 = vpop.xlane.xlu0 %2331 }
 0xb76   : > { %v21766_v30 = vpop.xlane.xlu1 %2334 }
 0xb77   : > { %v13468_v33 = vpop.permute.xlu0 %13467  ;;  %16899 = vrcp.f32 %v21766_v30 }
 0xb78   : > { %v13802_v35 = vsel %vm628_vm1, %v3777_v63, %v13468_v33  ;;  %v16886_v63 = vpop.eup %16885  ;;  %16901 = vrcp.f32 %v21764_v39 }
 0xb79   : > { %v16888_v23 = vpop.eup %16887 }
 0xb7a   : > { %v13594_v47 = vpop.permute.xlu1 %13593 }
 0xb7b   : > { %v13596_v29 = vpop.permute.xlu0 %13595  ;;  %v13833_v52 = vsel %vm2047_vm2, %v13801_v21, %v13594_v47  ;;  %v23293_v21 = vld [vmem:[#allocation184_spill] sm:$0xff] }
 0xb7c   : > { %v13834_v50 = vsel %vm2047_vm2, %v13802_v35, %v13596_v29 }
 0xb7e   : > { %v13724_v4 = vpop.permute.xlu1 %13723 }
 0xb7f   : > { %v13867_v51 = vsel %vm13849_vm3, %v13834_v50, %v13724_v4  ;;  %v13722_v54 = vpop.permute.xlu0 %13721  ;;  %v3782_v50 = vmul.f32 %v16886_v63, %v23293_v21 }
 0xb80   : > { %v13866_v2 = vsel %vm13849_vm3, %v13833_v52, %v13722_v54 }
 0xb81   : > { %16337 = vmatprep.mubr.msk.f32.mxu0 %vm298_vm0, %v13866_v2 }
 0xb82   : > { %16338 = vmatmul.mubr.msk.f32.gmra.mxu0 %vm298_vm0, %v13867_v51  ;;  %v13472_v13 = vpop.permute.xlu1 %13471 }
 0xb83   : > { %v13470_v0 = vpop.permute.xlu0 %13469  ;;  %v13804_v14 = vsel %vm628_vm1, %v3779_v10, %v13472_v13  ;;  %v23294_v10 = vld [vmem:[#allocation66_spill] sm:$0xff] }
 0xb84   : > { %v13803_v58 = vsel %vm628_vm1, %v3778_v38, %v13470_v0  ;;  %v23295_v38 = vld [vmem:[#allocation68_spill] sm:$0xff] }
 0xb86   : > { %v13600_v24 = vpop.permute.xlu1 %13599 }
 0xb87   : > { %v13598_v48 = vpop.permute.xlu0 %13597  ;;  %v13836_v49 = vsel %vm2047_vm2, %v13804_v14, %v13600_v24  ;;  %v16890_v24 = vpop.eup %16889 }
 0xb88   : > { %v13835_v19 = vsel %vm2047_vm2, %v13803_v58, %v13598_v48  ;;  %v3785_v48 = vmul.f32 %v16888_v23, %v23294_v10  ;;  %v3784_v14 = vmul.f32 %v16890_v24, %v23295_v38  ;;  %v23301_v24 = vld [vmem:[#allocation193_spill] sm:$0xff] }
 0xb8a   : > { %v13728_v56 = vpop.permute.xlu1 %13727 }
 0xb8b   : > { %v13869_v22 = vsel %vm13849_vm3, %v13836_v49, %v13728_v56  ;;  %v16330_v37 = vpop.f32.mrf.mxu0  ;;  %v13726_v59 = vpop.permute.xlu0 %13725 }
 0xb8c   : > { %v14111_v11 = vadd.f32 %v16330_v37, %v21537_v1  ;;  %v13868_v16 = vsel %vm13849_vm3, %v13835_v19, %v13726_v59 }
 0xb8d   : > { %v14105_v44 = vpop.f32.mrf.mxu0  ;;  %16340 = vmatprep.mubr.msk.f32.mxu0 %vm298_vm0, %v13868_v16  ;;  %v16892_v16 = vpop.eup %16891 }
 0xb8e   : > { %14225 = vst.msk [vmem:[%s21545_s14 + $0x58] sm:$0xff] %vm298_vm0, %v14111_v11  ;;  %v14106_v62 = vadd.f32 %v21537_v1, %v14105_v44  ;;  %16341 = vmatmul.mubr.msk.f32.gmra.mxu0 %vm298_vm0, %v13869_v22  ;;  %v13476_v36 = vpop.permute.xlu1 %13475  ;;  %v16894_v44 = vpop.eup %16893 }
 0xb8f   : > { %v13474_v26 = vpop.permute.xlu0 %13473  ;;  %v13806_v46 = vsel %vm628_vm1, %v3781_v57, %v13476_v36  ;;  %v23296_v36 = vld [vmem:[#allocation186_spill] sm:$0xff] }
 0xb90   : > { %14224 = vst.msk [vmem:[%s21545_s14 + $0x50] sm:$0xff] %vm298_vm0, %v14106_v62  ;;  %v13805_v34 = vsel %vm628_vm1, %v3780_v27, %v13474_v26  ;;  %v3787_v26 = vmul.f32 %v16892_v16, %v23296_v36 }
 0xb92   : > { %v13604_v41 = vpop.permute.xlu1 %13603 }
 0xb93   : > { %v13602_v7 = vpop.permute.xlu0 %13601  ;;  %v13838_v60 = vsel %vm2047_vm2, %v13806_v46, %v13604_v41  ;;  %v3786_v41 = vmul.f32 %v16894_v44, %v23297_v45 }
 0xb94   : > { %v13837_v33 = vsel %vm2047_vm2, %v13805_v34, %v13602_v7 }
 0xb96   : > { %v13732_v55 = vpop.permute.xlu1 %13731 }
 0xb97   : > { %v13871_v25 = vsel %vm13849_vm3, %v13838_v60, %v13732_v55  ;;  %v13730_v8 = vpop.permute.xlu0 %13729  ;;  %v16896_v55 = vpop.eup %16895 }
 0xb98   : > { %v13870_v6 = vsel %vm13849_vm3, %v13837_v33, %v13730_v8  ;;  %v16898_v33 = vpop.eup %16897  ;;  %v23298_v8 = vld [vmem:[#allocation85_spill] sm:$0xff] }
 0xb99   : > { %16343 = vmatprep.mubr.msk.f32.mxu0 %vm298_vm0, %v13870_v6  ;;  %v3789_v6 = vmul.f32 %v16896_v55, %v23298_v8  ;;  %v16903_v55 = vld [vmem:[%s21933_s5] ss:$0 sm:$0xff] }
 0xb9a   : > { %16344 = vmatmul.mubr.msk.f32.gmra.mxu0 %vm298_vm0, %v13871_v25  ;;  %v13480_v42 = vpop.permute.xlu1 %13479 }
 0xb9b   : > { %v13478_v47 = vpop.permute.xlu0 %13477  ;;  %v13808_v4 = vsel %vm628_vm1, %v3783_v43, %v13480_v42 }
 0xb9c   : > { %v13807_v52 = vsel %vm628_vm1, %v3782_v50, %v13478_v47  ;;  %v23299_v47 = vld [vmem:[#allocation86_spill] sm:$0xff] }
 0xb9d   : > { %v3788_v53 = vmul.f32 %v16898_v33, %v23299_v47 }
 0xb9e   : > { %v13608_v29 = vpop.permute.xlu1 %13607 }
 0xb9f   : > { %v13606_v35 = vpop.permute.xlu0 %13605  ;;  %v13840_v51 = vsel %vm2047_vm2, %v13808_v4, %v13608_v29 }
 0xba0   : > { %v13839_v40 = vsel %vm2047_vm2, %v13807_v52, %v13606_v35 }
 0xba2   : > { %v13736_v54 = vpop.permute.xlu1 %13735 }
 0xba3   : > { %v13873_v2 = vsel %vm13849_vm3, %v13840_v51, %v13736_v54  ;;  %v13734_v13 = vpop.permute.xlu0 %13733 }
 0xba4   : > { %v13872_v3 = vsel %vm13849_vm3, %v13839_v40, %v13734_v13 }
 0xba5   : > { %16346 = vmatprep.mubr.msk.f32.mxu0 %vm298_vm0, %v13872_v3 }
 0xba6   : > { %16347 = vmatmul.mubr.msk.f32.gmra.mxu0 %vm298_vm0, %v13873_v2  ;;  %v13484_v0 = vpop.permute.xlu1 %13483  ;;  %v16900_v2 = vpop.eup %16899 }
 0xba7   : > { %v13482_v15 = vpop.permute.xlu0 %13481  ;;  %v13810_v58 = vsel %vm628_vm1, %v3785_v48, %v13484_v0  ;;  %v16902_v13 = vpop.eup %16901  ;;  %v23300_v0 = vld [vmem:[#allocation191_spill] sm:$0xff] }
 0xba8   : > { %v13809_v49 = vsel %vm628_vm1, %v3784_v14, %v13482_v15  ;;  %v3791_v15 = vmul.f32 %v16900_v2, %v23300_v0 }
 0xbaa   : > { %v13612_v32 = vpop.permute.xlu1 %13611 }
 0xbab   : > { %v13610_v28 = vpop.permute.xlu0 %13609  ;;  %v13842_v56 = vsel %vm2047_vm2, %v13810_v58, %v13612_v32  ;;  %v3790_v32 = vmul.f32 %v16902_v13, %v23301_v24 }
 0xbac   : > { %v13841_v9 = vsel %vm2047_vm2, %v13809_v49, %v13610_v28 }
 0xbae   : > { %v13740_v19 = vpop.permute.xlu1 %13739 }
 0xbaf   : > { %v13875_v22 = vsel %vm13849_vm3, %v13842_v56, %v13740_v19  ;;  %v13738_v37 = vpop.permute.xlu0 %13737 }
 0xbb0   : > { %v13874_v17 = vsel %vm13849_vm3, %v13841_v9, %v13738_v37 }
 0xbb1   : > { %16349 = vmatprep.mubr.msk.f32.mxu0 %vm298_vm0, %v13874_v17 }
 0xbb2   : > { %16350 = vmatmul.mubr.msk.f32.gmra.mxu0 %vm298_vm0, %v13875_v22  ;;  %v13488_v59 = vpop.permute.xlu1 %13487 }
 0xbb3   : > { %v13486_v11 = vpop.permute.xlu0 %13485  ;;  %v13812_v61 = vsel %vm628_vm1, %v3787_v26, %v13488_v59 }
 0xbb4   : > { %v13811_v57 = vsel %vm628_vm1, %v3786_v41, %v13486_v11 }
 0xbb6   : > { %v13616_v62 = vpop.permute.xlu1 %13615 }
 0xbb7   : > { %v13614_v5 = vpop.permute.xlu0 %13613  ;;  %v13844_v7 = vsel %vm2047_vm2, %v13812_v61, %v13616_v62 }
 0xbb8   : > { %v13843_v20 = vsel %vm2047_vm2, %v13811_v57, %v13614_v5 }
 0xbba   : > { %v13744_v12 = vpop.permute.xlu1 %13743 }
 0xbbb   : > { %v13877_v27 = vsel %vm13849_vm3, %v13844_v7, %v13744_v12  ;;  %v13742_v46 = vpop.permute.xlu0 %13741 }
 0xbbc   : > { %v13876_v18 = vsel %vm13849_vm3, %v13843_v20, %v13742_v46 }
 0xbbd   : > { %16352 = vmatprep.mubr.msk.f32.mxu0 %vm298_vm0, %v13876_v18 }
 0xbbe   : > { %16353 = vmatmul.mubr.msk.f32.gmra.mxu0 %vm298_vm0, %v13877_v27  ;;  %v13492_v34 = vpop.permute.xlu1 %13491 }
 0xbbf   : > { %v13490_v60 = vpop.permute.xlu0 %13489  ;;  %v13814_v63 = vsel %vm628_vm1, %v3789_v6, %v13492_v34 }
 0xbc0   : > { %v13813_v29 = vsel %vm628_vm1, %v3788_v53, %v13490_v60 }
 0xbc2   : > { %v13620_v25 = vpop.permute.xlu1 %13619 }
 0xbc3   : > { %v13618_v42 = vpop.permute.xlu0 %13617  ;;  %v13846_v31 = vsel %vm2047_vm2, %v13814_v63, %v13620_v25 }
 0xbc4   : > { %v13845_v30 = vsel %vm2047_vm2, %v13813_v29, %v13618_v42 }
 0xbc6   : > { %v13748_v43 = vpop.permute.xlu1 %13747 }
 0xbc7   : > { %v13879_v39 = vsel %vm13849_vm3, %v13846_v31, %v13748_v43  ;;  %v13746_v35 = vpop.permute.xlu0 %13745 }
 0xbc8   : > { %v13878_v21 = vsel %vm13849_vm3, %v13845_v30, %v13746_v35  ;;  %v16333_v50 = vpop.f32.mrf.mxu0 }
 0xbc9   : > { %v14121_v4 = vadd.f32 %v16333_v50, %v21537_v1  ;;  %16355 = vmatprep.mubr.msk.f32.mxu0 %vm298_vm0, %v13878_v21 }
 0xbca   : > { %v14115_v52 = vpop.f32.mrf.mxu0  ;;  %16356 = vmatmul.mubr.msk.f32.gmra.mxu0 %vm298_vm0, %v13879_v39  ;;  %v13496_v51 = vpop.permute.xlu1 %13495 }
 0xbcb   : > { %14227 = vst.msk [vmem:[%s21545_s14 + $0x68] sm:$0xff] %vm298_vm0, %v14121_v4  ;;  %v14116_v54 = vadd.f32 %v21537_v1, %v14115_v52  ;;  %v13494_v40 = vpop.permute.xlu0 %13493  ;;  %v13816_v10 = vsel %vm628_vm1, %v3791_v15, %v13496_v51 }
 0xbcc   : > { %v13815_v48 = vsel %vm628_vm1, %v3790_v32, %v13494_v40 }
 0xbcd   : > { %14226 = vst.msk [vmem:[%s21545_s14 + $0x60] sm:$0xff] %vm298_vm0, %v14116_v54 }
 0xbce   : > { %v13624_v3 = vpop.permute.xlu1 %13623 }
 0xbcf   : > { %v13622_v23 = vpop.permute.xlu0 %13621  ;;  %v13848_v28 = vsel %vm2047_vm2, %v13816_v10, %v13624_v3 }
 0xbd0   : > { %v13847_v14 = vsel %vm2047_vm2, %v13815_v48, %v13622_v23 }
 0xbd2   : > { %v13752_v38 = vpop.permute.xlu1 %13751 }
 0xbd3   : > { %v13881_v58 = vsel %vm13849_vm3, %v13848_v28, %v13752_v38  ;;  %v13750_v49 = vpop.permute.xlu0 %13749 }
 0xbd4   : > { %v13880_v56 = vsel %vm13849_vm3, %v13847_v14, %v13750_v49 }
 0xbd5   : > { %16358 = vmatprep.mubr.msk.f32.mxu0 %vm298_vm0, %v13880_v56 }
 0xbd6   : > { %16359 = vmatmul.mubr.msk.f32.gmra.mxu0 %vm298_vm0, %v13881_v58 }
 0xc05   : > { %v16336_v19 = vpop.f32.mrf.mxu0 }
 0xc06   : > { %v14131_v9 = vadd.f32 %v16336_v19, %v21537_v1 }
 0xc07   : > { %v14125_v22 = vpop.f32.mrf.mxu0 }
 0xc08   : > { %14229 = vst.msk [vmem:[%s21545_s14 + $0x78] sm:$0xff] %vm298_vm0, %v14131_v9  ;;  %v14126_v37 = vadd.f32 %v21537_v1, %v14125_v22 }
 0xc0a   : > { %14228 = vst.msk [vmem:[%s21545_s14 + $0x70] sm:$0xff] %vm298_vm0, %v14126_v37 }
 0xc42   : > { %v16339_v17 = vpop.f32.mrf.mxu0 }
 0xc43   : > { %v14141_v59 = vadd.f32 %v16339_v17, %v21537_v1 }
 0xc44   : > { %v14135_v11 = vpop.f32.mrf.mxu0 }
 0xc45   : > { %14231 = vst.msk [vmem:[%s21545_s14 + $0x88] sm:$0xff] %vm298_vm0, %v14141_v59  ;;  %v14136_v16 = vadd.f32 %v21537_v1, %v14135_v11 }
 0xc47   : > { %14230 = vst.msk [vmem:[%s21545_s14 + $0x80] sm:$0xff] %vm298_vm0, %v14136_v16 }
 0xc4e   : > { %v16342_v44 = vpop.f32.mrf.mxu0 }
 0xc4f   : > { %v14151_v62 = vadd.f32 %v16342_v44, %v21537_v1 }
 0xc50   : > { %v14145_v36 = vpop.f32.mrf.mxu0 }
 0xc51   : > { %14233 = vst.msk [vmem:[%s21545_s14 + $0x98] sm:$0xff] %vm298_vm0, %v14151_v62  ;;  %v14146_v26 = vadd.f32 %v21537_v1, %v14145_v36 }
 0xc53   : > { %14232 = vst.msk [vmem:[%s21545_s14 + $0x90] sm:$0xff] %vm298_vm0, %v14146_v26 }
 0xc5a   : > { %v16345_v5 = vpop.f32.mrf.mxu0 }
 0xc5b   : > { %v14161_v45 = vadd.f32 %v16345_v5, %v21537_v1 }
 0xc5c   : > { %v14155_v41 = vpop.f32.mrf.mxu0 }
 0xc5d   : > { %14235 = vst.msk [vmem:[%s21545_s14 + $0xa8] sm:$0xff] %vm298_vm0, %v14161_v45  ;;  %v14156_v61 = vadd.f32 %v21537_v1, %v14155_v41 }
 0xc5f   : > { %14234 = vst.msk [vmem:[%s21545_s14 + $0xa0] sm:$0xff] %vm298_vm0, %v14156_v61 }
 0xc66   : > { %v16348_v57 = vpop.f32.mrf.mxu0 }
 0xc67   : > { %v14171_v7 = vadd.f32 %v16348_v57, %v21537_v1 }
 0xc68   : > { %v14165_v12 = vpop.f32.mrf.mxu0 }
 0xc69   : > { %14237 = vst.msk [vmem:[%s21545_s14 + $0xb8] sm:$0xff] %vm298_vm0, %v14171_v7  ;;  %v14166_v20 = vadd.f32 %v21537_v1, %v14165_v12 }
 0xc6b   : > { %14236 = vst.msk [vmem:[%s21545_s14 + $0xb0] sm:$0xff] %vm298_vm0, %v14166_v20 }
 0xc72   : > { %v16351_v27 = vpop.f32.mrf.mxu0 }
 0xc73   : > { %v14181_v46 = vadd.f32 %v16351_v27, %v21537_v1 }
 0xc74   : > { %v14175_v18 = vpop.f32.mrf.mxu0 }
 0xc75   : > { %14239 = vst.msk [vmem:[%s21545_s14 + $0xc8] sm:$0xff] %vm298_vm0, %v14181_v46  ;;  %v14176_v34 = vadd.f32 %v21537_v1, %v14175_v18 }
 0xc77   : > { %14238 = vst.msk [vmem:[%s21545_s14 + $0xc0] sm:$0xff] %vm298_vm0, %v14176_v34 }
 0xc7e   : > { %v16354_v60 = vpop.f32.mrf.mxu0 }
 0xc7f   : > { %v14191_v33 = vadd.f32 %v16903_v55, %v16354_v60 }
 0xc80   : > { %v14185_v25 = vpop.f32.mrf.mxu0 }
 0xc81   : > { %14241 = vst.msk [vmem:[%s21545_s14 + $0xd8] sm:$0xff] %vm298_vm0, %v14191_v33  ;;  %v14186_v8 = vadd.f32 %v16903_v55, %v14185_v25 }
 0xc83   : > { %14240 = vst.msk [vmem:[%s21545_s14 + $0xd0] sm:$0xff] %vm298_vm0, %v14186_v8 }
 0xc8a   : > { %v16357_v6 = vpop.f32.mrf.mxu0 }
 0xc8b   : > { %v14201_v42 = vadd.f32 %v16903_v55, %v16357_v6 }
 0xc8c   : > { %v14195_v47 = vpop.f32.mrf.mxu0 }
 0xc8d   : > { %14243 = vst.msk [vmem:[%s21545_s14 + $0xe8] sm:$0xff] %vm298_vm0, %v14201_v42  ;;  %v14196_v1 = vadd.f32 %v16903_v55, %v14195_v47 }
 0xc8f   : > { %14242 = vst.msk [vmem:[%s21545_s14 + $0xe0] sm:$0xff] %vm298_vm0, %v14196_v1 }
 0xc96   : > { %v16360_v53 = vpop.f32.mrf.mxu0 }
 0xc97   : > { %v14211_v63 = vadd.f32 %v16903_v55, %v16360_v53 }
 0xc98   : > { %v14205_v29 = vpop.f32.mrf.mxu0 }
 0xc99   : > { %14245 = vst.msk [vmem:[%s21545_s14 + $0xf8] sm:$0xff] %vm298_vm0, %v14211_v63  ;;  %v14206_v31 = vadd.f32 %v16903_v55, %v14205_v29 }
 0xc9b   : > { %14244 = vst.msk [vmem:[%s21545_s14 + $0xf0] sm:$0xff] %vm298_vm0, %v14206_v31 }
 0xc9c PF: > { %s16_s21 = sadd.s32 1, %s16910_s21  }
 0xc9d   : > { %p13_p4 = scmp.ge.s32.totalorder %s16_s21, 4  }
 0xc9f   :  { %15 = sbr.rel (!%p13_p4) target bundleno = 1 (0x1), region = 77 }

</bundles_post_ra>
